<compile_context>
chip_gen: v5e
topology: v5e:2x2
jax: 0.10.0
libtpu: 0.0.40
codegen_flags: <defaults>
</compile_context>

<pallas_src>
import functools

import jax
import jax.numpy as jnp
from jax.experimental import pallas as pl
from jax.experimental.pallas import tpu as pltpu


# ----------------------------------------------------------------------------
# Tiled matmul + bias:  out = x @ w + b   (used for the vocab projection)
# ----------------------------------------------------------------------------
def _matmul_bias_kernel(x_ref, w_ref, b_ref, o_ref, acc_ref):
    k = pl.program_id(2)

    @pl.when(k == 0)
    def _():
        acc_ref[...] = jnp.zeros_like(acc_ref)

    acc_ref[...] += jnp.dot(x_ref[...].astype(w_ref.dtype), w_ref[...],
                            preferred_element_type=jnp.float32)

    @pl.when(k == pl.num_programs(2) - 1)
    def _():
        o_ref[...] = (acc_ref[...] + b_ref[...].astype(jnp.float32)
                      ).astype(o_ref.dtype)


def _aligned_tile(dim, target, align):
    """Largest tile <= target that is a multiple of `align` and divides dim
    (or the full dim when it is small / nothing divides)."""
    if dim <= target:
        return dim
    t = (target // align) * align
    while t >= align:
        if dim % t == 0:
            return t
        t -= align
    return dim


def _matmul_bias(x, w, b, out_dtype, tm=512, tn=1024, tk=1024):
    """out = x @ w + b, tiled for the MXU.

    Grid is ordered (N, M, K): when K fits one k-tile (vocab projection,
    K = lstm_dim), `w` streams from HBM exactly once and the much smaller
    activation `x` is the re-read operand.  The x tile is cast to w's dtype in
    VMEM, so activations can stay f32 in HBM while the MXU runs bf16.
    """
    M, K = x.shape
    K2, N = w.shape
    assert K == K2 and b.shape == (1, N)
    tm = _aligned_tile(M, tm, 8)     # sublane dim of x / out
    tn = _aligned_tile(N, tn, 128)   # lane dim of w / out
    tk = _aligned_tile(K, tk, 128)   # lane dim of x, sublane dim of w

    grid = (N // tn, M // tm, K // tk)
    return pl.pallas_call(
        _matmul_bias_kernel,
        out_shape=jax.ShapeDtypeStruct((M, N), out_dtype),
        grid_spec=pltpu.PrefetchScalarGridSpec(
            num_scalar_prefetch=0,
            grid=grid,
            in_specs=[
                pl.BlockSpec((tm, tk), lambda j, i, k: (i, k)),
                pl.BlockSpec((tk, tn), lambda j, i, k: (k, j)),
                pl.BlockSpec((1, tn), lambda j, i, k: (0, j)),
            ],
            out_specs=pl.BlockSpec((tm, tn), lambda j, i, k: (i, j)),
            scratch_shapes=[pltpu.VMEM((tm, tn), jnp.float32)],
        ),
        compiler_params=pltpu.CompilerParams(
            dimension_semantics=("parallel", "parallel", "arbitrary"),
            vmem_limit_bytes=48 * 1024 * 1024),
    )(x, w, b)


# ----------------------------------------------------------------------------
# Recurrence kernel: fused input projection + serial LSTM steps per time block.
# ----------------------------------------------------------------------------
def _lstm_recurrence_kernel(emb_ref, wih_ref, whh_ref, bias_ref,
                            hall_ref, hfin_ref, cfin_ref,
                            gin_sc, h_sc, c_sc, *, seq_len, t_pad):
    """
    emb_ref : (t_blk, b_chunk, E)   embeddings for this (batch chunk, time block)
    wih_ref : (E, 4H)               input->gates weights (VMEM resident)
    whh_ref : (H, 4H)               hidden->gates weights (VMEM resident)
    bias_ref: (1, 4H)               b_ih + b_hh (f32, resident)
    hall_ref: (b_chunk, t_blk, H)   per-step hidden state, BATCH-MAJOR (f32)
    hfin_ref/cfin_ref: (b_chunk, H) final state (f32)
    gin_sc  : (t_blk, b_chunk, 4H)  f32 scratch for the fused input projection
    h_sc/c_sc: (b_chunk, H) f32     recurrence carry across time-block grid steps
    """
    tb = pl.program_id(1)            # time-block index ("arbitrary" axis)

    @pl.when(tb == 0)
    def _():
        h_sc[...] = jnp.zeros_like(h_sc)
        c_sc[...] = jnp.zeros_like(c_sc)

    t_blk, b_chunk, gdim = gin_sc.shape
    hdim = gdim // 4
    edim = emb_ref.shape[-1]
    mxu_dtype = whh_ref.dtype

    # Fused input projection for the whole time block: one bulk MXU matmul that
    # is off the serial h-chain.  Writing through VMEM scratch (instead of
    # keeping a (t_blk*b_chunk, 4H) value live) bounds vreg pressure.
    x = emb_ref[...].reshape(t_blk * b_chunk, edim)
    gin_sc[...] = (
        jnp.dot(x, wih_ref[...], preferred_element_type=jnp.float32)
        + bias_ref[...].astype(jnp.float32)
    ).reshape(t_blk, b_chunk, gdim)

    h = h_sc[...]
    c = c_sc[...]
    last_block_start = t_pad - t_blk
    # Static unroll: t_blk is capped (<=32) by the VMEM/vreg budget heuristic,
    # so the dependent chain is visible to the scheduler without spilling.
    for s in range(t_blk):
        gin = gin_sc[s]                           # (b_chunk, 4H) f32
        h_op = h.astype(mxu_dtype)
        # Split i/f/g columns from o columns so EUP/VPU work (sigmoid/tanh and
        # the c update) overlaps the tail of the o-gate MXU op.
        g_ifg = gin[:, :3 * hdim] + jnp.dot(
            h_op, whh_ref[:, :3 * hdim], preferred_element_type=jnp.float32)
        g_o = gin[:, 3 * hdim:] + jnp.dot(
            h_op, whh_ref[:, 3 * hdim:], preferred_element_type=jnp.float32)
        i_g = jax.nn.sigmoid(g_ifg[:, 0 * hdim:1 * hdim])
        f_g = jax.nn.sigmoid(g_ifg[:, 1 * hdim:2 * hdim])
        g_g = jnp.tanh(g_ifg[:, 2 * hdim:3 * hdim])
        o_g = jax.nn.sigmoid(g_o)
        c_new = f_g * c + i_g * g_g
        h_new = o_g * jnp.tanh(c_new)
        if last_block_start + s >= seq_len:
            # This unrolled step can be sequence padding (only possible in the
            # last time block); freeze h/c there so the final state is exact.
            valid = (tb * t_blk + s) < seq_len
            c = jnp.where(valid, c_new, c)
            h = jnp.where(valid, h_new, h)
        else:
            c = c_new
            h = h_new
        # Batch-major store: removes the (T,B,H)->(B,T,H) HBM transpose.
        hall_ref[:, s, :] = h.astype(hall_ref.dtype)

    h_sc[...] = h
    c_sc[...] = c

    @pl.when(tb == pl.num_programs(1) - 1)
    def _():
        hfin_ref[...] = h
        cfin_ref[...] = c


def _lstm_recurrence(emb_tm, w_ih, w_hh, bias, *, t_blk, seq_len, batch_blocks):
    T_pad, B, E = emb_tm.shape
    H = w_hh.shape[0]
    G = 4 * H
    assert T_pad % t_blk == 0
    assert (t_blk % 8 == 0) or (t_blk == T_pad)
    assert B % batch_blocks == 0
    b_chunk = B // batch_blocks
    assert b_chunk % 8 == 0, "each batch chunk must be a multiple of 8 sublanes"
    n_tb = T_pad // t_blk

    kernel = functools.partial(_lstm_recurrence_kernel,
                               seq_len=seq_len, t_pad=T_pad)

    grid_spec = pltpu.PrefetchScalarGridSpec(
        num_scalar_prefetch=0,
        grid=(batch_blocks, n_tb),                 # (parallel batch, serial time)
        in_specs=[
            pl.BlockSpec((t_blk, b_chunk, E), lambda b, t: (t, b, 0)),  # emb
            pl.BlockSpec((E, G), lambda b, t: (0, 0)),                  # w_ih
            pl.BlockSpec((H, G), lambda b, t: (0, 0)),                  # w_hh
            pl.BlockSpec((1, G), lambda b, t: (0, 0)),                  # bias
        ],
        out_specs=[
            pl.BlockSpec((b_chunk, t_blk, H), lambda b, t: (b, t, 0)),  # h_all
            pl.BlockSpec((b_chunk, H), lambda b, t: (b, 0)),            # final h
            pl.BlockSpec((b_chunk, H), lambda b, t: (b, 0)),            # final c
        ],
        scratch_shapes=[
            pltpu.VMEM((t_blk, b_chunk, G), jnp.float32),   # gate pre-acts
            pltpu.VMEM((b_chunk, H), jnp.float32),          # h carry
            pltpu.VMEM((b_chunk, H), jnp.float32),          # c carry
        ],
    )
    return pl.pallas_call(
        kernel,
        out_shape=(
            jax.ShapeDtypeStruct((B, T_pad, H), jnp.float32),  # batch-major h_all
            jax.ShapeDtypeStruct((B, H), jnp.float32),
            jax.ShapeDtypeStruct((B, H), jnp.float32),
        ),
        grid_spec=grid_spec,
        compiler_params=pltpu.CompilerParams(
            dimension_semantics=("parallel", "arbitrary"),
            vmem_limit_bytes=48 * 1024 * 1024),
    )(emb_tm, w_ih, w_hh, bias)


# ----------------------------------------------------------------------------
# Block-size heuristics
# ----------------------------------------------------------------------------
def _largest_divisor(n, cap):
    cap = max(1, min(cap, n))
    for d in range(cap, 0, -1):
        if n % d == 0:
            return d
    return 1


def _choose_time_block(T, b_chunk, E, H, op_bytes):
    """Pick (t_blk, t_pad): time steps per grid iteration and padded seq length.

    t_blk is capped so the recurrence kernel's VMEM footprint (resident weights
    + f32 gate-preact scratch + double-buffered emb / h_all blocks) fits the
    smallest-VMEM generation (v7x: 64 MiB/TC), and so the fully unrolled inner
    loop stays short enough not to spill vregs.  Awkward T is handled by
    padding (masked in-kernel) instead of degenerating to t_blk=1.
    """
    try:
        vmem_cap = pltpu.get_tpu_info().vmem_capacity_bytes
    except Exception:
        vmem_cap = 64 * 1024 * 1024                       # v7x worst case
    budget = min(vmem_cap // 4, 36 * 1024 * 1024)
    resident = (E + H) * 4 * H * op_bytes + 4 * H * 4     # w_ih + w_hh + bias
    per_step = b_chunk * (4 * H * 4                       # gin scratch (f32)
                          + 2 * E * op_bytes              # emb block, 2 bufs
                          + 2 * H * 4)                    # h_all block (f32), 2 bufs
    cap = int(max(8, min(32, (budget - resident) // max(per_step, 1))))
    if T <= cap:
        return T, T                    # whole sequence in one (full-dim) block
    d = _largest_divisor(T, cap)
    if d % 8 == 0:
        return d, T                    # divides T, sublane aligned -> no padding
    # No aligned divisor: pad the time axis.  Score = wasted (masked) recurrence
    # steps + ~2 steps worth of per-grid-iteration overhead per block.
    best_blk, best_score = 8, None
    for blk in range(8, (cap // 8) * 8 + 1, 8):
        t_pad = -(-T // blk) * blk
        score = (t_pad - T) + 2 * (t_pad // blk)
        if best_score is None or score <= best_score:
            best_blk, best_score = blk, score
    t_pad = -(-T // best_blk) * best_blk
    return best_blk, t_pad


# ----------------------------------------------------------------------------
# Full forward
# ----------------------------------------------------------------------------
@functools.partial(jax.jit,
                   static_argnames=("compute_dtype", "t_blk", "batch_blocks"))
def lmlstm_forward(X, params, compute_dtype=jnp.float32, t_blk=None,
                   batch_blocks=None):
    """X: (B, T) int32 token ids. Returns (logits (B,T,V), (h, c)) like PyTorch.

    compute_dtype casts only the matmul *operands* (weights, embeddings, h fed
    to the MXU); gate math, cell/hidden carries and accumulation stay f32.
    bf16 operands are recommended on every generation (incl. v5e, whose MXU
    peak is bf16).
    """
    embed_table = params["embed"].astype(compute_dtype)   # (V, E)
    w_ih = params["w_ih"].astype(compute_dtype)           # (E, 4H)
    w_hh = params["w_hh"].astype(compute_dtype)           # (H, 4H)
    bias = params["bias"]                                  # (1, 4H) f32 (= b_ih+b_hh)
    w_out = params["w_out"].astype(compute_dtype)          # (H, V)
    b_out = params["b_out"]                                 # (1, V) f32

    B, T = X.shape
    E = embed_table.shape[1]
    H = w_hh.shape[0]
    V = w_out.shape[1]

    assert B % 8 == 0, "batch must be a multiple of 8 (sublanes)"
    assert E % 128 == 0 and H % 128 == 0 and V % 128 == 0, (
        "embed_dim / lstm_dim / vocab_size must be multiples of 128 (lanes); "
        "pad the model dims")

    if batch_blocks is None:
        # Leading parallel axis lets v7x's two TensorCores split the recurrence;
        # on 1-TC chips it is just a (cheap) outer loop.
        batch_blocks = 2 if (B % 16 == 0) else 1
    b_chunk = B // batch_blocks
    op_bytes = jnp.dtype(compute_dtype).itemsize

    if t_blk is None:
        t_blk, t_pad = _choose_time_block(T, b_chunk, E, H, op_bytes)
    else:
        t_pad = -(-T // t_blk) * t_blk
        assert t_blk % 8 == 0 or t_pad == t_blk, (
            "explicit t_blk must be a multiple of 8 or cover the whole sequence")

    # Embedding gather directly time-major (transpose only the tiny index array).
    emb_tm = jnp.take(embed_table, X.T, axis=0)            # (T, B, E)
    if t_pad != T:
        emb_tm = jnp.pad(emb_tm, ((0, t_pad - T), (0, 0), (0, 0)))

    # Recurrence with fused input projection; h_all comes out batch-major f32.
    h_all, h_fin, c_fin = _lstm_recurrence(
        emb_tm, w_ih, w_hh, bias,
        t_blk=t_blk, seq_len=T, batch_blocks=batch_blocks)

    if t_pad != T:
        h_all = h_all[:, :T, :]
    h_2d = h_all.reshape(B * T, H)      # batch-major already: no transpose needed

    # Vocab projection: N-major grid so w_out streams from HBM exactly once.
    logits = _matmul_bias(h_2d, w_out, b_out,
                          out_dtype=jnp.float32).reshape(B, T, V)

    # num_layers = 1 -> leading layer axis like PyTorch's (L, B, H) state.
    state = (h_fin[None], c_fin[None])
    return logits, state


# ----------------------------------------------------------------------------
# Pure-JAX reference (lax.scan) for correctness checking.
# ----------------------------------------------------------------------------
def _reference_forward(X, params):
    emb = jnp.take(params["embed"], X, axis=0)      # (B, T, E)
    H = params["w_hh"].shape[0]
    B = X.shape[0]

    def step(carry, x_t):
        h, c = carry
        gates = x_t @ params["w_ih"] + h @ params["w_hh"] + params["bias"][0]
        i_g = jax.nn.sigmoid(gates[:, 0 * H:1 * H])
        f_g = jax.nn.sigmoid(gates[:, 1 * H:2 * H])
        g_g = jnp.tanh(gates[:, 2 * H:3 * H])
        o_g = jax.nn.sigmoid(gates[:, 3 * H:4 * H])
        c_new = f_g * c + i_g * g_g
        h_new = o_g * jnp.tanh(c_new)
        return (h_new, c_new), h_new

    init = (jnp.zeros((B, H), jnp.float32), jnp.zeros((B, H), jnp.float32))
    (h_fin, c_fin), hs = jax.lax.scan(step, init, jnp.transpose(emb, (1, 0, 2)))
    logits = jnp.einsum("tbh,hv->btv", hs, params["w_out"]) + params["b_out"][0]
    return logits, (h_fin[None], c_fin[None])


def init_params(key, vocab_size, embed_dim, lstm_dim):
    """nn.LSTM stores weight_ih (4H,E), weight_hh (4H,H); we keep transposed
    (E,4H)/(H,4H) for right-multiplication. Gate order i,f,g,o. The two LSTM
    biases are pre-summed. nn.Linear weight (V,H) kept as (H,V)."""
    ks = jax.random.split(key, 6)
    s = 1.0 / jnp.sqrt(lstm_dim)
    return {
        "embed": jax.random.normal(ks[0], (vocab_size, embed_dim), jnp.float32),
        "w_ih": jax.random.uniform(ks[1], (embed_dim, 4 * lstm_dim), jnp.float32, -s, s),
        "w_hh": jax.random.uniform(ks[2], (lstm_dim, 4 * lstm_dim), jnp.float32, -s, s),
        "bias": jax.random.uniform(ks[3], (1, 4 * lstm_dim), jnp.float32, -s, s),
        "w_out": jax.random.uniform(ks[4], (lstm_dim, vocab_size), jnp.float32, -s, s),
        "b_out": jax.random.uniform(ks[5], (1, vocab_size), jnp.float32, -s, s),
    }


if __name__ == "__main__":
    # TPU-aligned config: B multiple of 8 (sublanes), E/H/V multiples of 128
    # (lanes).  vocab=256, embed=128, hidden=128, num_layers=1.
    VOCAB, EMBED, HIDDEN = 256, 128, 128

    key = jax.random.PRNGKey(0)
    k_par, k_x = jax.random.split(key)
    params = init_params(k_par, VOCAB, EMBED, HIDDEN)

    # init_state (zeros) — the module's forward ignores it; dropout(p=0.2) is
    # defined but never applied in forward, so it is omitted.
    # TODO(synk): dropout is unused in the PyTorch forward; not implemented.

    # --- Config 1: f32 path ------------------------------------------------
    B, T = 8, 16
    X = jax.random.randint(k_x, (B, T), 0, VOCAB, dtype=jnp.int32)
    logits, (h, c) = lmlstm_forward(X, params)
    jax.block_until_ready((logits, h, c))
    ref_logits, (ref_h, ref_c) = _reference_forward(X, params)
    assert logits.shape == (B, T, VOCAB)
    assert h.shape == (1, B, HIDDEN) and c.shape == (1, B, HIDDEN)
    assert jnp.allclose(logits, ref_logits, atol=5e-4, rtol=5e-4)
    assert jnp.allclose(h, ref_h, atol=5e-4, rtol=5e-4)
    assert jnp.allclose(c, ref_c, atol=5e-4, rtol=5e-4)

    # --- Config 2: bf16 matmul operands (all generations, incl. v5e) -------
    logits_bf, (h_bf, c_bf) = lmlstm_forward(X, params,
                                             compute_dtype=jnp.bfloat16)
    jax.block_until_ready((logits_bf, h_bf, c_bf))
    assert bool(jnp.all(jnp.isfinite(logits_bf)))
    assert jnp.allclose(logits_bf, ref_logits, atol=1.5e-1, rtol=1e-1)
    assert jnp.allclose(h_bf, ref_h, atol=1e-1, rtol=1e-1)
    assert jnp.allclose(c_bf, ref_c, atol=1e-1, rtol=1e-1)

    # --- Config 3: batch split into two parallel chunks (v7x megacore path) -
    B2 = 16
    X2 = jax.random.randint(jax.random.PRNGKey(1), (B2, T), 0, VOCAB,
                            dtype=jnp.int32)
    logits2, (h2, c2) = lmlstm_forward(X2, params, batch_blocks=2)
    jax.block_until_ready((logits2, h2, c2))
    ref2, (rh2, rc2) = _reference_forward(X2, params)
    assert jnp.allclose(logits2, ref2, atol=5e-4, rtol=5e-4)
    assert jnp.allclose(h2, rh2, atol=5e-4, rtol=5e-4)
    assert jnp.allclose(c2, rc2, atol=5e-4, rtol=5e-4)

    # --- Config 4: awkward (prime) sequence length -> padded time blocks ----
    T3 = 37
    X3 = jax.random.randint(jax.random.PRNGKey(2), (B, T3), 0, VOCAB,
                            dtype=jnp.int32)
    logits3, (h3, c3) = lmlstm_forward(X3, params)
    jax.block_until_ready((logits3, h3, c3))
    ref3, (rh3, rc3) = _reference_forward(X3, params)
    assert logits3.shape == (B, T3, VOCAB)
    assert jnp.allclose(logits3, ref3, atol=5e-4, rtol=5e-4)
    assert jnp.allclose(h3, rh3, atol=5e-4, rtol=5e-4)
    assert jnp.allclose(c3, rc3, atol=5e-4, rtol=5e-4)

    print("KERNEL_OK")
</pallas_src>

<mosaic_0001>
module attributes {stable_mosaic.version = 11 : i64} {
  func.func @_matmul_bias_kernel(%arg0: i32, %arg1: i32, %arg2: i32, %arg3: memref<128x128xf32, #tpu.memory_space<vmem>>, %arg4: memref<128x256xf32, #tpu.memory_space<vmem>>, %arg5: memref<1x256xf32, #tpu.memory_space<vmem>>, %arg6: memref<128x256xf32, #tpu.memory_space<vmem>>, %arg7: memref<128x256xf32, #tpu.memory_space<vmem>>) attributes {dimension_semantics = [#tpu.dimension_semantics<parallel>, #tpu.dimension_semantics<parallel>, #tpu.dimension_semantics<arbitrary>], iteration_bounds = array<i64: 1, 1, 1>, scalar_prefetch = 0 : i64, scratch_operands = 1 : i64, tpu.core_type = #tpu.core_type<tc>, window_params = [{transform_indices = @transform_0, window_bounds = array<i64: 128, 128>}, {transform_indices = @transform_1, window_bounds = array<i64: 128, 256>}, {transform_indices = @transform_2, window_bounds = array<i64: 1, 256>}, {transform_indices = @transform_3, window_bounds = array<i64: 128, 256>}]} {
    %c0_i32 = arith.constant 0 : i32
    %0 = arith.cmpi eq, %arg2, %c0_i32 : i32
    %1 = arith.extui %0 : i1 to i32
    %c0_i32_0 = arith.constant 0 : i32
    %2 = arith.cmpi ne, %1, %c0_i32_0 : i32
    scf.if %2 {
      %cst_10 = arith.constant 0.000000e+00 : f32
      %12 = vector.broadcast %cst_10 : f32 to vector<128x256xf32>
      %c0_11 = arith.constant 0 : index
      %c0_12 = arith.constant 0 : index
      %13 = vector.load %arg7[%c0_11, %c0_12] : memref<128x256xf32, #tpu.memory_space<vmem>>, vector<128x256xf32>
      tpu.vector_store %arg7[%c0_11, %c0_12], %12 {strides = array<i32>} : memref<128x256xf32, #tpu.memory_space<vmem>>, vector<128x256xf32>,
    } else {
    }
    %c0 = arith.constant 0 : index
    %c0_1 = arith.constant 0 : index
    %3 = vector.load %arg7[%c0, %c0_1] : memref<128x256xf32, #tpu.memory_space<vmem>>, vector<128x256xf32>
    %c0_2 = arith.constant 0 : index
    %c0_3 = arith.constant 0 : index
    %4 = vector.load %arg3[%c0_2, %c0_3] : memref<128x128xf32, #tpu.memory_space<vmem>>, vector<128x128xf32>
    %c0_4 = arith.constant 0 : index
    %c0_5 = arith.constant 0 : index
    %5 = vector.load %arg4[%c0_4, %c0_5] : memref<128x256xf32, #tpu.memory_space<vmem>>, vector<128x256xf32>
    %cst = arith.constant dense<0.000000e+00> : vector<128x256xf32>
    %6 = tpu.matmul %4, %5, %cst {dimension_numbers = #tpu.dot_dimension_numbers<[1], [0], [0], [1], [0, 0, 1, 1], [], []>} : vector<128x128xf32>, vector<128x256xf32>, vector<128x256xf32> -> vector<128x256xf32>
    %7 = arith.addf %3, %6 : vector<128x256xf32>
    %c0_6 = arith.constant 0 : index
    %c0_7 = arith.constant 0 : index
    %8 = vector.load %arg7[%c0_6, %c0_7] : memref<128x256xf32, #tpu.memory_space<vmem>>, vector<128x256xf32>
    tpu.vector_store %arg7[%c0_6, %c0_7], %7 {strides = array<i32>} : memref<128x256xf32, #tpu.memory_space<vmem>>, vector<128x256xf32>,
    %c0_i32_8 = arith.constant 0 : i32
    %9 = arith.cmpi eq, %arg2, %c0_i32_8 : i32
    %10 = arith.extui %9 : i1 to i32
    %c0_i32_9 = arith.constant 0 : i32
    %11 = arith.cmpi ne, %10, %c0_i32_9 : i32
    scf.if %11 {
      %c0_10 = arith.constant 0 : index
      %c0_11 = arith.constant 0 : index
      %12 = vector.load %arg7[%c0_10, %c0_11] : memref<128x256xf32, #tpu.memory_space<vmem>>, vector<128x256xf32>
      %c0_12 = arith.constant 0 : index
      %c0_13 = arith.constant 0 : index
      %13 = vector.load %arg5[%c0_12, %c0_13] : memref<1x256xf32, #tpu.memory_space<vmem>>, vector<1x256xf32>
      %14 = vector.broadcast %13 : vector<1x256xf32> to vector<128x256xf32>
      %15 = arith.addf %12, %14 : vector<128x256xf32>
      %c0_14 = arith.constant 0 : index
      %c0_15 = arith.constant 0 : index
      %16 = vector.load %arg6[%c0_14, %c0_15] : memref<128x256xf32, #tpu.memory_space<vmem>>, vector<128x256xf32>
      tpu.vector_store %arg6[%c0_14, %c0_15], %15 {strides = array<i32>} : memref<128x256xf32, #tpu.memory_space<vmem>>, vector<128x256xf32>,
    } else {
    }
    return
  }
  func.func @transform_0(%arg0: i32, %arg1: i32, %arg2: i32) -> (i32, i32) {
    %c0_i32 = arith.constant 0 : i32
    return %arg1, %arg2 : i32, i32
  }
  func.func @transform_1(%arg0: i32, %arg1: i32, %arg2: i32) -> (i32, i32) {
    %c0_i32 = arith.constant 0 : i32
    return %arg2, %arg0 : i32, i32
  }
  func.func @transform_2(%arg0: i32, %arg1: i32, %arg2: i32) -> (i32, i32) {
    %c0_i32 = arith.constant 0 : i32
    %c0_i32_0 = arith.constant 0 : i32
    return %c0_i32, %arg0 : i32, i32
  }
  func.func @transform_3(%arg0: i32, %arg1: i32, %arg2: i32) -> (i32, i32) {
    %c0_i32 = arith.constant 0 : i32
    return %arg1, %arg0 : i32, i32
  }
}

module attributes {stable_mosaic.version = 11 : i64} {
  func.func @_lstm_recurrence_kernel(%arg0: i32, %arg1: i32, %arg2: memref<16x8x128xf32, #tpu.memory_space<vmem>>, %arg3: memref<128x512xf32, #tpu.memory_space<vmem>>, %arg4: memref<128x512xf32, #tpu.memory_space<vmem>>, %arg5: memref<1x512xf32, #tpu.memory_space<vmem>>, %arg6: memref<8x16x128xf32, #tpu.memory_space<vmem>>, %arg7: memref<8x128xf32, #tpu.memory_space<vmem>>, %arg8: memref<8x128xf32, #tpu.memory_space<vmem>>, %arg9: memref<16x8x512xf32, #tpu.memory_space<vmem>>, %arg10: memref<8x128xf32, #tpu.memory_space<vmem>>, %arg11: memref<8x128xf32, #tpu.memory_space<vmem>>) attributes {dimension_semantics = [#tpu.dimension_semantics<parallel>, #tpu.dimension_semantics<arbitrary>], iteration_bounds = array<i64: 1, 1>, scalar_prefetch = 0 : i64, scratch_operands = 3 : i64, tpu.core_type = #tpu.core_type<tc>, window_params = [{transform_indices = @transform_0, window_bounds = array<i64: 16, 8, 128>}, {pipeline_mode = #tpu.pipeline_mode<synchronous>, transform_indices = @transform_1, window_bounds = array<i64: 128, 512>}, {pipeline_mode = #tpu.pipeline_mode<synchronous>, transform_indices = @transform_2, window_bounds = array<i64: 128, 512>}, {pipeline_mode = #tpu.pipeline_mode<synchronous>, transform_indices = @transform_3, window_bounds = array<i64: 1, 512>}, {transform_indices = @transform_4, window_bounds = array<i64: 8, 16, 128>}, {transform_indices = @transform_5, window_bounds = array<i64: 8, 128>}, {transform_indices = @transform_6, window_bounds = array<i64: 8, 128>}]} {
    %c0_i32 = arith.constant 0 : i32
    %0 = arith.cmpi eq, %arg1, %c0_i32 : i32
    %1 = arith.extui %0 : i1 to i32
    %c0_i32_0 = arith.constant 0 : i32
    %2 = arith.cmpi ne, %1, %c0_i32_0 : i32
    scf.if %2 {
      %cst_244 = arith.constant 0.000000e+00 : f32
      %611 = vector.broadcast %cst_244 : f32 to vector<8x128xf32>
      %c0_245 = arith.constant 0 : index
      %c0_246 = arith.constant 0 : index
      %612 = vector.load %arg10[%c0_245, %c0_246] : memref<8x128xf32, #tpu.memory_space<vmem>>, vector<8x128xf32>
      tpu.vector_store %arg10[%c0_245, %c0_246], %611 {strides = array<i32>} : memref<8x128xf32, #tpu.memory_space<vmem>>, vector<8x128xf32>,
      %cst_247 = arith.constant 0.000000e+00 : f32
      %613 = vector.broadcast %cst_247 : f32 to vector<8x128xf32>
      %c0_248 = arith.constant 0 : index
      %c0_249 = arith.constant 0 : index
      %614 = vector.load %arg11[%c0_248, %c0_249] : memref<8x128xf32, #tpu.memory_space<vmem>>, vector<8x128xf32>
      tpu.vector_store %arg11[%c0_248, %c0_249], %613 {strides = array<i32>} : memref<8x128xf32, #tpu.memory_space<vmem>>, vector<8x128xf32>,
    } else {
    }
    %c0 = arith.constant 0 : index
    %c0_1 = arith.constant 0 : index
    %c0_2 = arith.constant 0 : index
    %3 = vector.load %arg2[%c0, %c0_1, %c0_2] : memref<16x8x128xf32, #tpu.memory_space<vmem>>, vector<16x8x128xf32>
    %4 = vector.shape_cast %3 : vector<16x8x128xf32> to vector<128x128xf32>
    %c0_3 = arith.constant 0 : index
    %c0_4 = arith.constant 0 : index
    %5 = vector.load %arg3[%c0_3, %c0_4] : memref<128x512xf32, #tpu.memory_space<vmem>>, vector<128x512xf32>
    %cst = arith.constant dense<0.000000e+00> : vector<128x512xf32>
    %6 = tpu.matmul %4, %5, %cst {dimension_numbers = #tpu.dot_dimension_numbers<[1], [0], [0], [1], [0, 0, 1, 1], [], []>} : vector<128x128xf32>, vector<128x512xf32>, vector<128x512xf32> -> vector<128x512xf32>
    %c0_5 = arith.constant 0 : index
    %c0_6 = arith.constant 0 : index
    %7 = vector.load %arg5[%c0_5, %c0_6] : memref<1x512xf32, #tpu.memory_space<vmem>>, vector<1x512xf32>
    %8 = vector.broadcast %7 : vector<1x512xf32> to vector<128x512xf32>
    %9 = arith.addf %6, %8 : vector<128x512xf32>
    %10 = vector.shape_cast %9 : vector<128x512xf32> to vector<16x8x512xf32>
    %c0_7 = arith.constant 0 : index
    %c0_8 = arith.constant 0 : index
    %c0_9 = arith.constant 0 : index
    %11 = vector.load %arg9[%c0_7, %c0_8, %c0_9] : memref<16x8x512xf32, #tpu.memory_space<vmem>>, vector<16x8x512xf32>
    tpu.vector_store %arg9[%c0_7, %c0_8, %c0_9], %10 {strides = array<i32>} : memref<16x8x512xf32, #tpu.memory_space<vmem>>, vector<16x8x512xf32>,
    %c0_10 = arith.constant 0 : index
    %c0_11 = arith.constant 0 : index
    %12 = vector.load %arg10[%c0_10, %c0_11] : memref<8x128xf32, #tpu.memory_space<vmem>>, vector<8x128xf32>
    %c0_12 = arith.constant 0 : index
    %c0_13 = arith.constant 0 : index
    %13 = vector.load %arg11[%c0_12, %c0_13] : memref<8x128xf32, #tpu.memory_space<vmem>>, vector<8x128xf32>
    %c0_14 = arith.constant 0 : index
    %c0_15 = arith.constant 0 : index
    %c0_16 = arith.constant 0 : index
    %14 = vector.load %arg9[%c0_14, %c0_15, %c0_16] : memref<16x8x512xf32, #tpu.memory_space<vmem>>, vector<1x8x512xf32>
    %15 = vector.shape_cast %14 : vector<1x8x512xf32> to vector<8x512xf32>
    %16 = vector.extract_strided_slice %15 {offsets = [0, 0], sizes = [8, 384], strides = [1, 1]} : vector<8x512xf32> to vector<8x384xf32>
    %c0_17 = arith.constant 0 : index
    %c0_18 = arith.constant 0 : index
    %17 = vector.load %arg4[%c0_17, %c0_18] : memref<128x512xf32, #tpu.memory_space<vmem>>, vector<128x384xf32>
    %cst_19 = arith.constant dense<0.000000e+00> : vector<8x384xf32>
    %18 = tpu.matmul %12, %17, %cst_19 {dimension_numbers = #tpu.dot_dimension_numbers<[1], [0], [0], [1], [0, 0, 1, 1], [], []>} : vector<8x128xf32>, vector<128x384xf32>, vector<8x384xf32> -> vector<8x384xf32>
    %19 = arith.addf %16, %18 : vector<8x384xf32>
    %20 = vector.extract_strided_slice %15 {offsets = [0, 384], sizes = [8, 128], strides = [1, 1]} : vector<8x512xf32> to vector<8x128xf32>
    %c0_20 = arith.constant 0 : index
    %c384 = arith.constant 384 : index
    %21 = vector.load %arg4[%c0_20, %c384] : memref<128x512xf32, #tpu.memory_space<vmem>>, vector<128x128xf32>
    %cst_21 = arith.constant dense<0.000000e+00> : vector<8x128xf32>
    %22 = tpu.matmul %12, %21, %cst_21 {dimension_numbers = #tpu.dot_dimension_numbers<[1], [0], [0], [1], [0, 0, 1, 1], [], []>} : vector<8x128xf32>, vector<128x128xf32>, vector<8x128xf32> -> vector<8x128xf32>
    %23 = arith.addf %20, %22 : vector<8x128xf32>
    %24 = vector.extract_strided_slice %19 {offsets = [0, 0], sizes = [8, 128], strides = [1, 1]} : vector<8x384xf32> to vector<8x128xf32>
    %25 = arith.negf %24 : vector<8x128xf32>
    %26 = math.exp %25 : vector<8x128xf32>
    %cst_22 = arith.constant 1.000000e+00 : f32
    %27 = vector.broadcast %cst_22 : f32 to vector<8x128xf32>
    %28 = arith.addf %27, %26 : vector<8x128xf32>
    %29 = arith.divf %27, %28 : vector<8x128xf32>
    %30 = vector.extract_strided_slice %19 {offsets = [0, 128], sizes = [8, 128], strides = [1, 1]} : vector<8x384xf32> to vector<8x128xf32>
    %31 = arith.negf %30 : vector<8x128xf32>
    %32 = math.exp %31 : vector<8x128xf32>
    %cst_23 = arith.constant 1.000000e+00 : f32
    %33 = vector.broadcast %cst_23 : f32 to vector<8x128xf32>
    %34 = arith.addf %33, %32 : vector<8x128xf32>
    %35 = arith.divf %33, %34 : vector<8x128xf32>
    %36 = vector.extract_strided_slice %19 {offsets = [0, 256], sizes = [8, 128], strides = [1, 1]} : vector<8x384xf32> to vector<8x128xf32>
    %37 = math.tanh %36 : vector<8x128xf32>
    %38 = arith.negf %23 : vector<8x128xf32>
    %39 = math.exp %38 : vector<8x128xf32>
    %cst_24 = arith.constant 1.000000e+00 : f32
    %40 = vector.broadcast %cst_24 : f32 to vector<8x128xf32>
    %41 = arith.addf %40, %39 : vector<8x128xf32>
    %42 = arith.divf %40, %41 : vector<8x128xf32>
    %43 = arith.mulf %35, %13 : vector<8x128xf32>
    %44 = arith.mulf %29, %37 : vector<8x128xf32>
    %45 = arith.addf %43, %44 : vector<8x128xf32>
    %46 = math.tanh %45 : vector<8x128xf32>
    %47 = arith.mulf %42, %46 : vector<8x128xf32>
    %c0_25 = arith.constant 0 : index
    %c0_26 = arith.constant 0 : index
    %c0_27 = arith.constant 0 : index
    %48 = vector.load %arg6[%c0_25, %c0_26, %c0_27] : memref<8x16x128xf32, #tpu.memory_space<vmem>>, vector<8x1x128xf32>
    %49 = vector.shape_cast %48 : vector<8x1x128xf32> to vector<8x128xf32>
    %50 = vector.shape_cast %47 : vector<8x128xf32> to vector<8x1x128xf32>
    tpu.vector_store %arg6[%c0_25, %c0_26, %c0_27], %50 {strides = array<i32>} : memref<8x16x128xf32, #tpu.memory_space<vmem>>, vector<8x1x128xf32>,
    %c1 = arith.constant 1 : index
    %c0_28 = arith.constant 0 : index
    %c0_29 = arith.constant 0 : index
    %51 = vector.load %arg9[%c1, %c0_28, %c0_29] : memref<16x8x512xf32, #tpu.memory_space<vmem>>, vector<1x8x512xf32>
    %52 = vector.shape_cast %51 : vector<1x8x512xf32> to vector<8x512xf32>
    %53 = vector.extract_strided_slice %52 {offsets = [0, 0], sizes = [8, 384], strides = [1, 1]} : vector<8x512xf32> to vector<8x384xf32>
    %c0_30 = arith.constant 0 : index
    %c0_31 = arith.constant 0 : index
    %54 = vector.load %arg4[%c0_30, %c0_31] : memref<128x512xf32, #tpu.memory_space<vmem>>, vector<128x384xf32>
    %cst_32 = arith.constant dense<0.000000e+00> : vector<8x384xf32>
    %55 = tpu.matmul %47, %54, %cst_32 {dimension_numbers = #tpu.dot_dimension_numbers<[1], [0], [0], [1], [0, 0, 1, 1], [], []>} : vector<8x128xf32>, vector<128x384xf32>, vector<8x384xf32> -> vector<8x384xf32>
    %56 = arith.addf %53, %55 : vector<8x384xf32>
    %57 = vector.extract_strided_slice %52 {offsets = [0, 384], sizes = [8, 128], strides = [1, 1]} : vector<8x512xf32> to vector<8x128xf32>
    %c0_33 = arith.constant 0 : index
    %c384_34 = arith.constant 384 : index
    %58 = vector.load %arg4[%c0_33, %c384_34] : memref<128x512xf32, #tpu.memory_space<vmem>>, vector<128x128xf32>
    %cst_35 = arith.constant dense<0.000000e+00> : vector<8x128xf32>
    %59 = tpu.matmul %47, %58, %cst_35 {dimension_numbers = #tpu.dot_dimension_numbers<[1], [0], [0], [1], [0, 0, 1, 1], [], []>} : vector<8x128xf32>, vector<128x128xf32>, vector<8x128xf32> -> vector<8x128xf32>
    %60 = arith.addf %57, %59 : vector<8x128xf32>
    %61 = vector.extract_strided_slice %56 {offsets = [0, 0], sizes = [8, 128], strides = [1, 1]} : vector<8x384xf32> to vector<8x128xf32>
    %62 = arith.negf %61 : vector<8x128xf32>
    %63 = math.exp %62 : vector<8x128xf32>
    %cst_36 = arith.constant 1.000000e+00 : f32
    %64 = vector.broadcast %cst_36 : f32 to vector<8x128xf32>
    %65 = arith.addf %64, %63 : vector<8x128xf32>
    %66 = arith.divf %64, %65 : vector<8x128xf32>
    %67 = vector.extract_strided_slice %56 {offsets = [0, 128], sizes = [8, 128], strides = [1, 1]} : vector<8x384xf32> to vector<8x128xf32>
    %68 = arith.negf %67 : vector<8x128xf32>
    %69 = math.exp %68 : vector<8x128xf32>
    %cst_37 = arith.constant 1.000000e+00 : f32
    %70 = vector.broadcast %cst_37 : f32 to vector<8x128xf32>
    %71 = arith.addf %70, %69 : vector<8x128xf32>
    %72 = arith.divf %70, %71 : vector<8x128xf32>
    %73 = vector.extract_strided_slice %56 {offsets = [0, 256], sizes = [8, 128], strides = [1, 1]} : vector<8x384xf32> to vector<8x128xf32>
    %74 = math.tanh %73 : vector<8x128xf32>
    %75 = arith.negf %60 : vector<8x128xf32>
    %76 = math.exp %75 : vector<8x128xf32>
    %cst_38 = arith.constant 1.000000e+00 : f32
    %77 = vector.broadcast %cst_38 : f32 to vector<8x128xf32>
    %78 = arith.addf %77, %76 : vector<8x128xf32>
    %79 = arith.divf %77, %78 : vector<8x128xf32>
    %80 = arith.mulf %72, %45 : vector<8x128xf32>
    %81 = arith.mulf %66, %74 : vector<8x128xf32>
    %82 = arith.addf %80, %81 : vector<8x128xf32>
    %83 = math.tanh %82 : vector<8x128xf32>
    %84 = arith.mulf %79, %83 : vector<8x128xf32>
    %c0_39 = arith.constant 0 : index
    %c1_40 = arith.constant 1 : index
    %c0_41 = arith.constant 0 : index
    %85 = vector.load %arg6[%c0_39, %c1_40, %c0_41] : memref<8x16x128xf32, #tpu.memory_space<vmem>>, vector<8x1x128xf32>
    %86 = vector.shape_cast %85 : vector<8x1x128xf32> to vector<8x128xf32>
    %87 = vector.shape_cast %84 : vector<8x128xf32> to vector<8x1x128xf32>
    tpu.vector_store %arg6[%c0_39, %c1_40, %c0_41], %87 {strides = array<i32>} : memref<8x16x128xf32, #tpu.memory_space<vmem>>, vector<8x1x128xf32>,
    %c2 = arith.constant 2 : index
    %c0_42 = arith.constant 0 : index
    %c0_43 = arith.constant 0 : index
    %88 = vector.load %arg9[%c2, %c0_42, %c0_43] : memref<16x8x512xf32, #tpu.memory_space<vmem>>, vector<1x8x512xf32>
    %89 = vector.shape_cast %88 : vector<1x8x512xf32> to vector<8x512xf32>
    %90 = vector.extract_strided_slice %89 {offsets = [0, 0], sizes = [8, 384], strides = [1, 1]} : vector<8x512xf32> to vector<8x384xf32>
    %c0_44 = arith.constant 0 : index
    %c0_45 = arith.constant 0 : index
    %91 = vector.load %arg4[%c0_44, %c0_45] : memref<128x512xf32, #tpu.memory_space<vmem>>, vector<128x384xf32>
    %cst_46 = arith.constant dense<0.000000e+00> : vector<8x384xf32>
    %92 = tpu.matmul %84, %91, %cst_46 {dimension_numbers = #tpu.dot_dimension_numbers<[1], [0], [0], [1], [0, 0, 1, 1], [], []>} : vector<8x128xf32>, vector<128x384xf32>, vector<8x384xf32> -> vector<8x384xf32>
    %93 = arith.addf %90, %92 : vector<8x384xf32>
    %94 = vector.extract_strided_slice %89 {offsets = [0, 384], sizes = [8, 128], strides = [1, 1]} : vector<8x512xf32> to vector<8x128xf32>
    %c0_47 = arith.constant 0 : index
    %c384_48 = arith.constant 384 : index
    %95 = vector.load %arg4[%c0_47, %c384_48] : memref<128x512xf32, #tpu.memory_space<vmem>>, vector<128x128xf32>
    %cst_49 = arith.constant dense<0.000000e+00> : vector<8x128xf32>
    %96 = tpu.matmul %84, %95, %cst_49 {dimension_numbers = #tpu.dot_dimension_numbers<[1], [0], [0], [1], [0, 0, 1, 1], [], []>} : vector<8x128xf32>, vector<128x128xf32>, vector<8x128xf32> -> vector<8x128xf32>
    %97 = arith.addf %94, %96 : vector<8x128xf32>
    %98 = vector.extract_strided_slice %93 {offsets = [0, 0], sizes = [8, 128], strides = [1, 1]} : vector<8x384xf32> to vector<8x128xf32>
    %99 = arith.negf %98 : vector<8x128xf32>
    %100 = math.exp %99 : vector<8x128xf32>
    %cst_50 = arith.constant 1.000000e+00 : f32
    %101 = vector.broadcast %cst_50 : f32 to vector<8x128xf32>
    %102 = arith.addf %101, %100 : vector<8x128xf32>
    %103 = arith.divf %101, %102 : vector<8x128xf32>
    %104 = vector.extract_strided_slice %93 {offsets = [0, 128], sizes = [8, 128], strides = [1, 1]} : vector<8x384xf32> to vector<8x128xf32>
    %105 = arith.negf %104 : vector<8x128xf32>
    %106 = math.exp %105 : vector<8x128xf32>
    %cst_51 = arith.constant 1.000000e+00 : f32
    %107 = vector.broadcast %cst_51 : f32 to vector<8x128xf32>
    %108 = arith.addf %107, %106 : vector<8x128xf32>
    %109 = arith.divf %107, %108 : vector<8x128xf32>
    %110 = vector.extract_strided_slice %93 {offsets = [0, 256], sizes = [8, 128], strides = [1, 1]} : vector<8x384xf32> to vector<8x128xf32>
    %111 = math.tanh %110 : vector<8x128xf32>
    %112 = arith.negf %97 : vector<8x128xf32>
    %113 = math.exp %112 : vector<8x128xf32>
    %cst_52 = arith.constant 1.000000e+00 : f32
    %114 = vector.broadcast %cst_52 : f32 to vector<8x128xf32>
    %115 = arith.addf %114, %113 : vector<8x128xf32>
    %116 = arith.divf %114, %115 : vector<8x128xf32>
    %117 = arith.mulf %109, %82 : vector<8x128xf32>
    %118 = arith.mulf %103, %111 : vector<8x128xf32>
    %119 = arith.addf %117, %118 : vector<8x128xf32>
    %120 = math.tanh %119 : vector<8x128xf32>
    %121 = arith.mulf %116, %120 : vector<8x128xf32>
    %c0_53 = arith.constant 0 : index
    %c2_54 = arith.constant 2 : index
    %c0_55 = arith.constant 0 : index
    %122 = vector.load %arg6[%c0_53, %c2_54, %c0_55] : memref<8x16x128xf32, #tpu.memory_space<vmem>>, vector<8x1x128xf32>
    %123 = vector.shape_cast %122 : vector<8x1x128xf32> to vector<8x128xf32>
    %124 = vector.shape_cast %121 : vector<8x128xf32> to vector<8x1x128xf32>
    tpu.vector_store %arg6[%c0_53, %c2_54, %c0_55], %124 {strides = array<i32>} : memref<8x16x128xf32, #tpu.memory_space<vmem>>, vector<8x1x128xf32>,
    %c3 = arith.constant 3 : index
    %c0_56 = arith.constant 0 : index
    %c0_57 = arith.constant 0 : index
    %125 = vector.load %arg9[%c3, %c0_56, %c0_57] : memref<16x8x512xf32, #tpu.memory_space<vmem>>, vector<1x8x512xf32>
    %126 = vector.shape_cast %125 : vector<1x8x512xf32> to vector<8x512xf32>
    %127 = vector.extract_strided_slice %126 {offsets = [0, 0], sizes = [8, 384], strides = [1, 1]} : vector<8x512xf32> to vector<8x384xf32>
    %c0_58 = arith.constant 0 : index
    %c0_59 = arith.constant 0 : index
    %128 = vector.load %arg4[%c0_58, %c0_59] : memref<128x512xf32, #tpu.memory_space<vmem>>, vector<128x384xf32>
    %cst_60 = arith.constant dense<0.000000e+00> : vector<8x384xf32>
    %129 = tpu.matmul %121, %128, %cst_60 {dimension_numbers = #tpu.dot_dimension_numbers<[1], [0], [0], [1], [0, 0, 1, 1], [], []>} : vector<8x128xf32>, vector<128x384xf32>, vector<8x384xf32> -> vector<8x384xf32>
    %130 = arith.addf %127, %129 : vector<8x384xf32>
    %131 = vector.extract_strided_slice %126 {offsets = [0, 384], sizes = [8, 128], strides = [1, 1]} : vector<8x512xf32> to vector<8x128xf32>
    %c0_61 = arith.constant 0 : index
    %c384_62 = arith.constant 384 : index
    %132 = vector.load %arg4[%c0_61, %c384_62] : memref<128x512xf32, #tpu.memory_space<vmem>>, vector<128x128xf32>
    %cst_63 = arith.constant dense<0.000000e+00> : vector<8x128xf32>
    %133 = tpu.matmul %121, %132, %cst_63 {dimension_numbers = #tpu.dot_dimension_numbers<[1], [0], [0], [1], [0, 0, 1, 1], [], []>} : vector<8x128xf32>, vector<128x128xf32>, vector<8x128xf32> -> vector<8x128xf32>
    %134 = arith.addf %131, %133 : vector<8x128xf32>
    %135 = vector.extract_strided_slice %130 {offsets = [0, 0], sizes = [8, 128], strides = [1, 1]} : vector<8x384xf32> to vector<8x128xf32>
    %136 = arith.negf %135 : vector<8x128xf32>
    %137 = math.exp %136 : vector<8x128xf32>
    %cst_64 = arith.constant 1.000000e+00 : f32
    %138 = vector.broadcast %cst_64 : f32 to vector<8x128xf32>
    %139 = arith.addf %138, %137 : vector<8x128xf32>
    %140 = arith.divf %138, %139 : vector<8x128xf32>
    %141 = vector.extract_strided_slice %130 {offsets = [0, 128], sizes = [8, 128], strides = [1, 1]} : vector<8x384xf32> to vector<8x128xf32>
    %142 = arith.negf %141 : vector<8x128xf32>
    %143 = math.exp %142 : vector<8x128xf32>
    %cst_65 = arith.constant 1.000000e+00 : f32
    %144 = vector.broadcast %cst_65 : f32 to vector<8x128xf32>
    %145 = arith.addf %144, %143 : vector<8x128xf32>
    %146 = arith.divf %144, %145 : vector<8x128xf32>
    %147 = vector.extract_strided_slice %130 {offsets = [0, 256], sizes = [8, 128], strides = [1, 1]} : vector<8x384xf32> to vector<8x128xf32>
    %148 = math.tanh %147 : vector<8x128xf32>
    %149 = arith.negf %134 : vector<8x128xf32>
    %150 = math.exp %149 : vector<8x128xf32>
    %cst_66 = arith.constant 1.000000e+00 : f32
    %151 = vector.broadcast %cst_66 : f32 to vector<8x128xf32>
    %152 = arith.addf %151, %150 : vector<8x128xf32>
    %153 = arith.divf %151, %152 : vector<8x128xf32>
    %154 = arith.mulf %146, %119 : vector<8x128xf32>
    %155 = arith.mulf %140, %148 : vector<8x128xf32>
    %156 = arith.addf %154, %155 : vector<8x128xf32>
    %157 = math.tanh %156 : vector<8x128xf32>
    %158 = arith.mulf %153, %157 : vector<8x128xf32>
    %c0_67 = arith.constant 0 : index
    %c3_68 = arith.constant 3 : index
    %c0_69 = arith.constant 0 : index
    %159 = vector.load %arg6[%c0_67, %c3_68, %c0_69] : memref<8x16x128xf32, #tpu.memory_space<vmem>>, vector<8x1x128xf32>
    %160 = vector.shape_cast %159 : vector<8x1x128xf32> to vector<8x128xf32>
    %161 = vector.shape_cast %158 : vector<8x128xf32> to vector<8x1x128xf32>
    tpu.vector_store %arg6[%c0_67, %c3_68, %c0_69], %161 {strides = array<i32>} : memref<8x16x128xf32, #tpu.memory_space<vmem>>, vector<8x1x128xf32>,
    %c4 = arith.constant 4 : index
    %c0_70 = arith.constant 0 : index
    %c0_71 = arith.constant 0 : index
    %162 = vector.load %arg9[%c4, %c0_70, %c0_71] : memref<16x8x512xf32, #tpu.memory_space<vmem>>, vector<1x8x512xf32>
    %163 = vector.shape_cast %162 : vector<1x8x512xf32> to vector<8x512xf32>
    %164 = vector.extract_strided_slice %163 {offsets = [0, 0], sizes = [8, 384], strides = [1, 1]} : vector<8x512xf32> to vector<8x384xf32>
    %c0_72 = arith.constant 0 : index
    %c0_73 = arith.constant 0 : index
    %165 = vector.load %arg4[%c0_72, %c0_73] : memref<128x512xf32, #tpu.memory_space<vmem>>, vector<128x384xf32>
    %cst_74 = arith.constant dense<0.000000e+00> : vector<8x384xf32>
    %166 = tpu.matmul %158, %165, %cst_74 {dimension_numbers = #tpu.dot_dimension_numbers<[1], [0], [0], [1], [0, 0, 1, 1], [], []>} : vector<8x128xf32>, vector<128x384xf32>, vector<8x384xf32> -> vector<8x384xf32>
    %167 = arith.addf %164, %166 : vector<8x384xf32>
    %168 = vector.extract_strided_slice %163 {offsets = [0, 384], sizes = [8, 128], strides = [1, 1]} : vector<8x512xf32> to vector<8x128xf32>
    %c0_75 = arith.constant 0 : index
    %c384_76 = arith.constant 384 : index
    %169 = vector.load %arg4[%c0_75, %c384_76] : memref<128x512xf32, #tpu.memory_space<vmem>>, vector<128x128xf32>
    %cst_77 = arith.constant dense<0.000000e+00> : vector<8x128xf32>
    %170 = tpu.matmul %158, %169, %cst_77 {dimension_numbers = #tpu.dot_dimension_numbers<[1], [0], [0], [1], [0, 0, 1, 1], [], []>} : vector<8x128xf32>, vector<128x128xf32>, vector<8x128xf32> -> vector<8x128xf32>
    %171 = arith.addf %168, %170 : vector<8x128xf32>
    %172 = vector.extract_strided_slice %167 {offsets = [0, 0], sizes = [8, 128], strides = [1, 1]} : vector<8x384xf32> to vector<8x128xf32>
    %173 = arith.negf %172 : vector<8x128xf32>
    %174 = math.exp %173 : vector<8x128xf32>
    %cst_78 = arith.constant 1.000000e+00 : f32
    %175 = vector.broadcast %cst_78 : f32 to vector<8x128xf32>
    %176 = arith.addf %175, %174 : vector<8x128xf32>
    %177 = arith.divf %175, %176 : vector<8x128xf32>
    %178 = vector.extract_strided_slice %167 {offsets = [0, 128], sizes = [8, 128], strides = [1, 1]} : vector<8x384xf32> to vector<8x128xf32>
    %179 = arith.negf %178 : vector<8x128xf32>
    %180 = math.exp %179 : vector<8x128xf32>
    %cst_79 = arith.constant 1.000000e+00 : f32
    %181 = vector.broadcast %cst_79 : f32 to vector<8x128xf32>
    %182 = arith.addf %181, %180 : vector<8x128xf32>
    %183 = arith.divf %181, %182 : vector<8x128xf32>
    %184 = vector.extract_strided_slice %167 {offsets = [0, 256], sizes = [8, 128], strides = [1, 1]} : vector<8x384xf32> to vector<8x128xf32>
    %185 = math.tanh %184 : vector<8x128xf32>
    %186 = arith.negf %171 : vector<8x128xf32>
    %187 = math.exp %186 : vector<8x128xf32>
    %cst_80 = arith.constant 1.000000e+00 : f32
    %188 = vector.broadcast %cst_80 : f32 to vector<8x128xf32>
    %189 = arith.addf %188, %187 : vector<8x128xf32>
    %190 = arith.divf %188, %189 : vector<8x128xf32>
    %191 = arith.mulf %183, %156 : vector<8x128xf32>
    %192 = arith.mulf %177, %185 : vector<8x128xf32>
    %193 = arith.addf %191, %192 : vector<8x128xf32>
    %194 = math.tanh %193 : vector<8x128xf32>
    %195 = arith.mulf %190, %194 : vector<8x128xf32>
    %c0_81 = arith.constant 0 : index
    %c4_82 = arith.constant 4 : index
    %c0_83 = arith.constant 0 : index
    %196 = vector.load %arg6[%c0_81, %c4_82, %c0_83] : memref<8x16x128xf32, #tpu.memory_space<vmem>>, vector<8x1x128xf32>
    %197 = vector.shape_cast %196 : vector<8x1x128xf32> to vector<8x128xf32>
    %198 = vector.shape_cast %195 : vector<8x128xf32> to vector<8x1x128xf32>
    tpu.vector_store %arg6[%c0_81, %c4_82, %c0_83], %198 {strides = array<i32>} : memref<8x16x128xf32, #tpu.memory_space<vmem>>, vector<8x1x128xf32>,
    %c5 = arith.constant 5 : index
    %c0_84 = arith.constant 0 : index
    %c0_85 = arith.constant 0 : index
    %199 = vector.load %arg9[%c5, %c0_84, %c0_85] : memref<16x8x512xf32, #tpu.memory_space<vmem>>, vector<1x8x512xf32>
    %200 = vector.shape_cast %199 : vector<1x8x512xf32> to vector<8x512xf32>
    %201 = vector.extract_strided_slice %200 {offsets = [0, 0], sizes = [8, 384], strides = [1, 1]} : vector<8x512xf32> to vector<8x384xf32>
    %c0_86 = arith.constant 0 : index
    %c0_87 = arith.constant 0 : index
    %202 = vector.load %arg4[%c0_86, %c0_87] : memref<128x512xf32, #tpu.memory_space<vmem>>, vector<128x384xf32>
    %cst_88 = arith.constant dense<0.000000e+00> : vector<8x384xf32>
    %203 = tpu.matmul %195, %202, %cst_88 {dimension_numbers = #tpu.dot_dimension_numbers<[1], [0], [0], [1], [0, 0, 1, 1], [], []>} : vector<8x128xf32>, vector<128x384xf32>, vector<8x384xf32> -> vector<8x384xf32>
    %204 = arith.addf %201, %203 : vector<8x384xf32>
    %205 = vector.extract_strided_slice %200 {offsets = [0, 384], sizes = [8, 128], strides = [1, 1]} : vector<8x512xf32> to vector<8x128xf32>
    %c0_89 = arith.constant 0 : index
    %c384_90 = arith.constant 384 : index
    %206 = vector.load %arg4[%c0_89, %c384_90] : memref<128x512xf32, #tpu.memory_space<vmem>>, vector<128x128xf32>
    %cst_91 = arith.constant dense<0.000000e+00> : vector<8x128xf32>
    %207 = tpu.matmul %195, %206, %cst_91 {dimension_numbers = #tpu.dot_dimension_numbers<[1], [0], [0], [1], [0, 0, 1, 1], [], []>} : vector<8x128xf32>, vector<128x128xf32>, vector<8x128xf32> -> vector<8x128xf32>
    %208 = arith.addf %205, %207 : vector<8x128xf32>
    %209 = vector.extract_strided_slice %204 {offsets = [0, 0], sizes = [8, 128], strides = [1, 1]} : vector<8x384xf32> to vector<8x128xf32>
    %210 = arith.negf %209 : vector<8x128xf32>
    %211 = math.exp %210 : vector<8x128xf32>
    %cst_92 = arith.constant 1.000000e+00 : f32
    %212 = vector.broadcast %cst_92 : f32 to vector<8x128xf32>
    %213 = arith.addf %212, %211 : vector<8x128xf32>
    %214 = arith.divf %212, %213 : vector<8x128xf32>
    %215 = vector.extract_strided_slice %204 {offsets = [0, 128], sizes = [8, 128], strides = [1, 1]} : vector<8x384xf32> to vector<8x128xf32>
    %216 = arith.negf %215 : vector<8x128xf32>
    %217 = math.exp %216 : vector<8x128xf32>
    %cst_93 = arith.constant 1.000000e+00 : f32
    %218 = vector.broadcast %cst_93 : f32 to vector<8x128xf32>
    %219 = arith.addf %218, %217 : vector<8x128xf32>
    %220 = arith.divf %218, %219 : vector<8x128xf32>
    %221 = vector.extract_strided_slice %204 {offsets = [0, 256], sizes = [8, 128], strides = [1, 1]} : vector<8x384xf32> to vector<8x128xf32>
    %222 = math.tanh %221 : vector<8x128xf32>
    %223 = arith.negf %208 : vector<8x128xf32>
    %224 = math.exp %223 : vector<8x128xf32>
    %cst_94 = arith.constant 1.000000e+00 : f32
    %225 = vector.broadcast %cst_94 : f32 to vector<8x128xf32>
    %226 = arith.addf %225, %224 : vector<8x128xf32>
    %227 = arith.divf %225, %226 : vector<8x128xf32>
    %228 = arith.mulf %220, %193 : vector<8x128xf32>
    %229 = arith.mulf %214, %222 : vector<8x128xf32>
    %230 = arith.addf %228, %229 : vector<8x128xf32>
    %231 = math.tanh %230 : vector<8x128xf32>
    %232 = arith.mulf %227, %231 : vector<8x128xf32>
    %c0_95 = arith.constant 0 : index
    %c5_96 = arith.constant 5 : index
    %c0_97 = arith.constant 0 : index
    %233 = vector.load %arg6[%c0_95, %c5_96, %c0_97] : memref<8x16x128xf32, #tpu.memory_space<vmem>>, vector<8x1x128xf32>
    %234 = vector.shape_cast %233 : vector<8x1x128xf32> to vector<8x128xf32>
    %235 = vector.shape_cast %232 : vector<8x128xf32> to vector<8x1x128xf32>
    tpu.vector_store %arg6[%c0_95, %c5_96, %c0_97], %235 {strides = array<i32>} : memref<8x16x128xf32, #tpu.memory_space<vmem>>, vector<8x1x128xf32>,
    %c6 = arith.constant 6 : index
    %c0_98 = arith.constant 0 : index
    %c0_99 = arith.constant 0 : index
    %236 = vector.load %arg9[%c6, %c0_98, %c0_99] : memref<16x8x512xf32, #tpu.memory_space<vmem>>, vector<1x8x512xf32>
    %237 = vector.shape_cast %236 : vector<1x8x512xf32> to vector<8x512xf32>
    %238 = vector.extract_strided_slice %237 {offsets = [0, 0], sizes = [8, 384], strides = [1, 1]} : vector<8x512xf32> to vector<8x384xf32>
    %c0_100 = arith.constant 0 : index
    %c0_101 = arith.constant 0 : index
    %239 = vector.load %arg4[%c0_100, %c0_101] : memref<128x512xf32, #tpu.memory_space<vmem>>, vector<128x384xf32>
    %cst_102 = arith.constant dense<0.000000e+00> : vector<8x384xf32>
    %240 = tpu.matmul %232, %239, %cst_102 {dimension_numbers = #tpu.dot_dimension_numbers<[1], [0], [0], [1], [0, 0, 1, 1], [], []>} : vector<8x128xf32>, vector<128x384xf32>, vector<8x384xf32> -> vector<8x384xf32>
    %241 = arith.addf %238, %240 : vector<8x384xf32>
    %242 = vector.extract_strided_slice %237 {offsets = [0, 384], sizes = [8, 128], strides = [1, 1]} : vector<8x512xf32> to vector<8x128xf32>
    %c0_103 = arith.constant 0 : index
    %c384_104 = arith.constant 384 : index
    %243 = vector.load %arg4[%c0_103, %c384_104] : memref<128x512xf32, #tpu.memory_space<vmem>>, vector<128x128xf32>
    %cst_105 = arith.constant dense<0.000000e+00> : vector<8x128xf32>
    %244 = tpu.matmul %232, %243, %cst_105 {dimension_numbers = #tpu.dot_dimension_numbers<[1], [0], [0], [1], [0, 0, 1, 1], [], []>} : vector<8x128xf32>, vector<128x128xf32>, vector<8x128xf32> -> vector<8x128xf32>
    %245 = arith.addf %242, %244 : vector<8x128xf32>
    %246 = vector.extract_strided_slice %241 {offsets = [0, 0], sizes = [8, 128], strides = [1, 1]} : vector<8x384xf32> to vector<8x128xf32>
    %247 = arith.negf %246 : vector<8x128xf32>
    %248 = math.exp %247 : vector<8x128xf32>
    %cst_106 = arith.constant 1.000000e+00 : f32
    %249 = vector.broadcast %cst_106 : f32 to vector<8x128xf32>
    %250 = arith.addf %249, %248 : vector<8x128xf32>
    %251 = arith.divf %249, %250 : vector<8x128xf32>
    %252 = vector.extract_strided_slice %241 {offsets = [0, 128], sizes = [8, 128], strides = [1, 1]} : vector<8x384xf32> to vector<8x128xf32>
    %253 = arith.negf %252 : vector<8x128xf32>
    %254 = math.exp %253 : vector<8x128xf32>
    %cst_107 = arith.constant 1.000000e+00 : f32
    %255 = vector.broadcast %cst_107 : f32 to vector<8x128xf32>
    %256 = arith.addf %255, %254 : vector<8x128xf32>
    %257 = arith.divf %255, %256 : vector<8x128xf32>
    %258 = vector.extract_strided_slice %241 {offsets = [0, 256], sizes = [8, 128], strides = [1, 1]} : vector<8x384xf32> to vector<8x128xf32>
    %259 = math.tanh %258 : vector<8x128xf32>
    %260 = arith.negf %245 : vector<8x128xf32>
    %261 = math.exp %260 : vector<8x128xf32>
    %cst_108 = arith.constant 1.000000e+00 : f32
    %262 = vector.broadcast %cst_108 : f32 to vector<8x128xf32>
    %263 = arith.addf %262, %261 : vector<8x128xf32>
    %264 = arith.divf %262, %263 : vector<8x128xf32>
    %265 = arith.mulf %257, %230 : vector<8x128xf32>
    %266 = arith.mulf %251, %259 : vector<8x128xf32>
    %267 = arith.addf %265, %266 : vector<8x128xf32>
    %268 = math.tanh %267 : vector<8x128xf32>
    %269 = arith.mulf %264, %268 : vector<8x128xf32>
    %c0_109 = arith.constant 0 : index
    %c6_110 = arith.constant 6 : index
    %c0_111 = arith.constant 0 : index
    %270 = vector.load %arg6[%c0_109, %c6_110, %c0_111] : memref<8x16x128xf32, #tpu.memory_space<vmem>>, vector<8x1x128xf32>
    %271 = vector.shape_cast %270 : vector<8x1x128xf32> to vector<8x128xf32>
    %272 = vector.shape_cast %269 : vector<8x128xf32> to vector<8x1x128xf32>
    tpu.vector_store %arg6[%c0_109, %c6_110, %c0_111], %272 {strides = array<i32>} : memref<8x16x128xf32, #tpu.memory_space<vmem>>, vector<8x1x128xf32>,
    %c7 = arith.constant 7 : index
    %c0_112 = arith.constant 0 : index
    %c0_113 = arith.constant 0 : index
    %273 = vector.load %arg9[%c7, %c0_112, %c0_113] : memref<16x8x512xf32, #tpu.memory_space<vmem>>, vector<1x8x512xf32>
    %274 = vector.shape_cast %273 : vector<1x8x512xf32> to vector<8x512xf32>
    %275 = vector.extract_strided_slice %274 {offsets = [0, 0], sizes = [8, 384], strides = [1, 1]} : vector<8x512xf32> to vector<8x384xf32>
    %c0_114 = arith.constant 0 : index
    %c0_115 = arith.constant 0 : index
    %276 = vector.load %arg4[%c0_114, %c0_115] : memref<128x512xf32, #tpu.memory_space<vmem>>, vector<128x384xf32>
    %cst_116 = arith.constant dense<0.000000e+00> : vector<8x384xf32>
    %277 = tpu.matmul %269, %276, %cst_116 {dimension_numbers = #tpu.dot_dimension_numbers<[1], [0], [0], [1], [0, 0, 1, 1], [], []>} : vector<8x128xf32>, vector<128x384xf32>, vector<8x384xf32> -> vector<8x384xf32>
    %278 = arith.addf %275, %277 : vector<8x384xf32>
    %279 = vector.extract_strided_slice %274 {offsets = [0, 384], sizes = [8, 128], strides = [1, 1]} : vector<8x512xf32> to vector<8x128xf32>
    %c0_117 = arith.constant 0 : index
    %c384_118 = arith.constant 384 : index
    %280 = vector.load %arg4[%c0_117, %c384_118] : memref<128x512xf32, #tpu.memory_space<vmem>>, vector<128x128xf32>
    %cst_119 = arith.constant dense<0.000000e+00> : vector<8x128xf32>
    %281 = tpu.matmul %269, %280, %cst_119 {dimension_numbers = #tpu.dot_dimension_numbers<[1], [0], [0], [1], [0, 0, 1, 1], [], []>} : vector<8x128xf32>, vector<128x128xf32>, vector<8x128xf32> -> vector<8x128xf32>
    %282 = arith.addf %279, %281 : vector<8x128xf32>
    %283 = vector.extract_strided_slice %278 {offsets = [0, 0], sizes = [8, 128], strides = [1, 1]} : vector<8x384xf32> to vector<8x128xf32>
    %284 = arith.negf %283 : vector<8x128xf32>
    %285 = math.exp %284 : vector<8x128xf32>
    %cst_120 = arith.constant 1.000000e+00 : f32
    %286 = vector.broadcast %cst_120 : f32 to vector<8x128xf32>
    %287 = arith.addf %286, %285 : vector<8x128xf32>
    %288 = arith.divf %286, %287 : vector<8x128xf32>
    %289 = vector.extract_strided_slice %278 {offsets = [0, 128], sizes = [8, 128], strides = [1, 1]} : vector<8x384xf32> to vector<8x128xf32>
    %290 = arith.negf %289 : vector<8x128xf32>
    %291 = math.exp %290 : vector<8x128xf32>
    %cst_121 = arith.constant 1.000000e+00 : f32
    %292 = vector.broadcast %cst_121 : f32 to vector<8x128xf32>
    %293 = arith.addf %292, %291 : vector<8x128xf32>
    %294 = arith.divf %292, %293 : vector<8x128xf32>
    %295 = vector.extract_strided_slice %278 {offsets = [0, 256], sizes = [8, 128], strides = [1, 1]} : vector<8x384xf32> to vector<8x128xf32>
    %296 = math.tanh %295 : vector<8x128xf32>
    %297 = arith.negf %282 : vector<8x128xf32>
    %298 = math.exp %297 : vector<8x128xf32>
    %cst_122 = arith.constant 1.000000e+00 : f32
    %299 = vector.broadcast %cst_122 : f32 to vector<8x128xf32>
    %300 = arith.addf %299, %298 : vector<8x128xf32>
    %301 = arith.divf %299, %300 : vector<8x128xf32>
    %302 = arith.mulf %294, %267 : vector<8x128xf32>
    %303 = arith.mulf %288, %296 : vector<8x128xf32>
    %304 = arith.addf %302, %303 : vector<8x128xf32>
    %305 = math.tanh %304 : vector<8x128xf32>
    %306 = arith.mulf %301, %305 : vector<8x128xf32>
    %c0_123 = arith.constant 0 : index
    %c7_124 = arith.constant 7 : index
    %c0_125 = arith.constant 0 : index
    %307 = vector.load %arg6[%c0_123, %c7_124, %c0_125] : memref<8x16x128xf32, #tpu.memory_space<vmem>>, vector<8x1x128xf32>
    %308 = vector.shape_cast %307 : vector<8x1x128xf32> to vector<8x128xf32>
    %309 = vector.shape_cast %306 : vector<8x128xf32> to vector<8x1x128xf32>
    tpu.vector_store %arg6[%c0_123, %c7_124, %c0_125], %309 {strides = array<i32>} : memref<8x16x128xf32, #tpu.memory_space<vmem>>, vector<8x1x128xf32>,
    %c8 = arith.constant 8 : index
    %c0_126 = arith.constant 0 : index
    %c0_127 = arith.constant 0 : index
    %310 = vector.load %arg9[%c8, %c0_126, %c0_127] : memref<16x8x512xf32, #tpu.memory_space<vmem>>, vector<1x8x512xf32>
    %311 = vector.shape_cast %310 : vector<1x8x512xf32> to vector<8x512xf32>
    %312 = vector.extract_strided_slice %311 {offsets = [0, 0], sizes = [8, 384], strides = [1, 1]} : vector<8x512xf32> to vector<8x384xf32>
    %c0_128 = arith.constant 0 : index
    %c0_129 = arith.constant 0 : index
    %313 = vector.load %arg4[%c0_128, %c0_129] : memref<128x512xf32, #tpu.memory_space<vmem>>, vector<128x384xf32>
    %cst_130 = arith.constant dense<0.000000e+00> : vector<8x384xf32>
    %314 = tpu.matmul %306, %313, %cst_130 {dimension_numbers = #tpu.dot_dimension_numbers<[1], [0], [0], [1], [0, 0, 1, 1], [], []>} : vector<8x128xf32>, vector<128x384xf32>, vector<8x384xf32> -> vector<8x384xf32>
    %315 = arith.addf %312, %314 : vector<8x384xf32>
    %316 = vector.extract_strided_slice %311 {offsets = [0, 384], sizes = [8, 128], strides = [1, 1]} : vector<8x512xf32> to vector<8x128xf32>
    %c0_131 = arith.constant 0 : index
    %c384_132 = arith.constant 384 : index
    %317 = vector.load %arg4[%c0_131, %c384_132] : memref<128x512xf32, #tpu.memory_space<vmem>>, vector<128x128xf32>
    %cst_133 = arith.constant dense<0.000000e+00> : vector<8x128xf32>
    %318 = tpu.matmul %306, %317, %cst_133 {dimension_numbers = #tpu.dot_dimension_numbers<[1], [0], [0], [1], [0, 0, 1, 1], [], []>} : vector<8x128xf32>, vector<128x128xf32>, vector<8x128xf32> -> vector<8x128xf32>
    %319 = arith.addf %316, %318 : vector<8x128xf32>
    %320 = vector.extract_strided_slice %315 {offsets = [0, 0], sizes = [8, 128], strides = [1, 1]} : vector<8x384xf32> to vector<8x128xf32>
    %321 = arith.negf %320 : vector<8x128xf32>
    %322 = math.exp %321 : vector<8x128xf32>
    %cst_134 = arith.constant 1.000000e+00 : f32
    %323 = vector.broadcast %cst_134 : f32 to vector<8x128xf32>
    %324 = arith.addf %323, %322 : vector<8x128xf32>
    %325 = arith.divf %323, %324 : vector<8x128xf32>
    %326 = vector.extract_strided_slice %315 {offsets = [0, 128], sizes = [8, 128], strides = [1, 1]} : vector<8x384xf32> to vector<8x128xf32>
    %327 = arith.negf %326 : vector<8x128xf32>
    %328 = math.exp %327 : vector<8x128xf32>
    %cst_135 = arith.constant 1.000000e+00 : f32
    %329 = vector.broadcast %cst_135 : f32 to vector<8x128xf32>
    %330 = arith.addf %329, %328 : vector<8x128xf32>
    %331 = arith.divf %329, %330 : vector<8x128xf32>
    %332 = vector.extract_strided_slice %315 {offsets = [0, 256], sizes = [8, 128], strides = [1, 1]} : vector<8x384xf32> to vector<8x128xf32>
    %333 = math.tanh %332 : vector<8x128xf32>
    %334 = arith.negf %319 : vector<8x128xf32>
    %335 = math.exp %334 : vector<8x128xf32>
    %cst_136 = arith.constant 1.000000e+00 : f32
    %336 = vector.broadcast %cst_136 : f32 to vector<8x128xf32>
    %337 = arith.addf %336, %335 : vector<8x128xf32>
    %338 = arith.divf %336, %337 : vector<8x128xf32>
    %339 = arith.mulf %331, %304 : vector<8x128xf32>
    %340 = arith.mulf %325, %333 : vector<8x128xf32>
    %341 = arith.addf %339, %340 : vector<8x128xf32>
    %342 = math.tanh %341 : vector<8x128xf32>
    %343 = arith.mulf %338, %342 : vector<8x128xf32>
    %c0_137 = arith.constant 0 : index
    %c8_138 = arith.constant 8 : index
    %c0_139 = arith.constant 0 : index
    %344 = vector.load %arg6[%c0_137, %c8_138, %c0_139] : memref<8x16x128xf32, #tpu.memory_space<vmem>>, vector<8x1x128xf32>
    %345 = vector.shape_cast %344 : vector<8x1x128xf32> to vector<8x128xf32>
    %346 = vector.shape_cast %343 : vector<8x128xf32> to vector<8x1x128xf32>
    tpu.vector_store %arg6[%c0_137, %c8_138, %c0_139], %346 {strides = array<i32>} : memref<8x16x128xf32, #tpu.memory_space<vmem>>, vector<8x1x128xf32>,
    %c9 = arith.constant 9 : index
    %c0_140 = arith.constant 0 : index
    %c0_141 = arith.constant 0 : index
    %347 = vector.load %arg9[%c9, %c0_140, %c0_141] : memref<16x8x512xf32, #tpu.memory_space<vmem>>, vector<1x8x512xf32>
    %348 = vector.shape_cast %347 : vector<1x8x512xf32> to vector<8x512xf32>
    %349 = vector.extract_strided_slice %348 {offsets = [0, 0], sizes = [8, 384], strides = [1, 1]} : vector<8x512xf32> to vector<8x384xf32>
    %c0_142 = arith.constant 0 : index
    %c0_143 = arith.constant 0 : index
    %350 = vector.load %arg4[%c0_142, %c0_143] : memref<128x512xf32, #tpu.memory_space<vmem>>, vector<128x384xf32>
    %cst_144 = arith.constant dense<0.000000e+00> : vector<8x384xf32>
    %351 = tpu.matmul %343, %350, %cst_144 {dimension_numbers = #tpu.dot_dimension_numbers<[1], [0], [0], [1], [0, 0, 1, 1], [], []>} : vector<8x128xf32>, vector<128x384xf32>, vector<8x384xf32> -> vector<8x384xf32>
    %352 = arith.addf %349, %351 : vector<8x384xf32>
    %353 = vector.extract_strided_slice %348 {offsets = [0, 384], sizes = [8, 128], strides = [1, 1]} : vector<8x512xf32> to vector<8x128xf32>
    %c0_145 = arith.constant 0 : index
    %c384_146 = arith.constant 384 : index
    %354 = vector.load %arg4[%c0_145, %c384_146] : memref<128x512xf32, #tpu.memory_space<vmem>>, vector<128x128xf32>
    %cst_147 = arith.constant dense<0.000000e+00> : vector<8x128xf32>
    %355 = tpu.matmul %343, %354, %cst_147 {dimension_numbers = #tpu.dot_dimension_numbers<[1], [0], [0], [1], [0, 0, 1, 1], [], []>} : vector<8x128xf32>, vector<128x128xf32>, vector<8x128xf32> -> vector<8x128xf32>
    %356 = arith.addf %353, %355 : vector<8x128xf32>
    %357 = vector.extract_strided_slice %352 {offsets = [0, 0], sizes = [8, 128], strides = [1, 1]} : vector<8x384xf32> to vector<8x128xf32>
    %358 = arith.negf %357 : vector<8x128xf32>
    %359 = math.exp %358 : vector<8x128xf32>
    %cst_148 = arith.constant 1.000000e+00 : f32
    %360 = vector.broadcast %cst_148 : f32 to vector<8x128xf32>
    %361 = arith.addf %360, %359 : vector<8x128xf32>
    %362 = arith.divf %360, %361 : vector<8x128xf32>
    %363 = vector.extract_strided_slice %352 {offsets = [0, 128], sizes = [8, 128], strides = [1, 1]} : vector<8x384xf32> to vector<8x128xf32>
    %364 = arith.negf %363 : vector<8x128xf32>
    %365 = math.exp %364 : vector<8x128xf32>
    %cst_149 = arith.constant 1.000000e+00 : f32
    %366 = vector.broadcast %cst_149 : f32 to vector<8x128xf32>
    %367 = arith.addf %366, %365 : vector<8x128xf32>
    %368 = arith.divf %366, %367 : vector<8x128xf32>
    %369 = vector.extract_strided_slice %352 {offsets = [0, 256], sizes = [8, 128], strides = [1, 1]} : vector<8x384xf32> to vector<8x128xf32>
    %370 = math.tanh %369 : vector<8x128xf32>
    %371 = arith.negf %356 : vector<8x128xf32>
    %372 = math.exp %371 : vector<8x128xf32>
    %cst_150 = arith.constant 1.000000e+00 : f32
    %373 = vector.broadcast %cst_150 : f32 to vector<8x128xf32>
    %374 = arith.addf %373, %372 : vector<8x128xf32>
    %375 = arith.divf %373, %374 : vector<8x128xf32>
    %376 = arith.mulf %368, %341 : vector<8x128xf32>
    %377 = arith.mulf %362, %370 : vector<8x128xf32>
    %378 = arith.addf %376, %377 : vector<8x128xf32>
    %379 = math.tanh %378 : vector<8x128xf32>
    %380 = arith.mulf %375, %379 : vector<8x128xf32>
    %c0_151 = arith.constant 0 : index
    %c9_152 = arith.constant 9 : index
    %c0_153 = arith.constant 0 : index
    %381 = vector.load %arg6[%c0_151, %c9_152, %c0_153] : memref<8x16x128xf32, #tpu.memory_space<vmem>>, vector<8x1x128xf32>
    %382 = vector.shape_cast %381 : vector<8x1x128xf32> to vector<8x128xf32>
    %383 = vector.shape_cast %380 : vector<8x128xf32> to vector<8x1x128xf32>
    tpu.vector_store %arg6[%c0_151, %c9_152, %c0_153], %383 {strides = array<i32>} : memref<8x16x128xf32, #tpu.memory_space<vmem>>, vector<8x1x128xf32>,
    %c10 = arith.constant 10 : index
    %c0_154 = arith.constant 0 : index
    %c0_155 = arith.constant 0 : index
    %384 = vector.load %arg9[%c10, %c0_154, %c0_155] : memref<16x8x512xf32, #tpu.memory_space<vmem>>, vector<1x8x512xf32>
    %385 = vector.shape_cast %384 : vector<1x8x512xf32> to vector<8x512xf32>
    %386 = vector.extract_strided_slice %385 {offsets = [0, 0], sizes = [8, 384], strides = [1, 1]} : vector<8x512xf32> to vector<8x384xf32>
    %c0_156 = arith.constant 0 : index
    %c0_157 = arith.constant 0 : index
    %387 = vector.load %arg4[%c0_156, %c0_157] : memref<128x512xf32, #tpu.memory_space<vmem>>, vector<128x384xf32>
    %cst_158 = arith.constant dense<0.000000e+00> : vector<8x384xf32>
    %388 = tpu.matmul %380, %387, %cst_158 {dimension_numbers = #tpu.dot_dimension_numbers<[1], [0], [0], [1], [0, 0, 1, 1], [], []>} : vector<8x128xf32>, vector<128x384xf32>, vector<8x384xf32> -> vector<8x384xf32>
    %389 = arith.addf %386, %388 : vector<8x384xf32>
    %390 = vector.extract_strided_slice %385 {offsets = [0, 384], sizes = [8, 128], strides = [1, 1]} : vector<8x512xf32> to vector<8x128xf32>
    %c0_159 = arith.constant 0 : index
    %c384_160 = arith.constant 384 : index
    %391 = vector.load %arg4[%c0_159, %c384_160] : memref<128x512xf32, #tpu.memory_space<vmem>>, vector<128x128xf32>
    %cst_161 = arith.constant dense<0.000000e+00> : vector<8x128xf32>
    %392 = tpu.matmul %380, %391, %cst_161 {dimension_numbers = #tpu.dot_dimension_numbers<[1], [0], [0], [1], [0, 0, 1, 1], [], []>} : vector<8x128xf32>, vector<128x128xf32>, vector<8x128xf32> -> vector<8x128xf32>
    %393 = arith.addf %390, %392 : vector<8x128xf32>
    %394 = vector.extract_strided_slice %389 {offsets = [0, 0], sizes = [8, 128], strides = [1, 1]} : vector<8x384xf32> to vector<8x128xf32>
    %395 = arith.negf %394 : vector<8x128xf32>
    %396 = math.exp %395 : vector<8x128xf32>
    %cst_162 = arith.constant 1.000000e+00 : f32
    %397 = vector.broadcast %cst_162 : f32 to vector<8x128xf32>
    %398 = arith.addf %397, %396 : vector<8x128xf32>
    %399 = arith.divf %397, %398 : vector<8x128xf32>
    %400 = vector.extract_strided_slice %389 {offsets = [0, 128], sizes = [8, 128], strides = [1, 1]} : vector<8x384xf32> to vector<8x128xf32>
    %401 = arith.negf %400 : vector<8x128xf32>
    %402 = math.exp %401 : vector<8x128xf32>
    %cst_163 = arith.constant 1.000000e+00 : f32
    %403 = vector.broadcast %cst_163 : f32 to vector<8x128xf32>
    %404 = arith.addf %403, %402 : vector<8x128xf32>
    %405 = arith.divf %403, %404 : vector<8x128xf32>
    %406 = vector.extract_strided_slice %389 {offsets = [0, 256], sizes = [8, 128], strides = [1, 1]} : vector<8x384xf32> to vector<8x128xf32>
    %407 = math.tanh %406 : vector<8x128xf32>
    %408 = arith.negf %393 : vector<8x128xf32>
    %409 = math.exp %408 : vector<8x128xf32>
    %cst_164 = arith.constant 1.000000e+00 : f32
    %410 = vector.broadcast %cst_164 : f32 to vector<8x128xf32>
    %411 = arith.addf %410, %409 : vector<8x128xf32>
    %412 = arith.divf %410, %411 : vector<8x128xf32>
    %413 = arith.mulf %405, %378 : vector<8x128xf32>
    %414 = arith.mulf %399, %407 : vector<8x128xf32>
    %415 = arith.addf %413, %414 : vector<8x128xf32>
    %416 = math.tanh %415 : vector<8x128xf32>
    %417 = arith.mulf %412, %416 : vector<8x128xf32>
    %c0_165 = arith.constant 0 : index
    %c10_166 = arith.constant 10 : index
    %c0_167 = arith.constant 0 : index
    %418 = vector.load %arg6[%c0_165, %c10_166, %c0_167] : memref<8x16x128xf32, #tpu.memory_space<vmem>>, vector<8x1x128xf32>
    %419 = vector.shape_cast %418 : vector<8x1x128xf32> to vector<8x128xf32>
    %420 = vector.shape_cast %417 : vector<8x128xf32> to vector<8x1x128xf32>
    tpu.vector_store %arg6[%c0_165, %c10_166, %c0_167], %420 {strides = array<i32>} : memref<8x16x128xf32, #tpu.memory_space<vmem>>, vector<8x1x128xf32>,
    %c11 = arith.constant 11 : index
    %c0_168 = arith.constant 0 : index
    %c0_169 = arith.constant 0 : index
    %421 = vector.load %arg9[%c11, %c0_168, %c0_169] : memref<16x8x512xf32, #tpu.memory_space<vmem>>, vector<1x8x512xf32>
    %422 = vector.shape_cast %421 : vector<1x8x512xf32> to vector<8x512xf32>
    %423 = vector.extract_strided_slice %422 {offsets = [0, 0], sizes = [8, 384], strides = [1, 1]} : vector<8x512xf32> to vector<8x384xf32>
    %c0_170 = arith.constant 0 : index
    %c0_171 = arith.constant 0 : index
    %424 = vector.load %arg4[%c0_170, %c0_171] : memref<128x512xf32, #tpu.memory_space<vmem>>, vector<128x384xf32>
    %cst_172 = arith.constant dense<0.000000e+00> : vector<8x384xf32>
    %425 = tpu.matmul %417, %424, %cst_172 {dimension_numbers = #tpu.dot_dimension_numbers<[1], [0], [0], [1], [0, 0, 1, 1], [], []>} : vector<8x128xf32>, vector<128x384xf32>, vector<8x384xf32> -> vector<8x384xf32>
    %426 = arith.addf %423, %425 : vector<8x384xf32>
    %427 = vector.extract_strided_slice %422 {offsets = [0, 384], sizes = [8, 128], strides = [1, 1]} : vector<8x512xf32> to vector<8x128xf32>
    %c0_173 = arith.constant 0 : index
    %c384_174 = arith.constant 384 : index
    %428 = vector.load %arg4[%c0_173, %c384_174] : memref<128x512xf32, #tpu.memory_space<vmem>>, vector<128x128xf32>
    %cst_175 = arith.constant dense<0.000000e+00> : vector<8x128xf32>
    %429 = tpu.matmul %417, %428, %cst_175 {dimension_numbers = #tpu.dot_dimension_numbers<[1], [0], [0], [1], [0, 0, 1, 1], [], []>} : vector<8x128xf32>, vector<128x128xf32>, vector<8x128xf32> -> vector<8x128xf32>
    %430 = arith.addf %427, %429 : vector<8x128xf32>
    %431 = vector.extract_strided_slice %426 {offsets = [0, 0], sizes = [8, 128], strides = [1, 1]} : vector<8x384xf32> to vector<8x128xf32>
    %432 = arith.negf %431 : vector<8x128xf32>
    %433 = math.exp %432 : vector<8x128xf32>
    %cst_176 = arith.constant 1.000000e+00 : f32
    %434 = vector.broadcast %cst_176 : f32 to vector<8x128xf32>
    %435 = arith.addf %434, %433 : vector<8x128xf32>
    %436 = arith.divf %434, %435 : vector<8x128xf32>
    %437 = vector.extract_strided_slice %426 {offsets = [0, 128], sizes = [8, 128], strides = [1, 1]} : vector<8x384xf32> to vector<8x128xf32>
    %438 = arith.negf %437 : vector<8x128xf32>
    %439 = math.exp %438 : vector<8x128xf32>
    %cst_177 = arith.constant 1.000000e+00 : f32
    %440 = vector.broadcast %cst_177 : f32 to vector<8x128xf32>
    %441 = arith.addf %440, %439 : vector<8x128xf32>
    %442 = arith.divf %440, %441 : vector<8x128xf32>
    %443 = vector.extract_strided_slice %426 {offsets = [0, 256], sizes = [8, 128], strides = [1, 1]} : vector<8x384xf32> to vector<8x128xf32>
    %444 = math.tanh %443 : vector<8x128xf32>
    %445 = arith.negf %430 : vector<8x128xf32>
    %446 = math.exp %445 : vector<8x128xf32>
    %cst_178 = arith.constant 1.000000e+00 : f32
    %447 = vector.broadcast %cst_178 : f32 to vector<8x128xf32>
    %448 = arith.addf %447, %446 : vector<8x128xf32>
    %449 = arith.divf %447, %448 : vector<8x128xf32>
    %450 = arith.mulf %442, %415 : vector<8x128xf32>
    %451 = arith.mulf %436, %444 : vector<8x128xf32>
    %452 = arith.addf %450, %451 : vector<8x128xf32>
    %453 = math.tanh %452 : vector<8x128xf32>
    %454 = arith.mulf %449, %453 : vector<8x128xf32>
    %c0_179 = arith.constant 0 : index
    %c11_180 = arith.constant 11 : index
    %c0_181 = arith.constant 0 : index
    %455 = vector.load %arg6[%c0_179, %c11_180, %c0_181] : memref<8x16x128xf32, #tpu.memory_space<vmem>>, vector<8x1x128xf32>
    %456 = vector.shape_cast %455 : vector<8x1x128xf32> to vector<8x128xf32>
    %457 = vector.shape_cast %454 : vector<8x128xf32> to vector<8x1x128xf32>
    tpu.vector_store %arg6[%c0_179, %c11_180, %c0_181], %457 {strides = array<i32>} : memref<8x16x128xf32, #tpu.memory_space<vmem>>, vector<8x1x128xf32>,
    %c12 = arith.constant 12 : index
    %c0_182 = arith.constant 0 : index
    %c0_183 = arith.constant 0 : index
    %458 = vector.load %arg9[%c12, %c0_182, %c0_183] : memref<16x8x512xf32, #tpu.memory_space<vmem>>, vector<1x8x512xf32>
    %459 = vector.shape_cast %458 : vector<1x8x512xf32> to vector<8x512xf32>
    %460 = vector.extract_strided_slice %459 {offsets = [0, 0], sizes = [8, 384], strides = [1, 1]} : vector<8x512xf32> to vector<8x384xf32>
    %c0_184 = arith.constant 0 : index
    %c0_185 = arith.constant 0 : index
    %461 = vector.load %arg4[%c0_184, %c0_185] : memref<128x512xf32, #tpu.memory_space<vmem>>, vector<128x384xf32>
    %cst_186 = arith.constant dense<0.000000e+00> : vector<8x384xf32>
    %462 = tpu.matmul %454, %461, %cst_186 {dimension_numbers = #tpu.dot_dimension_numbers<[1], [0], [0], [1], [0, 0, 1, 1], [], []>} : vector<8x128xf32>, vector<128x384xf32>, vector<8x384xf32> -> vector<8x384xf32>
    %463 = arith.addf %460, %462 : vector<8x384xf32>
    %464 = vector.extract_strided_slice %459 {offsets = [0, 384], sizes = [8, 128], strides = [1, 1]} : vector<8x512xf32> to vector<8x128xf32>
    %c0_187 = arith.constant 0 : index
    %c384_188 = arith.constant 384 : index
    %465 = vector.load %arg4[%c0_187, %c384_188] : memref<128x512xf32, #tpu.memory_space<vmem>>, vector<128x128xf32>
    %cst_189 = arith.constant dense<0.000000e+00> : vector<8x128xf32>
    %466 = tpu.matmul %454, %465, %cst_189 {dimension_numbers = #tpu.dot_dimension_numbers<[1], [0], [0], [1], [0, 0, 1, 1], [], []>} : vector<8x128xf32>, vector<128x128xf32>, vector<8x128xf32> -> vector<8x128xf32>
    %467 = arith.addf %464, %466 : vector<8x128xf32>
    %468 = vector.extract_strided_slice %463 {offsets = [0, 0], sizes = [8, 128], strides = [1, 1]} : vector<8x384xf32> to vector<8x128xf32>
    %469 = arith.negf %468 : vector<8x128xf32>
    %470 = math.exp %469 : vector<8x128xf32>
    %cst_190 = arith.constant 1.000000e+00 : f32
    %471 = vector.broadcast %cst_190 : f32 to vector<8x128xf32>
    %472 = arith.addf %471, %470 : vector<8x128xf32>
    %473 = arith.divf %471, %472 : vector<8x128xf32>
    %474 = vector.extract_strided_slice %463 {offsets = [0, 128], sizes = [8, 128], strides = [1, 1]} : vector<8x384xf32> to vector<8x128xf32>
    %475 = arith.negf %474 : vector<8x128xf32>
    %476 = math.exp %475 : vector<8x128xf32>
    %cst_191 = arith.constant 1.000000e+00 : f32
    %477 = vector.broadcast %cst_191 : f32 to vector<8x128xf32>
    %478 = arith.addf %477, %476 : vector<8x128xf32>
    %479 = arith.divf %477, %478 : vector<8x128xf32>
    %480 = vector.extract_strided_slice %463 {offsets = [0, 256], sizes = [8, 128], strides = [1, 1]} : vector<8x384xf32> to vector<8x128xf32>
    %481 = math.tanh %480 : vector<8x128xf32>
    %482 = arith.negf %467 : vector<8x128xf32>
    %483 = math.exp %482 : vector<8x128xf32>
    %cst_192 = arith.constant 1.000000e+00 : f32
    %484 = vector.broadcast %cst_192 : f32 to vector<8x128xf32>
    %485 = arith.addf %484, %483 : vector<8x128xf32>
    %486 = arith.divf %484, %485 : vector<8x128xf32>
    %487 = arith.mulf %479, %452 : vector<8x128xf32>
    %488 = arith.mulf %473, %481 : vector<8x128xf32>
    %489 = arith.addf %487, %488 : vector<8x128xf32>
    %490 = math.tanh %489 : vector<8x128xf32>
    %491 = arith.mulf %486, %490 : vector<8x128xf32>
    %c0_193 = arith.constant 0 : index
    %c12_194 = arith.constant 12 : index
    %c0_195 = arith.constant 0 : index
    %492 = vector.load %arg6[%c0_193, %c12_194, %c0_195] : memref<8x16x128xf32, #tpu.memory_space<vmem>>, vector<8x1x128xf32>
    %493 = vector.shape_cast %492 : vector<8x1x128xf32> to vector<8x128xf32>
    %494 = vector.shape_cast %491 : vector<8x128xf32> to vector<8x1x128xf32>
    tpu.vector_store %arg6[%c0_193, %c12_194, %c0_195], %494 {strides = array<i32>} : memref<8x16x128xf32, #tpu.memory_space<vmem>>, vector<8x1x128xf32>,
    %c13 = arith.constant 13 : index
    %c0_196 = arith.constant 0 : index
    %c0_197 = arith.constant 0 : index
    %495 = vector.load %arg9[%c13, %c0_196, %c0_197] : memref<16x8x512xf32, #tpu.memory_space<vmem>>, vector<1x8x512xf32>
    %496 = vector.shape_cast %495 : vector<1x8x512xf32> to vector<8x512xf32>
    %497 = vector.extract_strided_slice %496 {offsets = [0, 0], sizes = [8, 384], strides = [1, 1]} : vector<8x512xf32> to vector<8x384xf32>
    %c0_198 = arith.constant 0 : index
    %c0_199 = arith.constant 0 : index
    %498 = vector.load %arg4[%c0_198, %c0_199] : memref<128x512xf32, #tpu.memory_space<vmem>>, vector<128x384xf32>
    %cst_200 = arith.constant dense<0.000000e+00> : vector<8x384xf32>
    %499 = tpu.matmul %491, %498, %cst_200 {dimension_numbers = #tpu.dot_dimension_numbers<[1], [0], [0], [1], [0, 0, 1, 1], [], []>} : vector<8x128xf32>, vector<128x384xf32>, vector<8x384xf32> -> vector<8x384xf32>
    %500 = arith.addf %497, %499 : vector<8x384xf32>
    %501 = vector.extract_strided_slice %496 {offsets = [0, 384], sizes = [8, 128], strides = [1, 1]} : vector<8x512xf32> to vector<8x128xf32>
    %c0_201 = arith.constant 0 : index
    %c384_202 = arith.constant 384 : index
    %502 = vector.load %arg4[%c0_201, %c384_202] : memref<128x512xf32, #tpu.memory_space<vmem>>, vector<128x128xf32>
    %cst_203 = arith.constant dense<0.000000e+00> : vector<8x128xf32>
    %503 = tpu.matmul %491, %502, %cst_203 {dimension_numbers = #tpu.dot_dimension_numbers<[1], [0], [0], [1], [0, 0, 1, 1], [], []>} : vector<8x128xf32>, vector<128x128xf32>, vector<8x128xf32> -> vector<8x128xf32>
    %504 = arith.addf %501, %503 : vector<8x128xf32>
    %505 = vector.extract_strided_slice %500 {offsets = [0, 0], sizes = [8, 128], strides = [1, 1]} : vector<8x384xf32> to vector<8x128xf32>
    %506 = arith.negf %505 : vector<8x128xf32>
    %507 = math.exp %506 : vector<8x128xf32>
    %cst_204 = arith.constant 1.000000e+00 : f32
    %508 = vector.broadcast %cst_204 : f32 to vector<8x128xf32>
    %509 = arith.addf %508, %507 : vector<8x128xf32>
    %510 = arith.divf %508, %509 : vector<8x128xf32>
    %511 = vector.extract_strided_slice %500 {offsets = [0, 128], sizes = [8, 128], strides = [1, 1]} : vector<8x384xf32> to vector<8x128xf32>
    %512 = arith.negf %511 : vector<8x128xf32>
    %513 = math.exp %512 : vector<8x128xf32>
    %cst_205 = arith.constant 1.000000e+00 : f32
    %514 = vector.broadcast %cst_205 : f32 to vector<8x128xf32>
    %515 = arith.addf %514, %513 : vector<8x128xf32>
    %516 = arith.divf %514, %515 : vector<8x128xf32>
    %517 = vector.extract_strided_slice %500 {offsets = [0, 256], sizes = [8, 128], strides = [1, 1]} : vector<8x384xf32> to vector<8x128xf32>
    %518 = math.tanh %517 : vector<8x128xf32>
    %519 = arith.negf %504 : vector<8x128xf32>
    %520 = math.exp %519 : vector<8x128xf32>
    %cst_206 = arith.constant 1.000000e+00 : f32
    %521 = vector.broadcast %cst_206 : f32 to vector<8x128xf32>
    %522 = arith.addf %521, %520 : vector<8x128xf32>
    %523 = arith.divf %521, %522 : vector<8x128xf32>
    %524 = arith.mulf %516, %489 : vector<8x128xf32>
    %525 = arith.mulf %510, %518 : vector<8x128xf32>
    %526 = arith.addf %524, %525 : vector<8x128xf32>
    %527 = math.tanh %526 : vector<8x128xf32>
    %528 = arith.mulf %523, %527 : vector<8x128xf32>
    %c0_207 = arith.constant 0 : index
    %c13_208 = arith.constant 13 : index
    %c0_209 = arith.constant 0 : index
    %529 = vector.load %arg6[%c0_207, %c13_208, %c0_209] : memref<8x16x128xf32, #tpu.memory_space<vmem>>, vector<8x1x128xf32>
    %530 = vector.shape_cast %529 : vector<8x1x128xf32> to vector<8x128xf32>
    %531 = vector.shape_cast %528 : vector<8x128xf32> to vector<8x1x128xf32>
    tpu.vector_store %arg6[%c0_207, %c13_208, %c0_209], %531 {strides = array<i32>} : memref<8x16x128xf32, #tpu.memory_space<vmem>>, vector<8x1x128xf32>,
    %c14 = arith.constant 14 : index
    %c0_210 = arith.constant 0 : index
    %c0_211 = arith.constant 0 : index
    %532 = vector.load %arg9[%c14, %c0_210, %c0_211] : memref<16x8x512xf32, #tpu.memory_space<vmem>>, vector<1x8x512xf32>
    %533 = vector.shape_cast %532 : vector<1x8x512xf32> to vector<8x512xf32>
    %534 = vector.extract_strided_slice %533 {offsets = [0, 0], sizes = [8, 384], strides = [1, 1]} : vector<8x512xf32> to vector<8x384xf32>
    %c0_212 = arith.constant 0 : index
    %c0_213 = arith.constant 0 : index
    %535 = vector.load %arg4[%c0_212, %c0_213] : memref<128x512xf32, #tpu.memory_space<vmem>>, vector<128x384xf32>
    %cst_214 = arith.constant dense<0.000000e+00> : vector<8x384xf32>
    %536 = tpu.matmul %528, %535, %cst_214 {dimension_numbers = #tpu.dot_dimension_numbers<[1], [0], [0], [1], [0, 0, 1, 1], [], []>} : vector<8x128xf32>, vector<128x384xf32>, vector<8x384xf32> -> vector<8x384xf32>
    %537 = arith.addf %534, %536 : vector<8x384xf32>
    %538 = vector.extract_strided_slice %533 {offsets = [0, 384], sizes = [8, 128], strides = [1, 1]} : vector<8x512xf32> to vector<8x128xf32>
    %c0_215 = arith.constant 0 : index
    %c384_216 = arith.constant 384 : index
    %539 = vector.load %arg4[%c0_215, %c384_216] : memref<128x512xf32, #tpu.memory_space<vmem>>, vector<128x128xf32>
    %cst_217 = arith.constant dense<0.000000e+00> : vector<8x128xf32>
    %540 = tpu.matmul %528, %539, %cst_217 {dimension_numbers = #tpu.dot_dimension_numbers<[1], [0], [0], [1], [0, 0, 1, 1], [], []>} : vector<8x128xf32>, vector<128x128xf32>, vector<8x128xf32> -> vector<8x128xf32>
    %541 = arith.addf %538, %540 : vector<8x128xf32>
    %542 = vector.extract_strided_slice %537 {offsets = [0, 0], sizes = [8, 128], strides = [1, 1]} : vector<8x384xf32> to vector<8x128xf32>
    %543 = arith.negf %542 : vector<8x128xf32>
    %544 = math.exp %543 : vector<8x128xf32>
    %cst_218 = arith.constant 1.000000e+00 : f32
    %545 = vector.broadcast %cst_218 : f32 to vector<8x128xf32>
    %546 = arith.addf %545, %544 : vector<8x128xf32>
    %547 = arith.divf %545, %546 : vector<8x128xf32>
    %548 = vector.extract_strided_slice %537 {offsets = [0, 128], sizes = [8, 128], strides = [1, 1]} : vector<8x384xf32> to vector<8x128xf32>
    %549 = arith.negf %548 : vector<8x128xf32>
    %550 = math.exp %549 : vector<8x128xf32>
    %cst_219 = arith.constant 1.000000e+00 : f32
    %551 = vector.broadcast %cst_219 : f32 to vector<8x128xf32>
    %552 = arith.addf %551, %550 : vector<8x128xf32>
    %553 = arith.divf %551, %552 : vector<8x128xf32>
    %554 = vector.extract_strided_slice %537 {offsets = [0, 256], sizes = [8, 128], strides = [1, 1]} : vector<8x384xf32> to vector<8x128xf32>
    %555 = math.tanh %554 : vector<8x128xf32>
    %556 = arith.negf %541 : vector<8x128xf32>
    %557 = math.exp %556 : vector<8x128xf32>
    %cst_220 = arith.constant 1.000000e+00 : f32
    %558 = vector.broadcast %cst_220 : f32 to vector<8x128xf32>
    %559 = arith.addf %558, %557 : vector<8x128xf32>
    %560 = arith.divf %558, %559 : vector<8x128xf32>
    %561 = arith.mulf %553, %526 : vector<8x128xf32>
    %562 = arith.mulf %547, %555 : vector<8x128xf32>
    %563 = arith.addf %561, %562 : vector<8x128xf32>
    %564 = math.tanh %563 : vector<8x128xf32>
    %565 = arith.mulf %560, %564 : vector<8x128xf32>
    %c0_221 = arith.constant 0 : index
    %c14_222 = arith.constant 14 : index
    %c0_223 = arith.constant 0 : index
    %566 = vector.load %arg6[%c0_221, %c14_222, %c0_223] : memref<8x16x128xf32, #tpu.memory_space<vmem>>, vector<8x1x128xf32>
    %567 = vector.shape_cast %566 : vector<8x1x128xf32> to vector<8x128xf32>
    %568 = vector.shape_cast %565 : vector<8x128xf32> to vector<8x1x128xf32>
    tpu.vector_store %arg6[%c0_221, %c14_222, %c0_223], %568 {strides = array<i32>} : memref<8x16x128xf32, #tpu.memory_space<vmem>>, vector<8x1x128xf32>,
    %c15 = arith.constant 15 : index
    %c0_224 = arith.constant 0 : index
    %c0_225 = arith.constant 0 : index
    %569 = vector.load %arg9[%c15, %c0_224, %c0_225] : memref<16x8x512xf32, #tpu.memory_space<vmem>>, vector<1x8x512xf32>
    %570 = vector.shape_cast %569 : vector<1x8x512xf32> to vector<8x512xf32>
    %571 = vector.extract_strided_slice %570 {offsets = [0, 0], sizes = [8, 384], strides = [1, 1]} : vector<8x512xf32> to vector<8x384xf32>
    %c0_226 = arith.constant 0 : index
    %c0_227 = arith.constant 0 : index
    %572 = vector.load %arg4[%c0_226, %c0_227] : memref<128x512xf32, #tpu.memory_space<vmem>>, vector<128x384xf32>
    %cst_228 = arith.constant dense<0.000000e+00> : vector<8x384xf32>
    %573 = tpu.matmul %565, %572, %cst_228 {dimension_numbers = #tpu.dot_dimension_numbers<[1], [0], [0], [1], [0, 0, 1, 1], [], []>} : vector<8x128xf32>, vector<128x384xf32>, vector<8x384xf32> -> vector<8x384xf32>
    %574 = arith.addf %571, %573 : vector<8x384xf32>
    %575 = vector.extract_strided_slice %570 {offsets = [0, 384], sizes = [8, 128], strides = [1, 1]} : vector<8x512xf32> to vector<8x128xf32>
    %c0_229 = arith.constant 0 : index
    %c384_230 = arith.constant 384 : index
    %576 = vector.load %arg4[%c0_229, %c384_230] : memref<128x512xf32, #tpu.memory_space<vmem>>, vector<128x128xf32>
    %cst_231 = arith.constant dense<0.000000e+00> : vector<8x128xf32>
    %577 = tpu.matmul %565, %576, %cst_231 {dimension_numbers = #tpu.dot_dimension_numbers<[1], [0], [0], [1], [0, 0, 1, 1], [], []>} : vector<8x128xf32>, vector<128x128xf32>, vector<8x128xf32> -> vector<8x128xf32>
    %578 = arith.addf %575, %577 : vector<8x128xf32>
    %579 = vector.extract_strided_slice %574 {offsets = [0, 0], sizes = [8, 128], strides = [1, 1]} : vector<8x384xf32> to vector<8x128xf32>
    %580 = arith.negf %579 : vector<8x128xf32>
    %581 = math.exp %580 : vector<8x128xf32>
    %cst_232 = arith.constant 1.000000e+00 : f32
    %582 = vector.broadcast %cst_232 : f32 to vector<8x128xf32>
    %583 = arith.addf %582, %581 : vector<8x128xf32>
    %584 = arith.divf %582, %583 : vector<8x128xf32>
    %585 = vector.extract_strided_slice %574 {offsets = [0, 128], sizes = [8, 128], strides = [1, 1]} : vector<8x384xf32> to vector<8x128xf32>
    %586 = arith.negf %585 : vector<8x128xf32>
    %587 = math.exp %586 : vector<8x128xf32>
    %cst_233 = arith.constant 1.000000e+00 : f32
    %588 = vector.broadcast %cst_233 : f32 to vector<8x128xf32>
    %589 = arith.addf %588, %587 : vector<8x128xf32>
    %590 = arith.divf %588, %589 : vector<8x128xf32>
    %591 = vector.extract_strided_slice %574 {offsets = [0, 256], sizes = [8, 128], strides = [1, 1]} : vector<8x384xf32> to vector<8x128xf32>
    %592 = math.tanh %591 : vector<8x128xf32>
    %593 = arith.negf %578 : vector<8x128xf32>
    %594 = math.exp %593 : vector<8x128xf32>
    %cst_234 = arith.constant 1.000000e+00 : f32
    %595 = vector.broadcast %cst_234 : f32 to vector<8x128xf32>
    %596 = arith.addf %595, %594 : vector<8x128xf32>
    %597 = arith.divf %595, %596 : vector<8x128xf32>
    %598 = arith.mulf %590, %563 : vector<8x128xf32>
    %599 = arith.mulf %584, %592 : vector<8x128xf32>
    %600 = arith.addf %598, %599 : vector<8x128xf32>
    %601 = math.tanh %600 : vector<8x128xf32>
    %602 = arith.mulf %597, %601 : vector<8x128xf32>
    %c0_235 = arith.constant 0 : index
    %c15_236 = arith.constant 15 : index
    %c0_237 = arith.constant 0 : index
    %603 = vector.load %arg6[%c0_235, %c15_236, %c0_237] : memref<8x16x128xf32, #tpu.memory_space<vmem>>, vector<8x1x128xf32>
    %604 = vector.shape_cast %603 : vector<8x1x128xf32> to vector<8x128xf32>
    %605 = vector.shape_cast %602 : vector<8x128xf32> to vector<8x1x128xf32>
    tpu.vector_store %arg6[%c0_235, %c15_236, %c0_237], %605 {strides = array<i32>} : memref<8x16x128xf32, #tpu.memory_space<vmem>>, vector<8x1x128xf32>,
    %c0_238 = arith.constant 0 : index
    %c0_239 = arith.constant 0 : index
    %606 = vector.load %arg10[%c0_238, %c0_239] : memref<8x128xf32, #tpu.memory_space<vmem>>, vector<8x128xf32>
    tpu.vector_store %arg10[%c0_238, %c0_239], %602 {strides = array<i32>} : memref<8x128xf32, #tpu.memory_space<vmem>>, vector<8x128xf32>,
    %c0_240 = arith.constant 0 : index
    %c0_241 = arith.constant 0 : index
    %607 = vector.load %arg11[%c0_240, %c0_241] : memref<8x128xf32, #tpu.memory_space<vmem>>, vector<8x128xf32>
    tpu.vector_store %arg11[%c0_240, %c0_241], %600 {strides = array<i32>} : memref<8x128xf32, #tpu.memory_space<vmem>>, vector<8x128xf32>,
    %c0_i32_242 = arith.constant 0 : i32
    %608 = arith.cmpi eq, %arg1, %c0_i32_242 : i32
    %609 = arith.extui %608 : i1 to i32
    %c0_i32_243 = arith.constant 0 : i32
    %610 = arith.cmpi ne, %609, %c0_i32_243 : i32
    scf.if %610 {
      %c0_244 = arith.constant 0 : index
      %c0_245 = arith.constant 0 : index
      %611 = vector.load %arg7[%c0_244, %c0_245] : memref<8x128xf32, #tpu.memory_space<vmem>>, vector<8x128xf32>
      tpu.vector_store %arg7[%c0_244, %c0_245], %602 {strides = array<i32>} : memref<8x128xf32, #tpu.memory_space<vmem>>, vector<8x128xf32>,
      %c0_246 = arith.constant 0 : index
      %c0_247 = arith.constant 0 : index
      %612 = vector.load %arg8[%c0_246, %c0_247] : memref<8x128xf32, #tpu.memory_space<vmem>>, vector<8x128xf32>
      tpu.vector_store %arg8[%c0_246, %c0_247], %600 {strides = array<i32>} : memref<8x128xf32, #tpu.memory_space<vmem>>, vector<8x128xf32>,
    } else {
    }
    return
  }
  func.func @transform_0(%arg0: i32, %arg1: i32) -> (i32, i32, i32) {
    %c0_i32 = arith.constant 0 : i32
    %c0_i32_0 = arith.constant 0 : i32
    return %arg1, %arg0, %c0_i32 : i32, i32, i32
  }
  func.func @transform_1(%arg0: i32, %arg1: i32) -> (i32, i32) {
    %c0_i32 = arith.constant 0 : i32
    %c0_i32_0 = arith.constant 0 : i32
    %c0_i32_1 = arith.constant 0 : i32
    return %c0_i32, %c0_i32_0 : i32, i32
  }
  func.func @transform_2(%arg0: i32, %arg1: i32) -> (i32, i32) {
    %c0_i32 = arith.constant 0 : i32
    %c0_i32_0 = arith.constant 0 : i32
    %c0_i32_1 = arith.constant 0 : i32
    return %c0_i32, %c0_i32_0 : i32, i32
  }
  func.func @transform_3(%arg0: i32, %arg1: i32) -> (i32, i32) {
    %c0_i32 = arith.constant 0 : i32
    %c0_i32_0 = arith.constant 0 : i32
    %c0_i32_1 = arith.constant 0 : i32
    return %c0_i32, %c0_i32_0 : i32, i32
  }
  func.func @transform_4(%arg0: i32, %arg1: i32) -> (i32, i32, i32) {
    %c0_i32 = arith.constant 0 : i32
    %c0_i32_0 = arith.constant 0 : i32
    return %arg0, %arg1, %c0_i32 : i32, i32, i32
  }
  func.func @transform_5(%arg0: i32, %arg1: i32) -> (i32, i32) {
    %c0_i32 = arith.constant 0 : i32
    %c0_i32_0 = arith.constant 0 : i32
    return %arg0, %c0_i32 : i32, i32
  }
  func.func @transform_6(%arg0: i32, %arg1: i32) -> (i32, i32) {
    %c0_i32 = arith.constant 0 : i32
    %c0_i32_0 = arith.constant 0 : i32
    return %arg0, %c0_i32 : i32, i32
  }
}

</mosaic_0001>

<bundles_post_ra>
// kernel: lmlstm_forward.3
= control target key start
LH: loop header
LB: loop body
LE: loop exit
PB: predicated region body
PF: predicated region fallthrough
CT: control target
= control target key end

     0   :  { %s718_s0 = inlined_call_operand.vmem [shape: f32[128,128], index: 0, kind: input, shape index: {}]   ;;  %s719_s1 = inlined_call_operand.vmem [shape: f32[128,256], index: 1, kind: input, shape index: {}]   ;;  %s720_s2 = inlined_call_operand.vmem [shape: f32[1,256], index: 2, kind: input, shape index: {}]   ;;  %s721_s3 = inlined_call_operand.hbm [shape: f32[128,256], index: 3, kind: output, shape index: {}]  }
   0x1   :  { %v129_v0 = vld [vmem:[%s719_s1 + $0xf0] sm:$0xff]  ;;  %v130_v1 = vld [vmem:[%s719_s1 + $0xf8] sm:$0xff]  ;;  %v127_v2 = vld [vmem:[%s719_s1 + $0xe0] sm:$0xff] }
   0x2   :  { %448 = vmatpush.msra.mxu2 %v129_v0  ;;  %464 = vmatpush.msra.mxu3 %v130_v1  ;;  %v128_v3 = vld [vmem:[%s719_s1 + $0xe8] sm:$0xff]  ;;  %v125_v4 = vld [vmem:[%s719_s1 + $0xd0] sm:$0xff]  ;;  %v126_v5 = vld [vmem:[%s719_s1 + $0xd8] sm:$0xff] }
   0x3   :  { %131 = vmatpush.msra.mxu0 %v129_v0  ;;  %196 = vmatpush.msra.mxu1 %v130_v1  ;;  %v123_v6 = vld [vmem:[%s719_s1 + $0xc0] sm:$0xff]  ;;  %v124_v7 = vld [vmem:[%s719_s1 + $0xc8] sm:$0xff]  ;;  %v121_v8 = vld [vmem:[%s719_s1 + $0xb0] sm:$0xff] }
   0x4   :  { %449 = vmatpush.msra.mxu2 %v127_v2  ;;  %465 = vmatpush.msra.mxu3 %v128_v3  ;;  %v122_v9 = vld [vmem:[%s719_s1 + $0xb8] sm:$0xff]  ;;  %v119_v10 = vld [vmem:[%s719_s1 + $0xa0] sm:$0xff]  ;;  %v120_v11 = vld [vmem:[%s719_s1 + $0xa8] sm:$0xff] }
   0x5   :  { %132 = vmatpush.msra.mxu0 %v127_v2  ;;  %197 = vmatpush.msra.mxu1 %v128_v3  ;;  %v117_v12 = vld [vmem:[%s719_s1 + $0x90] sm:$0xff]  ;;  %v118_v13 = vld [vmem:[%s719_s1 + $0x98] sm:$0xff]  ;;  %v115_v14 = vld [vmem:[%s719_s1 + $0x80] sm:$0xff] }
   0x6   :  { %450 = vmatpush.msra.mxu2 %v125_v4  ;;  %466 = vmatpush.msra.mxu3 %v126_v5  ;;  %v116_v15 = vld [vmem:[%s719_s1 + $0x88] sm:$0xff] }
   0x7   :  { %133 = vmatpush.msra.mxu0 %v125_v4  ;;  %198 = vmatpush.msra.mxu1 %v126_v5 }
   0x8   :  { %451 = vmatpush.msra.mxu2 %v123_v6  ;;  %467 = vmatpush.msra.mxu3 %v124_v7 }
   0x9   :  { %134 = vmatpush.msra.mxu0 %v123_v6  ;;  %199 = vmatpush.msra.mxu1 %v124_v7 }
   0xa   :  { %452 = vmatpush.msra.mxu2 %v121_v8  ;;  %468 = vmatpush.msra.mxu3 %v122_v9 }
   0xb   :  { %135 = vmatpush.msra.mxu0 %v121_v8  ;;  %200 = vmatpush.msra.mxu1 %v122_v9 }
   0xc   :  { %453 = vmatpush.msra.mxu2 %v119_v10  ;;  %469 = vmatpush.msra.mxu3 %v120_v11 }
   0xd   :  { %136 = vmatpush.msra.mxu0 %v119_v10  ;;  %201 = vmatpush.msra.mxu1 %v120_v11 }
   0xe   :  { %8 = vsyncpa [#allocation4], 0  ;;  %454 = vmatpush.msra.mxu2 %v117_v12  ;;  %470 = vmatpush.msra.mxu3 %v118_v13  ;;  %v113_v16 = vld [vmem:[%s719_s1 + $0x70] sm:$0xff]  ;;  %v114_v17 = vld [vmem:[%s719_s1 + $0x78] sm:$0xff]  ;;  %s436_s29 = sshll.u32 %s721_s3, 4  ;;  %s510_s30 = smov 256   ;;  %s437_s29 = int_to_ptr.hbm [resolvable:$true] %s436_s29 }
   0xf   :  { %137 = vmatpush.msra.mxu0 %v117_v12  ;;  %202 = vmatpush.msra.mxu1 %v118_v13  ;;  %v111_v18 = vld [vmem:[%s719_s1 + $0x60] sm:$0xff]  ;;  %v112_v19 = vld [vmem:[%s719_s1 + $0x68] sm:$0xff]  ;;  %v109_v20 = vld [vmem:[%s719_s1 + $0x50] sm:$0xff]  ;;  %s511_s4 = smov 16  }
  0x10   :  { %455 = vmatpush.msra.mxu2 %v115_v14  ;;  %471 = vmatpush.msra.mxu3 %v116_v15  ;;  %v110_v21 = vld [vmem:[%s719_s1 + $0x58] sm:$0xff]  ;;  %v107_v22 = vld [vmem:[%s719_s1 + $0x40] sm:$0xff]  ;;  %v108_v23 = vld [vmem:[%s719_s1 + $0x48] sm:$0xff] }
  0x11   :  { %138 = vmatpush.msra.mxu0 %v115_v14  ;;  %203 = vmatpush.msra.mxu1 %v116_v15  ;;  %v105_v24 = vld [vmem:[%s719_s1 + $0x30] sm:$0xff]  ;;  %v106_v25 = vld [vmem:[%s719_s1 + $0x38] sm:$0xff]  ;;  %v103_v26 = vld [vmem:[%s719_s1 + $0x20] sm:$0xff] }
  0x12   :  { %456 = vmatpush.msra.mxu2 %v113_v16  ;;  %472 = vmatpush.msra.mxu3 %v114_v17  ;;  %v104_v27 = vld [vmem:[%s719_s1 + $0x28] sm:$0xff]  ;;  %v101_v28 = vld [vmem:[%s719_s1 + $0x10] sm:$0xff]  ;;  %v102_v29 = vld [vmem:[%s719_s1 + $0x18] sm:$0xff] }
  0x13   :  { %139 = vmatpush.msra.mxu0 %v113_v16  ;;  %204 = vmatpush.msra.mxu1 %v114_v17  ;;  %v99_v30 = vld [vmem:[%s719_s1] sm:$0xff]  ;;  %v100_v31 = vld [vmem:[%s719_s1 + $0x8] sm:$0xff]  ;;  %v93_v36 = vld [vmem:[%s718_s0 + $0x50] sm:$0xff] }
  0x14   :  { %457 = vmatpush.msra.mxu2 %v111_v18  ;;  %473 = vmatpush.msra.mxu3 %v112_v19  ;;  %v91_v32 = vld [vmem:[%s718_s0 + $0x40] sm:$0xff]  ;;  %v92_v34 = vld [vmem:[%s718_s0 + $0x48] sm:$0xff]  ;;  %v85_v37 = vld [vmem:[%s718_s0 + $0x10] sm:$0xff] }
  0x15   :  { %140 = vmatpush.msra.mxu0 %v111_v18  ;;  %205 = vmatpush.msra.mxu1 %v112_v19  ;;  %v83_v33 = vld [vmem:[%s718_s0] sm:$0xff]  ;;  %v84_v35 = vld [vmem:[%s718_s0 + $0x8] sm:$0xff]  ;;  %v94_v38 = vld [vmem:[%s718_s0 + $0x58] sm:$0xff] }
  0x16   :  { %458 = vmatpush.msra.mxu2 %v109_v20  ;;  %474 = vmatpush.msra.mxu3 %v110_v21  ;;  %v86_v39 = vld [vmem:[%s718_s0 + $0x18] sm:$0xff]  ;;  %v95_v40 = vld [vmem:[%s718_s0 + $0x60] sm:$0xff]  ;;  %v96_v42 = vld [vmem:[%s718_s0 + $0x68] sm:$0xff] }
  0x17   :  { %141 = vmatpush.msra.mxu0 %v109_v20  ;;  %206 = vmatpush.msra.mxu1 %v110_v21  ;;  %v87_v41 = vld [vmem:[%s718_s0 + $0x20] sm:$0xff]  ;;  %v88_v43 = vld [vmem:[%s718_s0 + $0x28] sm:$0xff]  ;;  %v97_v44 = vld [vmem:[%s718_s0 + $0x70] sm:$0xff] }
  0x18   :  { %459 = vmatpush.msra.mxu2 %v107_v22  ;;  %475 = vmatpush.msra.mxu3 %v108_v23  ;;  %v89_v45 = vld [vmem:[%s718_s0 + $0x30] sm:$0xff]  ;;  %v98_v46 = vld [vmem:[%s718_s0 + $0x78] sm:$0xff]  ;;  %v360_v48 = vld [vmem:[%s720_s2] sm:$0x3] }
  0x19   :  { %142 = vmatpush.msra.mxu0 %v107_v22  ;;  %207 = vmatpush.msra.mxu1 %v108_v23  ;;  %v90_v47 = vld [vmem:[%s718_s0 + $0x38] sm:$0xff]  ;;  %v679_v49 = vperm.slane %v360_v48, 0  ;;  %v681_v50 = vperm.slane %v360_v48, 1  ;;  %s509_s0 = smov [#allocation3]  }
  0x1a   :  { %460 = vmatpush.msra.mxu2 %v105_v24  ;;  %476 = vmatpush.msra.mxu3 %v106_v25  ;;  %s434_s2 = sshll.u32 %s509_s0, 4  ;;  %s435_s2 = int_to_ptr.vmem [resolvable:$true] %s434_s2 }
  0x1b   :  { %143 = vmatpush.msra.mxu0 %v105_v24  ;;  %208 = vmatpush.msra.mxu1 %v106_v25 }
  0x1c   :  { %461 = vmatpush.msra.mxu2 %v103_v26  ;;  %477 = vmatpush.msra.mxu3 %v104_v27 }
  0x1d   :  { %144 = vmatpush.msra.mxu0 %v103_v26  ;;  %209 = vmatpush.msra.mxu1 %v104_v27 }
  0x1e   :  { %462 = vmatpush.msra.mxu2 %v101_v28  ;;  %478 = vmatpush.msra.mxu3 %v102_v29 }
  0x1f   :  { %145 = vmatpush.msra.mxu0 %v101_v28  ;;  %210 = vmatpush.msra.mxu1 %v102_v29 }
  0x20   :  { %463 = vmatpush.msra.mxu2 %v99_v30  ;;  %479 = vmatpush.msra.mxu3 %v100_v31 }
  0x21   :  { %171 = vmatmul.f32.vlgmr.msra.gmra.mxu2 %v91_v32  ;;  %236 = vmatmul.f32.vlgmr.msra.gmra.mxu3 %v91_v32 }
  0x22   :  { %146 = vmatpush.msra.mxu0 %v99_v30  ;;  %211 = vmatpush.msra.mxu1 %v100_v31 }
  0x23   :  { %147 = vmatmul.f32.vlgmr.msra.gmra.mxu0 %v83_v33  ;;  %212 = vmatmul.f32.vlgmr.msra.gmra.mxu1 %v83_v33 }
  0x29   :  { %174 = vmatmul.f32.gmra.mxu2 %v92_v34  ;;  %239 = vmatmul.f32.gmra.mxu3 %v92_v34 }
  0x2b   :  { %150 = vmatmul.f32.gmra.mxu0 %v84_v35  ;;  %215 = vmatmul.f32.gmra.mxu1 %v84_v35 }
  0x31   :  { %177 = vmatmul.f32.gmra.mxu2 %v93_v36  ;;  %242 = vmatmul.f32.gmra.mxu3 %v93_v36 }
  0x33   :  { %153 = vmatmul.f32.gmra.mxu0 %v85_v37  ;;  %218 = vmatmul.f32.gmra.mxu1 %v85_v37 }
  0x39   :  { %180 = vmatmul.f32.gmra.mxu2 %v94_v38  ;;  %245 = vmatmul.f32.gmra.mxu3 %v94_v38 }
  0x3b   :  { %156 = vmatmul.f32.gmra.mxu0 %v86_v39  ;;  %221 = vmatmul.f32.gmra.mxu1 %v86_v39 }
  0x41   :  { %183 = vmatmul.f32.gmra.mxu2 %v95_v40  ;;  %248 = vmatmul.f32.gmra.mxu3 %v95_v40 }
  0x43   :  { %159 = vmatmul.f32.gmra.mxu0 %v87_v41  ;;  %224 = vmatmul.f32.gmra.mxu1 %v87_v41 }
  0x49   :  { %186 = vmatmul.f32.gmra.mxu2 %v96_v42  ;;  %251 = vmatmul.f32.gmra.mxu3 %v96_v42 }
  0x4b   :  { %162 = vmatmul.f32.gmra.mxu0 %v88_v43  ;;  %227 = vmatmul.f32.gmra.mxu1 %v88_v43 }
  0x51   :  { %189 = vmatmul.f32.gmra.mxu2 %v97_v44  ;;  %254 = vmatmul.f32.gmra.mxu3 %v97_v44 }
  0x53   :  { %165 = vmatmul.f32.gmra.mxu0 %v89_v45  ;;  %230 = vmatmul.f32.gmra.mxu1 %v89_v45 }
  0x59   :  { %192 = vmatmul.f32.gmra.mxu2 %v98_v46  ;;  %257 = vmatmul.f32.gmra.mxu3 %v98_v46 }
  0x5b   :  { %168 = vmatmul.f32.gmra.mxu0 %v90_v47  ;;  %233 = vmatmul.f32.gmra.mxu1 %v90_v47 }
  0xa0   :  { %v148_v51 = vpop.f32.mrf.mxu0  ;;  %v213_v52 = vpop.f32.mrf.mxu1 }
  0xa1   :  { %v366_v53 = vadd.f32 %v679_v49, %v148_v51  ;;  %v367_v54 = vadd.f32 %v681_v50, %v213_v52 }
  0xa3   :  { %398 = vst [vmem:[#allocation3] sm:$0xff] %v366_v53 }
  0xa4   :  { %v172_v55 = vpop.f32.mrf.mxu2  ;;  %399 = vst [vmem:[#allocation3 + $0x8] sm:$0xff] %v367_v54  ;;  %v237_v56 = vpop.f32.mrf.mxu3 }
  0xa5   :  { %v382_v57 = vadd.f32 %v679_v49, %v172_v55  ;;  %v383_v58 = vadd.f32 %v681_v50, %v237_v56 }
  0xa7   :  { %414 = vst [vmem:[#allocation3 + $0x80] sm:$0xff] %v382_v57 }
  0xa8   :  { %415 = vst [vmem:[#allocation3 + $0x88] sm:$0xff] %v383_v58  ;;  %v151_v59 = vpop.f32.mrf.mxu0  ;;  %v216_v60 = vpop.f32.mrf.mxu1 }
  0xa9   :  { %v368_v61 = vadd.f32 %v679_v49, %v151_v59  ;;  %v369_v62 = vadd.f32 %v681_v50, %v216_v60 }
  0xab   :  { %400 = vst [vmem:[#allocation3 + $0x10] sm:$0xff] %v368_v61 }
  0xac   :  { %v175_v63 = vpop.f32.mrf.mxu2  ;;  %401 = vst [vmem:[#allocation3 + $0x18] sm:$0xff] %v369_v62  ;;  %v240_v0 = vpop.f32.mrf.mxu3 }
  0xad   :  { %v384_v1 = vadd.f32 %v679_v49, %v175_v63  ;;  %v385_v2 = vadd.f32 %v681_v50, %v240_v0 }
  0xaf   :  { %416 = vst [vmem:[#allocation3 + $0x90] sm:$0xff] %v384_v1 }
  0xb0   :  { %417 = vst [vmem:[#allocation3 + $0x98] sm:$0xff] %v385_v2  ;;  %v154_v3 = vpop.f32.mrf.mxu0  ;;  %v219_v4 = vpop.f32.mrf.mxu1 }
  0xb1   :  { %v370_v5 = vadd.f32 %v679_v49, %v154_v3  ;;  %v371_v6 = vadd.f32 %v681_v50, %v219_v4 }
  0xb3   :  { %402 = vst [vmem:[#allocation3 + $0x20] sm:$0xff] %v370_v5 }
  0xb4   :  { %v178_v7 = vpop.f32.mrf.mxu2  ;;  %403 = vst [vmem:[#allocation3 + $0x28] sm:$0xff] %v371_v6  ;;  %v243_v8 = vpop.f32.mrf.mxu3 }
  0xb5   :  { %v386_v9 = vadd.f32 %v679_v49, %v178_v7  ;;  %v387_v10 = vadd.f32 %v681_v50, %v243_v8 }
  0xb7   :  { %418 = vst [vmem:[#allocation3 + $0xa0] sm:$0xff] %v386_v9 }
  0xb8   :  { %419 = vst [vmem:[#allocation3 + $0xa8] sm:$0xff] %v387_v10  ;;  %v157_v11 = vpop.f32.mrf.mxu0  ;;  %v222_v12 = vpop.f32.mrf.mxu1 }
  0xb9   :  { %v372_v13 = vadd.f32 %v679_v49, %v157_v11  ;;  %v373_v14 = vadd.f32 %v681_v50, %v222_v12 }
  0xbb   :  { %404 = vst [vmem:[#allocation3 + $0x30] sm:$0xff] %v372_v13 }
  0xbc   :  { %v181_v15 = vpop.f32.mrf.mxu2  ;;  %405 = vst [vmem:[#allocation3 + $0x38] sm:$0xff] %v373_v14  ;;  %v246_v16 = vpop.f32.mrf.mxu3 }
  0xbd   :  { %v388_v17 = vadd.f32 %v679_v49, %v181_v15  ;;  %v389_v18 = vadd.f32 %v681_v50, %v246_v16 }
  0xbf   :  { %420 = vst [vmem:[#allocation3 + $0xb0] sm:$0xff] %v388_v17 }
  0xc0   :  { %421 = vst [vmem:[#allocation3 + $0xb8] sm:$0xff] %v389_v18  ;;  %v160_v19 = vpop.f32.mrf.mxu0  ;;  %v225_v20 = vpop.f32.mrf.mxu1 }
  0xc1   :  { %v374_v21 = vadd.f32 %v679_v49, %v160_v19  ;;  %v375_v22 = vadd.f32 %v681_v50, %v225_v20 }
  0xc3   :  { %406 = vst [vmem:[#allocation3 + $0x40] sm:$0xff] %v374_v21 }
  0xc4   :  { %v184_v23 = vpop.f32.mrf.mxu2  ;;  %407 = vst [vmem:[#allocation3 + $0x48] sm:$0xff] %v375_v22  ;;  %v249_v24 = vpop.f32.mrf.mxu3 }
  0xc5   :  { %v390_v25 = vadd.f32 %v679_v49, %v184_v23  ;;  %v391_v26 = vadd.f32 %v681_v50, %v249_v24 }
  0xc7   :  { %422 = vst [vmem:[#allocation3 + $0xc0] sm:$0xff] %v390_v25 }
  0xc8   :  { %423 = vst [vmem:[#allocation3 + $0xc8] sm:$0xff] %v391_v26  ;;  %v163_v27 = vpop.f32.mrf.mxu0  ;;  %v228_v28 = vpop.f32.mrf.mxu1 }
  0xc9   :  { %v376_v29 = vadd.f32 %v679_v49, %v163_v27  ;;  %v377_v30 = vadd.f32 %v681_v50, %v228_v28 }
  0xcb   :  { %408 = vst [vmem:[#allocation3 + $0x50] sm:$0xff] %v376_v29 }
  0xcc   :  { %v187_v31 = vpop.f32.mrf.mxu2  ;;  %409 = vst [vmem:[#allocation3 + $0x58] sm:$0xff] %v377_v30  ;;  %v252_v32 = vpop.f32.mrf.mxu3 }
  0xcd   :  { %v392_v33 = vadd.f32 %v679_v49, %v187_v31  ;;  %v393_v34 = vadd.f32 %v681_v50, %v252_v32 }
  0xcf   :  { %424 = vst [vmem:[#allocation3 + $0xd0] sm:$0xff] %v392_v33 }
  0xd0   :  { %425 = vst [vmem:[#allocation3 + $0xd8] sm:$0xff] %v393_v34  ;;  %v166_v35 = vpop.f32.mrf.mxu0  ;;  %v231_v36 = vpop.f32.mrf.mxu1 }
  0xd1   :  { %v378_v37 = vadd.f32 %v679_v49, %v166_v35  ;;  %v379_v38 = vadd.f32 %v681_v50, %v231_v36 }
  0xd3   :  { %410 = vst [vmem:[#allocation3 + $0x60] sm:$0xff] %v378_v37 }
  0xd4   :  { %v190_v39 = vpop.f32.mrf.mxu2  ;;  %411 = vst [vmem:[#allocation3 + $0x68] sm:$0xff] %v379_v38  ;;  %v255_v40 = vpop.f32.mrf.mxu3 }
  0xd5   :  { %v394_v41 = vadd.f32 %v679_v49, %v190_v39  ;;  %v395_v42 = vadd.f32 %v681_v50, %v255_v40 }
  0xd7   :  { %426 = vst [vmem:[#allocation3 + $0xe0] sm:$0xff] %v394_v41 }
  0xd8   :  { %427 = vst [vmem:[#allocation3 + $0xe8] sm:$0xff] %v395_v42  ;;  %v169_v43 = vpop.f32.mrf.mxu0  ;;  %v234_v44 = vpop.f32.mrf.mxu1 }
  0xd9   :  { %v380_v45 = vadd.f32 %v679_v49, %v169_v43  ;;  %v381_v46 = vadd.f32 %v681_v50, %v234_v44 }
  0xdb   :  { %412 = vst [vmem:[#allocation3 + $0x70] sm:$0xff] %v380_v45 }
  0xdc   :  { %v193_v47 = vpop.f32.mrf.mxu2  ;;  %413 = vst [vmem:[#allocation3 + $0x78] sm:$0xff] %v381_v46  ;;  %v258_v48 = vpop.f32.mrf.mxu3 }
  0xdd   :  { %v396_v51 = vadd.f32 %v679_v49, %v193_v47  ;;  %v397_v52 = vadd.f32 %v681_v50, %v258_v48 }
  0xdf   :  { %428 = vst [vmem:[#allocation3 + $0xf0] sm:$0xff] %v396_v51 }
  0xe0   :  { %429 = vst [vmem:[#allocation3 + $0xf8] sm:$0xff] %v397_v52 }
  0xe1   :  { %442 = dma.vmem_to_hbm [thread:$0]  %s435_s2, 4096, %s437_s29, [#allocation4], %s510_s30, %s510_s30, %s511_s4  }
  0xe2   :  { %507 = dma.done.wait [#allocation4], 4096  }
  0xe3   :  { %508 = vsyncadd [#allocation4], 4294963200 }
  0xe4   :  { %447 = vsyncpa [#allocation4], 1 }

// kernel: lmlstm_forward.2
= control target key start
LH: loop header
LB: loop body
LE: loop exit
PB: predicated region body
PF: predicated region fallthrough
CT: control target
= control target key end

     0   :  { %12 = vsyncpa [#allocation6], 0  ;;  %s8758_s0 = inlined_call_operand.vmem [shape: f32[16,8,128], index: 0, kind: input, shape index: {}]   ;;  %s8759_s1 = inlined_call_operand.vmem [shape: f32[128,512], index: 1, kind: input, shape index: {}]   ;;  %s8760_s2 = inlined_call_operand.vmem [shape: f32[128,512], index: 2, kind: input, shape index: {}]   ;;  %s8761_s3 = inlined_call_operand.vmem [shape: f32[1,512], index: 3, kind: input, shape index: {}]   ;;  %s8762_s4 = inlined_call_operand.vmem [shape: f32[8,16,128], index: 4, kind: output, shape index: {0}]   ;;  %s8763_s5 = inlined_call_operand.hbm [shape: f32[8,128], index: 5, kind: output, shape index: {1}]   ;;  %s8764_s6 = inlined_call_operand.hbm [shape: f32[8,128], index: 6, kind: output, shape index: {2}]  }
   0x1   :  { %v104_v0 = vld [vmem:[%s8759_s1 + $0x1e0] sm:$0xff]  ;;  %v105_v1 = vld [vmem:[%s8759_s1 + $0x1e8] sm:$0xff]  ;;  %v106_v2 = vld [vmem:[%s8759_s1 + $0x1f0] sm:$0xff] }
   0x2   :  { %118 = vmatpush.msra.mxu0 %v104_v0  ;;  %183 = vmatpush.msra.mxu1 %v105_v1  ;;  %v107_v3 = vld [vmem:[%s8759_s1 + $0x1f8] sm:$0xff]  ;;  %v100_v4 = vld [vmem:[%s8759_s1 + $0x1c0] sm:$0xff]  ;;  %v101_v5 = vld [vmem:[%s8759_s1 + $0x1c8] sm:$0xff] }
   0x3   :  { %248 = vmatpush.msra.mxu2 %v106_v2  ;;  %313 = vmatpush.msra.mxu3 %v107_v3  ;;  %v102_v6 = vld [vmem:[%s8759_s1 + $0x1d0] sm:$0xff]  ;;  %v103_v7 = vld [vmem:[%s8759_s1 + $0x1d8] sm:$0xff]  ;;  %v96_v8 = vld [vmem:[%s8759_s1 + $0x1a0] sm:$0xff] }
   0x4   :  { %119 = vmatpush.msra.mxu0 %v100_v4  ;;  %184 = vmatpush.msra.mxu1 %v101_v5  ;;  %v97_v9 = vld [vmem:[%s8759_s1 + $0x1a8] sm:$0xff]  ;;  %v98_v10 = vld [vmem:[%s8759_s1 + $0x1b0] sm:$0xff]  ;;  %v99_v11 = vld [vmem:[%s8759_s1 + $0x1b8] sm:$0xff] }
   0x5   :  { %249 = vmatpush.msra.mxu2 %v102_v6  ;;  %314 = vmatpush.msra.mxu3 %v103_v7  ;;  %v92_v12 = vld [vmem:[%s8759_s1 + $0x180] sm:$0xff]  ;;  %v93_v13 = vld [vmem:[%s8759_s1 + $0x188] sm:$0xff]  ;;  %v94_v14 = vld [vmem:[%s8759_s1 + $0x190] sm:$0xff] }
   0x6   :  { %120 = vmatpush.msra.mxu0 %v96_v8  ;;  %185 = vmatpush.msra.mxu1 %v97_v9  ;;  %v95_v15 = vld [vmem:[%s8759_s1 + $0x198] sm:$0xff]  ;;  %v88_v16 = vld [vmem:[%s8759_s1 + $0x160] sm:$0xff]  ;;  %v89_v17 = vld [vmem:[%s8759_s1 + $0x168] sm:$0xff] }
   0x7   :  { %250 = vmatpush.msra.mxu2 %v98_v10  ;;  %315 = vmatpush.msra.mxu3 %v99_v11  ;;  %v90_v18 = vld [vmem:[%s8759_s1 + $0x170] sm:$0xff]  ;;  %v91_v19 = vld [vmem:[%s8759_s1 + $0x178] sm:$0xff]  ;;  %v84_v20 = vld [vmem:[%s8759_s1 + $0x140] sm:$0xff] }
   0x8   :  { %121 = vmatpush.msra.mxu0 %v92_v12  ;;  %186 = vmatpush.msra.mxu1 %v93_v13  ;;  %v85_v21 = vld [vmem:[%s8759_s1 + $0x148] sm:$0xff]  ;;  %v86_v22 = vld [vmem:[%s8759_s1 + $0x150] sm:$0xff]  ;;  %v87_v23 = vld [vmem:[%s8759_s1 + $0x158] sm:$0xff] }
   0x9   :  { %251 = vmatpush.msra.mxu2 %v94_v14  ;;  %316 = vmatpush.msra.mxu3 %v95_v15  ;;  %v80_v24 = vld [vmem:[%s8759_s1 + $0x120] sm:$0xff]  ;;  %v81_v25 = vld [vmem:[%s8759_s1 + $0x128] sm:$0xff]  ;;  %v82_v26 = vld [vmem:[%s8759_s1 + $0x130] sm:$0xff] }
   0xa   :  { %122 = vmatpush.msra.mxu0 %v88_v16  ;;  %187 = vmatpush.msra.mxu1 %v89_v17  ;;  %v83_v27 = vld [vmem:[%s8759_s1 + $0x138] sm:$0xff]  ;;  %v76_v28 = vld [vmem:[%s8759_s1 + $0x100] sm:$0xff]  ;;  %v77_v29 = vld [vmem:[%s8759_s1 + $0x108] sm:$0xff] }
   0xb   :  { %252 = vmatpush.msra.mxu2 %v90_v18  ;;  %317 = vmatpush.msra.mxu3 %v91_v19  ;;  %v78_v30 = vld [vmem:[%s8759_s1 + $0x110] sm:$0xff]  ;;  %v79_v31 = vld [vmem:[%s8759_s1 + $0x118] sm:$0xff]  ;;  %v72_v32 = vld [vmem:[%s8759_s1 + $0xe0] sm:$0xff] }
   0xc   :  { %123 = vmatpush.msra.mxu0 %v84_v20  ;;  %188 = vmatpush.msra.mxu1 %v85_v21  ;;  %v73_v33 = vld [vmem:[%s8759_s1 + $0xe8] sm:$0xff]  ;;  %v74_v34 = vld [vmem:[%s8759_s1 + $0xf0] sm:$0xff]  ;;  %v75_v35 = vld [vmem:[%s8759_s1 + $0xf8] sm:$0xff] }
   0xd   :  { %253 = vmatpush.msra.mxu2 %v86_v22  ;;  %318 = vmatpush.msra.mxu3 %v87_v23  ;;  %v68_v36 = vld [vmem:[%s8759_s1 + $0xc0] sm:$0xff]  ;;  %v69_v37 = vld [vmem:[%s8759_s1 + $0xc8] sm:$0xff]  ;;  %v70_v38 = vld [vmem:[%s8759_s1 + $0xd0] sm:$0xff] }
   0xe   :  { %124 = vmatpush.msra.mxu0 %v80_v24  ;;  %189 = vmatpush.msra.mxu1 %v81_v25  ;;  %v71_v39 = vld [vmem:[%s8759_s1 + $0xd8] sm:$0xff]  ;;  %v64_v40 = vld [vmem:[%s8759_s1 + $0xa0] sm:$0xff]  ;;  %v65_v41 = vld [vmem:[%s8759_s1 + $0xa8] sm:$0xff] }
   0xf   :  { %254 = vmatpush.msra.mxu2 %v82_v26  ;;  %319 = vmatpush.msra.mxu3 %v83_v27  ;;  %v66_v42 = vld [vmem:[%s8759_s1 + $0xb0] sm:$0xff]  ;;  %v67_v43 = vld [vmem:[%s8759_s1 + $0xb8] sm:$0xff]  ;;  %v60_v44 = vld [vmem:[%s8759_s1 + $0x80] sm:$0xff] }
  0x10   :  { %125 = vmatpush.msra.mxu0 %v76_v28  ;;  %190 = vmatpush.msra.mxu1 %v77_v29  ;;  %v61_v45 = vld [vmem:[%s8759_s1 + $0x88] sm:$0xff]  ;;  %v62_v46 = vld [vmem:[%s8759_s1 + $0x90] sm:$0xff]  ;;  %v63_v47 = vld [vmem:[%s8759_s1 + $0x98] sm:$0xff] }
  0x11   :  { %255 = vmatpush.msra.mxu2 %v78_v30  ;;  %320 = vmatpush.msra.mxu3 %v79_v31  ;;  %v56_v48 = vld [vmem:[%s8759_s1 + $0x60] sm:$0xff]  ;;  %v57_v49 = vld [vmem:[%s8759_s1 + $0x68] sm:$0xff]  ;;  %v58_v50 = vld [vmem:[%s8759_s1 + $0x70] sm:$0xff] }
  0x12   :  { %126 = vmatpush.msra.mxu0 %v72_v32  ;;  %191 = vmatpush.msra.mxu1 %v73_v33  ;;  %v59_v51 = vld [vmem:[%s8759_s1 + $0x78] sm:$0xff]  ;;  %v52_v52 = vld [vmem:[%s8759_s1 + $0x40] sm:$0xff]  ;;  %v53_v53 = vld [vmem:[%s8759_s1 + $0x48] sm:$0xff] }
  0x13   :  { %256 = vmatpush.msra.mxu2 %v74_v34  ;;  %321 = vmatpush.msra.mxu3 %v75_v35  ;;  %v54_v54 = vld [vmem:[%s8759_s1 + $0x50] sm:$0xff]  ;;  %v55_v55 = vld [vmem:[%s8759_s1 + $0x58] sm:$0xff]  ;;  %v48_v56 = vld [vmem:[%s8759_s1 + $0x20] sm:$0xff] }
  0x14   :  { %127 = vmatpush.msra.mxu0 %v68_v36  ;;  %192 = vmatpush.msra.mxu1 %v69_v37  ;;  %v49_v57 = vld [vmem:[%s8759_s1 + $0x28] sm:$0xff]  ;;  %v50_v58 = vld [vmem:[%s8759_s1 + $0x30] sm:$0xff]  ;;  %v51_v59 = vld [vmem:[%s8759_s1 + $0x38] sm:$0xff] }
  0x15   :  { %257 = vmatpush.msra.mxu2 %v70_v38  ;;  %322 = vmatpush.msra.mxu3 %v71_v39  ;;  %v44_v60 = vld [vmem:[%s8759_s1] sm:$0xff]  ;;  %v45_v61 = vld [vmem:[%s8759_s1 + $0x8] sm:$0xff] }
  0x16   :  { %128 = vmatpush.msra.mxu0 %v64_v40  ;;  %193 = vmatpush.msra.mxu1 %v65_v41 }
  0x17   :  { %258 = vmatpush.msra.mxu2 %v66_v42  ;;  %323 = vmatpush.msra.mxu3 %v67_v43 }
  0x18   :  { %129 = vmatpush.msra.mxu0 %v60_v44  ;;  %194 = vmatpush.msra.mxu1 %v61_v45 }
  0x19   :  { %259 = vmatpush.msra.mxu2 %v62_v46  ;;  %324 = vmatpush.msra.mxu3 %v63_v47 }
  0x1a   :  { %130 = vmatpush.msra.mxu0 %v56_v48  ;;  %195 = vmatpush.msra.mxu1 %v57_v49 }
  0x1b   :  { %260 = vmatpush.msra.mxu2 %v58_v50  ;;  %325 = vmatpush.msra.mxu3 %v59_v51 }
  0x1c   :  { %131 = vmatpush.msra.mxu0 %v52_v52  ;;  %196 = vmatpush.msra.mxu1 %v53_v53 }
  0x1d   :  { %261 = vmatpush.msra.mxu2 %v54_v54  ;;  %326 = vmatpush.msra.mxu3 %v55_v55 }
  0x1e   :  { %13 = vsyncpa [#allocation8], 0  ;;  %132 = vmatpush.msra.mxu0 %v48_v56  ;;  %197 = vmatpush.msra.mxu1 %v49_v57  ;;  %v46_v62 = vld [vmem:[%s8759_s1 + $0x10] sm:$0xff]  ;;  %v47_v63 = vld [vmem:[%s8759_s1 + $0x18] sm:$0xff]  ;;  %s4670_s28 = smov [#allocation7]   ;;  %s4294_s8 = sshll.u32 %s8764_s6, 4  ;;  %s4295_s8 = int_to_ptr.hbm [resolvable:$true] %s4294_s8 }
  0x1f   :  { %262 = vmatpush.msra.mxu2 %v50_v58  ;;  %327 = vmatpush.msra.mxu3 %v51_v59  ;;  %v28_v0 = vld [vmem:[%s8758_s0] sm:$0xff]  ;;  %v4910_v2 = vld [vmem:[%s8760_s2 + $0x1e8] sm:$0xff]  ;;  %v4915_v3 = vld [vmem:[%s8760_s2 + $0x1f8] sm:$0xff]  ;;  %s4292_s29 = sshll.u32 %s4670_s28, 4  ;;  %s4671_s9 = smov [#allocation5]   ;;  %s4293_s29 = int_to_ptr.vmem [resolvable:$true] %s4292_s29 }
  0x20   :  { %133 = vmatpush.msra.mxu0 %v44_v60  ;;  %198 = vmatpush.msra.mxu1 %v45_v61  ;;  %v4905_v1 = vld [vmem:[%s8760_s2 + $0x1e0] sm:$0xff]  ;;  %v4920_v4 = vld [vmem:[%s8760_s2 + $0x1f0] sm:$0xff]  ;;  %v4930_v6 = vld [vmem:[%s8760_s2 + $0x1c8] sm:$0xff]  ;;  %s4281_s6 = sshll.u32 %s4671_s9, 4  ;;  %s4283_s11 = sshll.u32 %s8763_s5, 4  ;;  %s4282_s6 = int_to_ptr.vmem [resolvable:$true] %s4281_s6  ;;  %s4284_s11 = int_to_ptr.hbm [resolvable:$true] %s4283_s11 }
  0x21   :  { %263 = vmatpush.msra.mxu2 %v46_v62  ;;  %328 = vmatpush.msra.mxu3 %v47_v63  ;;  %v4925_v5 = vld [vmem:[%s8760_s2 + $0x1c0] sm:$0xff]  ;;  %v4937_v7 = vld [vmem:[%s8760_s2 + $0x1d8] sm:$0xff]  ;;  %v4942_v8 = vld [vmem:[%s8760_s2 + $0x1d0] sm:$0xff] }
  0x22   :  { %134 = vmatmul.f32.vlgmr.msra.gmra.mxu0 %v28_v0  ;;  %199 = vmatmul.f32.vlgmr.msra.gmra.mxu1 %v28_v0  ;;  %v4949_v9 = vld [vmem:[%s8760_s2 + $0x1a0] sm:$0xff]  ;;  %v4954_v10 = vld [vmem:[%s8760_s2 + $0x1a8] sm:$0xff]  ;;  %v4961_v11 = vld [vmem:[%s8760_s2 + $0x1b8] sm:$0xff] }
  0x23   :  { %264 = vmatmul.f32.vlgmr.msra.gmra.mxu2 %v28_v0  ;;  %329 = vmatmul.f32.vlgmr.msra.gmra.mxu3 %v28_v0  ;;  %v4966_v12 = vld [vmem:[%s8760_s2 + $0x1b0] sm:$0xff]  ;;  %v29_v13 = vld [vmem:[%s8758_s0 + $0x8] sm:$0xff]  ;;  %v4979_v14 = vld [vmem:[%s8760_s2 + $0x180] sm:$0xff] }
  0x24   :  { %496 = vmatpush.msrb.mxu0 %v4905_v1  ;;  %516 = vmatpush.msrb.mxu1 %v4910_v2  ;;  %v4984_v15 = vld [vmem:[%s8760_s2 + $0x188] sm:$0xff]  ;;  %v4990_v16 = vld [vmem:[%s8760_s2 + $0x198] sm:$0xff]  ;;  %v4995_v17 = vld [vmem:[%s8760_s2 + $0x190] sm:$0xff] }
  0x25   :  { %575 = vmatpush.msrb.mxu3 %v4915_v3  ;;  %536 = vmatpush.msrb.mxu2 %v4920_v4  ;;  %v5000_v18 = vld [vmem:[%s8760_s2 + $0x160] sm:$0xff]  ;;  %v5005_v19 = vld [vmem:[%s8760_s2 + $0x168] sm:$0xff]  ;;  %v5012_v20 = vld [vmem:[%s8760_s2 + $0x178] sm:$0xff] }
  0x26   :  { %497 = vmatpush.msrb.mxu0 %v4925_v5  ;;  %517 = vmatpush.msrb.mxu1 %v4930_v6  ;;  %v5017_v21 = vld [vmem:[%s8760_s2 + $0x170] sm:$0xff]  ;;  %v5024_v22 = vld [vmem:[%s8760_s2 + $0x140] sm:$0xff]  ;;  %v5029_v23 = vld [vmem:[%s8760_s2 + $0x148] sm:$0xff] }
  0x27   :  { %576 = vmatpush.msrb.mxu3 %v4937_v7  ;;  %537 = vmatpush.msrb.mxu2 %v4942_v8  ;;  %v5036_v24 = vld [vmem:[%s8760_s2 + $0x158] sm:$0xff]  ;;  %v30_v25 = vld [vmem:[%s8758_s0 + $0x10] sm:$0xff]  ;;  %v5049_v26 = vld [vmem:[%s8760_s2 + $0x120] sm:$0xff] }
  0x28   :  { %498 = vmatpush.msrb.mxu0 %v4949_v9  ;;  %518 = vmatpush.msrb.mxu1 %v4954_v10  ;;  %v5054_v27 = vld [vmem:[%s8760_s2 + $0x128] sm:$0xff]  ;;  %v5059_v28 = vld [vmem:[%s8760_s2 + $0x138] sm:$0xff]  ;;  %v5066_v29 = vld [vmem:[%s8760_s2 + $0x150] sm:$0xff] }
  0x29   :  { %577 = vmatpush.msrb.mxu3 %v4961_v11  ;;  %538 = vmatpush.msrb.mxu2 %v4966_v12  ;;  %v31_v30 = vld [vmem:[%s8758_s0 + $0x18] sm:$0xff]  ;;  %v5076_v31 = vld [vmem:[%s8760_s2 + $0x100] sm:$0xff]  ;;  %v5081_v32 = vld [vmem:[%s8760_s2 + $0x108] sm:$0xff] }
  0x2a   :  { %137 = vmatmul.f32.gmra.mxu0 %v29_v13  ;;  %202 = vmatmul.f32.gmra.mxu1 %v29_v13  ;;  %v5086_v33 = vld [vmem:[%s8760_s2 + $0x118] sm:$0xff]  ;;  %v5093_v34 = vld [vmem:[%s8760_s2 + $0x130] sm:$0xff]  ;;  %v32_v35 = vld [vmem:[%s8758_s0 + $0x20] sm:$0xff] }
  0x2b   :  { %267 = vmatmul.f32.gmra.mxu2 %v29_v13  ;;  %332 = vmatmul.f32.gmra.mxu3 %v29_v13  ;;  %v5103_v36 = vld [vmem:[%s8760_s2 + $0xe0] sm:$0xff]  ;;  %v5108_v37 = vld [vmem:[%s8760_s2 + $0xe8] sm:$0xff]  ;;  %v5113_v38 = vld [vmem:[%s8760_s2 + $0xf8] sm:$0xff] }
  0x2c   :  { %499 = vmatpush.msrb.mxu0 %v4979_v14  ;;  %519 = vmatpush.msrb.mxu1 %v4984_v15  ;;  %v5120_v39 = vld [vmem:[%s8760_s2 + $0x110] sm:$0xff]  ;;  %v33_v40 = vld [vmem:[%s8758_s0 + $0x28] sm:$0xff]  ;;  %v5130_v41 = vld [vmem:[%s8760_s2 + $0xc0] sm:$0xff] }
  0x2d   :  { %578 = vmatpush.msrb.mxu3 %v4990_v16  ;;  %539 = vmatpush.msrb.mxu2 %v4995_v17  ;;  %v5135_v42 = vld [vmem:[%s8760_s2 + $0xc8] sm:$0xff]  ;;  %v5140_v43 = vld [vmem:[%s8760_s2 + $0xd8] sm:$0xff]  ;;  %v5147_v44 = vld [vmem:[%s8760_s2 + $0xf0] sm:$0xff] }
  0x2e   :  { %500 = vmatpush.msrb.mxu0 %v5000_v18  ;;  %520 = vmatpush.msrb.mxu1 %v5005_v19  ;;  %v34_v45 = vld [vmem:[%s8758_s0 + $0x30] sm:$0xff]  ;;  %v5157_v46 = vld [vmem:[%s8760_s2 + $0xa0] sm:$0xff]  ;;  %v5162_v47 = vld [vmem:[%s8760_s2 + $0xa8] sm:$0xff] }
  0x2f   :  { %579 = vmatpush.msrb.mxu3 %v5012_v20  ;;  %540 = vmatpush.msrb.mxu2 %v5017_v21  ;;  %v5167_v48 = vld [vmem:[%s8760_s2 + $0xb8] sm:$0xff]  ;;  %v5174_v49 = vld [vmem:[%s8760_s2 + $0xd0] sm:$0xff]  ;;  %v5184_v51 = vld [vmem:[%s8760_s2 + $0x80] sm:$0xff] }
  0x30   :  { %501 = vmatpush.msrb.mxu0 %v5024_v22  ;;  %521 = vmatpush.msrb.mxu1 %v5029_v23  ;;  %v35_v50 = vld [vmem:[%s8758_s0 + $0x38] sm:$0xff]  ;;  %v5189_v52 = vld [vmem:[%s8760_s2 + $0x88] sm:$0xff]  ;;  %v5201_v54 = vld [vmem:[%s8760_s2 + $0xb0] sm:$0xff] }
  0x31   :  { %580 = vmatpush.msrb.mxu3 %v5036_v24  ;;  %541 = vmatpush.msrb.mxu2 %v5066_v29  ;;  %v5194_v53 = vld [vmem:[%s8760_s2 + $0x98] sm:$0xff]  ;;  %v36_v55 = vld [vmem:[%s8758_s0 + $0x40] sm:$0xff]  ;;  %v5216_v57 = vld [vmem:[%s8760_s2 + $0x68] sm:$0xff] }
  0x32   :  { %140 = vmatmul.f32.gmra.mxu0 %v30_v25  ;;  %205 = vmatmul.f32.gmra.mxu1 %v30_v25  ;;  %v5211_v56 = vld [vmem:[%s8760_s2 + $0x60] sm:$0xff]  ;;  %v5221_v58 = vld [vmem:[%s8760_s2 + $0x78] sm:$0xff]  ;;  %v5228_v59 = vld [vmem:[%s8760_s2 + $0x90] sm:$0xff] }
  0x33   :  { %270 = vmatmul.f32.gmra.mxu2 %v30_v25  ;;  %335 = vmatmul.f32.gmra.mxu3 %v30_v25  ;;  %v37_v60 = vld [vmem:[%s8758_s0 + $0x48] sm:$0xff]  ;;  %v5238_v61 = vld [vmem:[%s8760_s2 + $0x40] sm:$0xff]  ;;  %v5248_v63 = vld [vmem:[%s8760_s2 + $0x58] sm:$0xff] }
  0x34   :  { %502 = vmatpush.msrb.mxu0 %v5049_v26  ;;  %522 = vmatpush.msrb.mxu1 %v5054_v27  ;;  %v5243_v62 = vld [vmem:[%s8760_s2 + $0x48] sm:$0xff]  ;;  %v5255_v0 = vld [vmem:[%s8760_s2 + $0x70] sm:$0xff]  ;;  %v5265_v25 = vld [vmem:[%s8760_s2 + $0x20] sm:$0xff] }
  0x35   :  { %581 = vmatpush.msrb.mxu3 %v5059_v28  ;;  %542 = vmatpush.msrb.mxu2 %v5093_v34  ;;  %v38_v13 = vld [vmem:[%s8758_s0 + $0x50] sm:$0xff] }
  0x36   :  { %503 = vmatpush.msrb.mxu0 %v5076_v31  ;;  %523 = vmatpush.msrb.mxu1 %v5081_v32 }
  0x37   :  { %582 = vmatpush.msrb.mxu3 %v5086_v33  ;;  %543 = vmatpush.msrb.mxu2 %v5120_v39 }
  0x38   :  { %504 = vmatpush.msrb.mxu0 %v5103_v36  ;;  %524 = vmatpush.msrb.mxu1 %v5108_v37 }
  0x39   :  { %583 = vmatpush.msrb.mxu3 %v5113_v38  ;;  %544 = vmatpush.msrb.mxu2 %v5147_v44 }
  0x3a   :  { %143 = vmatmul.f32.gmra.mxu0 %v31_v30  ;;  %208 = vmatmul.f32.gmra.mxu1 %v31_v30 }
  0x3b   :  { %273 = vmatmul.f32.gmra.mxu2 %v31_v30  ;;  %338 = vmatmul.f32.gmra.mxu3 %v31_v30  ;;  %v5270_v30 = vld [vmem:[%s8760_s2 + $0x28] sm:$0xff] }
  0x3c   :  { %505 = vmatpush.msrb.mxu0 %v5130_v41  ;;  %525 = vmatpush.msrb.mxu1 %v5135_v42 }
  0x3d   :  { %584 = vmatpush.msrb.mxu3 %v5140_v43  ;;  %545 = vmatpush.msrb.mxu2 %v5174_v49 }
  0x3e   :  { %506 = vmatpush.msrb.mxu0 %v5157_v46  ;;  %526 = vmatpush.msrb.mxu1 %v5162_v47 }
  0x3f   :  { %585 = vmatpush.msrb.mxu3 %v5167_v48  ;;  %546 = vmatpush.msrb.mxu2 %v5201_v54 }
  0x40   :  { %507 = vmatpush.msrb.mxu0 %v5184_v51  ;;  %527 = vmatpush.msrb.mxu1 %v5189_v52 }
  0x41   :  { %586 = vmatpush.msrb.mxu3 %v5194_v53  ;;  %547 = vmatpush.msrb.mxu2 %v5228_v59 }
  0x42   :  { %146 = vmatmul.f32.gmra.mxu0 %v32_v35  ;;  %211 = vmatmul.f32.gmra.mxu1 %v32_v35 }
  0x43   :  { %276 = vmatmul.f32.gmra.mxu2 %v32_v35  ;;  %341 = vmatmul.f32.gmra.mxu3 %v32_v35  ;;  %v5275_v35 = vld [vmem:[%s8760_s2 + $0x38] sm:$0xff] }
  0x44   :  { %508 = vmatpush.msrb.mxu0 %v5211_v56  ;;  %528 = vmatpush.msrb.mxu1 %v5216_v57 }
  0x45   :  { %587 = vmatpush.msrb.mxu3 %v5221_v58  ;;  %548 = vmatpush.msrb.mxu2 %v5255_v0 }
  0x46   :  { %509 = vmatpush.msrb.mxu0 %v5238_v61  ;;  %529 = vmatpush.msrb.mxu1 %v5243_v62 }
  0x47   :  { %588 = vmatpush.msrb.mxu3 %v5248_v63 }
  0x48   :  { %510 = vmatpush.msrb.mxu0 %v5265_v25  ;;  %530 = vmatpush.msrb.mxu1 %v5270_v30 }
  0x49   :  { %589 = vmatpush.msrb.mxu3 %v5275_v35 }
  0x4a   :  { %149 = vmatmul.f32.gmra.mxu0 %v33_v40  ;;  %214 = vmatmul.f32.gmra.mxu1 %v33_v40 }
  0x4b   :  { %279 = vmatmul.f32.gmra.mxu2 %v33_v40  ;;  %344 = vmatmul.f32.gmra.mxu3 %v33_v40  ;;  %v5282_v40 = vld [vmem:[%s8760_s2 + $0x50] sm:$0xff] }
  0x4c   :  { %549 = vmatpush.msrb.mxu2 %v5282_v40 }
  0x52   :  { %152 = vmatmul.f32.gmra.mxu0 %v34_v45  ;;  %217 = vmatmul.f32.gmra.mxu1 %v34_v45 }
  0x53   :  { %282 = vmatmul.f32.gmra.mxu2 %v34_v45  ;;  %347 = vmatmul.f32.gmra.mxu3 %v34_v45  ;;  %v39_v45 = vld [vmem:[%s8758_s0 + $0x58] sm:$0xff] }
  0x5a   :  { %155 = vmatmul.f32.gmra.mxu0 %v35_v50  ;;  %220 = vmatmul.f32.gmra.mxu1 %v35_v50 }
  0x5b   :  { %285 = vmatmul.f32.gmra.mxu2 %v35_v50  ;;  %350 = vmatmul.f32.gmra.mxu3 %v35_v50  ;;  %v5292_v50 = vld [vmem:[%s8760_s2] sm:$0xff] }
  0x5c   :  { %511 = vmatpush.msrb.mxu0 %v5292_v50 }
  0x5e   :  { %735 = vmatpush.msra.mxu0 %v4905_v1  ;;  %v5317_v1 = vld [vmem:[%s8760_s2 + $0x18] sm:$0xff] }
  0x5f   :  { %590 = vmatpush.msrb.mxu3 %v5317_v1 }
  0x60   :  { %736 = vmatpush.msra.mxu0 %v4925_v5  ;;  %v41_v5 = vld [vmem:[%s8758_s0 + $0x68] sm:$0xff] }
  0x61   :  { %814 = vmatpush.msra.mxu3 %v4915_v3  ;;  %v42_v3 = vld [vmem:[%s8758_s0 + $0x70] sm:$0xff] }
  0x62   :  { %158 = vmatmul.f32.gmra.mxu0 %v36_v55  ;;  %223 = vmatmul.f32.gmra.mxu1 %v36_v55 }
  0x63   :  { %288 = vmatmul.f32.gmra.mxu2 %v36_v55  ;;  %353 = vmatmul.f32.gmra.mxu3 %v36_v55  ;;  %v5297_v55 = vld [vmem:[%s8760_s2 + $0x8] sm:$0xff] }
  0x64   :  { %531 = vmatpush.msrb.mxu1 %v5297_v55  ;;  %737 = vmatpush.msra.mxu0 %v4949_v9 }
  0x65   :  { %815 = vmatpush.msra.mxu3 %v4937_v7 }
  0x66   :  { %755 = vmatpush.msra.mxu1 %v4910_v2  ;;  %v5323_v2 = vld [vmem:[%s8760_s2 + $0x10] sm:$0xff]  ;;  %738 = vmatpush.msra.mxu0 %v4979_v14 }
  0x67   :  { %816 = vmatpush.msra.mxu3 %v4961_v11 }
  0x68   :  { %756 = vmatpush.msra.mxu1 %v4930_v6  ;;  %739 = vmatpush.msra.mxu0 %v5000_v18 }
  0x69   :  { %817 = vmatpush.msra.mxu3 %v4990_v16 }
  0x6a   :  { %161 = vmatmul.f32.gmra.mxu0 %v37_v60  ;;  %226 = vmatmul.f32.gmra.mxu1 %v37_v60 }
  0x6b   :  { %291 = vmatmul.f32.gmra.mxu2 %v37_v60  ;;  %356 = vmatmul.f32.gmra.mxu3 %v37_v60  ;;  %v40_v60 = vld [vmem:[%s8758_s0 + $0x60] sm:$0xff] }
  0x6c   :  { %757 = vmatpush.msra.mxu1 %v4954_v10  ;;  %740 = vmatpush.msra.mxu0 %v5024_v22 }
  0x6d   :  { %818 = vmatpush.msra.mxu3 %v5012_v20 }
  0x6e   :  { %758 = vmatpush.msra.mxu1 %v4984_v15  ;;  %741 = vmatpush.msra.mxu0 %v5049_v26 }
  0x6f   :  { %819 = vmatpush.msra.mxu3 %v5036_v24 }
  0x70   :  { %759 = vmatpush.msra.mxu1 %v5005_v19  ;;  %742 = vmatpush.msra.mxu0 %v5076_v31 }
  0x71   :  { %820 = vmatpush.msra.mxu3 %v5059_v28 }
  0x72   :  { %164 = vmatmul.f32.gmra.mxu0 %v38_v13  ;;  %229 = vmatmul.f32.gmra.mxu1 %v38_v13 }
  0x73   :  { %294 = vmatmul.f32.gmra.mxu2 %v38_v13  ;;  %359 = vmatmul.f32.gmra.mxu3 %v38_v13  ;;  %v5309_v13 = vld [vmem:[%s8760_s2 + $0x30] sm:$0xff] }
  0x74   :  { %550 = vmatpush.msrb.mxu2 %v5309_v13  ;;  %760 = vmatpush.msra.mxu1 %v5029_v23 }
  0x75   :  { %743 = vmatpush.msra.mxu0 %v5103_v36  ;;  %821 = vmatpush.msra.mxu3 %v5086_v33 }
  0x76   :  { %551 = vmatpush.msrb.mxu2 %v5323_v2  ;;  %761 = vmatpush.msra.mxu1 %v5054_v27 }
  0x77   :  { %744 = vmatpush.msra.mxu0 %v5130_v41  ;;  %822 = vmatpush.msra.mxu3 %v5113_v38 }
  0x78   :  { %775 = vmatpush.msra.mxu2 %v4920_v4  ;;  %762 = vmatpush.msra.mxu1 %v5081_v32  ;;  %v43_v4 = vld [vmem:[%s8758_s0 + $0x78] sm:$0xff] }
  0x79   :  { %745 = vmatpush.msra.mxu0 %v5157_v46  ;;  %823 = vmatpush.msra.mxu3 %v5140_v43 }
  0x7a   :  { %167 = vmatmul.f32.gmra.mxu0 %v39_v45  ;;  %232 = vmatmul.f32.gmra.mxu1 %v39_v45 }
  0x7b   :  { %297 = vmatmul.f32.gmra.mxu2 %v39_v45  ;;  %362 = vmatmul.f32.gmra.mxu3 %v39_v45 }
  0x7c   :  { %776 = vmatpush.msra.mxu2 %v4942_v8  ;;  %763 = vmatpush.msra.mxu1 %v5108_v37  ;;  %v4669_v8 = vmov 0.0  }
  0x7d   :  { %746 = vmatpush.msra.mxu0 %v5184_v51  ;;  %824 = vmatpush.msra.mxu3 %v5167_v48 }
  0x7e   :  { %777 = vmatpush.msra.mxu2 %v4966_v12  ;;  %764 = vmatpush.msra.mxu1 %v5135_v42 }
  0x7f   :  { %747 = vmatpush.msra.mxu0 %v5211_v56  ;;  %825 = vmatpush.msra.mxu3 %v5194_v53 }
  0x80   :  { %778 = vmatpush.msra.mxu2 %v4995_v17  ;;  %765 = vmatpush.msra.mxu1 %v5162_v47 }
  0x81   :  { %748 = vmatpush.msra.mxu0 %v5238_v61  ;;  %826 = vmatpush.msra.mxu3 %v5221_v58 }
  0x82   :  { %170 = vmatmul.f32.gmra.mxu0 %v40_v60  ;;  %235 = vmatmul.f32.gmra.mxu1 %v40_v60 }
  0x83   :  { %300 = vmatmul.f32.gmra.mxu2 %v40_v60  ;;  %365 = vmatmul.f32.gmra.mxu3 %v40_v60 }
  0x84   :  { %779 = vmatpush.msra.mxu2 %v5017_v21  ;;  %766 = vmatpush.msra.mxu1 %v5189_v52 }
  0x85   :  { %749 = vmatpush.msra.mxu0 %v5265_v25  ;;  %827 = vmatpush.msra.mxu3 %v5248_v63 }
  0x86   :  { %780 = vmatpush.msra.mxu2 %v5066_v29  ;;  %767 = vmatpush.msra.mxu1 %v5216_v57 }
  0x87   :  { %750 = vmatpush.msra.mxu0 %v5292_v50  ;;  %828 = vmatpush.msra.mxu3 %v5275_v35 }
  0x88   :  { %781 = vmatpush.msra.mxu2 %v5093_v34  ;;  %768 = vmatpush.msra.mxu1 %v5243_v62 }
  0x89   :  { %829 = vmatpush.msra.mxu3 %v5317_v1 }
  0x8a   :  { %173 = vmatmul.f32.gmra.mxu0 %v41_v5  ;;  %238 = vmatmul.f32.gmra.mxu1 %v41_v5 }
  0x8b   :  { %303 = vmatmul.f32.gmra.mxu2 %v41_v5  ;;  %368 = vmatmul.f32.gmra.mxu3 %v41_v5 }
  0x8c   :  { %782 = vmatpush.msra.mxu2 %v5120_v39  ;;  %769 = vmatpush.msra.mxu1 %v5270_v30 }
  0x8e   :  { %783 = vmatpush.msra.mxu2 %v5147_v44  ;;  %770 = vmatpush.msra.mxu1 %v5297_v55 }
  0x90   :  { %784 = vmatpush.msra.mxu2 %v5174_v49 }
  0x92   :  { %176 = vmatmul.f32.gmra.mxu0 %v42_v3  ;;  %241 = vmatmul.f32.gmra.mxu1 %v42_v3 }
  0x93   :  { %306 = vmatmul.f32.gmra.mxu2 %v42_v3  ;;  %371 = vmatmul.f32.gmra.mxu3 %v42_v3 }
  0x94   :  { %785 = vmatpush.msra.mxu2 %v5201_v54 }
  0x96   :  { %786 = vmatpush.msra.mxu2 %v5228_v59 }
  0x98   :  { %787 = vmatpush.msra.mxu2 %v5255_v0 }
  0x9a   :  { %179 = vmatmul.f32.gmra.mxu0 %v43_v4  ;;  %244 = vmatmul.f32.gmra.mxu1 %v43_v4 }
  0x9b   :  { %309 = vmatmul.f32.gmra.mxu2 %v43_v4  ;;  %374 = vmatmul.f32.gmra.mxu3 %v43_v4 }
  0x9c   :  { %788 = vmatpush.msra.mxu2 %v5282_v40 }
  0x9e   :  { %789 = vmatpush.msra.mxu2 %v5309_v13 }
  0x9f   :  { %v5377_v6 = vpop.f32.mrf.mxu0  ;;  %v5379_v7 = vpop.f32.mrf.mxu1 }
  0xa0   :  { %790 = vmatpush.msra.mxu2 %v5323_v2  ;;  %v108_v2 = vld [vmem:[%s8761_s3] sm:$0xf] }
  0xa1   :  { %v5520_v4 = vperm.slane %v108_v2, 0 }
  0xa2   :  { %512 = vmatmul.f32.vlgmr.msrb.gmra.mxu0 %v4669_v8  ;;  %532 = vmatmul.f32.vlgmr.msrb.gmra.mxu1 %v4669_v8 }
  0xa3   :  { %552 = vmatmul.f32.vlgmr.msrb.gmra.mxu2 %v4669_v8  ;;  %591 = vmatmul.f32.vlgmr.msrb.gmra.mxu3 %v4669_v8  ;;  %8977 = vst [vmem:[#allocation64_spill] sm:$0xff] %v5520_v4  ;;  %v5522_v8 = vperm.slane %v108_v2, 1 }
  0xa5   :  { %8978 = vst [vmem:[#allocation65_spill] sm:$0xff] %v5522_v8 }
  0xa6   :  { %v5391_v9 = vpop.f32.mrf.mxu2  ;;  %v5393_v10 = vpop.f32.mrf.mxu3 }
  0xa7   :  { %v5397_v11 = vpop.f32.mrf.mxu0  ;;  %v5399_v12 = vpop.f32.mrf.mxu1 }
  0xae   :  { %v5407_v14 = vpop.f32.mrf.mxu2  ;;  %v5409_v15 = vpop.f32.mrf.mxu3 }
  0xaf   :  { %v5411_v16 = vpop.f32.mrf.mxu0  ;;  %v5413_v17 = vpop.f32.mrf.mxu1 }
  0xb0   :  { %8924 = vst [vmem:[#allocation11_spill] sm:$0xff] %v5411_v16  ;;  %v5925_v16 = vld [vmem:[%s8760_s2 + $0x28] sm:$0xff] }
  0xb1   :  { %8925 = vst [vmem:[#allocation12_spill] sm:$0xff] %v5413_v17  ;;  %v5904_v17 = vld [vmem:[%s8760_s2 + $0x50] sm:$0xff] }
  0xb2   :  { %8998 = vst [vmem:[#allocation85_spill] sm:$0xff] %v5904_v17 }
  0xb3   :  { %9001 = vst [vmem:[#allocation88_spill] sm:$0xff] %v5925_v16 }
  0xb6   :  { %v5415_v18 = vpop.f32.mrf.mxu2  ;;  %v5417_v19 = vpop.f32.mrf.mxu3 }
  0xb7   :  { %8926 = vst [vmem:[#allocation13_spill] sm:$0xff] %v5415_v18  ;;  %v5419_v20 = vpop.f32.mrf.mxu0  ;;  %v5421_v21 = vpop.f32.mrf.mxu1 }
  0xb8   :  { %8927 = vst [vmem:[#allocation14_spill] sm:$0xff] %v5417_v19  ;;  %v5885_v19 = vld [vmem:[%s8760_s2 + $0x78] sm:$0xff] }
  0xb9   :  { %8928 = vst [vmem:[#allocation15_spill] sm:$0xff] %v5419_v20 }
  0xba   :  { %8929 = vst [vmem:[#allocation16_spill] sm:$0xff] %v5421_v21  ;;  %v5876_v21 = vld [vmem:[%s8760_s2 + $0x70] sm:$0xff] }
  0xbb   :  { %8994 = vst [vmem:[#allocation81_spill] sm:$0xff] %v5876_v21 }
  0xbc   :  { %8995 = vst [vmem:[#allocation82_spill] sm:$0xff] %v5885_v19 }
  0xbe   :  { %v5423_v22 = vpop.f32.mrf.mxu2  ;;  %v5425_v23 = vpop.f32.mrf.mxu3 }
  0xbf   :  { %8930 = vst [vmem:[#allocation17_spill] sm:$0xff] %v5423_v22  ;;  %v5427_v24 = vpop.f32.mrf.mxu0  ;;  %v5429_v26 = vpop.f32.mrf.mxu1 }
  0xc0   :  { %8931 = vst [vmem:[#allocation18_spill] sm:$0xff] %v5425_v23  ;;  %v5866_v23 = vld [vmem:[%s8760_s2 + $0x60] sm:$0xff] }
  0xc1   :  { %8932 = vst [vmem:[#allocation19_spill] sm:$0xff] %v5427_v24  ;;  %v5859_v24 = vld [vmem:[%s8760_s2 + $0x98] sm:$0xff] }
  0xc2   :  { %8933 = vst [vmem:[#allocation20_spill] sm:$0xff] %v5429_v26 }
  0xc6   :  { %v5431_v27 = vpop.f32.mrf.mxu2  ;;  %v5433_v28 = vpop.f32.mrf.mxu3 }
  0xc7   :  { %8934 = vst [vmem:[#allocation21_spill] sm:$0xff] %v5431_v27  ;;  %v5435_v29 = vpop.f32.mrf.mxu0  ;;  %v5437_v31 = vpop.f32.mrf.mxu1  ;;  %v5835_v27 = vld [vmem:[%s8760_s2 + $0xb8] sm:$0xff] }
  0xc8   :  { %8935 = vst [vmem:[#allocation22_spill] sm:$0xff] %v5433_v28  ;;  %v5842_v28 = vld [vmem:[%s8760_s2 + $0x80] sm:$0xff] }
  0xc9   :  { %8936 = vst [vmem:[#allocation23_spill] sm:$0xff] %v5435_v29 }
  0xca   :  { %8937 = vst [vmem:[#allocation24_spill] sm:$0xff] %v5437_v31  ;;  %v5818_v31 = vld [vmem:[%s8760_s2 + $0xa0] sm:$0xff] }
  0xce   :  { %v5439_v32 = vpop.f32.mrf.mxu2  ;;  %v5441_v33 = vpop.f32.mrf.mxu3 }
  0xcf   :  { %8938 = vst [vmem:[#allocation25_spill] sm:$0xff] %v5439_v32  ;;  %v5443_v34 = vpop.f32.mrf.mxu0  ;;  %v5445_v36 = vpop.f32.mrf.mxu1  ;;  %v5811_v32 = vld [vmem:[%s8760_s2 + $0xd8] sm:$0xff] }
  0xd0   :  { %8939 = vst [vmem:[#allocation26_spill] sm:$0xff] %v5441_v33 }
  0xd1   :  { %8940 = vst [vmem:[#allocation27_spill] sm:$0xff] %v5443_v34  ;;  %v5802_v34 = vld [vmem:[%s8760_s2 + $0xd0] sm:$0xff] }
  0xd2   :  { %8941 = vst [vmem:[#allocation28_spill] sm:$0xff] %v5445_v36  ;;  %v5797_v36 = vld [vmem:[%s8760_s2 + $0xc8] sm:$0xff] }
  0xd6   :  { %v5447_v37 = vpop.f32.mrf.mxu2  ;;  %v5449_v38 = vpop.f32.mrf.mxu3 }
  0xd7   :  { %8942 = vst [vmem:[#allocation29_spill] sm:$0xff] %v5447_v37  ;;  %v5451_v39 = vpop.f32.mrf.mxu0  ;;  %v5453_v41 = vpop.f32.mrf.mxu1  ;;  %v5773_v37 = vld [vmem:[%s8760_s2 + $0xe8] sm:$0xff] }
  0xd8   :  { %8943 = vst [vmem:[#allocation30_spill] sm:$0xff] %v5449_v38  ;;  %v5792_v38 = vld [vmem:[%s8760_s2 + $0xc0] sm:$0xff] }
  0xd9   :  { %8944 = vst [vmem:[#allocation31_spill] sm:$0xff] %v5451_v39  ;;  %v5754_v39 = vld [vmem:[%s8760_s2 + $0x110] sm:$0xff] }
  0xda   :  { %8945 = vst [vmem:[#allocation32_spill] sm:$0xff] %v5453_v41  ;;  %v5749_v41 = vld [vmem:[%s8760_s2 + $0x108] sm:$0xff] }
  0xde   :  { %v5455_v42 = vpop.f32.mrf.mxu2  ;;  %v5457_v43 = vpop.f32.mrf.mxu3 }
  0xdf   :  { %8946 = vst [vmem:[#allocation33_spill] sm:$0xff] %v5455_v42  ;;  %v5459_v44 = vpop.f32.mrf.mxu0  ;;  %v5461_v46 = vpop.f32.mrf.mxu1 }
  0xe0   :  { %8947 = vst [vmem:[#allocation34_spill] sm:$0xff] %v5457_v43  ;;  %v5744_v43 = vld [vmem:[%s8760_s2 + $0x100] sm:$0xff] }
  0xe1   :  { %8948 = vst [vmem:[#allocation35_spill] sm:$0xff] %v5459_v44 }
  0xe2   :  { %8949 = vst [vmem:[#allocation36_spill] sm:$0xff] %v5461_v46  ;;  %v5737_v46 = vld [vmem:[%s8760_s2 + $0x138] sm:$0xff] }
  0xe6   :  { %v5463_v47 = vpop.f32.mrf.mxu2  ;;  %v5465_v48 = vpop.f32.mrf.mxu3 }
  0xe7   :  { %8950 = vst [vmem:[#allocation37_spill] sm:$0xff] %v5463_v47  ;;  %v5467_v49 = vpop.f32.mrf.mxu0  ;;  %v5469_v51 = vpop.f32.mrf.mxu1  ;;  %v5725_v47 = vld [vmem:[%s8760_s2 + $0x128] sm:$0xff] }
  0xe8   :  { %8951 = vst [vmem:[#allocation38_spill] sm:$0xff] %v5465_v48 }
  0xe9   :  { %8952 = vst [vmem:[#allocation39_spill] sm:$0xff] %v5467_v49  ;;  %v5720_v49 = vld [vmem:[%s8760_s2 + $0x120] sm:$0xff] }
  0xea   :  { %8953 = vst [vmem:[#allocation40_spill] sm:$0xff] %v5469_v51  ;;  %v204_v51 = vadd.f32 %v5399_v12, %v5522_v8 }
  0xee   :  { %v5471_v52 = vpop.f32.mrf.mxu2  ;;  %v5473_v53 = vpop.f32.mrf.mxu3 }
  0xef   :  { %8954 = vst [vmem:[#allocation41_spill] sm:$0xff] %v5471_v52  ;;  %v5475_v54 = vpop.f32.mrf.mxu0  ;;  %v5477_v56 = vpop.f32.mrf.mxu1 }
  0xf0   :  { %8955 = vst [vmem:[#allocation42_spill] sm:$0xff] %v5473_v53 }
  0xf1   :  { %8956 = vst [vmem:[#allocation43_spill] sm:$0xff] %v5475_v54 }
  0xf2   :  { %8957 = vst [vmem:[#allocation44_spill] sm:$0xff] %v5477_v56 }
  0xf6   :  { %v5479_v57 = vpop.f32.mrf.mxu2  ;;  %v5481_v58 = vpop.f32.mrf.mxu3 }
  0xf7   :  { %8958 = vst [vmem:[#allocation45_spill] sm:$0xff] %v5479_v57  ;;  %v5483_v59 = vpop.f32.mrf.mxu0  ;;  %v5485_v61 = vpop.f32.mrf.mxu1 }
  0xf8   :  { %8959 = vst [vmem:[#allocation46_spill] sm:$0xff] %v5481_v58 }
  0xf9   :  { %8960 = vst [vmem:[#allocation47_spill] sm:$0xff] %v5483_v59 }
  0xfa   :  { %8961 = vst [vmem:[#allocation48_spill] sm:$0xff] %v5485_v61 }
  0xfe   :  { %v5487_v62 = vpop.f32.mrf.mxu2  ;;  %v5489_v63 = vpop.f32.mrf.mxu3 }
  0xff   :  { %8962 = vst [vmem:[#allocation49_spill] sm:$0xff] %v5487_v62  ;;  %v5491_v0 = vpop.f32.mrf.mxu0  ;;  %v5493_v25 = vpop.f32.mrf.mxu1 }
 0x100   :  { %8963 = vst [vmem:[#allocation50_spill] sm:$0xff] %v5489_v63 }
 0x101   :  { %8964 = vst [vmem:[#allocation51_spill] sm:$0xff] %v5491_v0 }
 0x102   :  { %8965 = vst [vmem:[#allocation52_spill] sm:$0xff] %v5493_v25 }
 0x106   :  { %v5495_v30 = vpop.f32.mrf.mxu3  ;;  %v5501_v45 = vpop.f32.mrf.mxu2 }
 0x107   :  { %8966 = vst [vmem:[#allocation53_spill] sm:$0xff] %v5495_v30  ;;  %v5497_v35 = vpop.f32.mrf.mxu0  ;;  %v5499_v40 = vpop.f32.mrf.mxu1 }
 0x108   :  { %8967 = vst [vmem:[#allocation54_spill] sm:$0xff] %v5497_v35 }
 0x109   :  { %8968 = vst [vmem:[#allocation55_spill] sm:$0xff] %v5499_v40 }
 0x10a   :  { %8969 = vst [vmem:[#allocation56_spill] sm:$0xff] %v5501_v45  ;;  %v5532_v45 = vperm.slane %v108_v2, 3 }
 0x10c   :  { %8981 = vst [vmem:[#allocation68_spill] sm:$0xff] %v5532_v45 }
 0x10e   :  { %v5503_v50 = vpop.f32.mrf.mxu3  ;;  %v5509_v13 = vpop.f32.mrf.mxu2 }
 0x10f   :  { %8970 = vst [vmem:[#allocation57_spill] sm:$0xff] %v5503_v50  ;;  %v5505_v55 = vpop.f32.mrf.mxu0  ;;  %v5507_v60 = vpop.f32.mrf.mxu1 }
 0x110   :  { %8971 = vst [vmem:[#allocation58_spill] sm:$0xff] %v5505_v55 }
 0x111   :  { %8972 = vst [vmem:[#allocation59_spill] sm:$0xff] %v5507_v60  ;;  %v136_v60 = vadd.f32 %v5377_v6, %v5520_v4 }
 0x112   :  { %8973 = vst [vmem:[#allocation60_spill] sm:$0xff] %v5509_v13 }
 0x116   :  { %v5511_v1 = vpop.f32.mrf.mxu3  ;;  %v5524_v50 = vpop.f32.mrf.mxu2 }
 0x117   :  { %8974 = vst [vmem:[#allocation61_spill] sm:$0xff] %v5511_v1  ;;  %v5516_v5 = vpop.f32.mrf.mxu0  ;;  %v5518_v3 = vpop.f32.mrf.mxu1  ;;  %v201_v1 = vadd.f32 %v5379_v7, %v5522_v8  ;;  %v5920_v8 = vld [vmem:[%s8760_s2 + $0x20] sm:$0xff] }
 0x118   :  { %8975 = vst [vmem:[#allocation62_spill] sm:$0xff] %v5516_v5 }
 0x119   :  { %8976 = vst [vmem:[#allocation63_spill] sm:$0xff] %v5518_v3 }
 0x11a   :  { %8979 = vst [vmem:[#allocation66_spill] sm:$0xff] %v5524_v50  ;;  %v331_v50 = vadd.f32 %v5393_v10, %v5532_v45 }
 0x11b   :  { %9000 = vst [vmem:[#allocation87_spill] sm:$0xff] %v5920_v8 }
 0x11e   :  { %v5530_v55 = vpop.f32.mrf.mxu3  ;;  %v5536_v25 = vpop.f32.mrf.mxu2 }
 0x11f   :  { %8980 = vst [vmem:[#allocation67_spill] sm:$0xff] %v5530_v55  ;;  %v513_v13 = vpop.f32.mrf.mxu0  ;;  %v533_v40 = vpop.f32.mrf.mxu1 }
 0x120   :  { %v556_v35 = vadd.f32 %v513_v13, %v136_v60  ;;  %v557_v5 = vadd.f32 %v533_v40, %v201_v1  ;;  %8982 = vst [vmem:[#allocation69_spill] sm:$0xff] %v5536_v25  ;;  %v5538_v40 = vperm.slane %v108_v2, 2 }
 0x122   :  { %v4310_v3 = vmul.f32 -1.442695, %v556_v35  ;;  %v4311_v30 = vmul.f32 -1.442695, %v557_v5  ;;  %8983 = vst [vmem:[#allocation70_spill] sm:$0xff] %v5538_v40  ;;  %v266_v10 = vadd.f32 %v5391_v9, %v5538_v40 }
 0x124   :  { %4361 = vpow2.f32 %v4310_v3 }
 0x125   :  { %4363 = vpow2.f32 %v4311_v30 }
 0x126   :  { %v592_v6 = vpop.f32.mrf.mxu3  ;;  %v553_v35 = vpop.f32.mrf.mxu2 }
 0x127   :  { %v595_v0 = vadd.f32 %v592_v6, %v331_v50  ;;  %v558_v5 = vadd.f32 %v553_v35, %v266_v10 }
 0x129   :  { %v4312_v7 = vmul.f32 -1.442695, %v595_v0 }
 0x12a   :  { %v4362_v62 = vpop.eup %4361 }
 0x12b   :  { %v4364_v55 = vpop.eup %4363  ;;  %v599_v63 = vadd.f32 1.0, %v4362_v62  ;;  %4365 = vpow2.f32 %v4312_v7 }
 0x12c   :  { %v618_v60 = vadd.f32 1.0, %v4364_v55 }
 0x12d   :  { %4367 = vrcp.f32 %v599_v63  ;;  %v611_v7 = vand.u32 2147483648, %v599_v63  ;;  %v609_v25 = vand.u32 2147483647, %v599_v63  ;;  %vm605_vm2 = vweird.f32 %v599_v63 }
 0x12e   :  { %4369 = vrcp.f32 %v618_v60  ;;  %v630_v55 = vand.u32 2147483648, %v618_v60  ;;  %v628_v59 = vand.u32 2147483647, %v618_v60  ;;  %vm624_vm3 = vweird.f32 %v618_v60 }
 0x12f   :  { %v612_v35 = vor.u32 1.1754944e-38, %v611_v7  ;;  %vm610_vm5 = vcmp.eq.f32.partialorder %v609_v25, 8.507059e+37 }
 0x130   :  { %v631_v58 = vor.u32 1.1754944e-38, %v630_v55  ;;  %vm629_vm7 = vcmp.eq.f32.partialorder %v628_v59, 8.507059e+37 }
 0x131   :  { %v4366_v13 = vpop.eup %4365 }
 0x132   :  { %v638_v30 = vadd.f32 1.0, %v4366_v13 }
 0x133   :  { %v4368_v1 = vpop.eup %4367 }
 0x134   :  { %v4370_v3 = vpop.eup %4369  ;;  %v601_v50 = vmul.f32 %v4368_v1, %v599_v63  ;;  %4371 = vrcp.f32 %v638_v30  ;;  %vm606_vm0 = vweird.f32 %v4368_v1  ;;  %vm644_vm9 = vweird.f32 %v638_v30 }
 0x135   :  { %v620_v0 = vmul.f32 %v4370_v3, %v618_v60  ;;  %4373 = vtanh.f32 %v558_v5  ;;  %vm625_vm1 = vweird.f32 %v4370_v3  ;;  %vm607_vm4 = vmor %vm605_vm2, %vm606_vm0  ;;  %v648_v60 = vand.u32 2147483647, %v638_v30 }
 0x136   :  { %v602_v6 = vsub.f32 1.0, %v601_v50  ;;  %vm626_vm6 = vmor %vm624_vm3, %vm625_vm1 }
 0x137   :  { %v621_v62 = vsub.f32 1.0, %v620_v0  ;;  %vm649_vm11 = vcmp.eq.f32.partialorder %v648_v60, 8.507059e+37  ;;  %v5644_v60 = vld [vmem:[%s8760_s2 + $0x180] sm:$0xff] }
 0x138   :  { %v603_v2 = vmul.f32 %v4368_v1, %v602_v6  ;;  %8989 = vst [vmem:[#allocation76_spill] sm:$0xff] %v5644_v60 }
 0x139   :  { %v622_v61 = vmul.f32 %v4370_v3, %v621_v62 }
 0x13a   :  { %v4372_v57 = vpop.eup %4371  ;;  %v604_v9 = vadd.f32 %v4368_v1, %v603_v2 }
 0x13b   :  { %v623_v13 = vadd.f32 %v4370_v3, %v622_v61  ;;  %v640_v10 = vmul.f32 %v4372_v57, %v638_v30  ;;  %v4374_v5 = vpop.eup %4373  ;;  %vm645_vm8 = vweird.f32 %v4372_v57  ;;  %v650_v61 = vand.u32 2147483648, %v638_v30  ;;  %v5577_v30 = vld [vmem:[%s8760_s2 + $0x1e8] sm:$0xff] }
 0x13c   :  { %v608_v50 = vsel %vm607_vm4, %v4368_v1, %v604_v9  ;;  %vm646_vm10 = vmor %vm644_vm9, %vm645_vm8  ;;  %8984 = vst [vmem:[#allocation71_spill] sm:$0xff] %v5577_v30  ;;  %994 = vmatpush.msrb.mxu1 %v5577_v30 }
 0x13d   :  { %v613_v0 = vsel %vm610_vm5, %v612_v35, %v608_v50  ;;  %v627_v6 = vsel %vm626_vm6, %v4370_v3, %v623_v13  ;;  %v641_v56 = vsub.f32 1.0, %v640_v10  ;;  %v651_v1 = vor.u32 1.1754944e-38, %v650_v61  ;;  %v5582_v35 = vld [vmem:[%s8760_s2 + $0x1f0] sm:$0xff]  ;;  %v5589_v13 = vld [vmem:[%s8760_s2 + $0x1f8] sm:$0xff]  ;;  %v5596_v10 = vld [vmem:[%s8760_s2 + $0x1c0] sm:$0xff] }
 0x13e   :  { %v632_v62 = vsel %vm629_vm7, %v631_v58, %v627_v6  ;;  %v655_v54 = vmul.f32 %v4374_v5, %v613_v0  ;;  %8985 = vst [vmem:[#allocation72_spill] sm:$0xff] %v5582_v35  ;;  %1014 = vmatpush.msrb.mxu2 %v5582_v35  ;;  %1053 = vmatpush.msrb.mxu3 %v5589_v13  ;;  %v5601_v50 = vld [vmem:[%s8760_s2 + $0x1c8] sm:$0xff]  ;;  %v5606_v5 = vld [vmem:[%s8760_s2 + $0x1d0] sm:$0xff]  ;;  %v5613_v0 = vld [vmem:[%s8760_s2 + $0x1d8] sm:$0xff] }
 0x13f   :  { %v654_v52 = vmul.f32 0.0, %v632_v62  ;;  %v642_v53 = vmul.f32 %v4372_v57, %v641_v56  ;;  %8986 = vst [vmem:[#allocation73_spill] sm:$0xff] %v5589_v13  ;;  %995 = vmatpush.msrb.mxu1 %v5601_v50  ;;  %v5620_v6 = vld [vmem:[%s8760_s2 + $0x1a0] sm:$0xff]  ;;  %v5625_v62 = vld [vmem:[%s8760_s2 + $0x1a8] sm:$0xff]  ;;  %v5637_v61 = vld [vmem:[%s8760_s2 + $0x1b8] sm:$0xff] }
 0x140   :  { %8987 = vst [vmem:[#allocation74_spill] sm:$0xff] %v5596_v10  ;;  %1015 = vmatpush.msrb.mxu2 %v5606_v5  ;;  %1054 = vmatpush.msrb.mxu3 %v5613_v0 }
 0x141   :  { %v5542_v2 = vadd.f32 %v655_v54, %v654_v52  ;;  %v643_v63 = vadd.f32 %v4372_v57, %v642_v53  ;;  %8988 = vst [vmem:[#allocation75_spill] sm:$0xff] %v5625_v62  ;;  %996 = vmatpush.msrb.mxu1 %v5625_v62 }
 0x142   :  { %1055 = vmatpush.msrb.mxu3 %v5637_v61 }
 0x143   :  { %4375 = vtanh.f32 %v5542_v2  ;;  %v647_v25 = vsel %vm646_vm10, %v4372_v57, %v643_v63  ;;  %v5572_v57 = vld [vmem:[%s8760_s2 + $0x1e0] sm:$0xff]  ;;  %v5630_v63 = vld [vmem:[%s8760_s2 + $0x1b0] sm:$0xff] }
 0x144   :  { %v652_v59 = vsel %vm649_vm11, %v651_v1, %v647_v25  ;;  %974 = vmatpush.msrb.mxu0 %v5572_v57  ;;  %1016 = vmatpush.msrb.mxu2 %v5630_v63  ;;  %v5649_v25 = vld [vmem:[%s8760_s2 + $0x188] sm:$0xff]  ;;  %v5654_v1 = vld [vmem:[%s8760_s2 + $0x190] sm:$0xff] }
 0x145   :  { %997 = vmatpush.msrb.mxu1 %v5649_v25 }
 0x146   :  { %975 = vmatpush.msrb.mxu0 %v5596_v10  ;;  %1017 = vmatpush.msrb.mxu2 %v5654_v1 }
 0x148   :  { %976 = vmatpush.msrb.mxu0 %v5620_v6 }
 0x149   :  { %v4376_v3 = vpop.eup %4375 }
 0x14a   :  { %v658_v7 = vmul.f32 %v4376_v3, %v652_v59  ;;  %977 = vmatpush.msrb.mxu0 %v5644_v60  ;;  %v5661_v3 = vld [vmem:[%s8760_s2 + $0x198] sm:$0xff]  ;;  %v5668_v59 = vld [vmem:[%s8760_s2 + $0x160] sm:$0xff] }
 0x14b   :  { %8990 = vst [vmem:[#allocation77_spill] sm:$0xff] %v5661_v3  ;;  %1056 = vmatpush.msrb.mxu3 %v5661_v3 }
 0x14c   :  { %v660_v58 = vrot.slane %v658_v7, 1  ;;  %v661_v55 = vrot.slane %v658_v7, 2  ;;  %v662_v9 = vrot.slane %v658_v7, 3  ;;  %674 = vst [vmem:[%s8762_s4] sm:$0x1] %v658_v7  ;;  %751 = vmatmul.f32.vlgmr.msra.gmra.mxu0 %v658_v7  ;;  %771 = vmatmul.f32.vlgmr.msra.gmra.mxu1 %v658_v7  ;;  %v663_v52 = vrot.slane %v658_v7, 4 }
 0x14d   :  { %791 = vmatmul.f32.vlgmr.msra.gmra.mxu2 %v658_v7  ;;  %830 = vmatmul.f32.vlgmr.msra.gmra.mxu3 %v658_v7  ;;  %v664_v53 = vrot.slane %v658_v7, 5  ;;  %v665_v54 = vrot.slane %v658_v7, 6  ;;  %v666_v56 = vrot.slane %v658_v7, 7  ;;  %8991 = vst [vmem:[#allocation78_spill] sm:$0xff] %v5668_v59  ;;  %v5673_v7 = vld [vmem:[%s8760_s2 + $0x168] sm:$0xff] }
 0x14e   :  { %675 = vst [vmem:[%s8762_s4 + $0x10] sm:$0x1] %v660_v58  ;;  %v5678_v58 = vld [vmem:[%s8760_s2 + $0x170] sm:$0xff]  ;;  %978 = vmatpush.msrb.mxu0 %v5668_v59  ;;  %998 = vmatpush.msrb.mxu1 %v5673_v7 }
 0x14f   :  { %676 = vst [vmem:[%s8762_s4 + $0x20] sm:$0x1] %v661_v55  ;;  %v5685_v55 = vld [vmem:[%s8760_s2 + $0x178] sm:$0xff]  ;;  %1018 = vmatpush.msrb.mxu2 %v5678_v58 }
 0x150   :  { %677 = vst [vmem:[%s8762_s4 + $0x30] sm:$0x1] %v662_v9  ;;  %1057 = vmatpush.msrb.mxu3 %v5685_v55  ;;  %v5692_v9 = vld [vmem:[%s8760_s2 + $0x140] sm:$0xff] }
 0x151   :  { %678 = vst [vmem:[%s8762_s4 + $0x40] sm:$0x1] %v663_v52  ;;  %v5697_v52 = vld [vmem:[%s8760_s2 + $0x148] sm:$0xff]  ;;  %979 = vmatpush.msrb.mxu0 %v5692_v9 }
 0x152   :  { %679 = vst [vmem:[%s8762_s4 + $0x50] sm:$0x1] %v664_v53  ;;  %v5702_v53 = vld [vmem:[%s8760_s2 + $0x150] sm:$0xff]  ;;  %999 = vmatpush.msrb.mxu1 %v5697_v52 }
 0x153   :  { %680 = vst [vmem:[%s8762_s4 + $0x60] sm:$0x1] %v665_v54  ;;  %v5709_v54 = vld [vmem:[%s8760_s2 + $0x158] sm:$0xff]  ;;  %1019 = vmatpush.msrb.mxu2 %v5702_v53  ;;  %980 = vmatpush.msrb.mxu0 %v5720_v49 }
 0x154   :  { %681 = vst [vmem:[%s8762_s4 + $0x70] sm:$0x1] %v666_v56  ;;  %v139_v56 = vadd.f32 %v5397_v11, %v5520_v4  ;;  %1058 = vmatpush.msrb.mxu3 %v5709_v54  ;;  %v5730_v11 = vld [vmem:[%s8760_s2 + $0x130] sm:$0xff]  ;;  %1000 = vmatpush.msrb.mxu1 %v5725_v47 }
 0x155   :  { %8992 = vst [vmem:[#allocation79_spill] sm:$0xff] %v5673_v7  ;;  %1020 = vmatpush.msrb.mxu2 %v5730_v11  ;;  %981 = vmatpush.msrb.mxu0 %v5744_v43  ;;  %v5930_v4 = vld [vmem:[%s8760_s2 + $0x30] sm:$0xff] }
 0x156   :  { %1059 = vmatpush.msrb.mxu3 %v5737_v46  ;;  %1001 = vmatpush.msrb.mxu1 %v5749_v41  ;;  %9002 = vst [vmem:[#allocation89_spill] sm:$0xff] %v5930_v4 }
 0x157   :  { %1021 = vmatpush.msrb.mxu2 %v5754_v39 }
 0x158   :  { %1002 = vmatpush.msrb.mxu1 %v5773_v37 }
 0x15a   :  { %1003 = vmatpush.msrb.mxu1 %v5797_v36 }
 0x1c9   :  { %v752_v12 = vpop.f32.mrf.mxu0  ;;  %v772_v48 = vpop.f32.mrf.mxu1 }
 0x1ca   :  { %v795_v44 = vadd.f32 %v752_v12, %v139_v56  ;;  %v796_v42 = vadd.f32 %v772_v48, %v204_v51  ;;  %v5761_v48 = vld [vmem:[%s8760_s2 + $0x118] sm:$0xff]  ;;  %v5768_v12 = vld [vmem:[%s8760_s2 + $0xe0] sm:$0xff] }
 0x1cb   :  { %1060 = vmatpush.msrb.mxu3 %v5761_v48  ;;  %982 = vmatpush.msrb.mxu0 %v5768_v12 }
 0x1cc   :  { %v4313_v51 = vmul.f32 -1.442695, %v795_v44  ;;  %v4314_v56 = vmul.f32 -1.442695, %v796_v42  ;;  %v5780_v42 = vld [vmem:[%s8760_s2 + $0xf0] sm:$0xff]  ;;  %v5785_v44 = vld [vmem:[%s8760_s2 + $0xf8] sm:$0xff] }
 0x1cd   :  { %1022 = vmatpush.msrb.mxu2 %v5780_v42  ;;  %1061 = vmatpush.msrb.mxu3 %v5785_v44 }
 0x1ce   :  { %4377 = vpow2.f32 %v4313_v51  ;;  %v334_v51 = vadd.f32 %v5409_v15, %v5532_v45  ;;  %983 = vmatpush.msrb.mxu0 %v5792_v38  ;;  %v5823_v15 = vld [vmem:[%s8760_s2 + $0xa8] sm:$0xff] }
 0x1cf   :  { %4379 = vpow2.f32 %v4314_v56  ;;  %1023 = vmatpush.msrb.mxu2 %v5802_v34  ;;  %1062 = vmatpush.msrb.mxu3 %v5811_v32  ;;  %v5828_v56 = vld [vmem:[%s8760_s2 + $0xb0] sm:$0xff] }
 0x1d0   :  { %v831_v33 = vpop.f32.mrf.mxu3  ;;  %984 = vmatpush.msrb.mxu0 %v5818_v31  ;;  %1004 = vmatpush.msrb.mxu1 %v5823_v15 }
 0x1d1   :  { %v834_v29 = vadd.f32 %v831_v33, %v334_v51  ;;  %1024 = vmatpush.msrb.mxu2 %v5828_v56  ;;  %1063 = vmatpush.msrb.mxu3 %v5835_v27  ;;  %v5847_v33 = vld [vmem:[%s8760_s2 + $0x88] sm:$0xff]  ;;  %v5852_v51 = vld [vmem:[%s8760_s2 + $0x90] sm:$0xff] }
 0x1d2   :  { %985 = vmatpush.msrb.mxu0 %v5842_v28  ;;  %1005 = vmatpush.msrb.mxu1 %v5847_v33 }
 0x1d3   :  { %v4315_v26 = vmul.f32 -1.442695, %v834_v29  ;;  %1025 = vmatpush.msrb.mxu2 %v5852_v51  ;;  %1064 = vmatpush.msrb.mxu3 %v5859_v24  ;;  %v5871_v29 = vld [vmem:[%s8760_s2 + $0x68] sm:$0xff] }
 0x1d4   :  { %v4378_v22 = vpop.eup %4377  ;;  %8993 = vst [vmem:[#allocation80_spill] sm:$0xff] %v5871_v29  ;;  %986 = vmatpush.msrb.mxu0 %v5866_v23  ;;  %1006 = vmatpush.msrb.mxu1 %v5871_v29 }
 0x1d5   :  { %v4380_v20 = vpop.eup %4379  ;;  %v5878_v18 = vadd.f32 1.0, %v4378_v22  ;;  %4381 = vpow2.f32 %v4315_v26  ;;  %1026 = vmatpush.msrb.mxu2 %v5876_v21  ;;  %1065 = vmatpush.msrb.mxu3 %v5885_v19  ;;  %v5894_v22 = vld [vmem:[%s8760_s2 + $0x40] sm:$0xff]  ;;  %v5899_v26 = vld [vmem:[%s8760_s2 + $0x48] sm:$0xff] }
 0x1d6   :  { %v5887_v45 = vadd.f32 1.0, %v4380_v20  ;;  %8996 = vst [vmem:[#allocation83_spill] sm:$0xff] %v5894_v22  ;;  %987 = vmatpush.msrb.mxu0 %v5894_v22  ;;  %1007 = vmatpush.msrb.mxu1 %v5899_v26  ;;  %v5912_v20 = vld [vmem:[%s8760_s2 + $0x58] sm:$0xff] }
 0x1d7   :  { %8997 = vst [vmem:[#allocation84_spill] sm:$0xff] %v5899_v26  ;;  %4383 = vrcp.f32 %v5878_v18  ;;  %1027 = vmatpush.msrb.mxu2 %v5904_v17  ;;  %1066 = vmatpush.msrb.mxu3 %v5912_v20  ;;  %v792_v17 = vpop.f32.mrf.mxu2  ;;  %v5944_v26 = vld [vmem:[%s8760_s2] sm:$0xff]  ;;  %vm844_vm14 = vweird.f32 %v5878_v18 }
 0x1d8   :  { %8999 = vst [vmem:[#allocation86_spill] sm:$0xff] %v5912_v20  ;;  %4385 = vrcp.f32 %v5887_v45  ;;  %988 = vmatpush.msrb.mxu0 %v5920_v8  ;;  %1008 = vmatpush.msrb.mxu1 %v5925_v16  ;;  %v5937_v20 = vld [vmem:[%s8760_s2 + $0x38] sm:$0xff]  ;;  %v5949_v8 = vld [vmem:[%s8760_s2 + $0x8] sm:$0xff]  ;;  %v5954_v16 = vld [vmem:[%s8760_s2 + $0x10] sm:$0xff]  ;;  %vm863_vm15 = vweird.f32 %v5887_v45 }
 0x1d9   :  { %9003 = vst [vmem:[#allocation90_spill] sm:$0xff] %v5937_v20  ;;  %1028 = vmatpush.msrb.mxu2 %v5930_v4  ;;  %1067 = vmatpush.msrb.mxu3 %v5937_v20  ;;  %v269_v4 = vadd.f32 %v5407_v14, %v5538_v40  ;;  %v5963_v20 = vld [vmem:[%s8760_s2 + $0x18] sm:$0xff] }
 0x1da   :  { %989 = vmatpush.msrb.mxu0 %v5944_v26  ;;  %1009 = vmatpush.msrb.mxu1 %v5949_v8 }
 0x1db   :  { %v4382_v22 = vpop.eup %4381  ;;  %1029 = vmatpush.msrb.mxu2 %v5954_v16  ;;  %1068 = vmatpush.msrb.mxu3 %v5963_v20  ;;  %v797_v29 = vadd.f32 %v792_v17, %v269_v4 }
 0x1dc   :  { %v5965_v19 = vadd.f32 1.0, %v4382_v22  ;;  %1213 = vmatpush.msra.mxu0 %v5572_v57  ;;  %1233 = vmatpush.msra.mxu1 %v5577_v30  ;;  %v850_v30 = vand.u32 2147483648, %v5878_v18 }
 0x1dd   :  { %v4384_v21 = vpop.eup %4383  ;;  %1253 = vmatpush.msra.mxu2 %v5582_v35  ;;  %1292 = vmatpush.msra.mxu3 %v5589_v13  ;;  %v869_v13 = vand.u32 2147483648, %v5887_v45 }
 0x1de   :  { %v4386_v14 = vpop.eup %4385  ;;  %v840_v40 = vmul.f32 %v4384_v21, %v5878_v18  ;;  %4387 = vrcp.f32 %v5965_v19  ;;  %1214 = vmatpush.msra.mxu0 %v5596_v10  ;;  %1234 = vmatpush.msra.mxu1 %v5601_v50  ;;  %vm845_vm12 = vweird.f32 %v4384_v21  ;;  %v848_v10 = vand.u32 2147483647, %v5878_v18 }
 0x1df   :  { %v859_v22 = vmul.f32 %v4386_v14, %v5887_v45  ;;  %1254 = vmatpush.msra.mxu2 %v5606_v5  ;;  %1293 = vmatpush.msra.mxu3 %v5613_v0  ;;  %4389 = vtanh.f32 %v797_v29  ;;  %vm864_vm13 = vweird.f32 %v4386_v14  ;;  %vm846_vm0 = vmor %vm844_vm14, %vm845_vm12  ;;  %v870_v18 = vor.u32 1.1754944e-38, %v869_v13 }
 0x1e0   :  { %v841_v17 = vsub.f32 1.0, %v840_v40  ;;  %1215 = vmatpush.msra.mxu0 %v5620_v6  ;;  %1235 = vmatpush.msra.mxu1 %v5625_v62  ;;  %vm865_vm1 = vmor %vm863_vm15, %vm864_vm13  ;;  %vm849_vm2 = vcmp.eq.f32.partialorder %v848_v10, 8.507059e+37  ;;  %vm883_vm5 = vweird.f32 %v5965_v19 }
 0x1e1   :  { %v860_v4 = vsub.f32 1.0, %v859_v22  ;;  %1255 = vmatpush.msra.mxu2 %v5630_v63  ;;  %1294 = vmatpush.msra.mxu3 %v5637_v61  ;;  %v867_v22 = vand.u32 2147483647, %v5887_v45 }
 0x1e2   :  { %v842_v35 = vmul.f32 %v4384_v21, %v841_v17  ;;  %1216 = vmatpush.msra.mxu0 %v5644_v60  ;;  %1236 = vmatpush.msra.mxu1 %v5649_v25  ;;  %v851_v17 = vor.u32 1.1754944e-38, %v850_v30 }
 0x1e3   :  { %v861_v40 = vmul.f32 %v4386_v14, %v860_v4  ;;  %1256 = vmatpush.msra.mxu2 %v5654_v1  ;;  %1295 = vmatpush.msra.mxu3 %v5661_v3  ;;  %vm868_vm3 = vcmp.eq.f32.partialorder %v867_v22, 8.507059e+37  ;;  %v9004_v22 = vld [vmem:[#allocation80_spill] sm:$0xff] }
 0x1e4   :  { %v5990_v29 = vpop.eup %4387  ;;  %v843_v62 = vadd.f32 %v4384_v21, %v842_v35  ;;  %1217 = vmatpush.msra.mxu0 %v5668_v59  ;;  %1237 = vmatpush.msra.mxu1 %v5673_v7 }
 0x1e5   :  { %v862_v4 = vadd.f32 %v4386_v14, %v861_v40  ;;  %v879_v60 = vmul.f32 %v5990_v29, %v5965_v19  ;;  %1257 = vmatpush.msra.mxu2 %v5678_v58  ;;  %1296 = vmatpush.msra.mxu3 %v5685_v55  ;;  %v4390_v45 = vpop.eup %4389  ;;  %vm884_vm4 = vweird.f32 %v5990_v29 }
 0x1e6   :  { %v847_v35 = vsel %vm846_vm0, %v4384_v21, %v843_v62  ;;  %1218 = vmatpush.msra.mxu0 %v5692_v9  ;;  %1238 = vmatpush.msra.mxu1 %v5697_v52  ;;  %vm885_vm6 = vmor %vm883_vm5, %vm884_vm4 }
 0x1e7   :  { %v852_v3 = vsel %vm849_vm2, %v851_v17, %v847_v35  ;;  %v866_v30 = vsel %vm865_vm1, %v4386_v14, %v862_v4  ;;  %v880_v40 = vsub.f32 1.0, %v879_v60  ;;  %1258 = vmatpush.msra.mxu2 %v5702_v53  ;;  %1297 = vmatpush.msra.mxu3 %v5709_v54  ;;  %v887_v60 = vand.u32 2147483647, %v5965_v19 }
 0x1e8   :  { %v871_v59 = vsel %vm868_vm3, %v870_v18, %v866_v30  ;;  %v894_v7 = vmul.f32 %v4390_v45, %v852_v3  ;;  %1219 = vmatpush.msra.mxu0 %v5720_v49  ;;  %1239 = vmatpush.msra.mxu1 %v5725_v47  ;;  %v9005_v45 = vld [vmem:[#allocation81_spill] sm:$0xff]  ;;  %v9006_v30 = vld [vmem:[#allocation82_spill] sm:$0xff] }
 0x1e9   :  { %v893_v21 = vmul.f32 %v871_v59, %v5542_v2  ;;  %v881_v13 = vmul.f32 %v5990_v29, %v880_v40  ;;  %1259 = vmatpush.msra.mxu2 %v5730_v11  ;;  %1298 = vmatpush.msra.mxu3 %v5737_v46  ;;  %v889_v2 = vand.u32 2147483648, %v5965_v19  ;;  %vm888_vm7 = vcmp.eq.f32.partialorder %v887_v60, 8.507059e+37  ;;  %v9010_v60 = vld [vmem:[#allocation86_spill] sm:$0xff] }
 0x1ea   :  { %1220 = vmatpush.msra.mxu0 %v5744_v43  ;;  %1240 = vmatpush.msra.mxu1 %v5749_v41 }
 0x1eb   :  { %v6014_v10 = vadd.f32 %v894_v7, %v893_v21  ;;  %v882_v62 = vadd.f32 %v5990_v29, %v881_v13  ;;  %1260 = vmatpush.msra.mxu2 %v5754_v39  ;;  %1299 = vmatpush.msra.mxu3 %v5761_v48  ;;  %v890_v59 = vor.u32 1.1754944e-38, %v889_v2  ;;  %v9007_v21 = vld [vmem:[#allocation83_spill] sm:$0xff]  ;;  %v9008_v13 = vld [vmem:[#allocation84_spill] sm:$0xff]  ;;  %v9009_v2 = vld [vmem:[#allocation85_spill] sm:$0xff] }
 0x1ec   :  { %1221 = vmatpush.msra.mxu0 %v5768_v12  ;;  %1241 = vmatpush.msra.mxu1 %v5773_v37 }
 0x1ed   :  { %4391 = vtanh.f32 %v6014_v10  ;;  %1261 = vmatpush.msra.mxu2 %v5780_v42  ;;  %1300 = vmatpush.msra.mxu3 %v5785_v44  ;;  %v886_v3 = vsel %vm885_vm6, %v5990_v29, %v882_v62 }
 0x1ee   :  { %1222 = vmatpush.msra.mxu0 %v5792_v38  ;;  %1242 = vmatpush.msra.mxu1 %v5797_v36  ;;  %v891_v7 = vsel %vm888_vm7, %v890_v59, %v886_v3  ;;  %v9011_v3 = vld [vmem:[#allocation87_spill] sm:$0xff]  ;;  %v9012_v59 = vld [vmem:[#allocation88_spill] sm:$0xff] }
 0x1ef   :  { %1262 = vmatpush.msra.mxu2 %v5802_v34  ;;  %1301 = vmatpush.msra.mxu3 %v5811_v32 }
 0x1f0   :  { %1223 = vmatpush.msra.mxu0 %v5818_v31  ;;  %1243 = vmatpush.msra.mxu1 %v5823_v15 }
 0x1f1   :  { %1263 = vmatpush.msra.mxu2 %v5828_v56  ;;  %1302 = vmatpush.msra.mxu3 %v5835_v27 }
 0x1f2   :  { %1224 = vmatpush.msra.mxu0 %v5842_v28  ;;  %1244 = vmatpush.msra.mxu1 %v5847_v33 }
 0x1f3   :  { %v4392_v19 = vpop.eup %4391  ;;  %1264 = vmatpush.msra.mxu2 %v5852_v51  ;;  %1303 = vmatpush.msra.mxu3 %v5859_v24 }
 0x1f4   :  { %v897_v14 = vmul.f32 %v4392_v19, %v891_v7  ;;  %1225 = vmatpush.msra.mxu0 %v5866_v23  ;;  %1245 = vmatpush.msra.mxu1 %v9004_v22  ;;  %v9013_v19 = vld [vmem:[#allocation89_spill] sm:$0xff]  ;;  %v9014_v7 = vld [vmem:[#allocation90_spill] sm:$0xff] }
 0x1f5   :  { %1265 = vmatpush.msra.mxu2 %v9005_v45  ;;  %1304 = vmatpush.msra.mxu3 %v9006_v30 }
 0x1f6   :  { %v899_v29 = vrot.slane %v897_v14, 1  ;;  %v900_v17 = vrot.slane %v897_v14, 2  ;;  %v901_v4 = vrot.slane %v897_v14, 3  ;;  %913 = vst [vmem:[%s8762_s4 + $0x1] sm:$0x1] %v897_v14  ;;  %990 = vmatmul.f32.vlgmr.msrb.gmra.mxu0 %v897_v14  ;;  %1010 = vmatmul.f32.vlgmr.msrb.gmra.mxu1 %v897_v14  ;;  %v902_v18 = vrot.slane %v897_v14, 4 }
 0x1f7   :  { %1030 = vmatmul.f32.vlgmr.msrb.gmra.mxu2 %v897_v14  ;;  %1069 = vmatmul.f32.vlgmr.msrb.gmra.mxu3 %v897_v14  ;;  %v903_v35 = vrot.slane %v897_v14, 5  ;;  %v904_v40 = vrot.slane %v897_v14, 6  ;;  %v905_v62 = vrot.slane %v897_v14, 7  ;;  %v9015_v14 = vld [vmem:[#allocation71_spill] sm:$0xff] }
 0x1f8   :  { %914 = vst [vmem:[%s8762_s4 + $0x11] sm:$0x1] %v899_v29  ;;  %1226 = vmatpush.msra.mxu0 %v9007_v21  ;;  %1246 = vmatpush.msra.mxu1 %v9008_v13  ;;  %v9016_v29 = vld [vmem:[#allocation72_spill] sm:$0xff] }
 0x1f9   :  { %915 = vst [vmem:[%s8762_s4 + $0x21] sm:$0x1] %v900_v17  ;;  %1266 = vmatpush.msra.mxu2 %v9009_v2  ;;  %1305 = vmatpush.msra.mxu3 %v9010_v60  ;;  %v9017_v17 = vld [vmem:[#allocation73_spill] sm:$0xff] }
 0x1fa   :  { %916 = vst [vmem:[%s8762_s4 + $0x31] sm:$0x1] %v901_v4  ;;  %1227 = vmatpush.msra.mxu0 %v9011_v3  ;;  %1247 = vmatpush.msra.mxu1 %v9012_v59  ;;  %v9018_v4 = vld [vmem:[#allocation74_spill] sm:$0xff] }
 0x1fb   :  { %917 = vst [vmem:[%s8762_s4 + $0x41] sm:$0x1] %v902_v18  ;;  %1267 = vmatpush.msra.mxu2 %v9013_v19  ;;  %1306 = vmatpush.msra.mxu3 %v9014_v7  ;;  %v9019_v18 = vld [vmem:[#allocation75_spill] sm:$0xff] }
 0x1fc   :  { %918 = vst [vmem:[%s8762_s4 + $0x51] sm:$0x1] %v903_v35  ;;  %1228 = vmatpush.msra.mxu0 %v5944_v26  ;;  %1248 = vmatpush.msra.mxu1 %v5949_v8  ;;  %v9021_v35 = vld [vmem:[#allocation77_spill] sm:$0xff] }
 0x1fd   :  { %919 = vst [vmem:[%s8762_s4 + $0x61] sm:$0x1] %v904_v40  ;;  %1268 = vmatpush.msra.mxu2 %v5954_v16  ;;  %1307 = vmatpush.msra.mxu3 %v5963_v20 }
 0x1fe   :  { %920 = vst [vmem:[%s8762_s4 + $0x71] sm:$0x1] %v905_v62  ;;  %1452 = vmatpush.msrb.mxu0 %v5572_v57  ;;  %1472 = vmatpush.msrb.mxu1 %v9015_v14  ;;  %v9020_v57 = vld [vmem:[#allocation76_spill] sm:$0xff] }
 0x1ff   :  { %1492 = vmatpush.msrb.mxu2 %v9016_v29  ;;  %1531 = vmatpush.msrb.mxu3 %v9017_v17 }
 0x200   :  { %1453 = vmatpush.msrb.mxu0 %v9018_v4  ;;  %1473 = vmatpush.msrb.mxu1 %v5601_v50  ;;  %v9022_v50 = vld [vmem:[#allocation78_spill] sm:$0xff] }
 0x201   :  { %1493 = vmatpush.msrb.mxu2 %v5606_v5  ;;  %1532 = vmatpush.msrb.mxu3 %v5613_v0  ;;  %v9023_v5 = vld [vmem:[#allocation79_spill] sm:$0xff] }
 0x202   :  { %1454 = vmatpush.msrb.mxu0 %v5620_v6  ;;  %1474 = vmatpush.msrb.mxu1 %v9019_v18 }
 0x203   :  { %1494 = vmatpush.msrb.mxu2 %v5630_v63  ;;  %1533 = vmatpush.msrb.mxu3 %v5637_v61 }
 0x204   :  { %1455 = vmatpush.msrb.mxu0 %v9020_v57  ;;  %1475 = vmatpush.msrb.mxu1 %v5649_v25 }
 0x205   :  { %1495 = vmatpush.msrb.mxu2 %v5654_v1  ;;  %1534 = vmatpush.msrb.mxu3 %v9021_v35 }
 0x206   :  { %1456 = vmatpush.msrb.mxu0 %v9022_v50  ;;  %1476 = vmatpush.msrb.mxu1 %v9023_v5 }
 0x207   :  { %1496 = vmatpush.msrb.mxu2 %v5678_v58  ;;  %1535 = vmatpush.msrb.mxu3 %v5685_v55  ;;  %v9030_v58 = vld [vmem:[#allocation70_spill] sm:$0xff]  ;;  %v9031_v55 = vld [vmem:[#allocation13_spill] sm:$0xff] }
 0x208   :  { %1457 = vmatpush.msrb.mxu0 %v5692_v9  ;;  %1477 = vmatpush.msrb.mxu1 %v5697_v52  ;;  %v272_v9 = vadd.f32 %v9031_v55, %v9030_v58 }
 0x209   :  { %1497 = vmatpush.msrb.mxu2 %v5702_v53  ;;  %1536 = vmatpush.msrb.mxu3 %v5709_v54 }
 0x20a   :  { %1458 = vmatpush.msrb.mxu0 %v5720_v49  ;;  %1478 = vmatpush.msrb.mxu1 %v5725_v47 }
 0x20b   :  { %1498 = vmatpush.msrb.mxu2 %v5730_v11  ;;  %1537 = vmatpush.msrb.mxu3 %v5737_v46  ;;  %v9029_v46 = vld [vmem:[#allocation14_spill] sm:$0xff] }
 0x20c   :  { %1459 = vmatpush.msrb.mxu0 %v5744_v43  ;;  %1479 = vmatpush.msrb.mxu1 %v5749_v41  ;;  %v9028_v43 = vld [vmem:[#allocation68_spill] sm:$0xff] }
 0x20d   :  { %1499 = vmatpush.msrb.mxu2 %v5754_v39  ;;  %1538 = vmatpush.msrb.mxu3 %v5761_v48  ;;  %v337_v47 = vadd.f32 %v9029_v46, %v9028_v43  ;;  %v9033_v46 = vld [vmem:[#allocation16_spill] sm:$0xff] }
 0x20e   :  { %1460 = vmatpush.msrb.mxu0 %v5768_v12  ;;  %1480 = vmatpush.msrb.mxu1 %v5773_v37 }
 0x20f   :  { %1500 = vmatpush.msrb.mxu2 %v5780_v42  ;;  %1539 = vmatpush.msrb.mxu3 %v5785_v44 }
 0x210   :  { %1461 = vmatpush.msrb.mxu0 %v5792_v38  ;;  %1481 = vmatpush.msrb.mxu1 %v5797_v36 }
 0x211   :  { %1501 = vmatpush.msrb.mxu2 %v5802_v34  ;;  %1540 = vmatpush.msrb.mxu3 %v5811_v32 }
 0x212   :  { %1462 = vmatpush.msrb.mxu0 %v5818_v31  ;;  %1482 = vmatpush.msrb.mxu1 %v5823_v15  ;;  %v9027_v31 = vld [vmem:[#allocation12_spill] sm:$0xff] }
 0x213   :  { %1502 = vmatpush.msrb.mxu2 %v5828_v56  ;;  %1541 = vmatpush.msrb.mxu3 %v5835_v27 }
 0x214   :  { %1463 = vmatpush.msrb.mxu0 %v5842_v28  ;;  %1483 = vmatpush.msrb.mxu1 %v5847_v33  ;;  %v9026_v28 = vld [vmem:[#allocation65_spill] sm:$0xff] }
 0x215   :  { %1503 = vmatpush.msrb.mxu2 %v5852_v51  ;;  %1542 = vmatpush.msrb.mxu3 %v5859_v24  ;;  %v9025_v24 = vld [vmem:[#allocation11_spill] sm:$0xff]  ;;  %v207_v32 = vadd.f32 %v9027_v31, %v9026_v28 }
 0x216   :  { %1464 = vmatpush.msrb.mxu0 %v5866_v23  ;;  %1484 = vmatpush.msrb.mxu1 %v9004_v22  ;;  %v9024_v23 = vld [vmem:[#allocation64_spill] sm:$0xff] }
 0x217   :  { %1504 = vmatpush.msrb.mxu2 %v9005_v45  ;;  %1543 = vmatpush.msrb.mxu3 %v9006_v30  ;;  %v142_v27 = vadd.f32 %v9025_v24, %v9024_v23 }
 0x218   :  { %1465 = vmatpush.msrb.mxu0 %v9007_v21  ;;  %1485 = vmatpush.msrb.mxu1 %v9008_v13 }
 0x219   :  { %1505 = vmatpush.msrb.mxu2 %v9009_v2  ;;  %1544 = vmatpush.msrb.mxu3 %v9010_v60 }
 0x21a   :  { %1466 = vmatpush.msrb.mxu0 %v9011_v3  ;;  %1486 = vmatpush.msrb.mxu1 %v9012_v59 }
 0x21b   :  { %1506 = vmatpush.msrb.mxu2 %v9013_v19  ;;  %1545 = vmatpush.msrb.mxu3 %v9014_v7 }
 0x21c   :  { %1467 = vmatpush.msrb.mxu0 %v5944_v26  ;;  %1487 = vmatpush.msrb.mxu1 %v5949_v8 }
 0x21d   :  { %1507 = vmatpush.msrb.mxu2 %v5954_v16  ;;  %1546 = vmatpush.msrb.mxu3 %v5963_v20 }
 0x273   :  { %v991_v34 = vpop.f32.mrf.mxu0  ;;  %v1011_v36 = vpop.f32.mrf.mxu1 }
 0x274   :  { %v1034_v37 = vadd.f32 %v991_v34, %v142_v27  ;;  %v1035_v38 = vadd.f32 %v1011_v36, %v207_v32 }
 0x276   :  { %v4316_v39 = vmul.f32 -1.442695, %v1034_v37  ;;  %v4317_v41 = vmul.f32 -1.442695, %v1035_v38 }
 0x278   :  { %4393 = vpow2.f32 %v4316_v39  ;;  %v9032_v39 = vld [vmem:[#allocation15_spill] sm:$0xff] }
 0x279   :  { %4395 = vpow2.f32 %v4317_v41  ;;  %v145_v41 = vadd.f32 %v9032_v39, %v9024_v23 }
 0x27a   :  { %v1070_v16 = vpop.f32.mrf.mxu3  ;;  %v1031_v25 = vpop.f32.mrf.mxu2 }
 0x27b   :  { %v1073_v49 = vadd.f32 %v1070_v16, %v337_v47  ;;  %v1036_v54 = vadd.f32 %v1031_v25, %v272_v9  ;;  %v210_v47 = vadd.f32 %v9033_v46, %v9026_v28 }
 0x27d   :  { %v4318_v8 = vmul.f32 -1.442695, %v1073_v49 }
 0x27e   :  { %v4394_v0 = vpop.eup %4393 }
 0x27f   :  { %v4396_v6 = vpop.eup %4395  ;;  %v1077_v63 = vadd.f32 1.0, %v4394_v0  ;;  %4397 = vpow2.f32 %v4318_v8 }
 0x280   :  { %v1096_v61 = vadd.f32 1.0, %v4396_v6 }
 0x281   :  { %4399 = vrcp.f32 %v1077_v63  ;;  %v1089_v15 = vand.u32 2147483648, %v1077_v63  ;;  %v1087_v51 = vand.u32 2147483647, %v1077_v63  ;;  %vm1083_vm10 = vweird.f32 %v1077_v63 }
 0x282   :  { %4401 = vrcp.f32 %v1096_v61  ;;  %v1108_v56 = vand.u32 2147483648, %v1096_v61  ;;  %v1106_v20 = vand.u32 2147483647, %v1096_v61  ;;  %vm1102_vm11 = vweird.f32 %v1096_v61 }
 0x283   :  { %v1090_v30 = vor.u32 1.1754944e-38, %v1089_v15  ;;  %vm1088_vm14 = vcmp.eq.f32.partialorder %v1087_v51, 8.507059e+37 }
 0x284   :  { %v1109_v13 = vor.u32 1.1754944e-38, %v1108_v56  ;;  %vm1107_vm15 = vcmp.eq.f32.partialorder %v1106_v20, 8.507059e+37 }
 0x285   :  { %v4398_v1 = vpop.eup %4397 }
 0x286   :  { %v1116_v52 = vadd.f32 1.0, %v4398_v1 }
 0x287   :  { %v4400_v53 = vpop.eup %4399 }
 0x288   :  { %v4402_v11 = vpop.eup %4401  ;;  %v1079_v48 = vmul.f32 %v4400_v53, %v1077_v63  ;;  %4403 = vrcp.f32 %v1116_v52  ;;  %vm1084_vm8 = vweird.f32 %v4400_v53  ;;  %v1128_v18 = vand.u32 2147483648, %v1116_v52 }
 0x289   :  { %v1098_v12 = vmul.f32 %v4402_v11, %v1096_v61  ;;  %4405 = vtanh.f32 %v1036_v54  ;;  %vm1103_vm9 = vweird.f32 %v4402_v11  ;;  %vm1085_vm12 = vmor %vm1083_vm10, %vm1084_vm8  ;;  %vm1122_vm1 = vweird.f32 %v1116_v52  ;;  %v9034_v61 = vld [vmem:[#allocation18_spill] sm:$0xff] }
 0x28a   :  { %v1080_v42 = vsub.f32 1.0, %v1079_v48  ;;  %vm1104_vm13 = vmor %vm1102_vm11, %vm1103_vm9  ;;  %v1126_v57 = vand.u32 2147483647, %v1116_v52  ;;  %v1129_v50 = vor.u32 1.1754944e-38, %v1128_v18  ;;  %v340_v25 = vadd.f32 %v9034_v61, %v9028_v43  ;;  %v6232_v61 = vld [vmem:[%s8760_s2 + $0x1f0] sm:$0xff] }
 0x28b   :  { %v1099_v44 = vsub.f32 1.0, %v1098_v12  ;;  %9037 = vst [vmem:[#allocation81_spill] sm:$0xff] %v6232_v61 }
 0x28c   :  { %v1081_v33 = vmul.f32 %v4400_v53, %v1080_v42  ;;  %vm1127_vm3 = vcmp.eq.f32.partialorder %v1126_v57, 8.507059e+37  ;;  %v9035_v42 = vld [vmem:[#allocation17_spill] sm:$0xff] }
 0x28d   :  { %v1100_v26 = vmul.f32 %v4402_v11, %v1099_v44  ;;  %v275_v44 = vadd.f32 %v9035_v42, %v9030_v58  ;;  %v6299_v42 = vld [vmem:[%s8760_s2 + $0x188] sm:$0xff] }
 0x28e   :  { %v4404_v22 = vpop.eup %4403  ;;  %v1082_v45 = vadd.f32 %v4400_v53, %v1081_v33 }
 0x28f   :  { %v1101_v40 = vadd.f32 %v4402_v11, %v1100_v26  ;;  %v1118_v21 = vmul.f32 %v4404_v22, %v1116_v52  ;;  %v4406_v2 = vpop.eup %4405  ;;  %vm1123_vm0 = vweird.f32 %v4404_v22 }
 0x290   :  { %v1086_v62 = vsel %vm1085_vm12, %v4400_v53, %v1082_v45  ;;  %vm1124_vm2 = vmor %vm1122_vm1, %vm1123_vm0 }
 0x291   :  { %v1091_v60 = vsel %vm1088_vm14, %v1090_v30, %v1086_v62  ;;  %v1105_v3 = vsel %vm1104_vm13, %v4402_v11, %v1101_v40  ;;  %v1119_v59 = vsub.f32 1.0, %v1118_v21 }
 0x292   :  { %v1110_v19 = vsel %vm1107_vm15, %v1109_v13, %v1105_v3  ;;  %v1133_v7 = vmul.f32 %v4406_v2, %v1091_v60 }
 0x293   :  { %v1132_v14 = vmul.f32 %v1110_v19, %v6014_v10  ;;  %v1120_v29 = vmul.f32 %v4404_v22, %v1119_v59 }
 0x295   :  { %v6156_v17 = vadd.f32 %v1133_v7, %v1132_v14  ;;  %v1121_v4 = vadd.f32 %v4404_v22, %v1120_v29 }
 0x297   :  { %4407 = vtanh.f32 %v6156_v17  ;;  %v1125_v35 = vsel %vm1124_vm2, %v4404_v22, %v1121_v4 }
 0x298   :  { %v1130_v24 = vsel %vm1127_vm3, %v1129_v50, %v1125_v35 }
 0x29d   :  { %v4408_v5 = vpop.eup %4407 }
 0x29e   :  { %v1136_v27 = vmul.f32 %v4408_v5, %v1130_v24 }
 0x2a0   :  { %v1138_v31 = vrot.slane %v1136_v27, 1  ;;  %v1139_v32 = vrot.slane %v1136_v27, 2  ;;  %v1140_v10 = vrot.slane %v1136_v27, 3  ;;  %1152 = vst [vmem:[%s8762_s4 + $0x2] sm:$0x1] %v1136_v27  ;;  %1229 = vmatmul.f32.vlgmr.msra.gmra.mxu0 %v1136_v27  ;;  %1249 = vmatmul.f32.vlgmr.msra.gmra.mxu1 %v1136_v27  ;;  %v1141_v34 = vrot.slane %v1136_v27, 4 }
 0x2a1   :  { %1269 = vmatmul.f32.vlgmr.msra.gmra.mxu2 %v1136_v27  ;;  %1308 = vmatmul.f32.vlgmr.msra.gmra.mxu3 %v1136_v27  ;;  %v1142_v36 = vrot.slane %v1136_v27, 5  ;;  %v1143_v37 = vrot.slane %v1136_v27, 6  ;;  %v1144_v38 = vrot.slane %v1136_v27, 7 }
 0x2a2   :  { %1153 = vst [vmem:[%s8762_s4 + $0x12] sm:$0x1] %v1138_v31  ;;  %1731 = vmatpush.msra.mxu2 %v6232_v61 }
 0x2a3   :  { %1154 = vst [vmem:[%s8762_s4 + $0x22] sm:$0x1] %v1139_v32 }
 0x2a4   :  { %1155 = vst [vmem:[%s8762_s4 + $0x32] sm:$0x1] %v1140_v10 }
 0x2a5   :  { %1156 = vst [vmem:[%s8762_s4 + $0x42] sm:$0x1] %v1141_v34 }
 0x2a6   :  { %1157 = vst [vmem:[%s8762_s4 + $0x52] sm:$0x1] %v1142_v36 }
 0x2a7   :  { %1158 = vst [vmem:[%s8762_s4 + $0x62] sm:$0x1] %v1143_v37 }
 0x2a8   :  { %1159 = vst [vmem:[%s8762_s4 + $0x72] sm:$0x1] %v1144_v38 }
 0x31d   :  { %v1230_v16 = vpop.f32.mrf.mxu0  ;;  %v1250_v49 = vpop.f32.mrf.mxu1 }
 0x31e   :  { %v1273_v8 = vadd.f32 %v1230_v16, %v145_v41  ;;  %v1274_v0 = vadd.f32 %v1250_v49, %v210_v47 }
 0x320   :  { %v4319_v6 = vmul.f32 -1.442695, %v1273_v8  ;;  %v4320_v63 = vmul.f32 -1.442695, %v1274_v0 }
 0x322   :  { %4409 = vpow2.f32 %v4319_v6  ;;  %v6222_v6 = vld [vmem:[%s8760_s2 + $0x1e0] sm:$0xff] }
 0x323   :  { %4411 = vpow2.f32 %v4320_v63  ;;  %v6227_v63 = vld [vmem:[%s8760_s2 + $0x1e8] sm:$0xff]  ;;  %1691 = vmatpush.msra.mxu0 %v6222_v6 }
 0x324   :  { %v1309_v1 = vpop.f32.mrf.mxu3  ;;  %v1270_v48 = vpop.f32.mrf.mxu2  ;;  %9036 = vst [vmem:[#allocation80_spill] sm:$0xff] %v6227_v63  ;;  %1711 = vmatpush.msra.mxu1 %v6227_v63 }
 0x325   :  { %v1312_v55 = vadd.f32 %v1309_v1, %v340_v25  ;;  %v1275_v33 = vadd.f32 %v1270_v48, %v275_v44  ;;  %v6239_v25 = vld [vmem:[%s8760_s2 + $0x1f8] sm:$0xff]  ;;  %v6246_v1 = vld [vmem:[%s8760_s2 + $0x1c0] sm:$0xff]  ;;  %v6304_v44 = vld [vmem:[%s8760_s2 + $0x190] sm:$0xff] }
 0x326   :  { %9038 = vst [vmem:[#allocation82_spill] sm:$0xff] %v6239_v25  ;;  %1770 = vmatpush.msra.mxu3 %v6239_v25  ;;  %1692 = vmatpush.msra.mxu0 %v6246_v1  ;;  %v6287_v48 = vld [vmem:[%s8760_s2 + $0x1b8] sm:$0xff] }
 0x327   :  { %v4321_v9 = vmul.f32 -1.442695, %v1312_v55  ;;  %9039 = vst [vmem:[#allocation83_spill] sm:$0xff] %v6246_v1  ;;  %v6251_v55 = vld [vmem:[%s8760_s2 + $0x1c8] sm:$0xff] }
 0x328   :  { %v4410_v52 = vpop.eup %4409  ;;  %1712 = vmatpush.msra.mxu1 %v6251_v55 }
 0x329   :  { %v4412_v53 = vpop.eup %4411  ;;  %v1316_v54 = vadd.f32 1.0, %v4410_v52  ;;  %4413 = vpow2.f32 %v4321_v9  ;;  %v6256_v9 = vld [vmem:[%s8760_s2 + $0x1d0] sm:$0xff]  ;;  %v6263_v52 = vld [vmem:[%s8760_s2 + $0x1d8] sm:$0xff] }
 0x32a   :  { %v1335_v11 = vadd.f32 1.0, %v4412_v53  ;;  %1732 = vmatpush.msra.mxu2 %v6256_v9  ;;  %1771 = vmatpush.msra.mxu3 %v6263_v52  ;;  %v6270_v53 = vld [vmem:[%s8760_s2 + $0x1a0] sm:$0xff] }
 0x32b   :  { %4415 = vrcp.f32 %v1316_v54  ;;  %v1328_v30 = vand.u32 2147483648, %v1316_v54  ;;  %v1326_v13 = vand.u32 2147483647, %v1316_v54  ;;  %vm1322_vm6 = vweird.f32 %v1316_v54  ;;  %1693 = vmatpush.msra.mxu0 %v6270_v53 }
 0x32c   :  { %4417 = vrcp.f32 %v1335_v11  ;;  %v1347_v40 = vand.u32 2147483648, %v1335_v11  ;;  %v1345_v2 = vand.u32 2147483647, %v1335_v11  ;;  %vm1341_vm7 = vweird.f32 %v1335_v11  ;;  %1772 = vmatpush.msra.mxu3 %v6287_v48 }
 0x32d   :  { %v1329_v59 = vor.u32 1.1754944e-38, %v1328_v30  ;;  %vm1327_vm10 = vcmp.eq.f32.partialorder %v1326_v13, 8.507059e+37  ;;  %v6359_v30 = vld [vmem:[%s8760_s2 + $0x158] sm:$0xff] }
 0x32e   :  { %v1348_v14 = vor.u32 1.1754944e-38, %v1347_v40  ;;  %vm1346_vm11 = vcmp.eq.f32.partialorder %v1345_v2, 8.507059e+37  ;;  %v9045_v40 = vld [vmem:[#allocation19_spill] sm:$0xff]  ;;  %v9046_v13 = vld [vmem:[#allocation20_spill] sm:$0xff]  ;;  %v6370_v2 = vld [vmem:[%s8760_s2 + $0x120] sm:$0xff] }
 0x32f   :  { %v4414_v12 = vpop.eup %4413 }
 0x330   :  { %v1355_v15 = vadd.f32 1.0, %v4414_v12  ;;  %v6294_v12 = vld [vmem:[%s8760_s2 + $0x180] sm:$0xff] }
 0x331   :  { %v4416_v56 = vpop.eup %4415  ;;  %9041 = vst [vmem:[#allocation85_spill] sm:$0xff] %v6294_v12  ;;  %1694 = vmatpush.msra.mxu0 %v6294_v12 }
 0x332   :  { %v4418_v51 = vpop.eup %4417  ;;  %v1318_v26 = vmul.f32 %v4416_v56, %v1316_v54  ;;  %4419 = vrcp.f32 %v1355_v15  ;;  %vm1323_vm4 = vweird.f32 %v4416_v56  ;;  %v1367_v10 = vand.u32 2147483648, %v1355_v15  ;;  %v6275_v54 = vld [vmem:[%s8760_s2 + $0x1a8] sm:$0xff] }
 0x333   :  { %v1337_v20 = vmul.f32 %v4418_v51, %v1335_v11  ;;  %4421 = vtanh.f32 %v1275_v33  ;;  %vm1342_vm5 = vweird.f32 %v4418_v51  ;;  %vm1324_vm8 = vmor %vm1322_vm6, %vm1323_vm4  ;;  %vm1361_vm13 = vweird.f32 %v1355_v15  ;;  %9040 = vst [vmem:[#allocation84_spill] sm:$0xff] %v6275_v54  ;;  %v6280_v11 = vld [vmem:[%s8760_s2 + $0x1b0] sm:$0xff]  ;;  %1713 = vmatpush.msra.mxu1 %v6275_v54  ;;  %v6323_v33 = vld [vmem:[%s8760_s2 + $0x168] sm:$0xff] }
 0x334   :  { %v1319_v22 = vsub.f32 1.0, %v1318_v26  ;;  %vm1343_vm9 = vmor %vm1341_vm7, %vm1342_vm5  ;;  %v1365_v34 = vand.u32 2147483647, %v1355_v15  ;;  %v1368_v37 = vor.u32 1.1754944e-38, %v1367_v10  ;;  %1733 = vmatpush.msra.mxu2 %v6280_v11  ;;  %9044 = vst [vmem:[#allocation88_spill] sm:$0xff] %v6323_v33  ;;  %v6335_v26 = vld [vmem:[%s8760_s2 + $0x178] sm:$0xff] }
 0x335   :  { %v1338_v45 = vsub.f32 1.0, %v1337_v20  ;;  %1714 = vmatpush.msra.mxu1 %v6299_v42  ;;  %v6342_v20 = vld [vmem:[%s8760_s2 + $0x140] sm:$0xff]  ;;  %v6435_v10 = vld [vmem:[%s8760_s2 + $0xf8] sm:$0xff] }
 0x336   :  { %v1320_v21 = vmul.f32 %v4416_v56, %v1319_v22  ;;  %vm1366_vm15 = vcmp.eq.f32.partialorder %v1365_v34, 8.507059e+37  ;;  %1734 = vmatpush.msra.mxu2 %v6304_v44  ;;  %v6347_v22 = vld [vmem:[%s8760_s2 + $0x148] sm:$0xff]  ;;  %v6442_v34 = vld [vmem:[%s8760_s2 + $0xc0] sm:$0xff] }
 0x337   :  { %v1339_v62 = vmul.f32 %v4418_v51, %v1338_v45  ;;  %1715 = vmatpush.msra.mxu1 %v6323_v33  ;;  %v6352_v45 = vld [vmem:[%s8760_s2 + $0x150] sm:$0xff] }
 0x338   :  { %v4420_v60 = vpop.eup %4419  ;;  %v1321_v3 = vadd.f32 %v4416_v56, %v1320_v21  ;;  %v148_v21 = vadd.f32 %v9045_v40, %v9024_v23  ;;  %v6497_v40 = vld [vmem:[%s8760_s2 + $0x88] sm:$0xff]  ;;  %v6587_v23 = vld [vmem:[%s8760_s2 + $0x38] sm:$0xff] }
 0x339   :  { %v1340_v19 = vadd.f32 %v4418_v51, %v1339_v62  ;;  %v1357_v7 = vmul.f32 %v4420_v60, %v1355_v15  ;;  %v4422_v4 = vpop.eup %4421  ;;  %vm1362_vm12 = vweird.f32 %v4420_v60  ;;  %v6311_v15 = vld [vmem:[%s8760_s2 + $0x198] sm:$0xff]  ;;  %1716 = vmatpush.msra.mxu1 %v6347_v22  ;;  %v213_v62 = vadd.f32 %v9046_v13, %v9026_v28  ;;  %v6580_v28 = vld [vmem:[%s8760_s2 + $0x30] sm:$0xff]  ;;  %9058 = vst [vmem:[#allocation79_spill] sm:$0xff] %v6587_v23 }
 0x33a   :  { %v1325_v29 = vsel %vm1324_vm8, %v4416_v56, %v1321_v3  ;;  %vm1363_vm14 = vmor %vm1361_vm13, %vm1362_vm12  ;;  %9042 = vst [vmem:[#allocation86_spill] sm:$0xff] %v6311_v15  ;;  %1773 = vmatpush.msra.mxu3 %v6311_v15  ;;  %v6318_v56 = vld [vmem:[%s8760_s2 + $0x160] sm:$0xff]  ;;  %v6380_v3 = vld [vmem:[%s8760_s2 + $0x130] sm:$0xff] }
 0x33b   :  { %v1330_v18 = vsel %vm1327_vm10, %v1329_v59, %v1325_v29  ;;  %v1344_v57 = vsel %vm1343_vm9, %v4418_v51, %v1340_v19  ;;  %v1358_v35 = vsub.f32 1.0, %v1357_v7  ;;  %9043 = vst [vmem:[#allocation87_spill] sm:$0xff] %v6318_v56  ;;  %v6328_v51 = vld [vmem:[%s8760_s2 + $0x170] sm:$0xff]  ;;  %1695 = vmatpush.msra.mxu0 %v6318_v56  ;;  %v6387_v7 = vld [vmem:[%s8760_s2 + $0x138] sm:$0xff] }
 0x33c   :  { %v1349_v50 = vsel %vm1346_vm11, %v1348_v14, %v1344_v57  ;;  %v1372_v5 = vmul.f32 %v4422_v4, %v1330_v18  ;;  %1735 = vmatpush.msra.mxu2 %v6328_v51  ;;  %1774 = vmatpush.msra.mxu3 %v6335_v26  ;;  %v6394_v4 = vld [vmem:[%s8760_s2 + $0x100] sm:$0xff]  ;;  %v6399_v18 = vld [vmem:[%s8760_s2 + $0x108] sm:$0xff]  ;;  %v6404_v57 = vld [vmem:[%s8760_s2 + $0x110] sm:$0xff]  ;;  %9057 = vst [vmem:[#allocation78_spill] sm:$0xff] %v6580_v28 }
 0x33d   :  { %v1371_v24 = vmul.f32 %v1349_v50, %v6156_v17  ;;  %v1359_v27 = vmul.f32 %v4420_v60, %v1358_v35  ;;  %1696 = vmatpush.msra.mxu0 %v6342_v20  ;;  %v6411_v35 = vld [vmem:[%s8760_s2 + $0x118] sm:$0xff] }
 0x33e   :  { %1736 = vmatpush.msra.mxu2 %v6352_v45  ;;  %1775 = vmatpush.msra.mxu3 %v6359_v30 }
 0x33f   :  { %v6192_v31 = vadd.f32 %v1372_v5, %v1371_v24  ;;  %v1360_v32 = vadd.f32 %v4420_v60, %v1359_v27  ;;  %1697 = vmatpush.msra.mxu0 %v6370_v2  ;;  %v6418_v24 = vld [vmem:[%s8760_s2 + $0xe0] sm:$0xff]  ;;  %v6423_v27 = vld [vmem:[%s8760_s2 + $0xe8] sm:$0xff] }
 0x340   :  { %1737 = vmatpush.msra.mxu2 %v6380_v3  ;;  %1776 = vmatpush.msra.mxu3 %v6387_v7 }
 0x341   :  { %4423 = vtanh.f32 %v6192_v31  ;;  %v1364_v36 = vsel %vm1363_vm14, %v4420_v60, %v1360_v32  ;;  %v6375_v60 = vld [vmem:[%s8760_s2 + $0x128] sm:$0xff]  ;;  %1698 = vmatpush.msra.mxu0 %v6394_v4  ;;  %v6430_v32 = vld [vmem:[%s8760_s2 + $0xf0] sm:$0xff] }
 0x342   :  { %v1369_v39 = vsel %vm1366_vm15, %v1368_v37, %v1364_v36  ;;  %1717 = vmatpush.msra.mxu1 %v6375_v60  ;;  %1738 = vmatpush.msra.mxu2 %v6404_v57  ;;  %v6447_v36 = vld [vmem:[%s8760_s2 + $0xc8] sm:$0xff]  ;;  %v6452_v37 = vld [vmem:[%s8760_s2 + $0xd0] sm:$0xff] }
 0x343   :  { %1777 = vmatpush.msra.mxu3 %v6411_v35  ;;  %1699 = vmatpush.msra.mxu0 %v6418_v24 }
 0x344   :  { %1718 = vmatpush.msra.mxu1 %v6399_v18  ;;  %1739 = vmatpush.msra.mxu2 %v6430_v32 }
 0x345   :  { %1778 = vmatpush.msra.mxu3 %v6435_v10  ;;  %1700 = vmatpush.msra.mxu0 %v6442_v34 }
 0x346   :  { %1719 = vmatpush.msra.mxu1 %v6423_v27  ;;  %1740 = vmatpush.msra.mxu2 %v6452_v37 }
 0x347   :  { %v4424_v38 = vpop.eup %4423 }
 0x348   :  { %v1375_v41 = vmul.f32 %v4424_v38, %v1369_v39  ;;  %v9047_v38 = vld [vmem:[#allocation22_spill] sm:$0xff]  ;;  %1720 = vmatpush.msra.mxu1 %v6447_v36 }
 0x349   :  { %v343_v39 = vadd.f32 %v9047_v38, %v9028_v43  ;;  %v6535_v38 = vld [vmem:[%s8760_s2 + $0x78] sm:$0xff]  ;;  %v6575_v43 = vld [vmem:[%s8760_s2 + $0x28] sm:$0xff] }
 0x34a   :  { %v1377_v46 = vrot.slane %v1375_v41, 1  ;;  %v1378_v47 = vrot.slane %v1375_v41, 2  ;;  %v1379_v17 = vrot.slane %v1375_v41, 3  ;;  %1391 = vst [vmem:[%s8762_s4 + $0x3] sm:$0x1] %v1375_v41  ;;  %1468 = vmatmul.f32.vlgmr.msrb.gmra.mxu0 %v1375_v41  ;;  %1488 = vmatmul.f32.vlgmr.msrb.gmra.mxu1 %v1375_v41  ;;  %v1380_v16 = vrot.slane %v1375_v41, 4 }
 0x34b   :  { %1508 = vmatmul.f32.vlgmr.msrb.gmra.mxu2 %v1375_v41  ;;  %1547 = vmatmul.f32.vlgmr.msrb.gmra.mxu3 %v1375_v41  ;;  %v1381_v49 = vrot.slane %v1375_v41, 5  ;;  %v1382_v8 = vrot.slane %v1375_v41, 6  ;;  %v1383_v0 = vrot.slane %v1375_v41, 7  ;;  %v6461_v41 = vld [vmem:[%s8760_s2 + $0xd8] sm:$0xff]  ;;  %9050 = vst [vmem:[#allocation71_spill] sm:$0xff] %v6535_v38 }
 0x34c   :  { %1392 = vst [vmem:[%s8762_s4 + $0x13] sm:$0x1] %v1377_v46  ;;  %1779 = vmatpush.msra.mxu3 %v6461_v41 }
 0x34d   :  { %1393 = vst [vmem:[%s8762_s4 + $0x23] sm:$0x1] %v1378_v47  ;;  %v6468_v47 = vld [vmem:[%s8760_s2 + $0xa0] sm:$0xff] }
 0x34e   :  { %1394 = vst [vmem:[%s8762_s4 + $0x33] sm:$0x1] %v1379_v17  ;;  %v6473_v17 = vld [vmem:[%s8760_s2 + $0xa8] sm:$0xff]  ;;  %1701 = vmatpush.msra.mxu0 %v6468_v47 }
 0x34f   :  { %1395 = vst [vmem:[%s8762_s4 + $0x43] sm:$0x1] %v1380_v16  ;;  %v6478_v16 = vld [vmem:[%s8760_s2 + $0xb0] sm:$0xff]  ;;  %1721 = vmatpush.msra.mxu1 %v6473_v17 }
 0x350   :  { %1396 = vst [vmem:[%s8762_s4 + $0x53] sm:$0x1] %v1381_v49  ;;  %1741 = vmatpush.msra.mxu2 %v6478_v16 }
 0x351   :  { %1397 = vst [vmem:[%s8762_s4 + $0x63] sm:$0x1] %v1382_v8  ;;  %v6485_v8 = vld [vmem:[%s8760_s2 + $0xb8] sm:$0xff]  ;;  %1722 = vmatpush.msra.mxu1 %v6497_v40 }
 0x352   :  { %1398 = vst [vmem:[%s8762_s4 + $0x73] sm:$0x1] %v1383_v0  ;;  %1780 = vmatpush.msra.mxu3 %v6485_v8  ;;  %v6492_v0 = vld [vmem:[%s8760_s2 + $0x80] sm:$0xff] }
 0x353   :  { %1702 = vmatpush.msra.mxu0 %v6492_v0  ;;  %9056 = vst [vmem:[#allocation77_spill] sm:$0xff] %v6575_v43 }
 0x3c7   :  { %v1469_v59 = vpop.f32.mrf.mxu0  ;;  %v1489_v19 = vpop.f32.mrf.mxu1 }
 0x3c8   :  { %v1512_v14 = vadd.f32 %v1469_v59, %v148_v21  ;;  %v1513_v29 = vadd.f32 %v1489_v19, %v213_v62  ;;  %v6502_v21 = vld [vmem:[%s8760_s2 + $0x90] sm:$0xff]  ;;  %v6509_v62 = vld [vmem:[%s8760_s2 + $0x98] sm:$0xff]  ;;  %v6516_v19 = vld [vmem:[%s8760_s2 + $0x60] sm:$0xff] }
 0x3c9   :  { %1742 = vmatpush.msra.mxu2 %v6502_v21  ;;  %1781 = vmatpush.msra.mxu3 %v6509_v62 }
 0x3ca   :  { %v4322_v50 = vmul.f32 -1.442695, %v1512_v14  ;;  %v4323_v5 = vmul.f32 -1.442695, %v1513_v29  ;;  %v6521_v14 = vld [vmem:[%s8760_s2 + $0x68] sm:$0xff]  ;;  %v6526_v29 = vld [vmem:[%s8760_s2 + $0x70] sm:$0xff]  ;;  %1703 = vmatpush.msra.mxu0 %v6516_v19 }
 0x3cb   :  { %9048 = vst [vmem:[#allocation89_spill] sm:$0xff] %v6521_v14  ;;  %1723 = vmatpush.msra.mxu1 %v6521_v14  ;;  %1743 = vmatpush.msra.mxu2 %v6526_v29 }
 0x3cc   :  { %4425 = vpow2.f32 %v4322_v50  ;;  %9049 = vst [vmem:[#allocation90_spill] sm:$0xff] %v6526_v29  ;;  %1782 = vmatpush.msra.mxu3 %v6535_v38 }
 0x3cd   :  { %4427 = vpow2.f32 %v4323_v5 }
 0x3ce   :  { %v1548_v46 = vpop.f32.mrf.mxu3 }
 0x3cf   :  { %v1551_v49 = vadd.f32 %v1548_v46, %v343_v39  ;;  %v6544_v46 = vld [vmem:[%s8760_s2 + $0x40] sm:$0xff] }
 0x3d0   :  { %9051 = vst [vmem:[#allocation72_spill] sm:$0xff] %v6544_v46  ;;  %1704 = vmatpush.msra.mxu0 %v6544_v46 }
 0x3d1   :  { %v4324_v13 = vmul.f32 -1.442695, %v1551_v49  ;;  %v6549_v49 = vld [vmem:[%s8760_s2 + $0x48] sm:$0xff] }
 0x3d2   :  { %v4426_v59 = vpop.eup %4425  ;;  %9052 = vst [vmem:[#allocation73_spill] sm:$0xff] %v6549_v49  ;;  %1724 = vmatpush.msra.mxu1 %v6549_v49 }
 0x3d3   :  { %v4428_v50 = vpop.eup %4427  ;;  %v6528_v5 = vadd.f32 1.0, %v4426_v59  ;;  %4429 = vpow2.f32 %v4324_v13  ;;  %v6554_v13 = vld [vmem:[%s8760_s2 + $0x50] sm:$0xff]  ;;  %v6562_v59 = vld [vmem:[%s8760_s2 + $0x58] sm:$0xff] }
 0x3d4   :  { %v6537_v39 = vadd.f32 1.0, %v4428_v50  ;;  %9053 = vst [vmem:[#allocation74_spill] sm:$0xff] %v6554_v13  ;;  %1744 = vmatpush.msra.mxu2 %v6554_v13  ;;  %1783 = vmatpush.msra.mxu3 %v6562_v59  ;;  %v6570_v50 = vld [vmem:[%s8760_s2 + $0x20] sm:$0xff] }
 0x3d5   :  { %4431 = vrcp.f32 %v6528_v5  ;;  %9054 = vst [vmem:[#allocation75_spill] sm:$0xff] %v6562_v59  ;;  %1705 = vmatpush.msra.mxu0 %v6570_v50  ;;  %1725 = vmatpush.msra.mxu1 %v6575_v43  ;;  %v1509_v59 = vpop.f32.mrf.mxu2  ;;  %v6594_v13 = vld [vmem:[%s8760_s2] sm:$0xff]  ;;  %v6604_v43 = vld [vmem:[%s8760_s2 + $0x10] sm:$0xff]  ;;  %vm1561_vm2 = vweird.f32 %v6528_v5 }
 0x3d6   :  { %4433 = vrcp.f32 %v6537_v39  ;;  %9055 = vst [vmem:[#allocation76_spill] sm:$0xff] %v6570_v50  ;;  %1745 = vmatpush.msra.mxu2 %v6580_v28  ;;  %1784 = vmatpush.msra.mxu3 %v6587_v23  ;;  %v6599_v50 = vld [vmem:[%s8760_s2 + $0x8] sm:$0xff]  ;;  %v9059_v28 = vld [vmem:[#allocation21_spill] sm:$0xff]  ;;  %v6613_v23 = vld [vmem:[%s8760_s2 + $0x18] sm:$0xff]  ;;  %vm1580_vm3 = vweird.f32 %v6537_v39 }
 0x3d7   :  { %v278_v46 = vadd.f32 %v9059_v28, %v9030_v58  ;;  %1706 = vmatpush.msra.mxu0 %v6594_v13  ;;  %1726 = vmatpush.msra.mxu1 %v6599_v50 }
 0x3d8   :  { %1746 = vmatpush.msra.mxu2 %v6604_v43  ;;  %1785 = vmatpush.msra.mxu3 %v6613_v23 }
 0x3d9   :  { %v4430_v49 = vpop.eup %4429  ;;  %v1514_v14 = vadd.f32 %v1509_v59, %v278_v46  ;;  %1930 = vmatpush.msrb.mxu0 %v6222_v6  ;;  %1950 = vmatpush.msrb.mxu1 %v6227_v63  ;;  %v1567_v63 = vand.u32 2147483648, %v6528_v5 }
 0x3da   :  { %v6615_v38 = vadd.f32 1.0, %v4430_v49  ;;  %1970 = vmatpush.msrb.mxu2 %v6232_v61  ;;  %2009 = vmatpush.msrb.mxu3 %v6239_v25  ;;  %v1586_v25 = vand.u32 2147483648, %v6537_v39 }
 0x3db   :  { %v4432_v29 = vpop.eup %4431  ;;  %1931 = vmatpush.msrb.mxu0 %v6246_v1  ;;  %1951 = vmatpush.msrb.mxu1 %v6251_v55  ;;  %v1565_v1 = vand.u32 2147483647, %v6528_v5 }
 0x3dc   :  { %v4434_v28 = vpop.eup %4433  ;;  %v1557_v58 = vmul.f32 %v4432_v29, %v6528_v5  ;;  %4435 = vrcp.f32 %v6615_v38  ;;  %1971 = vmatpush.msrb.mxu2 %v6256_v9  ;;  %2010 = vmatpush.msrb.mxu3 %v6263_v52  ;;  %vm1562_vm0 = vweird.f32 %v4432_v29  ;;  %vm1600_vm9 = vweird.f32 %v6615_v38 }
 0x3dd   :  { %v1576_v49 = vmul.f32 %v4434_v28, %v6537_v39  ;;  %4437 = vtanh.f32 %v1514_v14  ;;  %1932 = vmatpush.msrb.mxu0 %v6270_v53  ;;  %1952 = vmatpush.msrb.mxu1 %v6275_v54  ;;  %vm1581_vm1 = vweird.f32 %v4434_v28  ;;  %vm1563_vm4 = vmor %vm1561_vm2, %vm1562_vm0  ;;  %vm1566_vm6 = vcmp.eq.f32.partialorder %v1565_v1, 8.507059e+37 }
 0x3de   :  { %v1558_v46 = vsub.f32 1.0, %v1557_v58  ;;  %1972 = vmatpush.msrb.mxu2 %v6280_v11  ;;  %2011 = vmatpush.msrb.mxu3 %v6287_v48  ;;  %vm1582_vm5 = vmor %vm1580_vm3, %vm1581_vm1 }
 0x3df   :  { %v1577_v59 = vsub.f32 1.0, %v1576_v49  ;;  %v1584_v49 = vand.u32 2147483647, %v6537_v39  ;;  %1933 = vmatpush.msrb.mxu0 %v6294_v12  ;;  %1953 = vmatpush.msrb.mxu1 %v6299_v42 }
 0x3e0   :  { %v1559_v61 = vmul.f32 %v4432_v29, %v1558_v46  ;;  %1973 = vmatpush.msrb.mxu2 %v6304_v44  ;;  %2012 = vmatpush.msrb.mxu3 %v6311_v15  ;;  %v1568_v46 = vor.u32 1.1754944e-38, %v1567_v63 }
 0x3e1   :  { %v1578_v58 = vmul.f32 %v4434_v28, %v1577_v59  ;;  %1934 = vmatpush.msrb.mxu0 %v6318_v56  ;;  %1954 = vmatpush.msrb.mxu1 %v6323_v33  ;;  %vm1585_vm7 = vcmp.eq.f32.partialorder %v1584_v49, 8.507059e+37  ;;  %v9060_v49 = vld [vmem:[#allocation89_spill] sm:$0xff] }
 0x3e2   :  { %v6640_v14 = vpop.eup %4435  ;;  %v1560_v54 = vadd.f32 %v4432_v29, %v1559_v61  ;;  %v1587_v61 = vor.u32 1.1754944e-38, %v1586_v25  ;;  %1974 = vmatpush.msrb.mxu2 %v6328_v51  ;;  %2013 = vmatpush.msrb.mxu3 %v6335_v26 }
 0x3e3   :  { %v1579_v59 = vadd.f32 %v4434_v28, %v1578_v58  ;;  %v1596_v12 = vmul.f32 %v6640_v14, %v6615_v38  ;;  %v4438_v39 = vpop.eup %4437  ;;  %1935 = vmatpush.msrb.mxu0 %v6342_v20  ;;  %1955 = vmatpush.msrb.mxu1 %v6347_v22  ;;  %vm1601_vm8 = vweird.f32 %v6640_v14 }
 0x3e4   :  { %v1564_v5 = vsel %vm1563_vm4, %v4432_v29, %v1560_v54  ;;  %1975 = vmatpush.msrb.mxu2 %v6352_v45  ;;  %2014 = vmatpush.msrb.mxu3 %v6359_v30  ;;  %vm1602_vm10 = vmor %vm1600_vm9, %vm1601_vm8 }
 0x3e5   :  { %v1569_v15 = vsel %vm1566_vm6, %v1568_v46, %v1564_v5  ;;  %v1583_v63 = vsel %vm1582_vm5, %v4434_v28, %v1579_v59  ;;  %v1597_v58 = vsub.f32 1.0, %v1596_v12  ;;  %1936 = vmatpush.msrb.mxu0 %v6370_v2  ;;  %1956 = vmatpush.msrb.mxu1 %v6375_v60 }
 0x3e6   :  { %v1588_v56 = vsel %vm1585_vm7, %v1587_v61, %v1583_v63  ;;  %v1611_v33 = vmul.f32 %v4438_v39, %v1569_v15  ;;  %1976 = vmatpush.msrb.mxu2 %v6380_v3  ;;  %2015 = vmatpush.msrb.mxu3 %v6387_v7  ;;  %v1604_v15 = vand.u32 2147483647, %v6615_v38  ;;  %v9061_v39 = vld [vmem:[#allocation90_spill] sm:$0xff]  ;;  %v9062_v63 = vld [vmem:[#allocation71_spill] sm:$0xff] }
 0x3e7   :  { %v1610_v25 = vmul.f32 %v1588_v56, %v6192_v31  ;;  %v1598_v1 = vmul.f32 %v6640_v14, %v1597_v58  ;;  %1937 = vmatpush.msrb.mxu0 %v6394_v4  ;;  %1957 = vmatpush.msrb.mxu1 %v6399_v18  ;;  %v1606_v31 = vand.u32 2147483648, %v6615_v38 }
 0x3e8   :  { %1977 = vmatpush.msrb.mxu2 %v6404_v57  ;;  %2016 = vmatpush.msrb.mxu3 %v6411_v35  ;;  %vm1605_vm11 = vcmp.eq.f32.partialorder %v1604_v15, 8.507059e+37  ;;  %v9066_v15 = vld [vmem:[#allocation75_spill] sm:$0xff] }
 0x3e9   :  { %v6664_v54 = vadd.f32 %v1611_v33, %v1610_v25  ;;  %v1599_v12 = vadd.f32 %v6640_v14, %v1598_v1  ;;  %1938 = vmatpush.msrb.mxu0 %v6418_v24  ;;  %1958 = vmatpush.msrb.mxu1 %v6423_v27  ;;  %v1607_v33 = vor.u32 1.1754944e-38, %v1606_v31  ;;  %v9063_v25 = vld [vmem:[#allocation72_spill] sm:$0xff]  ;;  %v9064_v1 = vld [vmem:[#allocation73_spill] sm:$0xff]  ;;  %v9065_v31 = vld [vmem:[#allocation74_spill] sm:$0xff] }
 0x3ea   :  { %1978 = vmatpush.msrb.mxu2 %v6430_v32  ;;  %2017 = vmatpush.msrb.mxu3 %v6435_v10 }
 0x3eb   :  { %4439 = vtanh.f32 %v6664_v54  ;;  %1939 = vmatpush.msrb.mxu0 %v6442_v34  ;;  %1959 = vmatpush.msrb.mxu1 %v6447_v36  ;;  %v1603_v56 = vsel %vm1602_vm10, %v6640_v14, %v1599_v12 }
 0x3ec   :  { %1979 = vmatpush.msrb.mxu2 %v6452_v37  ;;  %2018 = vmatpush.msrb.mxu3 %v6461_v41  ;;  %v1608_v38 = vsel %vm1605_vm11, %v1607_v33, %v1603_v56  ;;  %v9067_v56 = vld [vmem:[#allocation76_spill] sm:$0xff]  ;;  %v9068_v33 = vld [vmem:[#allocation77_spill] sm:$0xff] }
 0x3ed   :  { %1940 = vmatpush.msrb.mxu0 %v6468_v47  ;;  %1960 = vmatpush.msrb.mxu1 %v6473_v17 }
 0x3ee   :  { %1980 = vmatpush.msrb.mxu2 %v6478_v16  ;;  %2019 = vmatpush.msrb.mxu3 %v6485_v8 }
 0x3ef   :  { %1941 = vmatpush.msrb.mxu0 %v6492_v0  ;;  %1961 = vmatpush.msrb.mxu1 %v6497_v40 }
 0x3f0   :  { %1981 = vmatpush.msrb.mxu2 %v6502_v21  ;;  %2020 = vmatpush.msrb.mxu3 %v6509_v62 }
 0x3f1   :  { %v4440_v29 = vpop.eup %4439  ;;  %1942 = vmatpush.msrb.mxu0 %v6516_v19  ;;  %1962 = vmatpush.msrb.mxu1 %v9060_v49 }
 0x3f2   :  { %v1614_v28 = vmul.f32 %v4440_v29, %v1608_v38  ;;  %1982 = vmatpush.msrb.mxu2 %v9061_v39  ;;  %2021 = vmatpush.msrb.mxu3 %v9062_v63  ;;  %v9069_v29 = vld [vmem:[#allocation78_spill] sm:$0xff]  ;;  %v9070_v38 = vld [vmem:[#allocation79_spill] sm:$0xff] }
 0x3f3   :  { %1943 = vmatpush.msrb.mxu0 %v9063_v25  ;;  %1963 = vmatpush.msrb.mxu1 %v9064_v1 }
 0x3f4   :  { %v1616_v14 = vrot.slane %v1614_v28, 1  ;;  %v1617_v46 = vrot.slane %v1614_v28, 2  ;;  %v1618_v59 = vrot.slane %v1614_v28, 3  ;;  %1630 = vst [vmem:[%s8762_s4 + $0x4] sm:$0x1] %v1614_v28  ;;  %1707 = vmatmul.f32.vlgmr.msra.gmra.mxu0 %v1614_v28  ;;  %1727 = vmatmul.f32.vlgmr.msra.gmra.mxu1 %v1614_v28  ;;  %v1619_v61 = vrot.slane %v1614_v28, 4 }
 0x3f5   :  { %1747 = vmatmul.f32.vlgmr.msra.gmra.mxu2 %v1614_v28  ;;  %1786 = vmatmul.f32.vlgmr.msra.gmra.mxu3 %v1614_v28  ;;  %v1620_v5 = vrot.slane %v1614_v28, 5  ;;  %v1621_v58 = vrot.slane %v1614_v28, 6  ;;  %v1622_v12 = vrot.slane %v1614_v28, 7  ;;  %v9071_v28 = vld [vmem:[#allocation80_spill] sm:$0xff] }
 0x3f6   :  { %1631 = vst [vmem:[%s8762_s4 + $0x14] sm:$0x1] %v1616_v14  ;;  %1983 = vmatpush.msrb.mxu2 %v9065_v31  ;;  %2022 = vmatpush.msrb.mxu3 %v9066_v15  ;;  %v9072_v14 = vld [vmem:[#allocation81_spill] sm:$0xff] }
 0x3f7   :  { %1632 = vst [vmem:[%s8762_s4 + $0x24] sm:$0x1] %v1617_v46  ;;  %1944 = vmatpush.msrb.mxu0 %v9067_v56  ;;  %1964 = vmatpush.msrb.mxu1 %v9068_v33  ;;  %v9073_v46 = vld [vmem:[#allocation82_spill] sm:$0xff] }
 0x3f8   :  { %1633 = vst [vmem:[%s8762_s4 + $0x34] sm:$0x1] %v1618_v59  ;;  %1984 = vmatpush.msrb.mxu2 %v9069_v29  ;;  %2023 = vmatpush.msrb.mxu3 %v9070_v38  ;;  %v9074_v59 = vld [vmem:[#allocation83_spill] sm:$0xff] }
 0x3f9   :  { %1634 = vst [vmem:[%s8762_s4 + $0x44] sm:$0x1] %v1619_v61  ;;  %1945 = vmatpush.msrb.mxu0 %v6594_v13  ;;  %1965 = vmatpush.msrb.mxu1 %v6599_v50  ;;  %v9075_v61 = vld [vmem:[#allocation84_spill] sm:$0xff] }
 0x3fa   :  { %1635 = vst [vmem:[%s8762_s4 + $0x54] sm:$0x1] %v1620_v5  ;;  %1985 = vmatpush.msrb.mxu2 %v6604_v43  ;;  %2024 = vmatpush.msrb.mxu3 %v6613_v23  ;;  %v9077_v5 = vld [vmem:[#allocation86_spill] sm:$0xff] }
 0x3fb   :  { %1636 = vst [vmem:[%s8762_s4 + $0x64] sm:$0x1] %v1621_v58  ;;  %2169 = vmatpush.msra.mxu0 %v6222_v6  ;;  %2189 = vmatpush.msra.mxu1 %v9071_v28  ;;  %v9076_v6 = vld [vmem:[#allocation85_spill] sm:$0xff] }
 0x3fc   :  { %1637 = vst [vmem:[%s8762_s4 + $0x74] sm:$0x1] %v1622_v12  ;;  %2209 = vmatpush.msra.mxu2 %v9072_v14  ;;  %2248 = vmatpush.msra.mxu3 %v9073_v46 }
 0x3fd   :  { %2170 = vmatpush.msra.mxu0 %v9074_v59  ;;  %2190 = vmatpush.msra.mxu1 %v6251_v55  ;;  %v9078_v55 = vld [vmem:[#allocation87_spill] sm:$0xff] }
 0x3fe   :  { %2210 = vmatpush.msra.mxu2 %v6256_v9  ;;  %2249 = vmatpush.msra.mxu3 %v6263_v52  ;;  %v9079_v9 = vld [vmem:[#allocation88_spill] sm:$0xff] }
 0x3ff   :  { %2171 = vmatpush.msra.mxu0 %v6270_v53  ;;  %2191 = vmatpush.msra.mxu1 %v9075_v61  ;;  %v9080_v52 = vld [vmem:[#allocation64_spill] sm:$0xff]  ;;  %v9081_v53 = vld [vmem:[#allocation23_spill] sm:$0xff] }
 0x400   :  { %2211 = vmatpush.msra.mxu2 %v6280_v11  ;;  %2250 = vmatpush.msra.mxu3 %v6287_v48  ;;  %v151_v11 = vadd.f32 %v9081_v53, %v9080_v52  ;;  %v9082_v48 = vld [vmem:[#allocation65_spill] sm:$0xff] }
 0x401   :  { %2172 = vmatpush.msra.mxu0 %v9076_v6  ;;  %2192 = vmatpush.msra.mxu1 %v6299_v42  ;;  %v9083_v42 = vld [vmem:[#allocation24_spill] sm:$0xff] }
 0x402   :  { %2212 = vmatpush.msra.mxu2 %v6304_v44  ;;  %2251 = vmatpush.msra.mxu3 %v9077_v5  ;;  %v216_v44 = vadd.f32 %v9083_v42, %v9082_v48 }
 0x403   :  { %2173 = vmatpush.msra.mxu0 %v9078_v55  ;;  %2193 = vmatpush.msra.mxu1 %v9079_v9 }
 0x404   :  { %2213 = vmatpush.msra.mxu2 %v6328_v51  ;;  %2252 = vmatpush.msra.mxu3 %v6335_v26 }
 0x405   :  { %2174 = vmatpush.msra.mxu0 %v6342_v20  ;;  %2194 = vmatpush.msra.mxu1 %v6347_v22 }
 0x406   :  { %2214 = vmatpush.msra.mxu2 %v6352_v45  ;;  %2253 = vmatpush.msra.mxu3 %v6359_v30 }
 0x407   :  { %2175 = vmatpush.msra.mxu0 %v6370_v2  ;;  %2195 = vmatpush.msra.mxu1 %v6375_v60  ;;  %v9084_v2 = vld [vmem:[#allocation68_spill] sm:$0xff]  ;;  %v9085_v60 = vld [vmem:[#allocation26_spill] sm:$0xff] }
 0x408   :  { %2215 = vmatpush.msra.mxu2 %v6380_v3  ;;  %2254 = vmatpush.msra.mxu3 %v6387_v7  ;;  %v346_v3 = vadd.f32 %v9085_v60, %v9084_v2  ;;  %v9089_v60 = vld [vmem:[#allocation28_spill] sm:$0xff] }
 0x409   :  { %2176 = vmatpush.msra.mxu0 %v6394_v4  ;;  %2196 = vmatpush.msra.mxu1 %v6399_v18 }
 0x40a   :  { %2216 = vmatpush.msra.mxu2 %v6404_v57  ;;  %2255 = vmatpush.msra.mxu3 %v6411_v35 }
 0x40b   :  { %2177 = vmatpush.msra.mxu0 %v6418_v24  ;;  %2197 = vmatpush.msra.mxu1 %v6423_v27 }
 0x40c   :  { %2217 = vmatpush.msra.mxu2 %v6430_v32  ;;  %2256 = vmatpush.msra.mxu3 %v6435_v10  ;;  %v9086_v32 = vld [vmem:[#allocation70_spill] sm:$0xff]  ;;  %v9087_v10 = vld [vmem:[#allocation25_spill] sm:$0xff] }
 0x40d   :  { %2178 = vmatpush.msra.mxu0 %v6442_v34  ;;  %2198 = vmatpush.msra.mxu1 %v6447_v36  ;;  %v281_v34 = vadd.f32 %v9087_v10, %v9086_v32 }
 0x40e   :  { %2218 = vmatpush.msra.mxu2 %v6452_v37  ;;  %2257 = vmatpush.msra.mxu3 %v6461_v41 }
 0x40f   :  { %2179 = vmatpush.msra.mxu0 %v6468_v47  ;;  %2199 = vmatpush.msra.mxu1 %v6473_v17 }
 0x410   :  { %2219 = vmatpush.msra.mxu2 %v6478_v16  ;;  %2258 = vmatpush.msra.mxu3 %v6485_v8 }
 0x411   :  { %2180 = vmatpush.msra.mxu0 %v6492_v0  ;;  %2200 = vmatpush.msra.mxu1 %v6497_v40 }
 0x412   :  { %2220 = vmatpush.msra.mxu2 %v6502_v21  ;;  %2259 = vmatpush.msra.mxu3 %v6509_v62 }
 0x413   :  { %2181 = vmatpush.msra.mxu0 %v6516_v19  ;;  %2201 = vmatpush.msra.mxu1 %v9060_v49 }
 0x414   :  { %2221 = vmatpush.msra.mxu2 %v9061_v39  ;;  %2260 = vmatpush.msra.mxu3 %v9062_v63 }
 0x415   :  { %2182 = vmatpush.msra.mxu0 %v9063_v25  ;;  %2202 = vmatpush.msra.mxu1 %v9064_v1 }
 0x416   :  { %2222 = vmatpush.msra.mxu2 %v9065_v31  ;;  %2261 = vmatpush.msra.mxu3 %v9066_v15 }
 0x417   :  { %2183 = vmatpush.msra.mxu0 %v9067_v56  ;;  %2203 = vmatpush.msra.mxu1 %v9068_v33 }
 0x418   :  { %2223 = vmatpush.msra.mxu2 %v9069_v29  ;;  %2262 = vmatpush.msra.mxu3 %v9070_v38 }
 0x419   :  { %2184 = vmatpush.msra.mxu0 %v6594_v13  ;;  %2204 = vmatpush.msra.mxu1 %v6599_v50 }
 0x41a   :  { %2224 = vmatpush.msra.mxu2 %v6604_v43  ;;  %2263 = vmatpush.msra.mxu3 %v6613_v23 }
 0x471   :  { %v1708_v51 = vpop.f32.mrf.mxu0  ;;  %v1728_v26 = vpop.f32.mrf.mxu1 }
 0x472   :  { %v1751_v20 = vadd.f32 %v1708_v51, %v151_v11  ;;  %v1752_v22 = vadd.f32 %v1728_v26, %v216_v44 }
 0x474   :  { %v4325_v45 = vmul.f32 -1.442695, %v1751_v20  ;;  %v4326_v30 = vmul.f32 -1.442695, %v1752_v22 }
 0x476   :  { %4441 = vpow2.f32 %v4325_v45  ;;  %v9088_v45 = vld [vmem:[#allocation27_spill] sm:$0xff] }
 0x477   :  { %4443 = vpow2.f32 %v4326_v30  ;;  %v154_v30 = vadd.f32 %v9088_v45, %v9080_v52 }
 0x478   :  { %v1787_v43 = vpop.f32.mrf.mxu3  ;;  %v1748_v24 = vpop.f32.mrf.mxu2 }
 0x479   :  { %v1790_v7 = vadd.f32 %v1787_v43, %v346_v3  ;;  %v1753_v41 = vadd.f32 %v1748_v24, %v281_v34  ;;  %v219_v3 = vadd.f32 %v9089_v60, %v9082_v48 }
 0x47b   :  { %v4327_v23 = vmul.f32 -1.442695, %v1790_v7 }
 0x47c   :  { %v4442_v4 = vpop.eup %4441 }
 0x47d   :  { %v4444_v18 = vpop.eup %4443  ;;  %v1794_v57 = vadd.f32 1.0, %v4442_v4  ;;  %4445 = vpow2.f32 %v4327_v23 }
 0x47e   :  { %v1813_v35 = vadd.f32 1.0, %v4444_v18 }
 0x47f   :  { %4447 = vrcp.f32 %v1794_v57  ;;  %v1806_v40 = vand.u32 2147483648, %v1794_v57  ;;  %v1804_v19 = vand.u32 2147483647, %v1794_v57  ;;  %vm1800_vm14 = vweird.f32 %v1794_v57 }
 0x480   :  { %4449 = vrcp.f32 %v1813_v35  ;;  %v1825_v21 = vand.u32 2147483648, %v1813_v35  ;;  %v1823_v50 = vand.u32 2147483647, %v1813_v35  ;;  %vm1819_vm15 = vweird.f32 %v1813_v35 }
 0x481   :  { %v1807_v63 = vor.u32 1.1754944e-38, %v1806_v40  ;;  %vm1805_vm2 = vcmp.eq.f32.partialorder %v1804_v19, 8.507059e+37 }
 0x482   :  { %v1826_v1 = vor.u32 1.1754944e-38, %v1825_v21  ;;  %vm1824_vm3 = vcmp.eq.f32.partialorder %v1823_v50, 8.507059e+37 }
 0x483   :  { %v4446_v27 = vpop.eup %4445 }
 0x484   :  { %v1833_v36 = vadd.f32 1.0, %v4446_v27 }
 0x485   :  { %v4448_v37 = vpop.eup %4447 }
 0x486   :  { %v4450_v47 = vpop.eup %4449  ;;  %v1796_v17 = vmul.f32 %v4448_v37, %v1794_v57  ;;  %4451 = vrcp.f32 %v1833_v36  ;;  %vm1801_vm12 = vweird.f32 %v4448_v37  ;;  %v1845_v61 = vand.u32 2147483648, %v1833_v36 }
 0x487   :  { %v1815_v16 = vmul.f32 %v4450_v47, %v1813_v35  ;;  %4453 = vtanh.f32 %v1753_v41  ;;  %vm1820_vm13 = vweird.f32 %v4450_v47  ;;  %vm1802_vm0 = vmor %vm1800_vm14, %vm1801_vm12  ;;  %vm1839_vm5 = vweird.f32 %v1833_v36  ;;  %v9090_v35 = vld [vmem:[#allocation30_spill] sm:$0xff] }
 0x488   :  { %v1797_v8 = vsub.f32 1.0, %v1796_v17  ;;  %vm1821_vm1 = vmor %vm1819_vm15, %vm1820_vm13  ;;  %v1843_v6 = vand.u32 2147483647, %v1833_v36  ;;  %v1846_v55 = vor.u32 1.1754944e-38, %v1845_v61  ;;  %v349_v24 = vadd.f32 %v9090_v35, %v9084_v2  ;;  %v6882_v35 = vld [vmem:[%s8760_s2 + $0x1f0] sm:$0xff] }
 0x489   :  { %v1816_v0 = vsub.f32 1.0, %v1815_v16  ;;  %9093 = vst [vmem:[#allocation12_spill] sm:$0xff] %v6882_v35 }
 0x48a   :  { %v1798_v62 = vmul.f32 %v4448_v37, %v1797_v8  ;;  %vm1844_vm7 = vcmp.eq.f32.partialorder %v1843_v6, 8.507059e+37  ;;  %v9091_v8 = vld [vmem:[#allocation29_spill] sm:$0xff] }
 0x48b   :  { %v1817_v13 = vmul.f32 %v4450_v47, %v1816_v0  ;;  %v284_v0 = vadd.f32 %v9091_v8, %v9086_v32  ;;  %v6949_v8 = vld [vmem:[%s8760_s2 + $0x188] sm:$0xff] }
 0x48c   :  { %v4452_v49 = vpop.eup %4451  ;;  %v1799_v39 = vadd.f32 %v4448_v37, %v1798_v62 }
 0x48d   :  { %v1818_v58 = vadd.f32 %v4450_v47, %v1817_v13  ;;  %v1835_v25 = vmul.f32 %v4452_v49, %v1833_v36  ;;  %v4454_v31 = vpop.eup %4453  ;;  %vm1840_vm4 = vweird.f32 %v4452_v49 }
 0x48e   :  { %v1803_v12 = vsel %vm1802_vm0, %v4448_v37, %v1799_v39  ;;  %vm1841_vm6 = vmor %vm1839_vm5, %vm1840_vm4 }
 0x48f   :  { %v1808_v15 = vsel %vm1805_vm2, %v1807_v63, %v1803_v12  ;;  %v1822_v56 = vsel %vm1821_vm1, %v4450_v47, %v1818_v58  ;;  %v1836_v33 = vsub.f32 1.0, %v1835_v25 }
 0x490   :  { %v1827_v29 = vsel %vm1824_vm3, %v1826_v1, %v1822_v56  ;;  %v1850_v38 = vmul.f32 %v4454_v31, %v1808_v15 }
 0x491   :  { %v1849_v28 = vmul.f32 %v1827_v29, %v6664_v54  ;;  %v1837_v14 = vmul.f32 %v4452_v49, %v1836_v33 }
 0x493   :  { %v6806_v46 = vadd.f32 %v1850_v38, %v1849_v28  ;;  %v1838_v59 = vadd.f32 %v4452_v49, %v1837_v14 }
 0x495   :  { %4455 = vtanh.f32 %v6806_v46  ;;  %v1842_v5 = vsel %vm1841_vm6, %v4452_v49, %v1838_v59 }
 0x496   :  { %v1847_v53 = vsel %vm1844_vm7, %v1846_v55, %v1842_v5 }
 0x49b   :  { %v4456_v9 = vpop.eup %4455 }
 0x49c   :  { %v1853_v11 = vmul.f32 %v4456_v9, %v1847_v53 }
 0x49e   :  { %v1855_v42 = vrot.slane %v1853_v11, 1  ;;  %v1856_v44 = vrot.slane %v1853_v11, 2  ;;  %v1857_v54 = vrot.slane %v1853_v11, 3  ;;  %1869 = vst [vmem:[%s8762_s4 + $0x5] sm:$0x1] %v1853_v11  ;;  %1946 = vmatmul.f32.vlgmr.msrb.gmra.mxu0 %v1853_v11  ;;  %1966 = vmatmul.f32.vlgmr.msrb.gmra.mxu1 %v1853_v11  ;;  %v1858_v51 = vrot.slane %v1853_v11, 4 }
 0x49f   :  { %1986 = vmatmul.f32.vlgmr.msrb.gmra.mxu2 %v1853_v11  ;;  %2025 = vmatmul.f32.vlgmr.msrb.gmra.mxu3 %v1853_v11  ;;  %v1859_v26 = vrot.slane %v1853_v11, 5  ;;  %v1860_v20 = vrot.slane %v1853_v11, 6  ;;  %v1861_v22 = vrot.slane %v1853_v11, 7 }
 0x4a0   :  { %1870 = vst [vmem:[%s8762_s4 + $0x15] sm:$0x1] %v1855_v42  ;;  %2448 = vmatpush.msrb.mxu2 %v6882_v35 }
 0x4a1   :  { %1871 = vst [vmem:[%s8762_s4 + $0x25] sm:$0x1] %v1856_v44 }
 0x4a2   :  { %1872 = vst [vmem:[%s8762_s4 + $0x35] sm:$0x1] %v1857_v54 }
 0x4a3   :  { %1873 = vst [vmem:[%s8762_s4 + $0x45] sm:$0x1] %v1858_v51 }
 0x4a4   :  { %1874 = vst [vmem:[%s8762_s4 + $0x55] sm:$0x1] %v1859_v26 }
 0x4a5   :  { %1875 = vst [vmem:[%s8762_s4 + $0x65] sm:$0x1] %v1860_v20 }
 0x4a6   :  { %1876 = vst [vmem:[%s8762_s4 + $0x75] sm:$0x1] %v1861_v22 }
 0x51b   :  { %v1947_v43 = vpop.f32.mrf.mxu0  ;;  %v1967_v7 = vpop.f32.mrf.mxu1 }
 0x51c   :  { %v1990_v23 = vadd.f32 %v1947_v43, %v154_v30  ;;  %v1991_v4 = vadd.f32 %v1967_v7, %v219_v3 }
 0x51e   :  { %v4328_v18 = vmul.f32 -1.442695, %v1990_v23  ;;  %v4329_v57 = vmul.f32 -1.442695, %v1991_v4 }
 0x520   :  { %4457 = vpow2.f32 %v4328_v18  ;;  %v6872_v18 = vld [vmem:[%s8760_s2 + $0x1e0] sm:$0xff] }
 0x521   :  { %4459 = vpow2.f32 %v4329_v57  ;;  %v6877_v57 = vld [vmem:[%s8760_s2 + $0x1e8] sm:$0xff]  ;;  %2408 = vmatpush.msrb.mxu0 %v6872_v18 }
 0x522   :  { %v2026_v27 = vpop.f32.mrf.mxu3  ;;  %v1987_v17 = vpop.f32.mrf.mxu2  ;;  %9092 = vst [vmem:[#allocation11_spill] sm:$0xff] %v6877_v57  ;;  %2428 = vmatpush.msrb.mxu1 %v6877_v57 }
 0x523   :  { %v2029_v10 = vadd.f32 %v2026_v27, %v349_v24  ;;  %v1992_v62 = vadd.f32 %v1987_v17, %v284_v0  ;;  %v6889_v24 = vld [vmem:[%s8760_s2 + $0x1f8] sm:$0xff]  ;;  %v6896_v27 = vld [vmem:[%s8760_s2 + $0x1c0] sm:$0xff]  ;;  %v6954_v0 = vld [vmem:[%s8760_s2 + $0x190] sm:$0xff] }
 0x524   :  { %9094 = vst [vmem:[#allocation14_spill] sm:$0xff] %v6889_v24  ;;  %2487 = vmatpush.msrb.mxu3 %v6889_v24  ;;  %2409 = vmatpush.msrb.mxu0 %v6896_v27  ;;  %v6937_v17 = vld [vmem:[%s8760_s2 + $0x1b8] sm:$0xff] }
 0x525   :  { %v4330_v34 = vmul.f32 -1.442695, %v2029_v10  ;;  %9095 = vst [vmem:[#allocation13_spill] sm:$0xff] %v6896_v27  ;;  %v6901_v10 = vld [vmem:[%s8760_s2 + $0x1c8] sm:$0xff] }
 0x526   :  { %v4458_v36 = vpop.eup %4457  ;;  %2429 = vmatpush.msrb.mxu1 %v6901_v10 }
 0x527   :  { %v4460_v37 = vpop.eup %4459  ;;  %v2033_v41 = vadd.f32 1.0, %v4458_v36  ;;  %4461 = vpow2.f32 %v4330_v34  ;;  %v6906_v34 = vld [vmem:[%s8760_s2 + $0x1d0] sm:$0xff]  ;;  %v6913_v36 = vld [vmem:[%s8760_s2 + $0x1d8] sm:$0xff] }
 0x528   :  { %v2052_v47 = vadd.f32 1.0, %v4460_v37  ;;  %2449 = vmatpush.msrb.mxu2 %v6906_v34  ;;  %2488 = vmatpush.msrb.mxu3 %v6913_v36  ;;  %v6920_v37 = vld [vmem:[%s8760_s2 + $0x1a0] sm:$0xff] }
 0x529   :  { %4463 = vrcp.f32 %v2033_v41  ;;  %v2045_v63 = vand.u32 2147483648, %v2033_v41  ;;  %v2043_v1 = vand.u32 2147483647, %v2033_v41  ;;  %vm2039_vm10 = vweird.f32 %v2033_v41  ;;  %2410 = vmatpush.msrb.mxu0 %v6920_v37 }
 0x52a   :  { %4465 = vrcp.f32 %v2052_v47  ;;  %v2064_v58 = vand.u32 2147483648, %v2052_v47  ;;  %v2062_v31 = vand.u32 2147483647, %v2052_v47  ;;  %vm2058_vm11 = vweird.f32 %v2052_v47  ;;  %2489 = vmatpush.msrb.mxu3 %v6937_v17 }
 0x52b   :  { %v2046_v33 = vor.u32 1.1754944e-38, %v2045_v63  ;;  %vm2044_vm14 = vcmp.eq.f32.partialorder %v2043_v1, 8.507059e+37  ;;  %v7009_v63 = vld [vmem:[%s8760_s2 + $0x158] sm:$0xff] }
 0x52c   :  { %v2065_v28 = vor.u32 1.1754944e-38, %v2064_v58  ;;  %vm2063_vm15 = vcmp.eq.f32.partialorder %v2062_v31, 8.507059e+37  ;;  %v9101_v58 = vld [vmem:[#allocation31_spill] sm:$0xff]  ;;  %v9102_v1 = vld [vmem:[#allocation32_spill] sm:$0xff]  ;;  %v7020_v31 = vld [vmem:[%s8760_s2 + $0x120] sm:$0xff] }
 0x52d   :  { %v4462_v16 = vpop.eup %4461 }
 0x52e   :  { %v2072_v40 = vadd.f32 1.0, %v4462_v16  ;;  %v6944_v16 = vld [vmem:[%s8760_s2 + $0x180] sm:$0xff] }
 0x52f   :  { %v4464_v21 = vpop.eup %4463  ;;  %9097 = vst [vmem:[#allocation16_spill] sm:$0xff] %v6944_v16  ;;  %2411 = vmatpush.msrb.mxu0 %v6944_v16 }
 0x530   :  { %v4466_v19 = vpop.eup %4465  ;;  %v2035_v13 = vmul.f32 %v4464_v21, %v2033_v41  ;;  %4467 = vrcp.f32 %v2072_v40  ;;  %vm2040_vm8 = vweird.f32 %v4464_v21  ;;  %v2084_v54 = vand.u32 2147483648, %v2072_v40  ;;  %v6925_v41 = vld [vmem:[%s8760_s2 + $0x1a8] sm:$0xff] }
 0x531   :  { %v2054_v50 = vmul.f32 %v4466_v19, %v2052_v47  ;;  %4469 = vtanh.f32 %v1992_v62  ;;  %vm2059_vm9 = vweird.f32 %v4466_v19  ;;  %vm2041_vm12 = vmor %vm2039_vm10, %vm2040_vm8  ;;  %vm2078_vm1 = vweird.f32 %v2072_v40  ;;  %9096 = vst [vmem:[#allocation15_spill] sm:$0xff] %v6925_v41  ;;  %v6930_v47 = vld [vmem:[%s8760_s2 + $0x1b0] sm:$0xff]  ;;  %2430 = vmatpush.msrb.mxu1 %v6925_v41  ;;  %v6973_v62 = vld [vmem:[%s8760_s2 + $0x168] sm:$0xff] }
 0x532   :  { %v2036_v49 = vsub.f32 1.0, %v2035_v13  ;;  %vm2060_vm13 = vmor %vm2058_vm11, %vm2059_vm9  ;;  %v2082_v51 = vand.u32 2147483647, %v2072_v40  ;;  %v2085_v20 = vor.u32 1.1754944e-38, %v2084_v54  ;;  %2450 = vmatpush.msrb.mxu2 %v6930_v47  ;;  %9100 = vst [vmem:[#allocation19_spill] sm:$0xff] %v6973_v62  ;;  %v6985_v13 = vld [vmem:[%s8760_s2 + $0x178] sm:$0xff] }
 0x533   :  { %v2055_v39 = vsub.f32 1.0, %v2054_v50  ;;  %2431 = vmatpush.msrb.mxu1 %v6949_v8  ;;  %v6992_v50 = vld [vmem:[%s8760_s2 + $0x140] sm:$0xff]  ;;  %v7085_v54 = vld [vmem:[%s8760_s2 + $0xf8] sm:$0xff] }
 0x534   :  { %v2037_v25 = vmul.f32 %v4464_v21, %v2036_v49  ;;  %vm2083_vm3 = vcmp.eq.f32.partialorder %v2082_v51, 8.507059e+37  ;;  %2451 = vmatpush.msrb.mxu2 %v6954_v0  ;;  %v6997_v49 = vld [vmem:[%s8760_s2 + $0x148] sm:$0xff]  ;;  %v7092_v51 = vld [vmem:[%s8760_s2 + $0xc0] sm:$0xff] }
 0x535   :  { %v2056_v12 = vmul.f32 %v4466_v19, %v2055_v39  ;;  %2432 = vmatpush.msrb.mxu1 %v6973_v62  ;;  %v7002_v39 = vld [vmem:[%s8760_s2 + $0x150] sm:$0xff] }
 0x536   :  { %v4468_v15 = vpop.eup %4467  ;;  %v2038_v56 = vadd.f32 %v4464_v21, %v2037_v25  ;;  %v157_v25 = vadd.f32 %v9101_v58, %v9080_v52  ;;  %v7147_v58 = vld [vmem:[%s8760_s2 + $0x88] sm:$0xff]  ;;  %v7237_v52 = vld [vmem:[%s8760_s2 + $0x38] sm:$0xff] }
 0x537   :  { %v2057_v29 = vadd.f32 %v4466_v19, %v2056_v12  ;;  %v2074_v38 = vmul.f32 %v4468_v15, %v2072_v40  ;;  %v4470_v59 = vpop.eup %4469  ;;  %vm2079_vm0 = vweird.f32 %v4468_v15  ;;  %v6961_v40 = vld [vmem:[%s8760_s2 + $0x198] sm:$0xff]  ;;  %2433 = vmatpush.msrb.mxu1 %v6997_v49  ;;  %v222_v12 = vadd.f32 %v9102_v1, %v9082_v48  ;;  %v7230_v48 = vld [vmem:[%s8760_s2 + $0x30] sm:$0xff]  ;;  %9114 = vst [vmem:[#allocation76_spill] sm:$0xff] %v7237_v52 }
 0x538   :  { %v2042_v14 = vsel %vm2041_vm12, %v4464_v21, %v2038_v56  ;;  %vm2080_vm2 = vmor %vm2078_vm1, %vm2079_vm0  ;;  %9098 = vst [vmem:[#allocation18_spill] sm:$0xff] %v6961_v40  ;;  %2490 = vmatpush.msrb.mxu3 %v6961_v40  ;;  %v6968_v21 = vld [vmem:[%s8760_s2 + $0x160] sm:$0xff]  ;;  %v7030_v56 = vld [vmem:[%s8760_s2 + $0x130] sm:$0xff] }
 0x539   :  { %v2047_v61 = vsel %vm2044_vm14, %v2046_v33, %v2042_v14  ;;  %v2061_v6 = vsel %vm2060_vm13, %v4466_v19, %v2057_v29  ;;  %v2075_v5 = vsub.f32 1.0, %v2074_v38  ;;  %9099 = vst [vmem:[#allocation17_spill] sm:$0xff] %v6968_v21  ;;  %v6978_v19 = vld [vmem:[%s8760_s2 + $0x170] sm:$0xff]  ;;  %2412 = vmatpush.msrb.mxu0 %v6968_v21  ;;  %v7037_v38 = vld [vmem:[%s8760_s2 + $0x138] sm:$0xff] }
 0x53a   :  { %v2066_v55 = vsel %vm2063_vm15, %v2065_v28, %v2061_v6  ;;  %v2089_v9 = vmul.f32 %v4470_v59, %v2047_v61  ;;  %2452 = vmatpush.msrb.mxu2 %v6978_v19  ;;  %2491 = vmatpush.msrb.mxu3 %v6985_v13  ;;  %v7044_v59 = vld [vmem:[%s8760_s2 + $0x100] sm:$0xff]  ;;  %v7049_v61 = vld [vmem:[%s8760_s2 + $0x108] sm:$0xff]  ;;  %v7054_v6 = vld [vmem:[%s8760_s2 + $0x110] sm:$0xff]  ;;  %9113 = vst [vmem:[#allocation75_spill] sm:$0xff] %v7230_v48 }
 0x53b   :  { %v2088_v53 = vmul.f32 %v2066_v55, %v6806_v46  ;;  %v2076_v11 = vmul.f32 %v4468_v15, %v2075_v5  ;;  %2413 = vmatpush.msrb.mxu0 %v6992_v50  ;;  %v7061_v5 = vld [vmem:[%s8760_s2 + $0x118] sm:$0xff] }
 0x53c   :  { %2453 = vmatpush.msrb.mxu2 %v7002_v39  ;;  %2492 = vmatpush.msrb.mxu3 %v7009_v63 }
 0x53d   :  { %v6842_v42 = vadd.f32 %v2089_v9, %v2088_v53  ;;  %v2077_v44 = vadd.f32 %v4468_v15, %v2076_v11  ;;  %2414 = vmatpush.msrb.mxu0 %v7020_v31  ;;  %v7068_v53 = vld [vmem:[%s8760_s2 + $0xe0] sm:$0xff]  ;;  %v7073_v11 = vld [vmem:[%s8760_s2 + $0xe8] sm:$0xff] }
 0x53e   :  { %2454 = vmatpush.msrb.mxu2 %v7030_v56  ;;  %2493 = vmatpush.msrb.mxu3 %v7037_v38 }
 0x53f   :  { %4471 = vtanh.f32 %v6842_v42  ;;  %v2081_v26 = vsel %vm2080_vm2, %v4468_v15, %v2077_v44  ;;  %v7025_v15 = vld [vmem:[%s8760_s2 + $0x128] sm:$0xff]  ;;  %2415 = vmatpush.msrb.mxu0 %v7044_v59  ;;  %v7080_v44 = vld [vmem:[%s8760_s2 + $0xf0] sm:$0xff] }
 0x540   :  { %v2086_v45 = vsel %vm2083_vm3, %v2085_v20, %v2081_v26  ;;  %2434 = vmatpush.msrb.mxu1 %v7025_v15  ;;  %2455 = vmatpush.msrb.mxu2 %v7054_v6  ;;  %v7097_v26 = vld [vmem:[%s8760_s2 + $0xc8] sm:$0xff]  ;;  %v7102_v20 = vld [vmem:[%s8760_s2 + $0xd0] sm:$0xff] }
 0x541   :  { %2494 = vmatpush.msrb.mxu3 %v7061_v5  ;;  %2416 = vmatpush.msrb.mxu0 %v7068_v53 }
 0x542   :  { %2435 = vmatpush.msrb.mxu1 %v7049_v61  ;;  %2456 = vmatpush.msrb.mxu2 %v7080_v44 }
 0x543   :  { %2495 = vmatpush.msrb.mxu3 %v7085_v54  ;;  %2417 = vmatpush.msrb.mxu0 %v7092_v51 }
 0x544   :  { %2436 = vmatpush.msrb.mxu1 %v7073_v11  ;;  %2457 = vmatpush.msrb.mxu2 %v7102_v20 }
 0x545   :  { %v4472_v22 = vpop.eup %4471 }
 0x546   :  { %v2092_v30 = vmul.f32 %v4472_v22, %v2086_v45  ;;  %v9103_v22 = vld [vmem:[#allocation34_spill] sm:$0xff]  ;;  %2437 = vmatpush.msrb.mxu1 %v7097_v26 }
 0x547   :  { %v352_v45 = vadd.f32 %v9103_v22, %v9084_v2  ;;  %v7185_v22 = vld [vmem:[%s8760_s2 + $0x78] sm:$0xff]  ;;  %v7225_v2 = vld [vmem:[%s8760_s2 + $0x28] sm:$0xff] }
 0x548   :  { %v2094_v60 = vrot.slane %v2092_v30, 1  ;;  %v2095_v3 = vrot.slane %v2092_v30, 2  ;;  %v2096_v46 = vrot.slane %v2092_v30, 3  ;;  %2108 = vst [vmem:[%s8762_s4 + $0x6] sm:$0x1] %v2092_v30  ;;  %2185 = vmatmul.f32.vlgmr.msra.gmra.mxu0 %v2092_v30  ;;  %2205 = vmatmul.f32.vlgmr.msra.gmra.mxu1 %v2092_v30  ;;  %v2097_v43 = vrot.slane %v2092_v30, 4 }
 0x549   :  { %2225 = vmatmul.f32.vlgmr.msra.gmra.mxu2 %v2092_v30  ;;  %2264 = vmatmul.f32.vlgmr.msra.gmra.mxu3 %v2092_v30  ;;  %v2098_v7 = vrot.slane %v2092_v30, 5  ;;  %v2099_v23 = vrot.slane %v2092_v30, 6  ;;  %v2100_v4 = vrot.slane %v2092_v30, 7  ;;  %v7111_v30 = vld [vmem:[%s8760_s2 + $0xd8] sm:$0xff]  ;;  %9106 = vst [vmem:[#allocation21_spill] sm:$0xff] %v7185_v22 }
 0x54a   :  { %2109 = vst [vmem:[%s8762_s4 + $0x16] sm:$0x1] %v2094_v60  ;;  %2496 = vmatpush.msrb.mxu3 %v7111_v30 }
 0x54b   :  { %2110 = vst [vmem:[%s8762_s4 + $0x26] sm:$0x1] %v2095_v3  ;;  %v7118_v3 = vld [vmem:[%s8760_s2 + $0xa0] sm:$0xff] }
 0x54c   :  { %2111 = vst [vmem:[%s8762_s4 + $0x36] sm:$0x1] %v2096_v46  ;;  %v7123_v46 = vld [vmem:[%s8760_s2 + $0xa8] sm:$0xff]  ;;  %2418 = vmatpush.msrb.mxu0 %v7118_v3 }
 0x54d   :  { %2112 = vst [vmem:[%s8762_s4 + $0x46] sm:$0x1] %v2097_v43  ;;  %v7128_v43 = vld [vmem:[%s8760_s2 + $0xb0] sm:$0xff]  ;;  %2438 = vmatpush.msrb.mxu1 %v7123_v46 }
 0x54e   :  { %2113 = vst [vmem:[%s8762_s4 + $0x56] sm:$0x1] %v2098_v7  ;;  %2458 = vmatpush.msrb.mxu2 %v7128_v43 }
 0x54f   :  { %2114 = vst [vmem:[%s8762_s4 + $0x66] sm:$0x1] %v2099_v23  ;;  %v7135_v23 = vld [vmem:[%s8760_s2 + $0xb8] sm:$0xff]  ;;  %2439 = vmatpush.msrb.mxu1 %v7147_v58 }
 0x550   :  { %2115 = vst [vmem:[%s8762_s4 + $0x76] sm:$0x1] %v2100_v4  ;;  %2497 = vmatpush.msrb.mxu3 %v7135_v23  ;;  %v7142_v4 = vld [vmem:[%s8760_s2 + $0x80] sm:$0xff] }
 0x551   :  { %2419 = vmatpush.msrb.mxu0 %v7142_v4  ;;  %9112 = vst [vmem:[#allocation74_spill] sm:$0xff] %v7225_v2 }
 0x5c5   :  { %v2186_v33 = vpop.f32.mrf.mxu0  ;;  %v2206_v29 = vpop.f32.mrf.mxu1 }
 0x5c6   :  { %v2229_v28 = vadd.f32 %v2186_v33, %v157_v25  ;;  %v2230_v14 = vadd.f32 %v2206_v29, %v222_v12  ;;  %v7152_v25 = vld [vmem:[%s8760_s2 + $0x90] sm:$0xff]  ;;  %v7159_v12 = vld [vmem:[%s8760_s2 + $0x98] sm:$0xff]  ;;  %v7166_v29 = vld [vmem:[%s8760_s2 + $0x60] sm:$0xff] }
 0x5c7   :  { %2459 = vmatpush.msrb.mxu2 %v7152_v25  ;;  %2498 = vmatpush.msrb.mxu3 %v7159_v12 }
 0x5c8   :  { %v4331_v55 = vmul.f32 -1.442695, %v2229_v28  ;;  %v4332_v9 = vmul.f32 -1.442695, %v2230_v14  ;;  %v7171_v28 = vld [vmem:[%s8760_s2 + $0x68] sm:$0xff]  ;;  %v7176_v14 = vld [vmem:[%s8760_s2 + $0x70] sm:$0xff]  ;;  %2420 = vmatpush.msrb.mxu0 %v7166_v29 }
 0x5c9   :  { %9104 = vst [vmem:[#allocation20_spill] sm:$0xff] %v7171_v28  ;;  %2440 = vmatpush.msrb.mxu1 %v7171_v28  ;;  %2460 = vmatpush.msrb.mxu2 %v7176_v14 }
 0x5ca   :  { %4473 = vpow2.f32 %v4331_v55  ;;  %9105 = vst [vmem:[#allocation22_spill] sm:$0xff] %v7176_v14  ;;  %2499 = vmatpush.msrb.mxu3 %v7185_v22 }
 0x5cb   :  { %4475 = vpow2.f32 %v4332_v9 }
 0x5cc   :  { %v2265_v60 = vpop.f32.mrf.mxu3 }
 0x5cd   :  { %v2268_v7 = vadd.f32 %v2265_v60, %v352_v45  ;;  %v7194_v60 = vld [vmem:[%s8760_s2 + $0x40] sm:$0xff] }
 0x5ce   :  { %9107 = vst [vmem:[#allocation89_spill] sm:$0xff] %v7194_v60  ;;  %2421 = vmatpush.msrb.mxu0 %v7194_v60 }
 0x5cf   :  { %v4333_v1 = vmul.f32 -1.442695, %v2268_v7  ;;  %v7199_v7 = vld [vmem:[%s8760_s2 + $0x48] sm:$0xff] }
 0x5d0   :  { %v4474_v33 = vpop.eup %4473  ;;  %9108 = vst [vmem:[#allocation90_spill] sm:$0xff] %v7199_v7  ;;  %2441 = vmatpush.msrb.mxu1 %v7199_v7 }
 0x5d1   :  { %v4476_v55 = vpop.eup %4475  ;;  %v7178_v9 = vadd.f32 1.0, %v4474_v33  ;;  %4477 = vpow2.f32 %v4333_v1  ;;  %v7204_v1 = vld [vmem:[%s8760_s2 + $0x50] sm:$0xff]  ;;  %v7212_v33 = vld [vmem:[%s8760_s2 + $0x58] sm:$0xff] }
 0x5d2   :  { %v7187_v45 = vadd.f32 1.0, %v4476_v55  ;;  %9109 = vst [vmem:[#allocation71_spill] sm:$0xff] %v7204_v1  ;;  %2461 = vmatpush.msrb.mxu2 %v7204_v1  ;;  %2500 = vmatpush.msrb.mxu3 %v7212_v33  ;;  %v7220_v55 = vld [vmem:[%s8760_s2 + $0x20] sm:$0xff] }
 0x5d3   :  { %4479 = vrcp.f32 %v7178_v9  ;;  %9110 = vst [vmem:[#allocation72_spill] sm:$0xff] %v7212_v33  ;;  %2422 = vmatpush.msrb.mxu0 %v7220_v55  ;;  %2442 = vmatpush.msrb.mxu1 %v7225_v2  ;;  %v2226_v33 = vpop.f32.mrf.mxu2  ;;  %v7244_v1 = vld [vmem:[%s8760_s2] sm:$0xff]  ;;  %v7254_v2 = vld [vmem:[%s8760_s2 + $0x10] sm:$0xff]  ;;  %vm2278_vm6 = vweird.f32 %v7178_v9 }
 0x5d4   :  { %4481 = vrcp.f32 %v7187_v45  ;;  %9111 = vst [vmem:[#allocation73_spill] sm:$0xff] %v7220_v55  ;;  %2462 = vmatpush.msrb.mxu2 %v7230_v48  ;;  %2501 = vmatpush.msrb.mxu3 %v7237_v52  ;;  %v7249_v55 = vld [vmem:[%s8760_s2 + $0x8] sm:$0xff]  ;;  %v9115_v48 = vld [vmem:[#allocation33_spill] sm:$0xff]  ;;  %v7263_v52 = vld [vmem:[%s8760_s2 + $0x18] sm:$0xff]  ;;  %vm2297_vm7 = vweird.f32 %v7187_v45 }
 0x5d5   :  { %v287_v60 = vadd.f32 %v9115_v48, %v9086_v32  ;;  %2423 = vmatpush.msrb.mxu0 %v7244_v1  ;;  %2443 = vmatpush.msrb.mxu1 %v7249_v55 }
 0x5d6   :  { %2463 = vmatpush.msrb.mxu2 %v7254_v2  ;;  %2502 = vmatpush.msrb.mxu3 %v7263_v52 }
 0x5d7   :  { %v4478_v7 = vpop.eup %4477  ;;  %v2231_v28 = vadd.f32 %v2226_v33, %v287_v60  ;;  %2647 = vmatpush.msra.mxu0 %v6872_v18  ;;  %2667 = vmatpush.msra.mxu1 %v6877_v57  ;;  %v2284_v57 = vand.u32 2147483648, %v7178_v9 }
 0x5d8   :  { %v7265_v22 = vadd.f32 1.0, %v4478_v7  ;;  %2687 = vmatpush.msra.mxu2 %v6882_v35  ;;  %2726 = vmatpush.msra.mxu3 %v6889_v24  ;;  %v2303_v24 = vand.u32 2147483648, %v7187_v45 }
 0x5d9   :  { %v4480_v14 = vpop.eup %4479  ;;  %2648 = vmatpush.msra.mxu0 %v6896_v27  ;;  %2668 = vmatpush.msra.mxu1 %v6901_v10  ;;  %v2282_v27 = vand.u32 2147483647, %v7178_v9 }
 0x5da   :  { %v4482_v48 = vpop.eup %4481  ;;  %v2274_v32 = vmul.f32 %v4480_v14, %v7178_v9  ;;  %4483 = vrcp.f32 %v7265_v22  ;;  %2688 = vmatpush.msra.mxu2 %v6906_v34  ;;  %2727 = vmatpush.msra.mxu3 %v6913_v36  ;;  %vm2279_vm4 = vweird.f32 %v4480_v14  ;;  %vm2317_vm13 = vweird.f32 %v7265_v22 }
 0x5db   :  { %v2293_v7 = vmul.f32 %v4482_v48, %v7187_v45  ;;  %4485 = vtanh.f32 %v2231_v28  ;;  %2649 = vmatpush.msra.mxu0 %v6920_v37  ;;  %2669 = vmatpush.msra.mxu1 %v6925_v41  ;;  %vm2298_vm5 = vweird.f32 %v4482_v48  ;;  %vm2280_vm8 = vmor %vm2278_vm6, %vm2279_vm4  ;;  %vm2283_vm10 = vcmp.eq.f32.partialorder %v2282_v27, 8.507059e+37 }
 0x5dc   :  { %v2275_v60 = vsub.f32 1.0, %v2274_v32  ;;  %2689 = vmatpush.msra.mxu2 %v6930_v47  ;;  %2728 = vmatpush.msra.mxu3 %v6937_v17  ;;  %vm2299_vm9 = vmor %vm2297_vm7, %vm2298_vm5 }
 0x5dd   :  { %v2294_v33 = vsub.f32 1.0, %v2293_v7  ;;  %v2301_v7 = vand.u32 2147483647, %v7187_v45  ;;  %2650 = vmatpush.msra.mxu0 %v6944_v16  ;;  %2670 = vmatpush.msra.mxu1 %v6949_v8 }
 0x5de   :  { %v2276_v35 = vmul.f32 %v4480_v14, %v2275_v60  ;;  %2690 = vmatpush.msra.mxu2 %v6954_v0  ;;  %2729 = vmatpush.msra.mxu3 %v6961_v40  ;;  %v2285_v60 = vor.u32 1.1754944e-38, %v2284_v57 }
 0x5df   :  { %v2295_v32 = vmul.f32 %v4482_v48, %v2294_v33  ;;  %2651 = vmatpush.msra.mxu0 %v6968_v21  ;;  %2671 = vmatpush.msra.mxu1 %v6973_v62  ;;  %vm2302_vm11 = vcmp.eq.f32.partialorder %v2301_v7, 8.507059e+37  ;;  %v9116_v7 = vld [vmem:[#allocation20_spill] sm:$0xff] }
 0x5e0   :  { %v7290_v28 = vpop.eup %4483  ;;  %v2277_v41 = vadd.f32 %v4480_v14, %v2276_v35  ;;  %v2304_v35 = vor.u32 1.1754944e-38, %v2303_v24  ;;  %2691 = vmatpush.msra.mxu2 %v6978_v19  ;;  %2730 = vmatpush.msra.mxu3 %v6985_v13 }
 0x5e1   :  { %v2296_v33 = vadd.f32 %v4482_v48, %v2295_v32  ;;  %v2313_v16 = vmul.f32 %v7290_v28, %v7265_v22  ;;  %v4486_v45 = vpop.eup %4485  ;;  %2652 = vmatpush.msra.mxu0 %v6992_v50  ;;  %2672 = vmatpush.msra.mxu1 %v6997_v49  ;;  %vm2318_vm12 = vweird.f32 %v7290_v28 }
 0x5e2   :  { %v2281_v9 = vsel %vm2280_vm8, %v4480_v14, %v2277_v41  ;;  %2692 = vmatpush.msra.mxu2 %v7002_v39  ;;  %2731 = vmatpush.msra.mxu3 %v7009_v63  ;;  %vm2319_vm14 = vmor %vm2317_vm13, %vm2318_vm12 }
 0x5e3   :  { %v2286_v40 = vsel %vm2283_vm10, %v2285_v60, %v2281_v9  ;;  %v2300_v57 = vsel %vm2299_vm9, %v4482_v48, %v2296_v33  ;;  %v2314_v32 = vsub.f32 1.0, %v2313_v16  ;;  %2653 = vmatpush.msra.mxu0 %v7020_v31  ;;  %2673 = vmatpush.msra.mxu1 %v7025_v15 }
 0x5e4   :  { %v2305_v21 = vsel %vm2302_vm11, %v2304_v35, %v2300_v57  ;;  %v2328_v62 = vmul.f32 %v4486_v45, %v2286_v40  ;;  %2693 = vmatpush.msra.mxu2 %v7030_v56  ;;  %2732 = vmatpush.msra.mxu3 %v7037_v38  ;;  %v2321_v40 = vand.u32 2147483647, %v7265_v22  ;;  %v9117_v45 = vld [vmem:[#allocation22_spill] sm:$0xff]  ;;  %v9118_v57 = vld [vmem:[#allocation21_spill] sm:$0xff] }
 0x5e5   :  { %v2327_v24 = vmul.f32 %v2305_v21, %v6842_v42  ;;  %v2315_v27 = vmul.f32 %v7290_v28, %v2314_v32  ;;  %2654 = vmatpush.msra.mxu0 %v7044_v59  ;;  %2674 = vmatpush.msra.mxu1 %v7049_v61  ;;  %v2323_v42 = vand.u32 2147483648, %v7265_v22 }
 0x5e6   :  { %2694 = vmatpush.msra.mxu2 %v7054_v6  ;;  %2733 = vmatpush.msra.mxu3 %v7061_v5  ;;  %vm2322_vm15 = vcmp.eq.f32.partialorder %v2321_v40, 8.507059e+37  ;;  %v9122_v40 = vld [vmem:[#allocation72_spill] sm:$0xff] }
 0x5e7   :  { %v7314_v41 = vadd.f32 %v2328_v62, %v2327_v24  ;;  %v2316_v16 = vadd.f32 %v7290_v28, %v2315_v27  ;;  %2655 = vmatpush.msra.mxu0 %v7068_v53  ;;  %2675 = vmatpush.msra.mxu1 %v7073_v11  ;;  %v2324_v62 = vor.u32 1.1754944e-38, %v2323_v42  ;;  %v9119_v24 = vld [vmem:[#allocation89_spill] sm:$0xff]  ;;  %v9120_v27 = vld [vmem:[#allocation90_spill] sm:$0xff]  ;;  %v9121_v42 = vld [vmem:[#allocation71_spill] sm:$0xff] }
 0x5e8   :  { %2695 = vmatpush.msra.mxu2 %v7080_v44  ;;  %2734 = vmatpush.msra.mxu3 %v7085_v54 }
 0x5e9   :  { %4487 = vtanh.f32 %v7314_v41  ;;  %2656 = vmatpush.msra.mxu0 %v7092_v51  ;;  %2676 = vmatpush.msra.mxu1 %v7097_v26  ;;  %v2320_v21 = vsel %vm2319_vm14, %v7290_v28, %v2316_v16 }
 0x5ea   :  { %2696 = vmatpush.msra.mxu2 %v7102_v20  ;;  %2735 = vmatpush.msra.mxu3 %v7111_v30  ;;  %v2325_v22 = vsel %vm2322_vm15, %v2324_v62, %v2320_v21  ;;  %v9123_v21 = vld [vmem:[#allocation73_spill] sm:$0xff]  ;;  %v9124_v62 = vld [vmem:[#allocation74_spill] sm:$0xff] }
 0x5eb   :  { %2657 = vmatpush.msra.mxu0 %v7118_v3  ;;  %2677 = vmatpush.msra.mxu1 %v7123_v46 }
 0x5ec   :  { %2697 = vmatpush.msra.mxu2 %v7128_v43  ;;  %2736 = vmatpush.msra.mxu3 %v7135_v23 }
 0x5ed   :  { %2658 = vmatpush.msra.mxu0 %v7142_v4  ;;  %2678 = vmatpush.msra.mxu1 %v7147_v58 }
 0x5ee   :  { %2698 = vmatpush.msra.mxu2 %v7152_v25  ;;  %2737 = vmatpush.msra.mxu3 %v7159_v12 }
 0x5ef   :  { %v4488_v14 = vpop.eup %4487  ;;  %2659 = vmatpush.msra.mxu0 %v7166_v29  ;;  %2679 = vmatpush.msra.mxu1 %v9116_v7 }
 0x5f0   :  { %v2331_v48 = vmul.f32 %v4488_v14, %v2325_v22  ;;  %2699 = vmatpush.msra.mxu2 %v9117_v45  ;;  %2738 = vmatpush.msra.mxu3 %v9118_v57  ;;  %v9125_v14 = vld [vmem:[#allocation75_spill] sm:$0xff]  ;;  %v9126_v22 = vld [vmem:[#allocation76_spill] sm:$0xff] }
 0x5f1   :  { %2660 = vmatpush.msra.mxu0 %v9119_v24  ;;  %2680 = vmatpush.msra.mxu1 %v9120_v27 }
 0x5f2   :  { %v2333_v28 = vrot.slane %v2331_v48, 1  ;;  %v2334_v60 = vrot.slane %v2331_v48, 2  ;;  %v2335_v33 = vrot.slane %v2331_v48, 3  ;;  %2347 = vst [vmem:[%s8762_s4 + $0x7] sm:$0x1] %v2331_v48  ;;  %2424 = vmatmul.f32.vlgmr.msrb.gmra.mxu0 %v2331_v48  ;;  %2444 = vmatmul.f32.vlgmr.msrb.gmra.mxu1 %v2331_v48  ;;  %v2336_v35 = vrot.slane %v2331_v48, 4 }
 0x5f3   :  { %2464 = vmatmul.f32.vlgmr.msrb.gmra.mxu2 %v2331_v48  ;;  %2503 = vmatmul.f32.vlgmr.msrb.gmra.mxu3 %v2331_v48  ;;  %v2337_v9 = vrot.slane %v2331_v48, 5  ;;  %v2338_v32 = vrot.slane %v2331_v48, 6  ;;  %v2339_v16 = vrot.slane %v2331_v48, 7  ;;  %v9127_v48 = vld [vmem:[#allocation11_spill] sm:$0xff] }
 0x5f4   :  { %2348 = vst [vmem:[%s8762_s4 + $0x17] sm:$0x1] %v2333_v28  ;;  %2700 = vmatpush.msra.mxu2 %v9121_v42  ;;  %2739 = vmatpush.msra.mxu3 %v9122_v40  ;;  %v9128_v28 = vld [vmem:[#allocation12_spill] sm:$0xff] }
 0x5f5   :  { %2349 = vst [vmem:[%s8762_s4 + $0x27] sm:$0x1] %v2334_v60  ;;  %2661 = vmatpush.msra.mxu0 %v9123_v21  ;;  %2681 = vmatpush.msra.mxu1 %v9124_v62  ;;  %v9129_v60 = vld [vmem:[#allocation14_spill] sm:$0xff] }
 0x5f6   :  { %2350 = vst [vmem:[%s8762_s4 + $0x37] sm:$0x1] %v2335_v33  ;;  %2701 = vmatpush.msra.mxu2 %v9125_v14  ;;  %2740 = vmatpush.msra.mxu3 %v9126_v22  ;;  %v9130_v33 = vld [vmem:[#allocation13_spill] sm:$0xff] }
 0x5f7   :  { %2351 = vst [vmem:[%s8762_s4 + $0x47] sm:$0x1] %v2336_v35  ;;  %2662 = vmatpush.msra.mxu0 %v7244_v1  ;;  %2682 = vmatpush.msra.mxu1 %v7249_v55  ;;  %v9131_v35 = vld [vmem:[#allocation15_spill] sm:$0xff] }
 0x5f8   :  { %2352 = vst [vmem:[%s8762_s4 + $0x57] sm:$0x1] %v2337_v9  ;;  %2702 = vmatpush.msra.mxu2 %v7254_v2  ;;  %2741 = vmatpush.msra.mxu3 %v7263_v52  ;;  %v9133_v9 = vld [vmem:[#allocation18_spill] sm:$0xff] }
 0x5f9   :  { %2353 = vst [vmem:[%s8762_s4 + $0x67] sm:$0x1] %v2338_v32  ;;  %2886 = vmatpush.msrb.mxu0 %v6872_v18  ;;  %2906 = vmatpush.msrb.mxu1 %v9127_v48  ;;  %v9132_v18 = vld [vmem:[#allocation16_spill] sm:$0xff] }
 0x5fa   :  { %2354 = vst [vmem:[%s8762_s4 + $0x77] sm:$0x1] %v2339_v16  ;;  %2926 = vmatpush.msrb.mxu2 %v9128_v28  ;;  %2965 = vmatpush.msrb.mxu3 %v9129_v60 }
 0x5fb   :  { %2887 = vmatpush.msrb.mxu0 %v9130_v33  ;;  %2907 = vmatpush.msrb.mxu1 %v6901_v10  ;;  %v9134_v10 = vld [vmem:[#allocation17_spill] sm:$0xff] }
 0x5fc   :  { %2927 = vmatpush.msrb.mxu2 %v6906_v34  ;;  %2966 = vmatpush.msrb.mxu3 %v6913_v36  ;;  %v9135_v34 = vld [vmem:[#allocation19_spill] sm:$0xff]  ;;  %v9136_v36 = vld [vmem:[#allocation64_spill] sm:$0xff] }
 0x5fd   :  { %2888 = vmatpush.msrb.mxu0 %v6920_v37  ;;  %2908 = vmatpush.msrb.mxu1 %v9131_v35  ;;  %v9137_v37 = vld [vmem:[#allocation35_spill] sm:$0xff] }
 0x5fe   :  { %2928 = vmatpush.msrb.mxu2 %v6930_v47  ;;  %2967 = vmatpush.msrb.mxu3 %v6937_v17  ;;  %v160_v47 = vadd.f32 %v9137_v37, %v9136_v36  ;;  %v9138_v17 = vld [vmem:[#allocation65_spill] sm:$0xff] }
 0x5ff   :  { %2889 = vmatpush.msrb.mxu0 %v9132_v18  ;;  %2909 = vmatpush.msrb.mxu1 %v6949_v8  ;;  %v9139_v8 = vld [vmem:[#allocation36_spill] sm:$0xff] }
 0x600   :  { %2929 = vmatpush.msrb.mxu2 %v6954_v0  ;;  %2968 = vmatpush.msrb.mxu3 %v9133_v9  ;;  %v225_v0 = vadd.f32 %v9139_v8, %v9138_v17 }
 0x601   :  { %2890 = vmatpush.msrb.mxu0 %v9134_v10  ;;  %2910 = vmatpush.msrb.mxu1 %v9135_v34 }
 0x602   :  { %2930 = vmatpush.msrb.mxu2 %v6978_v19  ;;  %2969 = vmatpush.msrb.mxu3 %v6985_v13 }
 0x603   :  { %2891 = vmatpush.msrb.mxu0 %v6992_v50  ;;  %2911 = vmatpush.msrb.mxu1 %v6997_v49 }
 0x604   :  { %2931 = vmatpush.msrb.mxu2 %v7002_v39  ;;  %2970 = vmatpush.msrb.mxu3 %v7009_v63 }
 0x605   :  { %2892 = vmatpush.msrb.mxu0 %v7020_v31  ;;  %2912 = vmatpush.msrb.mxu1 %v7025_v15  ;;  %v9140_v31 = vld [vmem:[#allocation68_spill] sm:$0xff]  ;;  %v9141_v15 = vld [vmem:[#allocation38_spill] sm:$0xff] }
 0x606   :  { %2932 = vmatpush.msrb.mxu2 %v7030_v56  ;;  %2971 = vmatpush.msrb.mxu3 %v7037_v38  ;;  %v355_v56 = vadd.f32 %v9141_v15, %v9140_v31  ;;  %v9145_v15 = vld [vmem:[#allocation40_spill] sm:$0xff] }
 0x607   :  { %2893 = vmatpush.msrb.mxu0 %v7044_v59  ;;  %2913 = vmatpush.msrb.mxu1 %v7049_v61 }
 0x608   :  { %2933 = vmatpush.msrb.mxu2 %v7054_v6  ;;  %2972 = vmatpush.msrb.mxu3 %v7061_v5 }
 0x609   :  { %2894 = vmatpush.msrb.mxu0 %v7068_v53  ;;  %2914 = vmatpush.msrb.mxu1 %v7073_v11 }
 0x60a   :  { %2934 = vmatpush.msrb.mxu2 %v7080_v44  ;;  %2973 = vmatpush.msrb.mxu3 %v7085_v54  ;;  %v9142_v44 = vld [vmem:[#allocation70_spill] sm:$0xff]  ;;  %v9143_v54 = vld [vmem:[#allocation37_spill] sm:$0xff] }
 0x60b   :  { %2895 = vmatpush.msrb.mxu0 %v7092_v51  ;;  %2915 = vmatpush.msrb.mxu1 %v7097_v26  ;;  %v290_v51 = vadd.f32 %v9143_v54, %v9142_v44 }
 0x60c   :  { %2935 = vmatpush.msrb.mxu2 %v7102_v20  ;;  %2974 = vmatpush.msrb.mxu3 %v7111_v30 }
 0x60d   :  { %2896 = vmatpush.msrb.mxu0 %v7118_v3  ;;  %2916 = vmatpush.msrb.mxu1 %v7123_v46 }
 0x60e   :  { %2936 = vmatpush.msrb.mxu2 %v7128_v43  ;;  %2975 = vmatpush.msrb.mxu3 %v7135_v23 }
 0x60f   :  { %2897 = vmatpush.msrb.mxu0 %v7142_v4  ;;  %2917 = vmatpush.msrb.mxu1 %v7147_v58 }
 0x610   :  { %2937 = vmatpush.msrb.mxu2 %v7152_v25  ;;  %2976 = vmatpush.msrb.mxu3 %v7159_v12 }
 0x611   :  { %2898 = vmatpush.msrb.mxu0 %v7166_v29  ;;  %2918 = vmatpush.msrb.mxu1 %v9116_v7 }
 0x612   :  { %2938 = vmatpush.msrb.mxu2 %v9117_v45  ;;  %2977 = vmatpush.msrb.mxu3 %v9118_v57 }
 0x613   :  { %2899 = vmatpush.msrb.mxu0 %v9119_v24  ;;  %2919 = vmatpush.msrb.mxu1 %v9120_v27 }
 0x614   :  { %2939 = vmatpush.msrb.mxu2 %v9121_v42  ;;  %2978 = vmatpush.msrb.mxu3 %v9122_v40 }
 0x615   :  { %2900 = vmatpush.msrb.mxu0 %v9123_v21  ;;  %2920 = vmatpush.msrb.mxu1 %v9124_v62 }
 0x616   :  { %2940 = vmatpush.msrb.mxu2 %v9125_v14  ;;  %2979 = vmatpush.msrb.mxu3 %v9126_v22 }
 0x617   :  { %2901 = vmatpush.msrb.mxu0 %v7244_v1  ;;  %2921 = vmatpush.msrb.mxu1 %v7249_v55 }
 0x618   :  { %2941 = vmatpush.msrb.mxu2 %v7254_v2  ;;  %2980 = vmatpush.msrb.mxu3 %v7263_v52 }
 0x66f   :  { %v2425_v19 = vpop.f32.mrf.mxu0  ;;  %v2445_v13 = vpop.f32.mrf.mxu1 }
 0x670   :  { %v2468_v50 = vadd.f32 %v2425_v19, %v160_v47  ;;  %v2469_v49 = vadd.f32 %v2445_v13, %v225_v0 }
 0x672   :  { %v4334_v39 = vmul.f32 -1.442695, %v2468_v50  ;;  %v4335_v63 = vmul.f32 -1.442695, %v2469_v49 }
 0x674   :  { %4489 = vpow2.f32 %v4334_v39  ;;  %v9144_v39 = vld [vmem:[#allocation39_spill] sm:$0xff] }
 0x675   :  { %4491 = vpow2.f32 %v4335_v63  ;;  %v163_v63 = vadd.f32 %v9144_v39, %v9136_v36 }
 0x676   :  { %v2504_v2 = vpop.f32.mrf.mxu3  ;;  %v2465_v53 = vpop.f32.mrf.mxu2 }
 0x677   :  { %v2507_v38 = vadd.f32 %v2504_v2, %v355_v56  ;;  %v2470_v30 = vadd.f32 %v2465_v53, %v290_v51  ;;  %v228_v56 = vadd.f32 %v9145_v15, %v9138_v17 }
 0x679   :  { %v4336_v52 = vmul.f32 -1.442695, %v2507_v38 }
 0x67a   :  { %v4490_v59 = vpop.eup %4489 }
 0x67b   :  { %v4492_v61 = vpop.eup %4491  ;;  %v2511_v6 = vadd.f32 1.0, %v4490_v59  ;;  %4493 = vpow2.f32 %v4336_v52 }
 0x67c   :  { %v2530_v5 = vadd.f32 1.0, %v4492_v61 }
 0x67d   :  { %4495 = vrcp.f32 %v2511_v6  ;;  %v2523_v58 = vand.u32 2147483648, %v2511_v6  ;;  %v2521_v29 = vand.u32 2147483647, %v2511_v6  ;;  %vm2517_vm2 = vweird.f32 %v2511_v6 }
 0x67e   :  { %4497 = vrcp.f32 %v2530_v5  ;;  %v2542_v25 = vand.u32 2147483648, %v2530_v5  ;;  %v2540_v55 = vand.u32 2147483647, %v2530_v5  ;;  %vm2536_vm3 = vweird.f32 %v2530_v5 }
 0x67f   :  { %v2524_v57 = vor.u32 1.1754944e-38, %v2523_v58  ;;  %vm2522_vm6 = vcmp.eq.f32.partialorder %v2521_v29, 8.507059e+37 }
 0x680   :  { %v2543_v27 = vor.u32 1.1754944e-38, %v2542_v25  ;;  %vm2541_vm7 = vcmp.eq.f32.partialorder %v2540_v55, 8.507059e+37 }
 0x681   :  { %v4494_v11 = vpop.eup %4493 }
 0x682   :  { %v2550_v26 = vadd.f32 1.0, %v4494_v11 }
 0x683   :  { %v4496_v20 = vpop.eup %4495 }
 0x684   :  { %v4498_v3 = vpop.eup %4497  ;;  %v2513_v46 = vmul.f32 %v4496_v20, %v2511_v6  ;;  %4499 = vrcp.f32 %v2550_v26  ;;  %vm2518_vm0 = vweird.f32 %v4496_v20  ;;  %v2562_v35 = vand.u32 2147483648, %v2550_v26 }
 0x685   :  { %v2532_v43 = vmul.f32 %v4498_v3, %v2530_v5  ;;  %4501 = vtanh.f32 %v2470_v30  ;;  %vm2537_vm1 = vweird.f32 %v4498_v3  ;;  %vm2519_vm4 = vmor %vm2517_vm2, %vm2518_vm0  ;;  %vm2556_vm9 = vweird.f32 %v2550_v26  ;;  %v9146_v5 = vld [vmem:[#allocation42_spill] sm:$0xff] }
 0x686   :  { %v2514_v23 = vsub.f32 1.0, %v2513_v46  ;;  %vm2538_vm5 = vmor %vm2536_vm3, %vm2537_vm1  ;;  %v2560_v18 = vand.u32 2147483647, %v2550_v26  ;;  %v2563_v10 = vor.u32 1.1754944e-38, %v2562_v35  ;;  %v358_v53 = vadd.f32 %v9146_v5, %v9140_v31  ;;  %v7532_v5 = vld [vmem:[%s8760_s2 + $0x1f0] sm:$0xff] }
 0x687   :  { %v2533_v4 = vsub.f32 1.0, %v2532_v43  ;;  %9149 = vst [vmem:[#allocation78_spill] sm:$0xff] %v7532_v5 }
 0x688   :  { %v2515_v12 = vmul.f32 %v4496_v20, %v2514_v23  ;;  %vm2561_vm11 = vcmp.eq.f32.partialorder %v2560_v18, 8.507059e+37  ;;  %v9147_v23 = vld [vmem:[#allocation41_spill] sm:$0xff] }
 0x689   :  { %v2534_v1 = vmul.f32 %v4498_v3, %v2533_v4  ;;  %v293_v4 = vadd.f32 %v9147_v23, %v9142_v44  ;;  %v7599_v23 = vld [vmem:[%s8760_s2 + $0x188] sm:$0xff] }
 0x68a   :  { %v4500_v7 = vpop.eup %4499  ;;  %v2516_v45 = vadd.f32 %v4496_v20, %v2515_v12 }
 0x68b   :  { %v2535_v32 = vadd.f32 %v4498_v3, %v2534_v1  ;;  %v2552_v24 = vmul.f32 %v4500_v7, %v2550_v26  ;;  %v4502_v42 = vpop.eup %4501  ;;  %vm2557_vm8 = vweird.f32 %v4500_v7 }
 0x68c   :  { %v2520_v16 = vsel %vm2519_vm4, %v4496_v20, %v2516_v45  ;;  %vm2558_vm10 = vmor %vm2556_vm9, %vm2557_vm8 }
 0x68d   :  { %v2525_v40 = vsel %vm2522_vm6, %v2524_v57, %v2520_v16  ;;  %v2539_v21 = vsel %vm2538_vm5, %v4498_v3, %v2535_v32  ;;  %v2553_v62 = vsub.f32 1.0, %v2552_v24 }
 0x68e   :  { %v2544_v14 = vsel %vm2541_vm7, %v2543_v27, %v2539_v21  ;;  %v2567_v22 = vmul.f32 %v4502_v42, %v2525_v40 }
 0x68f   :  { %v2566_v48 = vmul.f32 %v2544_v14, %v7314_v41  ;;  %v2554_v28 = vmul.f32 %v4500_v7, %v2553_v62 }
 0x691   :  { %v7456_v60 = vadd.f32 %v2567_v22, %v2566_v48  ;;  %v2555_v33 = vadd.f32 %v4500_v7, %v2554_v28 }
 0x693   :  { %4503 = vtanh.f32 %v7456_v60  ;;  %v2559_v9 = vsel %vm2558_vm10, %v4500_v7, %v2555_v33 }
 0x694   :  { %v2564_v37 = vsel %vm2561_vm11, %v2563_v10, %v2559_v9 }
 0x699   :  { %v4504_v34 = vpop.eup %4503 }
 0x69a   :  { %v2570_v47 = vmul.f32 %v4504_v34, %v2564_v37 }
 0x69c   :  { %v2572_v8 = vrot.slane %v2570_v47, 1  ;;  %v2573_v0 = vrot.slane %v2570_v47, 2  ;;  %v2574_v41 = vrot.slane %v2570_v47, 3  ;;  %2586 = vst [vmem:[%s8762_s4 + $0x8] sm:$0x1] %v2570_v47  ;;  %2663 = vmatmul.f32.vlgmr.msra.gmra.mxu0 %v2570_v47  ;;  %2683 = vmatmul.f32.vlgmr.msra.gmra.mxu1 %v2570_v47  ;;  %v2575_v19 = vrot.slane %v2570_v47, 4 }
 0x69d   :  { %2703 = vmatmul.f32.vlgmr.msra.gmra.mxu2 %v2570_v47  ;;  %2742 = vmatmul.f32.vlgmr.msra.gmra.mxu3 %v2570_v47  ;;  %v2576_v13 = vrot.slane %v2570_v47, 5  ;;  %v2577_v50 = vrot.slane %v2570_v47, 6  ;;  %v2578_v49 = vrot.slane %v2570_v47, 7 }
 0x69e   :  { %2587 = vst [vmem:[%s8762_s4 + $0x18] sm:$0x1] %v2572_v8  ;;  %3165 = vmatpush.msra.mxu2 %v7532_v5 }
 0x69f   :  { %2588 = vst [vmem:[%s8762_s4 + $0x28] sm:$0x1] %v2573_v0 }
 0x6a0   :  { %2589 = vst [vmem:[%s8762_s4 + $0x38] sm:$0x1] %v2574_v41 }
 0x6a1   :  { %2590 = vst [vmem:[%s8762_s4 + $0x48] sm:$0x1] %v2575_v19 }
 0x6a2   :  { %2591 = vst [vmem:[%s8762_s4 + $0x58] sm:$0x1] %v2576_v13 }
 0x6a3   :  { %2592 = vst [vmem:[%s8762_s4 + $0x68] sm:$0x1] %v2577_v50 }
 0x6a4   :  { %2593 = vst [vmem:[%s8762_s4 + $0x78] sm:$0x1] %v2578_v49 }
 0x719   :  { %v2664_v2 = vpop.f32.mrf.mxu0  ;;  %v2684_v38 = vpop.f32.mrf.mxu1 }
 0x71a   :  { %v2707_v52 = vadd.f32 %v2664_v2, %v163_v63  ;;  %v2708_v59 = vadd.f32 %v2684_v38, %v228_v56 }
 0x71c   :  { %v4337_v61 = vmul.f32 -1.442695, %v2707_v52  ;;  %v4338_v6 = vmul.f32 -1.442695, %v2708_v59 }
 0x71e   :  { %4505 = vpow2.f32 %v4337_v61  ;;  %v7522_v61 = vld [vmem:[%s8760_s2 + $0x1e0] sm:$0xff] }
 0x71f   :  { %4507 = vpow2.f32 %v4338_v6  ;;  %v7527_v6 = vld [vmem:[%s8760_s2 + $0x1e8] sm:$0xff]  ;;  %3125 = vmatpush.msra.mxu0 %v7522_v61 }
 0x720   :  { %v2743_v11 = vpop.f32.mrf.mxu3  ;;  %v2704_v46 = vpop.f32.mrf.mxu2  ;;  %9148 = vst [vmem:[#allocation77_spill] sm:$0xff] %v7527_v6  ;;  %3145 = vmatpush.msra.mxu1 %v7527_v6 }
 0x721   :  { %v2746_v54 = vadd.f32 %v2743_v11, %v358_v53  ;;  %v2709_v12 = vadd.f32 %v2704_v46, %v293_v4  ;;  %v7539_v53 = vld [vmem:[%s8760_s2 + $0x1f8] sm:$0xff]  ;;  %v7546_v11 = vld [vmem:[%s8760_s2 + $0x1c0] sm:$0xff]  ;;  %v7604_v4 = vld [vmem:[%s8760_s2 + $0x190] sm:$0xff] }
 0x722   :  { %9150 = vst [vmem:[#allocation79_spill] sm:$0xff] %v7539_v53  ;;  %3204 = vmatpush.msra.mxu3 %v7539_v53  ;;  %3126 = vmatpush.msra.mxu0 %v7546_v11  ;;  %v7587_v46 = vld [vmem:[%s8760_s2 + $0x1b8] sm:$0xff] }
 0x723   :  { %v4339_v51 = vmul.f32 -1.442695, %v2746_v54  ;;  %9151 = vst [vmem:[#allocation80_spill] sm:$0xff] %v7546_v11  ;;  %v7551_v54 = vld [vmem:[%s8760_s2 + $0x1c8] sm:$0xff] }
 0x724   :  { %v4506_v26 = vpop.eup %4505  ;;  %3146 = vmatpush.msra.mxu1 %v7551_v54 }
 0x725   :  { %v4508_v20 = vpop.eup %4507  ;;  %v2750_v30 = vadd.f32 1.0, %v4506_v26  ;;  %4509 = vpow2.f32 %v4339_v51  ;;  %v7556_v51 = vld [vmem:[%s8760_s2 + $0x1d0] sm:$0xff]  ;;  %v7563_v26 = vld [vmem:[%s8760_s2 + $0x1d8] sm:$0xff] }
 0x726   :  { %v2769_v3 = vadd.f32 1.0, %v4508_v20  ;;  %3166 = vmatpush.msra.mxu2 %v7556_v51  ;;  %3205 = vmatpush.msra.mxu3 %v7563_v26  ;;  %v7570_v20 = vld [vmem:[%s8760_s2 + $0x1a0] sm:$0xff] }
 0x727   :  { %4511 = vrcp.f32 %v2750_v30  ;;  %v2762_v57 = vand.u32 2147483648, %v2750_v30  ;;  %v2760_v27 = vand.u32 2147483647, %v2750_v30  ;;  %vm2756_vm14 = vweird.f32 %v2750_v30  ;;  %3127 = vmatpush.msra.mxu0 %v7570_v20 }
 0x728   :  { %4513 = vrcp.f32 %v2769_v3  ;;  %v2781_v32 = vand.u32 2147483648, %v2769_v3  ;;  %v2779_v42 = vand.u32 2147483647, %v2769_v3  ;;  %vm2775_vm15 = vweird.f32 %v2769_v3  ;;  %3206 = vmatpush.msra.mxu3 %v7587_v46 }
 0x729   :  { %v2763_v62 = vor.u32 1.1754944e-38, %v2762_v57  ;;  %vm2761_vm2 = vcmp.eq.f32.partialorder %v2760_v27, 8.507059e+37  ;;  %v7659_v57 = vld [vmem:[%s8760_s2 + $0x158] sm:$0xff] }
 0x72a   :  { %v2782_v48 = vor.u32 1.1754944e-38, %v2781_v32  ;;  %vm2780_vm3 = vcmp.eq.f32.partialorder %v2779_v42, 8.507059e+37  ;;  %v9157_v32 = vld [vmem:[#allocation43_spill] sm:$0xff]  ;;  %v9158_v27 = vld [vmem:[#allocation44_spill] sm:$0xff]  ;;  %v7670_v42 = vld [vmem:[%s8760_s2 + $0x120] sm:$0xff] }
 0x72b   :  { %v4510_v43 = vpop.eup %4509 }
 0x72c   :  { %v2789_v58 = vadd.f32 1.0, %v4510_v43  ;;  %v7594_v43 = vld [vmem:[%s8760_s2 + $0x180] sm:$0xff] }
 0x72d   :  { %v4512_v25 = vpop.eup %4511  ;;  %9153 = vst [vmem:[#allocation82_spill] sm:$0xff] %v7594_v43  ;;  %3128 = vmatpush.msra.mxu0 %v7594_v43 }
 0x72e   :  { %v4514_v29 = vpop.eup %4513  ;;  %v2752_v1 = vmul.f32 %v4512_v25, %v2750_v30  ;;  %4515 = vrcp.f32 %v2789_v58  ;;  %vm2757_vm12 = vweird.f32 %v4512_v25  ;;  %v2801_v41 = vand.u32 2147483648, %v2789_v58  ;;  %v7575_v30 = vld [vmem:[%s8760_s2 + $0x1a8] sm:$0xff] }
 0x72f   :  { %v2771_v55 = vmul.f32 %v4514_v29, %v2769_v3  ;;  %4517 = vtanh.f32 %v2709_v12  ;;  %vm2776_vm13 = vweird.f32 %v4514_v29  ;;  %vm2758_vm0 = vmor %vm2756_vm14, %vm2757_vm12  ;;  %vm2795_vm5 = vweird.f32 %v2789_v58  ;;  %9152 = vst [vmem:[#allocation81_spill] sm:$0xff] %v7575_v30  ;;  %v7580_v3 = vld [vmem:[%s8760_s2 + $0x1b0] sm:$0xff]  ;;  %3147 = vmatpush.msra.mxu1 %v7575_v30  ;;  %v7623_v12 = vld [vmem:[%s8760_s2 + $0x168] sm:$0xff] }
 0x730   :  { %v2753_v7 = vsub.f32 1.0, %v2752_v1  ;;  %vm2777_vm1 = vmor %vm2775_vm15, %vm2776_vm13  ;;  %v2799_v19 = vand.u32 2147483647, %v2789_v58  ;;  %v2802_v50 = vor.u32 1.1754944e-38, %v2801_v41  ;;  %3167 = vmatpush.msra.mxu2 %v7580_v3  ;;  %9156 = vst [vmem:[#allocation85_spill] sm:$0xff] %v7623_v12  ;;  %v7635_v1 = vld [vmem:[%s8760_s2 + $0x178] sm:$0xff] }
 0x731   :  { %v2772_v45 = vsub.f32 1.0, %v2771_v55  ;;  %3148 = vmatpush.msra.mxu1 %v7599_v23  ;;  %v7642_v55 = vld [vmem:[%s8760_s2 + $0x140] sm:$0xff]  ;;  %v7735_v41 = vld [vmem:[%s8760_s2 + $0xf8] sm:$0xff] }
 0x732   :  { %v2754_v24 = vmul.f32 %v4512_v25, %v2753_v7  ;;  %vm2800_vm7 = vcmp.eq.f32.partialorder %v2799_v19, 8.507059e+37  ;;  %3168 = vmatpush.msra.mxu2 %v7604_v4  ;;  %v7647_v7 = vld [vmem:[%s8760_s2 + $0x148] sm:$0xff]  ;;  %v7742_v19 = vld [vmem:[%s8760_s2 + $0xc0] sm:$0xff] }
 0x733   :  { %v2773_v16 = vmul.f32 %v4514_v29, %v2772_v45  ;;  %3149 = vmatpush.msra.mxu1 %v7623_v12  ;;  %v7652_v45 = vld [vmem:[%s8760_s2 + $0x150] sm:$0xff] }
 0x734   :  { %v4516_v40 = vpop.eup %4515  ;;  %v2755_v21 = vadd.f32 %v4512_v25, %v2754_v24  ;;  %v166_v24 = vadd.f32 %v9157_v32, %v9136_v36  ;;  %v7797_v32 = vld [vmem:[%s8760_s2 + $0x88] sm:$0xff]  ;;  %v7887_v36 = vld [vmem:[%s8760_s2 + $0x38] sm:$0xff] }
 0x735   :  { %v2774_v14 = vadd.f32 %v4514_v29, %v2773_v16  ;;  %v2791_v22 = vmul.f32 %v4516_v40, %v2789_v58  ;;  %v4518_v33 = vpop.eup %4517  ;;  %vm2796_vm4 = vweird.f32 %v4516_v40  ;;  %v7611_v58 = vld [vmem:[%s8760_s2 + $0x198] sm:$0xff]  ;;  %3150 = vmatpush.msra.mxu1 %v7647_v7  ;;  %v231_v16 = vadd.f32 %v9158_v27, %v9138_v17  ;;  %v7880_v17 = vld [vmem:[%s8760_s2 + $0x30] sm:$0xff]  ;;  %9170 = vst [vmem:[#allocation29_spill] sm:$0xff] %v7887_v36 }
 0x736   :  { %v2759_v28 = vsel %vm2758_vm0, %v4512_v25, %v2755_v21  ;;  %vm2797_vm6 = vmor %vm2795_vm5, %vm2796_vm4  ;;  %9154 = vst [vmem:[#allocation83_spill] sm:$0xff] %v7611_v58  ;;  %3207 = vmatpush.msra.mxu3 %v7611_v58  ;;  %v7618_v25 = vld [vmem:[%s8760_s2 + $0x160] sm:$0xff]  ;;  %v7680_v21 = vld [vmem:[%s8760_s2 + $0x130] sm:$0xff] }
 0x737   :  { %v2764_v35 = vsel %vm2761_vm2, %v2763_v62, %v2759_v28  ;;  %v2778_v18 = vsel %vm2777_vm1, %v4514_v29, %v2774_v14  ;;  %v2792_v9 = vsub.f32 1.0, %v2791_v22  ;;  %9155 = vst [vmem:[#allocation84_spill] sm:$0xff] %v7618_v25  ;;  %v7628_v29 = vld [vmem:[%s8760_s2 + $0x170] sm:$0xff]  ;;  %3129 = vmatpush.msra.mxu0 %v7618_v25  ;;  %v7687_v22 = vld [vmem:[%s8760_s2 + $0x138] sm:$0xff] }
 0x738   :  { %v2783_v10 = vsel %vm2780_vm3, %v2782_v48, %v2778_v18  ;;  %v2806_v34 = vmul.f32 %v4518_v33, %v2764_v35  ;;  %3169 = vmatpush.msra.mxu2 %v7628_v29  ;;  %3208 = vmatpush.msra.mxu3 %v7635_v1  ;;  %v7694_v33 = vld [vmem:[%s8760_s2 + $0x100] sm:$0xff]  ;;  %v7699_v35 = vld [vmem:[%s8760_s2 + $0x108] sm:$0xff]  ;;  %v7704_v18 = vld [vmem:[%s8760_s2 + $0x110] sm:$0xff]  ;;  %9169 = vst [vmem:[#allocation30_spill] sm:$0xff] %v7880_v17 }
 0x739   :  { %v2805_v37 = vmul.f32 %v2783_v10, %v7456_v60  ;;  %v2793_v47 = vmul.f32 %v4516_v40, %v2792_v9  ;;  %3130 = vmatpush.msra.mxu0 %v7642_v55  ;;  %v7711_v9 = vld [vmem:[%s8760_s2 + $0x118] sm:$0xff] }
 0x73a   :  { %3170 = vmatpush.msra.mxu2 %v7652_v45  ;;  %3209 = vmatpush.msra.mxu3 %v7659_v57 }
 0x73b   :  { %v7492_v8 = vadd.f32 %v2806_v34, %v2805_v37  ;;  %v2794_v0 = vadd.f32 %v4516_v40, %v2793_v47  ;;  %3131 = vmatpush.msra.mxu0 %v7670_v42  ;;  %v7718_v37 = vld [vmem:[%s8760_s2 + $0xe0] sm:$0xff]  ;;  %v7723_v47 = vld [vmem:[%s8760_s2 + $0xe8] sm:$0xff] }
 0x73c   :  { %3171 = vmatpush.msra.mxu2 %v7680_v21  ;;  %3210 = vmatpush.msra.mxu3 %v7687_v22 }
 0x73d   :  { %4519 = vtanh.f32 %v7492_v8  ;;  %v2798_v13 = vsel %vm2797_vm6, %v4516_v40, %v2794_v0  ;;  %v7675_v40 = vld [vmem:[%s8760_s2 + $0x128] sm:$0xff]  ;;  %3132 = vmatpush.msra.mxu0 %v7694_v33  ;;  %v7730_v0 = vld [vmem:[%s8760_s2 + $0xf0] sm:$0xff] }
 0x73e   :  { %v2803_v39 = vsel %vm2800_vm7, %v2802_v50, %v2798_v13  ;;  %3151 = vmatpush.msra.mxu1 %v7675_v40  ;;  %3172 = vmatpush.msra.mxu2 %v7704_v18  ;;  %v7747_v13 = vld [vmem:[%s8760_s2 + $0xc8] sm:$0xff]  ;;  %v7752_v50 = vld [vmem:[%s8760_s2 + $0xd0] sm:$0xff] }
 0x73f   :  { %3211 = vmatpush.msra.mxu3 %v7711_v9  ;;  %3133 = vmatpush.msra.mxu0 %v7718_v37 }
 0x740   :  { %3152 = vmatpush.msra.mxu1 %v7699_v35  ;;  %3173 = vmatpush.msra.mxu2 %v7730_v0 }
 0x741   :  { %3212 = vmatpush.msra.mxu3 %v7735_v41  ;;  %3134 = vmatpush.msra.mxu0 %v7742_v19 }
 0x742   :  { %3153 = vmatpush.msra.mxu1 %v7723_v47  ;;  %3174 = vmatpush.msra.mxu2 %v7752_v50 }
 0x743   :  { %v4520_v49 = vpop.eup %4519 }
 0x744   :  { %v2809_v63 = vmul.f32 %v4520_v49, %v2803_v39  ;;  %v9159_v49 = vld [vmem:[#allocation46_spill] sm:$0xff]  ;;  %3154 = vmatpush.msra.mxu1 %v7747_v13 }
 0x745   :  { %v361_v39 = vadd.f32 %v9159_v49, %v9140_v31  ;;  %v7835_v49 = vld [vmem:[%s8760_s2 + $0x78] sm:$0xff]  ;;  %v7875_v31 = vld [vmem:[%s8760_s2 + $0x28] sm:$0xff] }
 0x746   :  { %v2811_v15 = vrot.slane %v2809_v63, 1  ;;  %v2812_v56 = vrot.slane %v2809_v63, 2  ;;  %v2813_v60 = vrot.slane %v2809_v63, 3  ;;  %2825 = vst [vmem:[%s8762_s4 + $0x9] sm:$0x1] %v2809_v63  ;;  %2902 = vmatmul.f32.vlgmr.msrb.gmra.mxu0 %v2809_v63  ;;  %2922 = vmatmul.f32.vlgmr.msrb.gmra.mxu1 %v2809_v63  ;;  %v2814_v2 = vrot.slane %v2809_v63, 4 }
 0x747   :  { %2942 = vmatmul.f32.vlgmr.msrb.gmra.mxu2 %v2809_v63  ;;  %2981 = vmatmul.f32.vlgmr.msrb.gmra.mxu3 %v2809_v63  ;;  %v2815_v38 = vrot.slane %v2809_v63, 5  ;;  %v2816_v52 = vrot.slane %v2809_v63, 6  ;;  %v2817_v59 = vrot.slane %v2809_v63, 7  ;;  %v7761_v63 = vld [vmem:[%s8760_s2 + $0xd8] sm:$0xff]  ;;  %9162 = vst [vmem:[#allocation88_spill] sm:$0xff] %v7835_v49 }
 0x748   :  { %2826 = vst [vmem:[%s8762_s4 + $0x19] sm:$0x1] %v2811_v15  ;;  %3213 = vmatpush.msra.mxu3 %v7761_v63 }
 0x749   :  { %2827 = vst [vmem:[%s8762_s4 + $0x29] sm:$0x1] %v2812_v56  ;;  %v7768_v56 = vld [vmem:[%s8760_s2 + $0xa0] sm:$0xff] }
 0x74a   :  { %2828 = vst [vmem:[%s8762_s4 + $0x39] sm:$0x1] %v2813_v60  ;;  %v7773_v60 = vld [vmem:[%s8760_s2 + $0xa8] sm:$0xff]  ;;  %3135 = vmatpush.msra.mxu0 %v7768_v56 }
 0x74b   :  { %2829 = vst [vmem:[%s8762_s4 + $0x49] sm:$0x1] %v2814_v2  ;;  %v7778_v2 = vld [vmem:[%s8760_s2 + $0xb0] sm:$0xff]  ;;  %3155 = vmatpush.msra.mxu1 %v7773_v60 }
 0x74c   :  { %2830 = vst [vmem:[%s8762_s4 + $0x59] sm:$0x1] %v2815_v38  ;;  %3175 = vmatpush.msra.mxu2 %v7778_v2 }
 0x74d   :  { %2831 = vst [vmem:[%s8762_s4 + $0x69] sm:$0x1] %v2816_v52  ;;  %v7785_v52 = vld [vmem:[%s8760_s2 + $0xb8] sm:$0xff]  ;;  %3156 = vmatpush.msra.mxu1 %v7797_v32 }
 0x74e   :  { %2832 = vst [vmem:[%s8762_s4 + $0x79] sm:$0x1] %v2817_v59  ;;  %3214 = vmatpush.msra.mxu3 %v7785_v52  ;;  %v7792_v59 = vld [vmem:[%s8760_s2 + $0x80] sm:$0xff] }
 0x74f   :  { %3136 = vmatpush.msra.mxu0 %v7792_v59  ;;  %9168 = vst [vmem:[#allocation28_spill] sm:$0xff] %v7875_v31 }
 0x7c3   :  { %v2903_v62 = vpop.f32.mrf.mxu0  ;;  %v2923_v14 = vpop.f32.mrf.mxu1 }
 0x7c4   :  { %v2946_v48 = vadd.f32 %v2903_v62, %v166_v24  ;;  %v2947_v28 = vadd.f32 %v2923_v14, %v231_v16  ;;  %v7802_v24 = vld [vmem:[%s8760_s2 + $0x90] sm:$0xff]  ;;  %v7809_v16 = vld [vmem:[%s8760_s2 + $0x98] sm:$0xff]  ;;  %v7816_v14 = vld [vmem:[%s8760_s2 + $0x60] sm:$0xff] }
 0x7c5   :  { %3176 = vmatpush.msra.mxu2 %v7802_v24  ;;  %3215 = vmatpush.msra.mxu3 %v7809_v16 }
 0x7c6   :  { %v4340_v10 = vmul.f32 -1.442695, %v2946_v48  ;;  %v4341_v34 = vmul.f32 -1.442695, %v2947_v28  ;;  %v7821_v48 = vld [vmem:[%s8760_s2 + $0x68] sm:$0xff]  ;;  %v7826_v28 = vld [vmem:[%s8760_s2 + $0x70] sm:$0xff]  ;;  %3137 = vmatpush.msra.mxu0 %v7816_v14 }
 0x7c7   :  { %9160 = vst [vmem:[#allocation86_spill] sm:$0xff] %v7821_v48  ;;  %3157 = vmatpush.msra.mxu1 %v7821_v48  ;;  %3177 = vmatpush.msra.mxu2 %v7826_v28 }
 0x7c8   :  { %4521 = vpow2.f32 %v4340_v10  ;;  %9161 = vst [vmem:[#allocation87_spill] sm:$0xff] %v7826_v28  ;;  %3216 = vmatpush.msra.mxu3 %v7835_v49 }
 0x7c9   :  { %4523 = vpow2.f32 %v4341_v34 }
 0x7ca   :  { %v2982_v15 = vpop.f32.mrf.mxu3 }
 0x7cb   :  { %v2985_v38 = vadd.f32 %v2982_v15, %v361_v39  ;;  %v7844_v15 = vld [vmem:[%s8760_s2 + $0x40] sm:$0xff] }
 0x7cc   :  { %9163 = vst [vmem:[#allocation23_spill] sm:$0xff] %v7844_v15  ;;  %3138 = vmatpush.msra.mxu0 %v7844_v15 }
 0x7cd   :  { %v4342_v27 = vmul.f32 -1.442695, %v2985_v38  ;;  %v7849_v38 = vld [vmem:[%s8760_s2 + $0x48] sm:$0xff] }
 0x7ce   :  { %v4522_v62 = vpop.eup %4521  ;;  %9164 = vst [vmem:[#allocation24_spill] sm:$0xff] %v7849_v38  ;;  %3158 = vmatpush.msra.mxu1 %v7849_v38 }
 0x7cf   :  { %v4524_v10 = vpop.eup %4523  ;;  %v7828_v34 = vadd.f32 1.0, %v4522_v62  ;;  %4525 = vpow2.f32 %v4342_v27  ;;  %v7854_v27 = vld [vmem:[%s8760_s2 + $0x50] sm:$0xff]  ;;  %v7862_v62 = vld [vmem:[%s8760_s2 + $0x58] sm:$0xff] }
 0x7d0   :  { %v7837_v39 = vadd.f32 1.0, %v4524_v10  ;;  %9165 = vst [vmem:[#allocation26_spill] sm:$0xff] %v7854_v27  ;;  %3178 = vmatpush.msra.mxu2 %v7854_v27  ;;  %3217 = vmatpush.msra.mxu3 %v7862_v62  ;;  %v7870_v10 = vld [vmem:[%s8760_s2 + $0x20] sm:$0xff] }
 0x7d1   :  { %4527 = vrcp.f32 %v7828_v34  ;;  %9166 = vst [vmem:[#allocation25_spill] sm:$0xff] %v7862_v62  ;;  %3139 = vmatpush.msra.mxu0 %v7870_v10  ;;  %3159 = vmatpush.msra.mxu1 %v7875_v31  ;;  %v2943_v62 = vpop.f32.mrf.mxu2  ;;  %v7894_v27 = vld [vmem:[%s8760_s2] sm:$0xff]  ;;  %v7904_v31 = vld [vmem:[%s8760_s2 + $0x10] sm:$0xff]  ;;  %vm2995_vm10 = vweird.f32 %v7828_v34 }
 0x7d2   :  { %4529 = vrcp.f32 %v7837_v39  ;;  %9167 = vst [vmem:[#allocation27_spill] sm:$0xff] %v7870_v10  ;;  %3179 = vmatpush.msra.mxu2 %v7880_v17  ;;  %3218 = vmatpush.msra.mxu3 %v7887_v36  ;;  %v7899_v10 = vld [vmem:[%s8760_s2 + $0x8] sm:$0xff]  ;;  %v9171_v17 = vld [vmem:[#allocation45_spill] sm:$0xff]  ;;  %v7913_v36 = vld [vmem:[%s8760_s2 + $0x18] sm:$0xff]  ;;  %vm3014_vm11 = vweird.f32 %v7837_v39 }
 0x7d3   :  { %v296_v15 = vadd.f32 %v9171_v17, %v9142_v44  ;;  %3140 = vmatpush.msra.mxu0 %v7894_v27  ;;  %3160 = vmatpush.msra.mxu1 %v7899_v10 }
 0x7d4   :  { %3180 = vmatpush.msra.mxu2 %v7904_v31  ;;  %3219 = vmatpush.msra.mxu3 %v7913_v36 }
 0x7d5   :  { %v4526_v38 = vpop.eup %4525  ;;  %v2948_v48 = vadd.f32 %v2943_v62, %v296_v15  ;;  %3364 = vmatpush.msrb.mxu0 %v7522_v61  ;;  %3384 = vmatpush.msrb.mxu1 %v7527_v6  ;;  %v3001_v6 = vand.u32 2147483648, %v7828_v34 }
 0x7d6   :  { %v7915_v49 = vadd.f32 1.0, %v4526_v38  ;;  %3404 = vmatpush.msrb.mxu2 %v7532_v5  ;;  %3443 = vmatpush.msrb.mxu3 %v7539_v53  ;;  %v3020_v53 = vand.u32 2147483648, %v7837_v39 }
 0x7d7   :  { %v4528_v28 = vpop.eup %4527  ;;  %3365 = vmatpush.msrb.mxu0 %v7546_v11  ;;  %3385 = vmatpush.msrb.mxu1 %v7551_v54  ;;  %v2999_v11 = vand.u32 2147483647, %v7828_v34 }
 0x7d8   :  { %v4530_v17 = vpop.eup %4529  ;;  %v2991_v44 = vmul.f32 %v4528_v28, %v7828_v34  ;;  %4531 = vrcp.f32 %v7915_v49  ;;  %3405 = vmatpush.msrb.mxu2 %v7556_v51  ;;  %3444 = vmatpush.msrb.mxu3 %v7563_v26  ;;  %vm2996_vm8 = vweird.f32 %v4528_v28  ;;  %vm3034_vm1 = vweird.f32 %v7915_v49 }
 0x7d9   :  { %v3010_v38 = vmul.f32 %v4530_v17, %v7837_v39  ;;  %4533 = vtanh.f32 %v2948_v48  ;;  %3366 = vmatpush.msrb.mxu0 %v7570_v20  ;;  %3386 = vmatpush.msrb.mxu1 %v7575_v30  ;;  %vm3015_vm9 = vweird.f32 %v4530_v17  ;;  %vm2997_vm12 = vmor %vm2995_vm10, %vm2996_vm8  ;;  %vm3000_vm14 = vcmp.eq.f32.partialorder %v2999_v11, 8.507059e+37 }
 0x7da   :  { %v2992_v15 = vsub.f32 1.0, %v2991_v44  ;;  %3406 = vmatpush.msrb.mxu2 %v7580_v3  ;;  %3445 = vmatpush.msrb.mxu3 %v7587_v46  ;;  %vm3016_vm13 = vmor %vm3014_vm11, %vm3015_vm9 }
 0x7db   :  { %v3011_v62 = vsub.f32 1.0, %v3010_v38  ;;  %v3018_v38 = vand.u32 2147483647, %v7837_v39  ;;  %3367 = vmatpush.msrb.mxu0 %v7594_v43  ;;  %3387 = vmatpush.msrb.mxu1 %v7599_v23 }
 0x7dc   :  { %v2993_v5 = vmul.f32 %v4528_v28, %v2992_v15  ;;  %3407 = vmatpush.msrb.mxu2 %v7604_v4  ;;  %3446 = vmatpush.msrb.mxu3 %v7611_v58  ;;  %v3002_v15 = vor.u32 1.1754944e-38, %v3001_v6 }
 0x7dd   :  { %v3012_v44 = vmul.f32 %v4530_v17, %v3011_v62  ;;  %3368 = vmatpush.msrb.mxu0 %v7618_v25  ;;  %3388 = vmatpush.msrb.mxu1 %v7623_v12  ;;  %vm3019_vm15 = vcmp.eq.f32.partialorder %v3018_v38, 8.507059e+37  ;;  %v9172_v38 = vld [vmem:[#allocation86_spill] sm:$0xff] }
 0x7de   :  { %v7940_v48 = vpop.eup %4531  ;;  %v2994_v30 = vadd.f32 %v4528_v28, %v2993_v5  ;;  %v3021_v5 = vor.u32 1.1754944e-38, %v3020_v53  ;;  %3408 = vmatpush.msrb.mxu2 %v7628_v29  ;;  %3447 = vmatpush.msrb.mxu3 %v7635_v1 }
 0x7df   :  { %v3013_v62 = vadd.f32 %v4530_v17, %v3012_v44  ;;  %v3030_v43 = vmul.f32 %v7940_v48, %v7915_v49  ;;  %v4534_v39 = vpop.eup %4533  ;;  %3369 = vmatpush.msrb.mxu0 %v7642_v55  ;;  %3389 = vmatpush.msrb.mxu1 %v7647_v7  ;;  %vm3035_vm0 = vweird.f32 %v7940_v48 }
 0x7e0   :  { %v2998_v34 = vsel %vm2997_vm12, %v4528_v28, %v2994_v30  ;;  %3409 = vmatpush.msrb.mxu2 %v7652_v45  ;;  %3448 = vmatpush.msrb.mxu3 %v7659_v57  ;;  %vm3036_vm2 = vmor %vm3034_vm1, %vm3035_vm0 }
 0x7e1   :  { %v3003_v58 = vsel %vm3000_vm14, %v3002_v15, %v2998_v34  ;;  %v3017_v6 = vsel %vm3016_vm13, %v4530_v17, %v3013_v62  ;;  %v3031_v44 = vsub.f32 1.0, %v3030_v43  ;;  %3370 = vmatpush.msrb.mxu0 %v7670_v42  ;;  %3390 = vmatpush.msrb.mxu1 %v7675_v40 }
 0x7e2   :  { %v3022_v25 = vsel %vm3019_vm15, %v3021_v5, %v3017_v6  ;;  %v3045_v12 = vmul.f32 %v4534_v39, %v3003_v58  ;;  %3410 = vmatpush.msrb.mxu2 %v7680_v21  ;;  %3449 = vmatpush.msrb.mxu3 %v7687_v22  ;;  %v3038_v58 = vand.u32 2147483647, %v7915_v49  ;;  %v9173_v39 = vld [vmem:[#allocation87_spill] sm:$0xff]  ;;  %v9174_v6 = vld [vmem:[#allocation88_spill] sm:$0xff] }
 0x7e3   :  { %v3044_v53 = vmul.f32 %v3022_v25, %v7492_v8  ;;  %v3032_v11 = vmul.f32 %v7940_v48, %v3031_v44  ;;  %3371 = vmatpush.msrb.mxu0 %v7694_v33  ;;  %3391 = vmatpush.msrb.mxu1 %v7699_v35  ;;  %v3040_v8 = vand.u32 2147483648, %v7915_v49 }
 0x7e4   :  { %3411 = vmatpush.msrb.mxu2 %v7704_v18  ;;  %3450 = vmatpush.msrb.mxu3 %v7711_v9  ;;  %vm3039_vm3 = vcmp.eq.f32.partialorder %v3038_v58, 8.507059e+37  ;;  %v9178_v58 = vld [vmem:[#allocation25_spill] sm:$0xff] }
 0x7e5   :  { %v7964_v30 = vadd.f32 %v3045_v12, %v3044_v53  ;;  %v3033_v43 = vadd.f32 %v7940_v48, %v3032_v11  ;;  %3372 = vmatpush.msrb.mxu0 %v7718_v37  ;;  %3392 = vmatpush.msrb.mxu1 %v7723_v47  ;;  %v3041_v12 = vor.u32 1.1754944e-38, %v3040_v8  ;;  %v9175_v53 = vld [vmem:[#allocation23_spill] sm:$0xff]  ;;  %v9176_v11 = vld [vmem:[#allocation24_spill] sm:$0xff]  ;;  %v9177_v8 = vld [vmem:[#allocation26_spill] sm:$0xff] }
 0x7e6   :  { %3412 = vmatpush.msrb.mxu2 %v7730_v0  ;;  %3451 = vmatpush.msrb.mxu3 %v7735_v41 }
 0x7e7   :  { %4535 = vtanh.f32 %v7964_v30  ;;  %3373 = vmatpush.msrb.mxu0 %v7742_v19  ;;  %3393 = vmatpush.msrb.mxu1 %v7747_v13  ;;  %v3037_v25 = vsel %vm3036_vm2, %v7940_v48, %v3033_v43 }
 0x7e8   :  { %3413 = vmatpush.msrb.mxu2 %v7752_v50  ;;  %3452 = vmatpush.msrb.mxu3 %v7761_v63  ;;  %v3042_v49 = vsel %vm3039_vm3, %v3041_v12, %v3037_v25  ;;  %v9179_v25 = vld [vmem:[#allocation27_spill] sm:$0xff]  ;;  %v9180_v12 = vld [vmem:[#allocation28_spill] sm:$0xff] }
 0x7e9   :  { %3374 = vmatpush.msrb.mxu0 %v7768_v56  ;;  %3394 = vmatpush.msrb.mxu1 %v7773_v60 }
 0x7ea   :  { %3414 = vmatpush.msrb.mxu2 %v7778_v2  ;;  %3453 = vmatpush.msrb.mxu3 %v7785_v52 }
 0x7eb   :  { %3375 = vmatpush.msrb.mxu0 %v7792_v59  ;;  %3395 = vmatpush.msrb.mxu1 %v7797_v32 }
 0x7ec   :  { %3415 = vmatpush.msrb.mxu2 %v7802_v24  ;;  %3454 = vmatpush.msrb.mxu3 %v7809_v16 }
 0x7ed   :  { %v4536_v28 = vpop.eup %4535  ;;  %3376 = vmatpush.msrb.mxu0 %v7816_v14  ;;  %3396 = vmatpush.msrb.mxu1 %v9172_v38 }
 0x7ee   :  { %v3048_v17 = vmul.f32 %v4536_v28, %v3042_v49  ;;  %3416 = vmatpush.msrb.mxu2 %v9173_v39  ;;  %3455 = vmatpush.msrb.mxu3 %v9174_v6  ;;  %v9181_v28 = vld [vmem:[#allocation30_spill] sm:$0xff]  ;;  %v9182_v49 = vld [vmem:[#allocation29_spill] sm:$0xff] }
 0x7ef   :  { %3377 = vmatpush.msrb.mxu0 %v9175_v53  ;;  %3397 = vmatpush.msrb.mxu1 %v9176_v11 }
 0x7f0   :  { %v3050_v48 = vrot.slane %v3048_v17, 1  ;;  %v3051_v15 = vrot.slane %v3048_v17, 2  ;;  %v3052_v62 = vrot.slane %v3048_v17, 3  ;;  %3064 = vst [vmem:[%s8762_s4 + $0xa] sm:$0x1] %v3048_v17  ;;  %3141 = vmatmul.f32.vlgmr.msra.gmra.mxu0 %v3048_v17  ;;  %3161 = vmatmul.f32.vlgmr.msra.gmra.mxu1 %v3048_v17  ;;  %v3053_v5 = vrot.slane %v3048_v17, 4 }
 0x7f1   :  { %3181 = vmatmul.f32.vlgmr.msra.gmra.mxu2 %v3048_v17  ;;  %3220 = vmatmul.f32.vlgmr.msra.gmra.mxu3 %v3048_v17  ;;  %v3054_v34 = vrot.slane %v3048_v17, 5  ;;  %v3055_v44 = vrot.slane %v3048_v17, 6  ;;  %v3056_v43 = vrot.slane %v3048_v17, 7  ;;  %v9183_v17 = vld [vmem:[#allocation77_spill] sm:$0xff] }
 0x7f2   :  { %3065 = vst [vmem:[%s8762_s4 + $0x1a] sm:$0x1] %v3050_v48  ;;  %3417 = vmatpush.msrb.mxu2 %v9177_v8  ;;  %3456 = vmatpush.msrb.mxu3 %v9178_v58  ;;  %v9184_v48 = vld [vmem:[#allocation78_spill] sm:$0xff] }
 0x7f3   :  { %3066 = vst [vmem:[%s8762_s4 + $0x2a] sm:$0x1] %v3051_v15  ;;  %3378 = vmatpush.msrb.mxu0 %v9179_v25  ;;  %3398 = vmatpush.msrb.mxu1 %v9180_v12  ;;  %v9185_v15 = vld [vmem:[#allocation79_spill] sm:$0xff] }
 0x7f4   :  { %3067 = vst [vmem:[%s8762_s4 + $0x3a] sm:$0x1] %v3052_v62  ;;  %3418 = vmatpush.msrb.mxu2 %v9181_v28  ;;  %3457 = vmatpush.msrb.mxu3 %v9182_v49  ;;  %v9186_v62 = vld [vmem:[#allocation80_spill] sm:$0xff] }
 0x7f5   :  { %3068 = vst [vmem:[%s8762_s4 + $0x4a] sm:$0x1] %v3053_v5  ;;  %3379 = vmatpush.msrb.mxu0 %v7894_v27  ;;  %3399 = vmatpush.msrb.mxu1 %v7899_v10  ;;  %v9187_v5 = vld [vmem:[#allocation81_spill] sm:$0xff] }
 0x7f6   :  { %3069 = vst [vmem:[%s8762_s4 + $0x5a] sm:$0x1] %v3054_v34  ;;  %3419 = vmatpush.msrb.mxu2 %v7904_v31  ;;  %3458 = vmatpush.msrb.mxu3 %v7913_v36  ;;  %v9189_v34 = vld [vmem:[#allocation83_spill] sm:$0xff] }
 0x7f7   :  { %3070 = vst [vmem:[%s8762_s4 + $0x6a] sm:$0x1] %v3055_v44  ;;  %3603 = vmatpush.msra.mxu0 %v7522_v61  ;;  %3623 = vmatpush.msra.mxu1 %v9183_v17  ;;  %v9188_v61 = vld [vmem:[#allocation82_spill] sm:$0xff] }
 0x7f8   :  { %3071 = vst [vmem:[%s8762_s4 + $0x7a] sm:$0x1] %v3056_v43  ;;  %3643 = vmatpush.msra.mxu2 %v9184_v48  ;;  %3682 = vmatpush.msra.mxu3 %v9185_v15 }
 0x7f9   :  { %3604 = vmatpush.msra.mxu0 %v9186_v62  ;;  %3624 = vmatpush.msra.mxu1 %v7551_v54  ;;  %v9190_v54 = vld [vmem:[#allocation84_spill] sm:$0xff] }
 0x7fa   :  { %3644 = vmatpush.msra.mxu2 %v7556_v51  ;;  %3683 = vmatpush.msra.mxu3 %v7563_v26  ;;  %v9191_v51 = vld [vmem:[#allocation85_spill] sm:$0xff]  ;;  %v9192_v26 = vld [vmem:[#allocation64_spill] sm:$0xff] }
 0x7fb   :  { %3605 = vmatpush.msra.mxu0 %v7570_v20  ;;  %3625 = vmatpush.msra.mxu1 %v9187_v5  ;;  %v9193_v20 = vld [vmem:[#allocation47_spill] sm:$0xff] }
 0x7fc   :  { %3645 = vmatpush.msra.mxu2 %v7580_v3  ;;  %3684 = vmatpush.msra.mxu3 %v7587_v46  ;;  %v169_v3 = vadd.f32 %v9193_v20, %v9192_v26  ;;  %v9194_v46 = vld [vmem:[#allocation65_spill] sm:$0xff] }
 0x7fd   :  { %3606 = vmatpush.msra.mxu0 %v9188_v61  ;;  %3626 = vmatpush.msra.mxu1 %v7599_v23  ;;  %v9195_v23 = vld [vmem:[#allocation48_spill] sm:$0xff] }
 0x7fe   :  { %3646 = vmatpush.msra.mxu2 %v7604_v4  ;;  %3685 = vmatpush.msra.mxu3 %v9189_v34  ;;  %v234_v4 = vadd.f32 %v9195_v23, %v9194_v46 }
 0x7ff   :  { %3607 = vmatpush.msra.mxu0 %v9190_v54  ;;  %3627 = vmatpush.msra.mxu1 %v9191_v51 }
 0x800   :  { %3647 = vmatpush.msra.mxu2 %v7628_v29  ;;  %3686 = vmatpush.msra.mxu3 %v7635_v1 }
 0x801   :  { %3608 = vmatpush.msra.mxu0 %v7642_v55  ;;  %3628 = vmatpush.msra.mxu1 %v7647_v7 }
 0x802   :  { %3648 = vmatpush.msra.mxu2 %v7652_v45  ;;  %3687 = vmatpush.msra.mxu3 %v7659_v57 }
 0x803   :  { %3609 = vmatpush.msra.mxu0 %v7670_v42  ;;  %3629 = vmatpush.msra.mxu1 %v7675_v40  ;;  %v9196_v42 = vld [vmem:[#allocation68_spill] sm:$0xff]  ;;  %v9197_v40 = vld [vmem:[#allocation50_spill] sm:$0xff] }
 0x804   :  { %3649 = vmatpush.msra.mxu2 %v7680_v21  ;;  %3688 = vmatpush.msra.mxu3 %v7687_v22  ;;  %v364_v21 = vadd.f32 %v9197_v40, %v9196_v42  ;;  %v9201_v40 = vld [vmem:[#allocation52_spill] sm:$0xff] }
 0x805   :  { %3610 = vmatpush.msra.mxu0 %v7694_v33  ;;  %3630 = vmatpush.msra.mxu1 %v7699_v35 }
 0x806   :  { %3650 = vmatpush.msra.mxu2 %v7704_v18  ;;  %3689 = vmatpush.msra.mxu3 %v7711_v9 }
 0x807   :  { %3611 = vmatpush.msra.mxu0 %v7718_v37  ;;  %3631 = vmatpush.msra.mxu1 %v7723_v47 }
 0x808   :  { %3651 = vmatpush.msra.mxu2 %v7730_v0  ;;  %3690 = vmatpush.msra.mxu3 %v7735_v41  ;;  %v9198_v0 = vld [vmem:[#allocation70_spill] sm:$0xff]  ;;  %v9199_v41 = vld [vmem:[#allocation49_spill] sm:$0xff] }
 0x809   :  { %3612 = vmatpush.msra.mxu0 %v7742_v19  ;;  %3632 = vmatpush.msra.mxu1 %v7747_v13  ;;  %v299_v19 = vadd.f32 %v9199_v41, %v9198_v0 }
 0x80a   :  { %3652 = vmatpush.msra.mxu2 %v7752_v50  ;;  %3691 = vmatpush.msra.mxu3 %v7761_v63 }
 0x80b   :  { %3613 = vmatpush.msra.mxu0 %v7768_v56  ;;  %3633 = vmatpush.msra.mxu1 %v7773_v60 }
 0x80c   :  { %3653 = vmatpush.msra.mxu2 %v7778_v2  ;;  %3692 = vmatpush.msra.mxu3 %v7785_v52 }
 0x80d   :  { %3614 = vmatpush.msra.mxu0 %v7792_v59  ;;  %3634 = vmatpush.msra.mxu1 %v7797_v32 }
 0x80e   :  { %3654 = vmatpush.msra.mxu2 %v7802_v24  ;;  %3693 = vmatpush.msra.mxu3 %v7809_v16 }
 0x80f   :  { %3615 = vmatpush.msra.mxu0 %v7816_v14  ;;  %3635 = vmatpush.msra.mxu1 %v9172_v38 }
 0x810   :  { %3655 = vmatpush.msra.mxu2 %v9173_v39  ;;  %3694 = vmatpush.msra.mxu3 %v9174_v6 }
 0x811   :  { %3616 = vmatpush.msra.mxu0 %v9175_v53  ;;  %3636 = vmatpush.msra.mxu1 %v9176_v11 }
 0x812   :  { %3656 = vmatpush.msra.mxu2 %v9177_v8  ;;  %3695 = vmatpush.msra.mxu3 %v9178_v58 }
 0x813   :  { %3617 = vmatpush.msra.mxu0 %v9179_v25  ;;  %3637 = vmatpush.msra.mxu1 %v9180_v12 }
 0x814   :  { %3657 = vmatpush.msra.mxu2 %v9181_v28  ;;  %3696 = vmatpush.msra.mxu3 %v9182_v49 }
 0x815   :  { %3618 = vmatpush.msra.mxu0 %v7894_v27  ;;  %3638 = vmatpush.msra.mxu1 %v7899_v10 }
 0x816   :  { %3658 = vmatpush.msra.mxu2 %v7904_v31  ;;  %3697 = vmatpush.msra.mxu3 %v7913_v36 }
 0x86d   :  { %v3142_v29 = vpop.f32.mrf.mxu0  ;;  %v3162_v1 = vpop.f32.mrf.mxu1 }
 0x86e   :  { %v3185_v55 = vadd.f32 %v3142_v29, %v169_v3  ;;  %v3186_v7 = vadd.f32 %v3162_v1, %v234_v4 }
 0x870   :  { %v4343_v45 = vmul.f32 -1.442695, %v3185_v55  ;;  %v4344_v57 = vmul.f32 -1.442695, %v3186_v7 }
 0x872   :  { %4537 = vpow2.f32 %v4343_v45  ;;  %v9200_v45 = vld [vmem:[#allocation51_spill] sm:$0xff] }
 0x873   :  { %4539 = vpow2.f32 %v4344_v57  ;;  %v172_v57 = vadd.f32 %v9200_v45, %v9192_v26 }
 0x874   :  { %v3221_v31 = vpop.f32.mrf.mxu3  ;;  %v3182_v37 = vpop.f32.mrf.mxu2 }
 0x875   :  { %v3224_v22 = vadd.f32 %v3221_v31, %v364_v21  ;;  %v3187_v63 = vadd.f32 %v3182_v37, %v299_v19  ;;  %v237_v21 = vadd.f32 %v9201_v40, %v9194_v46 }
 0x877   :  { %v4345_v36 = vmul.f32 -1.442695, %v3224_v22 }
 0x878   :  { %v4538_v33 = vpop.eup %4537 }
 0x879   :  { %v4540_v35 = vpop.eup %4539  ;;  %v3228_v18 = vadd.f32 1.0, %v4538_v33  ;;  %4541 = vpow2.f32 %v4345_v36 }
 0x87a   :  { %v3247_v9 = vadd.f32 1.0, %v4540_v35 }
 0x87b   :  { %4543 = vrcp.f32 %v3228_v18  ;;  %v3240_v32 = vand.u32 2147483648, %v3228_v18  ;;  %v3238_v14 = vand.u32 2147483647, %v3228_v18  ;;  %vm3234_vm6 = vweird.f32 %v3228_v18 }
 0x87c   :  { %4545 = vrcp.f32 %v3247_v9  ;;  %v3259_v24 = vand.u32 2147483648, %v3247_v9  ;;  %v3257_v10 = vand.u32 2147483647, %v3247_v9  ;;  %vm3253_vm7 = vweird.f32 %v3247_v9 }
 0x87d   :  { %v3241_v6 = vor.u32 1.1754944e-38, %v3240_v32  ;;  %vm3239_vm10 = vcmp.eq.f32.partialorder %v3238_v14, 8.507059e+37 }
 0x87e   :  { %v3260_v11 = vor.u32 1.1754944e-38, %v3259_v24  ;;  %vm3258_vm11 = vcmp.eq.f32.partialorder %v3257_v10, 8.507059e+37 }
 0x87f   :  { %v4542_v47 = vpop.eup %4541 }
 0x880   :  { %v3267_v13 = vadd.f32 1.0, %v4542_v47 }
 0x881   :  { %v4544_v50 = vpop.eup %4543 }
 0x882   :  { %v4546_v56 = vpop.eup %4545  ;;  %v3230_v60 = vmul.f32 %v4544_v50, %v3228_v18  ;;  %4547 = vrcp.f32 %v3267_v13  ;;  %vm3235_vm4 = vweird.f32 %v4544_v50  ;;  %v3279_v5 = vand.u32 2147483648, %v3267_v13 }
 0x883   :  { %v3249_v2 = vmul.f32 %v4546_v56, %v3247_v9  ;;  %4549 = vtanh.f32 %v3187_v63  ;;  %vm3254_vm5 = vweird.f32 %v4546_v56  ;;  %vm3236_vm8 = vmor %vm3234_vm6, %vm3235_vm4  ;;  %vm3273_vm13 = vweird.f32 %v3267_v13  ;;  %v9202_v9 = vld [vmem:[#allocation53_spill] sm:$0xff] }
 0x884   :  { %v3231_v52 = vsub.f32 1.0, %v3230_v60  ;;  %vm3255_vm9 = vmor %vm3253_vm7, %vm3254_vm5  ;;  %v3277_v61 = vand.u32 2147483647, %v3267_v13  ;;  %v3280_v54 = vor.u32 1.1754944e-38, %v3279_v5  ;;  %v367_v37 = vadd.f32 %v9202_v9, %v9196_v42  ;;  %v8182_v9 = vld [vmem:[%s8760_s2 + $0x1f0] sm:$0xff] }
 0x885   :  { %v3250_v59 = vsub.f32 1.0, %v3249_v2 }
 0x886   :  { %v3232_v16 = vmul.f32 %v4544_v50, %v3231_v52  ;;  %vm3278_vm15 = vcmp.eq.f32.partialorder %v3277_v61, 8.507059e+37  ;;  %v9203_v52 = vld [vmem:[#allocation56_spill] sm:$0xff] }
 0x887   :  { %v3251_v27 = vmul.f32 %v4546_v56, %v3250_v59  ;;  %v302_v59 = vadd.f32 %v9203_v52, %v9198_v0  ;;  %v8249_v52 = vld [vmem:[%s8760_s2 + $0x188] sm:$0xff] }
 0x888   :  { %v4548_v38 = vpop.eup %4547  ;;  %v3233_v39 = vadd.f32 %v4544_v50, %v3232_v16 }
 0x889   :  { %v3252_v44 = vadd.f32 %v4546_v56, %v3251_v27  ;;  %v3269_v53 = vmul.f32 %v4548_v38, %v3267_v13  ;;  %v4550_v8 = vpop.eup %4549  ;;  %vm3274_vm12 = vweird.f32 %v4548_v38 }
 0x88a   :  { %v3237_v43 = vsel %vm3236_vm8, %v4544_v50, %v3233_v39  ;;  %vm3275_vm14 = vmor %vm3273_vm13, %vm3274_vm12 }
 0x88b   :  { %v3242_v58 = vsel %vm3239_vm10, %v3241_v6, %v3237_v43  ;;  %v3256_v25 = vsel %vm3255_vm9, %v4546_v56, %v3252_v44  ;;  %v3270_v12 = vsub.f32 1.0, %v3269_v53 }
 0x88c   :  { %v3261_v28 = vsel %vm3258_vm11, %v3260_v11, %v3256_v25  ;;  %v3284_v49 = vmul.f32 %v4550_v8, %v3242_v58 }
 0x88d   :  { %v3283_v17 = vmul.f32 %v3261_v28, %v7964_v30  ;;  %v3271_v48 = vmul.f32 %v4548_v38, %v3270_v12 }
 0x88f   :  { %v8106_v15 = vadd.f32 %v3284_v49, %v3283_v17  ;;  %v3272_v62 = vadd.f32 %v4548_v38, %v3271_v48 }
 0x891   :  { %4551 = vtanh.f32 %v8106_v15  ;;  %v3276_v34 = vsel %vm3275_vm14, %v4548_v38, %v3272_v62 }
 0x892   :  { %v3281_v20 = vsel %vm3278_vm15, %v3280_v54, %v3276_v34 }
 0x897   :  { %v4552_v51 = vpop.eup %4551 }
 0x898   :  { %v3287_v3 = vmul.f32 %v4552_v51, %v3281_v20 }
 0x89a   :  { %v3289_v23 = vrot.slane %v3287_v3, 1  ;;  %v3290_v4 = vrot.slane %v3287_v3, 2  ;;  %v3291_v30 = vrot.slane %v3287_v3, 3  ;;  %3303 = vst [vmem:[%s8762_s4 + $0xb] sm:$0x1] %v3287_v3  ;;  %3380 = vmatmul.f32.vlgmr.msrb.gmra.mxu0 %v3287_v3  ;;  %3400 = vmatmul.f32.vlgmr.msrb.gmra.mxu1 %v3287_v3  ;;  %v3292_v29 = vrot.slane %v3287_v3, 4 }
 0x89b   :  { %3420 = vmatmul.f32.vlgmr.msrb.gmra.mxu2 %v3287_v3  ;;  %3459 = vmatmul.f32.vlgmr.msrb.gmra.mxu3 %v3287_v3  ;;  %v3293_v1 = vrot.slane %v3287_v3, 5  ;;  %v3294_v55 = vrot.slane %v3287_v3, 6  ;;  %v3295_v7 = vrot.slane %v3287_v3, 7 }
 0x89c   :  { %3304 = vst [vmem:[%s8762_s4 + $0x1b] sm:$0x1] %v3289_v23  ;;  %3882 = vmatpush.msrb.mxu2 %v8182_v9 }
 0x89d   :  { %3305 = vst [vmem:[%s8762_s4 + $0x2b] sm:$0x1] %v3290_v4 }
 0x89e   :  { %3306 = vst [vmem:[%s8762_s4 + $0x3b] sm:$0x1] %v3291_v30 }
 0x89f   :  { %3307 = vst [vmem:[%s8762_s4 + $0x4b] sm:$0x1] %v3292_v29 }
 0x8a0   :  { %3308 = vst [vmem:[%s8762_s4 + $0x5b] sm:$0x1] %v3293_v1 }
 0x8a1   :  { %3309 = vst [vmem:[%s8762_s4 + $0x6b] sm:$0x1] %v3294_v55 }
 0x8a2   :  { %3310 = vst [vmem:[%s8762_s4 + $0x7b] sm:$0x1] %v3295_v7 }
 0x917   :  { %v3381_v31 = vpop.f32.mrf.mxu0  ;;  %v3401_v22 = vpop.f32.mrf.mxu1 }
 0x918   :  { %v3424_v36 = vadd.f32 %v3381_v31, %v172_v57  ;;  %v3425_v33 = vadd.f32 %v3401_v22, %v237_v21 }
 0x91a   :  { %v4346_v35 = vmul.f32 -1.442695, %v3424_v36  ;;  %v4347_v18 = vmul.f32 -1.442695, %v3425_v33 }
 0x91c   :  { %4553 = vpow2.f32 %v4346_v35  ;;  %v8172_v35 = vld [vmem:[%s8760_s2 + $0x1e0] sm:$0xff] }
 0x91d   :  { %4555 = vpow2.f32 %v4347_v18  ;;  %v8177_v18 = vld [vmem:[%s8760_s2 + $0x1e8] sm:$0xff]  ;;  %3842 = vmatpush.msrb.mxu0 %v8172_v35 }
 0x91e   :  { %v3460_v47 = vpop.f32.mrf.mxu3  ;;  %v3421_v60 = vpop.f32.mrf.mxu2  ;;  %3862 = vmatpush.msrb.mxu1 %v8177_v18 }
 0x91f   :  { %v3463_v41 = vadd.f32 %v3460_v47, %v367_v37  ;;  %v3426_v16 = vadd.f32 %v3421_v60, %v302_v59  ;;  %v8189_v37 = vld [vmem:[%s8760_s2 + $0x1f8] sm:$0xff]  ;;  %v8196_v47 = vld [vmem:[%s8760_s2 + $0x1c0] sm:$0xff]  ;;  %v8254_v59 = vld [vmem:[%s8760_s2 + $0x190] sm:$0xff] }
 0x920   :  { %3921 = vmatpush.msrb.mxu3 %v8189_v37  ;;  %3843 = vmatpush.msrb.mxu0 %v8196_v47  ;;  %v8237_v60 = vld [vmem:[%s8760_s2 + $0x1b8] sm:$0xff] }
 0x921   :  { %v4348_v19 = vmul.f32 -1.442695, %v3463_v41  ;;  %v8201_v41 = vld [vmem:[%s8760_s2 + $0x1c8] sm:$0xff] }
 0x922   :  { %v4554_v13 = vpop.eup %4553  ;;  %3863 = vmatpush.msrb.mxu1 %v8201_v41 }
 0x923   :  { %v4556_v50 = vpop.eup %4555  ;;  %v3467_v63 = vadd.f32 1.0, %v4554_v13  ;;  %4557 = vpow2.f32 %v4348_v19  ;;  %v8206_v19 = vld [vmem:[%s8760_s2 + $0x1d0] sm:$0xff]  ;;  %v8213_v13 = vld [vmem:[%s8760_s2 + $0x1d8] sm:$0xff] }
 0x924   :  { %v3486_v56 = vadd.f32 1.0, %v4556_v50  ;;  %3883 = vmatpush.msrb.mxu2 %v8206_v19  ;;  %3922 = vmatpush.msrb.mxu3 %v8213_v13  ;;  %v8220_v50 = vld [vmem:[%s8760_s2 + $0x1a0] sm:$0xff] }
 0x925   :  { %4559 = vrcp.f32 %v3467_v63  ;;  %v3479_v6 = vand.u32 2147483648, %v3467_v63  ;;  %v3477_v11 = vand.u32 2147483647, %v3467_v63  ;;  %vm3473_vm2 = vweird.f32 %v3467_v63  ;;  %3844 = vmatpush.msrb.mxu0 %v8220_v50 }
 0x926   :  { %4561 = vrcp.f32 %v3486_v56  ;;  %v3498_v44 = vand.u32 2147483648, %v3486_v56  ;;  %v3496_v8 = vand.u32 2147483647, %v3486_v56  ;;  %vm3492_vm3 = vweird.f32 %v3486_v56  ;;  %3923 = vmatpush.msrb.mxu3 %v8237_v60 }
 0x927   :  { %v3480_v12 = vor.u32 1.1754944e-38, %v3479_v6  ;;  %vm3478_vm6 = vcmp.eq.f32.partialorder %v3477_v11, 8.507059e+37  ;;  %v8309_v6 = vld [vmem:[%s8760_s2 + $0x158] sm:$0xff]  ;;  %v9205_v11 = vld [vmem:[#allocation55_spill] sm:$0xff] }
 0x928   :  { %v3499_v17 = vor.u32 1.1754944e-38, %v3498_v44  ;;  %vm3497_vm7 = vcmp.eq.f32.partialorder %v3496_v8, 8.507059e+37  ;;  %v9204_v44 = vld [vmem:[#allocation54_spill] sm:$0xff]  ;;  %v8320_v8 = vld [vmem:[%s8760_s2 + $0x120] sm:$0xff] }
 0x929   :  { %v4558_v2 = vpop.eup %4557 }
 0x92a   :  { %v3506_v32 = vadd.f32 1.0, %v4558_v2  ;;  %v8244_v2 = vld [vmem:[%s8760_s2 + $0x180] sm:$0xff] }
 0x92b   :  { %v4560_v24 = vpop.eup %4559  ;;  %3845 = vmatpush.msrb.mxu0 %v8244_v2 }
 0x92c   :  { %v4562_v14 = vpop.eup %4561  ;;  %v3469_v27 = vmul.f32 %v4560_v24, %v3467_v63  ;;  %4563 = vrcp.f32 %v3506_v32  ;;  %vm3474_vm0 = vweird.f32 %v4560_v24  ;;  %v3518_v30 = vand.u32 2147483648, %v3506_v32  ;;  %v8225_v63 = vld [vmem:[%s8760_s2 + $0x1a8] sm:$0xff] }
 0x92d   :  { %v3488_v10 = vmul.f32 %v4562_v14, %v3486_v56  ;;  %4565 = vtanh.f32 %v3426_v16  ;;  %vm3493_vm1 = vweird.f32 %v4562_v14  ;;  %vm3475_vm4 = vmor %vm3473_vm2, %vm3474_vm0  ;;  %vm3512_vm9 = vweird.f32 %v3506_v32  ;;  %v8230_v56 = vld [vmem:[%s8760_s2 + $0x1b0] sm:$0xff]  ;;  %3864 = vmatpush.msrb.mxu1 %v8225_v63  ;;  %v8273_v16 = vld [vmem:[%s8760_s2 + $0x168] sm:$0xff] }
 0x92e   :  { %v3470_v38 = vsub.f32 1.0, %v3469_v27  ;;  %vm3494_vm5 = vmor %vm3492_vm3, %vm3493_vm1  ;;  %v3516_v29 = vand.u32 2147483647, %v3506_v32  ;;  %v3519_v55 = vor.u32 1.1754944e-38, %v3518_v30  ;;  %3884 = vmatpush.msrb.mxu2 %v8230_v56  ;;  %v8285_v27 = vld [vmem:[%s8760_s2 + $0x178] sm:$0xff] }
 0x92f   :  { %v3489_v39 = vsub.f32 1.0, %v3488_v10  ;;  %3865 = vmatpush.msrb.mxu1 %v8249_v52  ;;  %v8292_v10 = vld [vmem:[%s8760_s2 + $0x140] sm:$0xff]  ;;  %v8385_v30 = vld [vmem:[%s8760_s2 + $0xf8] sm:$0xff] }
 0x930   :  { %v3471_v53 = vmul.f32 %v4560_v24, %v3470_v38  ;;  %vm3517_vm11 = vcmp.eq.f32.partialorder %v3516_v29, 8.507059e+37  ;;  %3885 = vmatpush.msrb.mxu2 %v8254_v59  ;;  %v8297_v38 = vld [vmem:[%s8760_s2 + $0x148] sm:$0xff]  ;;  %v8392_v29 = vld [vmem:[%s8760_s2 + $0xc0] sm:$0xff] }
 0x931   :  { %v3490_v43 = vmul.f32 %v4562_v14, %v3489_v39  ;;  %3866 = vmatpush.msrb.mxu1 %v8273_v16  ;;  %v8302_v39 = vld [vmem:[%s8760_s2 + $0x150] sm:$0xff] }
 0x932   :  { %v4564_v58 = vpop.eup %4563  ;;  %v3472_v25 = vadd.f32 %v4560_v24, %v3471_v53  ;;  %v175_v53 = vadd.f32 %v9204_v44, %v9192_v26  ;;  %v8447_v44 = vld [vmem:[%s8760_s2 + $0x88] sm:$0xff]  ;;  %v8537_v26 = vld [vmem:[%s8760_s2 + $0x38] sm:$0xff] }
 0x933   :  { %v3491_v28 = vadd.f32 %v4562_v14, %v3490_v43  ;;  %v3508_v49 = vmul.f32 %v4564_v58, %v3506_v32  ;;  %v4566_v62 = vpop.eup %4565  ;;  %vm3513_vm8 = vweird.f32 %v4564_v58  ;;  %v8261_v32 = vld [vmem:[%s8760_s2 + $0x198] sm:$0xff]  ;;  %3867 = vmatpush.msrb.mxu1 %v8297_v38  ;;  %v240_v43 = vadd.f32 %v9205_v11, %v9194_v46  ;;  %v8530_v46 = vld [vmem:[%s8760_s2 + $0x30] sm:$0xff]  ;;  %9217 = vst [vmem:[#allocation72_spill] sm:$0xff] %v8537_v26 }
 0x934   :  { %v3476_v48 = vsel %vm3475_vm4, %v4560_v24, %v3472_v25  ;;  %vm3514_vm10 = vmor %vm3512_vm9, %vm3513_vm8  ;;  %3924 = vmatpush.msrb.mxu3 %v8261_v32  ;;  %v8268_v24 = vld [vmem:[%s8760_s2 + $0x160] sm:$0xff]  ;;  %v8330_v25 = vld [vmem:[%s8760_s2 + $0x130] sm:$0xff]  ;;  %9216 = vst [vmem:[#allocation71_spill] sm:$0xff] %v8530_v46 }
 0x935   :  { %v3481_v5 = vsel %vm3478_vm6, %v3480_v12, %v3476_v48  ;;  %v3495_v61 = vsel %vm3494_vm5, %v4562_v14, %v3491_v28  ;;  %v3509_v34 = vsub.f32 1.0, %v3508_v49  ;;  %v8278_v14 = vld [vmem:[%s8760_s2 + $0x170] sm:$0xff]  ;;  %3846 = vmatpush.msrb.mxu0 %v8268_v24  ;;  %v8337_v49 = vld [vmem:[%s8760_s2 + $0x138] sm:$0xff] }
 0x936   :  { %v3500_v54 = vsel %vm3497_vm7, %v3499_v17, %v3495_v61  ;;  %v3523_v51 = vmul.f32 %v4566_v62, %v3481_v5  ;;  %3886 = vmatpush.msrb.mxu2 %v8278_v14  ;;  %3925 = vmatpush.msrb.mxu3 %v8285_v27  ;;  %v8344_v62 = vld [vmem:[%s8760_s2 + $0x100] sm:$0xff]  ;;  %v8349_v5 = vld [vmem:[%s8760_s2 + $0x108] sm:$0xff]  ;;  %v8354_v61 = vld [vmem:[%s8760_s2 + $0x110] sm:$0xff] }
 0x937   :  { %v3522_v20 = vmul.f32 %v3500_v54, %v8106_v15  ;;  %v3510_v3 = vmul.f32 %v4564_v58, %v3509_v34  ;;  %3847 = vmatpush.msrb.mxu0 %v8292_v10  ;;  %v8361_v34 = vld [vmem:[%s8760_s2 + $0x118] sm:$0xff] }
 0x938   :  { %3887 = vmatpush.msrb.mxu2 %v8302_v39  ;;  %3926 = vmatpush.msrb.mxu3 %v8309_v6 }
 0x939   :  { %v8142_v23 = vadd.f32 %v3523_v51, %v3522_v20  ;;  %v3511_v4 = vadd.f32 %v4564_v58, %v3510_v3  ;;  %3848 = vmatpush.msrb.mxu0 %v8320_v8  ;;  %v8368_v20 = vld [vmem:[%s8760_s2 + $0xe0] sm:$0xff]  ;;  %v8373_v3 = vld [vmem:[%s8760_s2 + $0xe8] sm:$0xff] }
 0x93a   :  { %3888 = vmatpush.msrb.mxu2 %v8330_v25  ;;  %3927 = vmatpush.msrb.mxu3 %v8337_v49 }
 0x93b   :  { %4567 = vtanh.f32 %v8142_v23  ;;  %v3515_v1 = vsel %vm3514_vm10, %v4564_v58, %v3511_v4  ;;  %v8325_v58 = vld [vmem:[%s8760_s2 + $0x128] sm:$0xff]  ;;  %3849 = vmatpush.msrb.mxu0 %v8344_v62  ;;  %v8380_v4 = vld [vmem:[%s8760_s2 + $0xf0] sm:$0xff] }
 0x93c   :  { %v3520_v45 = vsel %vm3517_vm11, %v3519_v55, %v3515_v1  ;;  %3868 = vmatpush.msrb.mxu1 %v8325_v58  ;;  %3889 = vmatpush.msrb.mxu2 %v8354_v61  ;;  %v8397_v1 = vld [vmem:[%s8760_s2 + $0xc8] sm:$0xff]  ;;  %v8402_v55 = vld [vmem:[%s8760_s2 + $0xd0] sm:$0xff] }
 0x93d   :  { %3928 = vmatpush.msrb.mxu3 %v8361_v34  ;;  %3850 = vmatpush.msrb.mxu0 %v8368_v20 }
 0x93e   :  { %3869 = vmatpush.msrb.mxu1 %v8349_v5  ;;  %3890 = vmatpush.msrb.mxu2 %v8380_v4 }
 0x93f   :  { %3929 = vmatpush.msrb.mxu3 %v8385_v30  ;;  %3851 = vmatpush.msrb.mxu0 %v8392_v29 }
 0x940   :  { %3870 = vmatpush.msrb.mxu1 %v8373_v3  ;;  %3891 = vmatpush.msrb.mxu2 %v8402_v55 }
 0x941   :  { %v4568_v7 = vpop.eup %4567 }
 0x942   :  { %v3526_v57 = vmul.f32 %v4568_v7, %v3520_v45  ;;  %v9206_v7 = vld [vmem:[#allocation57_spill] sm:$0xff]  ;;  %3871 = vmatpush.msrb.mxu1 %v8397_v1 }
 0x943   :  { %v370_v45 = vadd.f32 %v9206_v7, %v9196_v42  ;;  %v8485_v7 = vld [vmem:[%s8760_s2 + $0x78] sm:$0xff]  ;;  %v8525_v42 = vld [vmem:[%s8760_s2 + $0x28] sm:$0xff] }
 0x944   :  { %v3528_v40 = vrot.slane %v3526_v57, 1  ;;  %v3529_v21 = vrot.slane %v3526_v57, 2  ;;  %v3530_v15 = vrot.slane %v3526_v57, 3  ;;  %3542 = vst [vmem:[%s8762_s4 + $0xc] sm:$0x1] %v3526_v57  ;;  %3619 = vmatmul.f32.vlgmr.msra.gmra.mxu0 %v3526_v57  ;;  %3639 = vmatmul.f32.vlgmr.msra.gmra.mxu1 %v3526_v57  ;;  %v3531_v31 = vrot.slane %v3526_v57, 4 }
 0x945   :  { %3659 = vmatmul.f32.vlgmr.msra.gmra.mxu2 %v3526_v57  ;;  %3698 = vmatmul.f32.vlgmr.msra.gmra.mxu3 %v3526_v57  ;;  %v3532_v22 = vrot.slane %v3526_v57, 5  ;;  %v3533_v36 = vrot.slane %v3526_v57, 6  ;;  %v3534_v33 = vrot.slane %v3526_v57, 7  ;;  %v8411_v57 = vld [vmem:[%s8760_s2 + $0xd8] sm:$0xff]  ;;  %9209 = vst [vmem:[#allocation34_spill] sm:$0xff] %v8485_v7 }
 0x946   :  { %3543 = vst [vmem:[%s8762_s4 + $0x1c] sm:$0x1] %v3528_v40  ;;  %3930 = vmatpush.msrb.mxu3 %v8411_v57 }
 0x947   :  { %3544 = vst [vmem:[%s8762_s4 + $0x2c] sm:$0x1] %v3529_v21  ;;  %v8418_v21 = vld [vmem:[%s8760_s2 + $0xa0] sm:$0xff] }
 0x948   :  { %3545 = vst [vmem:[%s8762_s4 + $0x3c] sm:$0x1] %v3530_v15  ;;  %v8423_v15 = vld [vmem:[%s8760_s2 + $0xa8] sm:$0xff]  ;;  %3852 = vmatpush.msrb.mxu0 %v8418_v21 }
 0x949   :  { %3546 = vst [vmem:[%s8762_s4 + $0x4c] sm:$0x1] %v3531_v31  ;;  %v8428_v31 = vld [vmem:[%s8760_s2 + $0xb0] sm:$0xff]  ;;  %3872 = vmatpush.msrb.mxu1 %v8423_v15 }
 0x94a   :  { %3547 = vst [vmem:[%s8762_s4 + $0x5c] sm:$0x1] %v3532_v22  ;;  %3892 = vmatpush.msrb.mxu2 %v8428_v31 }
 0x94b   :  { %3548 = vst [vmem:[%s8762_s4 + $0x6c] sm:$0x1] %v3533_v36  ;;  %v8435_v36 = vld [vmem:[%s8760_s2 + $0xb8] sm:$0xff]  ;;  %3873 = vmatpush.msrb.mxu1 %v8447_v44 }
 0x94c   :  { %3549 = vst [vmem:[%s8762_s4 + $0x7c] sm:$0x1] %v3534_v33  ;;  %3931 = vmatpush.msrb.mxu3 %v8435_v36  ;;  %v8442_v33 = vld [vmem:[%s8760_s2 + $0x80] sm:$0xff] }
 0x94d   :  { %3853 = vmatpush.msrb.mxu0 %v8442_v33  ;;  %9215 = vst [vmem:[#allocation90_spill] sm:$0xff] %v8525_v42 }
 0x9c1   :  { %v3620_v12 = vpop.f32.mrf.mxu0  ;;  %v3640_v28 = vpop.f32.mrf.mxu1 }
 0x9c2   :  { %v3663_v17 = vadd.f32 %v3620_v12, %v175_v53  ;;  %v3664_v48 = vadd.f32 %v3640_v28, %v240_v43  ;;  %v8452_v53 = vld [vmem:[%s8760_s2 + $0x90] sm:$0xff]  ;;  %v8459_v43 = vld [vmem:[%s8760_s2 + $0x98] sm:$0xff]  ;;  %v8466_v28 = vld [vmem:[%s8760_s2 + $0x60] sm:$0xff] }
 0x9c3   :  { %3893 = vmatpush.msrb.mxu2 %v8452_v53  ;;  %3932 = vmatpush.msrb.mxu3 %v8459_v43 }
 0x9c4   :  { %v4349_v54 = vmul.f32 -1.442695, %v3663_v17  ;;  %v4350_v51 = vmul.f32 -1.442695, %v3664_v48  ;;  %v8471_v17 = vld [vmem:[%s8760_s2 + $0x68] sm:$0xff]  ;;  %v8476_v48 = vld [vmem:[%s8760_s2 + $0x70] sm:$0xff]  ;;  %3854 = vmatpush.msrb.mxu0 %v8466_v28 }
 0x9c5   :  { %9207 = vst [vmem:[#allocation31_spill] sm:$0xff] %v8471_v17  ;;  %3874 = vmatpush.msrb.mxu1 %v8471_v17  ;;  %3894 = vmatpush.msrb.mxu2 %v8476_v48 }
 0x9c6   :  { %4569 = vpow2.f32 %v4349_v54  ;;  %9208 = vst [vmem:[#allocation32_spill] sm:$0xff] %v8476_v48  ;;  %3933 = vmatpush.msrb.mxu3 %v8485_v7 }
 0x9c7   :  { %4571 = vpow2.f32 %v4350_v51 }
 0x9c8   :  { %v3699_v40 = vpop.f32.mrf.mxu3 }
 0x9c9   :  { %v3702_v22 = vadd.f32 %v3699_v40, %v370_v45  ;;  %v8494_v40 = vld [vmem:[%s8760_s2 + $0x40] sm:$0xff] }
 0x9ca   :  { %9210 = vst [vmem:[#allocation33_spill] sm:$0xff] %v8494_v40  ;;  %3855 = vmatpush.msrb.mxu0 %v8494_v40 }
 0x9cb   :  { %v4351_v11 = vmul.f32 -1.442695, %v3702_v22  ;;  %v8499_v22 = vld [vmem:[%s8760_s2 + $0x48] sm:$0xff] }
 0x9cc   :  { %v4570_v12 = vpop.eup %4569  ;;  %9211 = vst [vmem:[#allocation20_spill] sm:$0xff] %v8499_v22  ;;  %3875 = vmatpush.msrb.mxu1 %v8499_v22 }
 0x9cd   :  { %v4572_v54 = vpop.eup %4571  ;;  %v8478_v51 = vadd.f32 1.0, %v4570_v12  ;;  %4573 = vpow2.f32 %v4351_v11  ;;  %v8504_v11 = vld [vmem:[%s8760_s2 + $0x50] sm:$0xff]  ;;  %v8512_v12 = vld [vmem:[%s8760_s2 + $0x58] sm:$0xff] }
 0x9ce   :  { %v8487_v45 = vadd.f32 1.0, %v4572_v54  ;;  %9212 = vst [vmem:[#allocation22_spill] sm:$0xff] %v8504_v11  ;;  %3895 = vmatpush.msrb.mxu2 %v8504_v11  ;;  %3934 = vmatpush.msrb.mxu3 %v8512_v12  ;;  %v8520_v54 = vld [vmem:[%s8760_s2 + $0x20] sm:$0xff] }
 0x9cf   :  { %4575 = vrcp.f32 %v8478_v51  ;;  %9213 = vst [vmem:[#allocation21_spill] sm:$0xff] %v8512_v12  ;;  %3856 = vmatpush.msrb.mxu0 %v8520_v54  ;;  %3876 = vmatpush.msrb.mxu1 %v8525_v42  ;;  %v3660_v12 = vpop.f32.mrf.mxu2  ;;  %v8544_v11 = vld [vmem:[%s8760_s2] sm:$0xff]  ;;  %v8554_v42 = vld [vmem:[%s8760_s2 + $0x10] sm:$0xff]  ;;  %vm3712_vm14 = vweird.f32 %v8478_v51 }
 0x9d0   :  { %4577 = vrcp.f32 %v8487_v45  ;;  %9214 = vst [vmem:[#allocation89_spill] sm:$0xff] %v8520_v54  ;;  %3896 = vmatpush.msrb.mxu2 %v8530_v46  ;;  %3935 = vmatpush.msrb.mxu3 %v8537_v26  ;;  %v8549_v54 = vld [vmem:[%s8760_s2 + $0x8] sm:$0xff]  ;;  %v9218_v46 = vld [vmem:[#allocation60_spill] sm:$0xff]  ;;  %vm3731_vm15 = vweird.f32 %v8487_v45 }
 0x9d1   :  { %v305_v40 = vadd.f32 %v9218_v46, %v9198_v0  ;;  %3857 = vmatpush.msrb.mxu0 %v8544_v11  ;;  %3877 = vmatpush.msrb.mxu1 %v8549_v54  ;;  %v8563_v26 = vld [vmem:[%s8760_s2 + $0x18] sm:$0xff] }
 0x9d2   :  { %3897 = vmatpush.msrb.mxu2 %v8554_v42  ;;  %3936 = vmatpush.msrb.mxu3 %v8563_v26 }
 0x9d3   :  { %v4574_v22 = vpop.eup %4573  ;;  %v3665_v17 = vadd.f32 %v3660_v12, %v305_v40  ;;  %4081 = vmatpush.msra.mxu0 %v8172_v35  ;;  %4101 = vmatpush.msra.mxu1 %v8177_v18  ;;  %v3718_v18 = vand.u32 2147483648, %v8478_v51 }
 0x9d4   :  { %v8565_v7 = vadd.f32 1.0, %v4574_v22  ;;  %4121 = vmatpush.msra.mxu2 %v8182_v9  ;;  %4160 = vmatpush.msra.mxu3 %v8189_v37  ;;  %v3737_v9 = vand.u32 2147483648, %v8487_v45 }
 0x9d5   :  { %v4576_v48 = vpop.eup %4575  ;;  %4082 = vmatpush.msra.mxu0 %v8196_v47  ;;  %4102 = vmatpush.msra.mxu1 %v8201_v41  ;;  %v3716_v47 = vand.u32 2147483647, %v8478_v51  ;;  %v3735_v41 = vand.u32 2147483647, %v8487_v45 }
 0x9d6   :  { %v4578_v46 = vpop.eup %4577  ;;  %v3708_v0 = vmul.f32 %v4576_v48, %v8478_v51  ;;  %4579 = vrcp.f32 %v8565_v7  ;;  %4122 = vmatpush.msra.mxu2 %v8206_v19  ;;  %4161 = vmatpush.msra.mxu3 %v8213_v13  ;;  %vm3713_vm12 = vweird.f32 %v4576_v48  ;;  %vm3751_vm5 = vweird.f32 %v8565_v7  ;;  %v9233_v51 = vld [vmem:[#allocation59_spill] sm:$0xff] }
 0x9d7   :  { %v3727_v22 = vmul.f32 %v4578_v46, %v8487_v45  ;;  %4581 = vtanh.f32 %v3665_v17  ;;  %4083 = vmatpush.msra.mxu0 %v8220_v50  ;;  %4103 = vmatpush.msra.mxu1 %v8225_v63  ;;  %vm3732_vm13 = vweird.f32 %v4578_v46  ;;  %vm3714_vm0 = vmor %vm3712_vm14, %vm3713_vm12  ;;  %v3719_v50 = vor.u32 1.1754944e-38, %v3718_v18 }
 0x9d8   :  { %v3709_v40 = vsub.f32 1.0, %v3708_v0  ;;  %4123 = vmatpush.msra.mxu2 %v8230_v56  ;;  %4162 = vmatpush.msra.mxu3 %v8237_v60  ;;  %vm3733_vm1 = vmor %vm3731_vm15, %vm3732_vm13  ;;  %v3738_v60 = vor.u32 1.1754944e-38, %v3737_v9  ;;  %vm3717_vm2 = vcmp.eq.f32.partialorder %v3716_v47, 8.507059e+37  ;;  %vm3736_vm3 = vcmp.eq.f32.partialorder %v3735_v41, 8.507059e+37 }
 0x9d9   :  { %v3728_v35 = vsub.f32 1.0, %v3727_v22  ;;  %4084 = vmatpush.msra.mxu0 %v8244_v2  ;;  %4104 = vmatpush.msra.mxu1 %v8249_v52 }
 0x9da   :  { %v3710_v37 = vmul.f32 %v4576_v48, %v3709_v40  ;;  %4124 = vmatpush.msra.mxu2 %v8254_v59  ;;  %4163 = vmatpush.msra.mxu3 %v8261_v32  ;;  %v9234_v40 = vld [vmem:[#allocation68_spill] sm:$0xff] }
 0x9db   :  { %v3729_v0 = vmul.f32 %v4578_v46, %v3728_v35  ;;  %4085 = vmatpush.msra.mxu0 %v8268_v24  ;;  %4105 = vmatpush.msra.mxu1 %v8273_v16  ;;  %v9235_v35 = vld [vmem:[#allocation61_spill] sm:$0xff] }
 0x9dc   :  { %v8590_v19 = vpop.eup %4579  ;;  %v3711_v13 = vadd.f32 %v4576_v48, %v3710_v37  ;;  %4125 = vmatpush.msra.mxu2 %v8278_v14  ;;  %4164 = vmatpush.msra.mxu3 %v8285_v27  ;;  %v373_v18 = vadd.f32 %v9235_v35, %v9234_v40  ;;  %v9239_v35 = vld [vmem:[#allocation63_spill] sm:$0xff] }
 0x9dd   :  { %v3730_v63 = vadd.f32 %v4578_v46, %v3729_v0  ;;  %v3747_v56 = vmul.f32 %v8590_v19, %v8565_v7  ;;  %v4582_v52 = vpop.eup %4581  ;;  %4086 = vmatpush.msra.mxu0 %v8292_v10  ;;  %4106 = vmatpush.msra.mxu1 %v8297_v38  ;;  %vm3752_vm4 = vweird.f32 %v8590_v19  ;;  %v3755_v38 = vand.u32 2147483647, %v8565_v7 }
 0x9de   :  { %v3715_v2 = vsel %vm3714_vm0, %v4576_v48, %v3711_v13  ;;  %4126 = vmatpush.msra.mxu2 %v8302_v39  ;;  %4165 = vmatpush.msra.mxu3 %v8309_v6  ;;  %vm3753_vm6 = vmor %vm3751_vm5, %vm3752_vm4 }
 0x9df   :  { %v3720_v59 = vsel %vm3717_vm2, %v3719_v50, %v3715_v2  ;;  %v3734_v32 = vsel %vm3733_vm1, %v4578_v46, %v3730_v63  ;;  %v3748_v17 = vsub.f32 1.0, %v3747_v56  ;;  %4087 = vmatpush.msra.mxu0 %v8320_v8  ;;  %4107 = vmatpush.msra.mxu1 %v8325_v58  ;;  %vm3756_vm7 = vcmp.eq.f32.partialorder %v3755_v38, 8.507059e+37  ;;  %v9236_v50 = vld [vmem:[#allocation70_spill] sm:$0xff] }
 0x9e0   :  { %v3739_v24 = vsel %vm3736_vm3, %v3738_v60, %v3734_v32  ;;  %v3762_v16 = vmul.f32 %v4582_v52, %v3720_v59  ;;  %4127 = vmatpush.msra.mxu2 %v8330_v25  ;;  %4166 = vmatpush.msra.mxu3 %v8337_v49  ;;  %v9219_v49 = vld [vmem:[#allocation31_spill] sm:$0xff]  ;;  %v9237_v63 = vld [vmem:[#allocation66_spill] sm:$0xff] }
 0x9e1   :  { %v3761_v48 = vmul.f32 %v3739_v24, %v8142_v23  ;;  %v3749_v14 = vmul.f32 %v8590_v19, %v3748_v17  ;;  %4088 = vmatpush.msra.mxu0 %v8344_v62  ;;  %4108 = vmatpush.msra.mxu1 %v8349_v5  ;;  %v3757_v23 = vand.u32 2147483648, %v8565_v7  ;;  %v308_v56 = vadd.f32 %v9237_v63, %v9236_v50 }
 0x9e2   :  { %4128 = vmatpush.msra.mxu2 %v8354_v61  ;;  %4167 = vmatpush.msra.mxu3 %v8361_v34 }
 0x9e3   :  { %v8614_v27 = vadd.f32 %v3762_v16, %v3761_v48  ;;  %v3750_v10 = vadd.f32 %v8590_v19, %v3749_v14  ;;  %4089 = vmatpush.msra.mxu0 %v8368_v20  ;;  %4109 = vmatpush.msra.mxu1 %v8373_v3  ;;  %v3758_v6 = vor.u32 1.1754944e-38, %v3757_v23  ;;  %v9220_v3 = vld [vmem:[#allocation32_spill] sm:$0xff] }
 0x9e4   :  { %4129 = vmatpush.msra.mxu2 %v8380_v4  ;;  %4168 = vmatpush.msra.mxu3 %v8385_v30  ;;  %v9221_v4 = vld [vmem:[#allocation34_spill] sm:$0xff] }
 0x9e5   :  { %4583 = vtanh.f32 %v8614_v27  ;;  %4090 = vmatpush.msra.mxu0 %v8392_v29  ;;  %4110 = vmatpush.msra.mxu1 %v8397_v1  ;;  %v3754_v39 = vsel %vm3753_vm6, %v8590_v19, %v3750_v10  ;;  %v9222_v29 = vld [vmem:[#allocation33_spill] sm:$0xff]  ;;  %v9223_v1 = vld [vmem:[#allocation20_spill] sm:$0xff] }
 0x9e6   :  { %4130 = vmatpush.msra.mxu2 %v8402_v55  ;;  %4169 = vmatpush.msra.mxu3 %v8411_v57  ;;  %v3759_v58 = vsel %vm3756_vm7, %v3758_v6, %v3754_v39  ;;  %v9224_v57 = vld [vmem:[#allocation22_spill] sm:$0xff] }
 0x9e7   :  { %4091 = vmatpush.msra.mxu0 %v8418_v21  ;;  %4111 = vmatpush.msra.mxu1 %v8423_v15  ;;  %v9225_v21 = vld [vmem:[#allocation21_spill] sm:$0xff] }
 0x9e8   :  { %4131 = vmatpush.msra.mxu2 %v8428_v31  ;;  %4170 = vmatpush.msra.mxu3 %v8435_v36  ;;  %v9226_v15 = vld [vmem:[#allocation89_spill] sm:$0xff]  ;;  %v9227_v31 = vld [vmem:[#allocation90_spill] sm:$0xff]  ;;  %v9228_v36 = vld [vmem:[#allocation71_spill] sm:$0xff] }
 0x9e9   :  { %4092 = vmatpush.msra.mxu0 %v8442_v33  ;;  %4112 = vmatpush.msra.mxu1 %v8447_v44  ;;  %v9229_v33 = vld [vmem:[#allocation72_spill] sm:$0xff] }
 0x9ea   :  { %4132 = vmatpush.msra.mxu2 %v8452_v53  ;;  %4171 = vmatpush.msra.mxu3 %v8459_v43  ;;  %v9230_v44 = vld [vmem:[#allocation64_spill] sm:$0xff]  ;;  %v9231_v53 = vld [vmem:[#allocation58_spill] sm:$0xff] }
 0x9eb   :  { %v4584_v8 = vpop.eup %4583  ;;  %4093 = vmatpush.msra.mxu0 %v8466_v28  ;;  %4113 = vmatpush.msra.mxu1 %v9219_v49  ;;  %v178_v43 = vadd.f32 %v9231_v53, %v9230_v44  ;;  %v9232_v28 = vld [vmem:[#allocation65_spill] sm:$0xff] }
 0x9ec   :  { %v3765_v25 = vmul.f32 %v4584_v8, %v3759_v58  ;;  %4133 = vmatpush.msra.mxu2 %v9220_v3  ;;  %4172 = vmatpush.msra.mxu3 %v9221_v4  ;;  %v243_v7 = vadd.f32 %v9233_v51, %v9232_v28 }
 0x9ed   :  { %4094 = vmatpush.msra.mxu0 %v9222_v29  ;;  %4114 = vmatpush.msra.mxu1 %v9223_v1 }
 0x9ee   :  { %v3767_v62 = vrot.slane %v3765_v25, 1  ;;  %v3768_v5 = vrot.slane %v3765_v25, 2  ;;  %v3769_v61 = vrot.slane %v3765_v25, 3  ;;  %3781 = vst [vmem:[%s8762_s4 + $0xd] sm:$0x1] %v3765_v25  ;;  %3858 = vmatmul.f32.vlgmr.msrb.gmra.mxu0 %v3765_v25  ;;  %3878 = vmatmul.f32.vlgmr.msrb.gmra.mxu1 %v3765_v25  ;;  %v3770_v34 = vrot.slane %v3765_v25, 4 }
 0x9ef   :  { %3898 = vmatmul.f32.vlgmr.msrb.gmra.mxu2 %v3765_v25  ;;  %3937 = vmatmul.f32.vlgmr.msrb.gmra.mxu3 %v3765_v25  ;;  %v3771_v20 = vrot.slane %v3765_v25, 5  ;;  %v3772_v30 = vrot.slane %v3765_v25, 6  ;;  %v3773_v55 = vrot.slane %v3765_v25, 7 }
 0x9f0   :  { %3782 = vst [vmem:[%s8762_s4 + $0x1d] sm:$0x1] %v3767_v62  ;;  %4134 = vmatpush.msra.mxu2 %v9224_v57  ;;  %4173 = vmatpush.msra.mxu3 %v9225_v21 }
 0x9f1   :  { %3783 = vst [vmem:[%s8762_s4 + $0x2d] sm:$0x1] %v3768_v5  ;;  %4095 = vmatpush.msra.mxu0 %v9226_v15  ;;  %4115 = vmatpush.msra.mxu1 %v9227_v31 }
 0x9f2   :  { %3784 = vst [vmem:[%s8762_s4 + $0x3d] sm:$0x1] %v3769_v61  ;;  %4135 = vmatpush.msra.mxu2 %v9228_v36  ;;  %4174 = vmatpush.msra.mxu3 %v9229_v33 }
 0x9f3   :  { %3785 = vst [vmem:[%s8762_s4 + $0x4d] sm:$0x1] %v3770_v34  ;;  %4096 = vmatpush.msra.mxu0 %v8544_v11  ;;  %4116 = vmatpush.msra.mxu1 %v8549_v54 }
 0x9f4   :  { %3786 = vst [vmem:[%s8762_s4 + $0x5d] sm:$0x1] %v3771_v20  ;;  %4136 = vmatpush.msra.mxu2 %v8554_v42  ;;  %4175 = vmatpush.msra.mxu3 %v8563_v26 }
 0x9f5   :  { %3787 = vst [vmem:[%s8762_s4 + $0x6d] sm:$0x1] %v3772_v30 }
 0x9f6   :  { %3788 = vst [vmem:[%s8762_s4 + $0x7d] sm:$0x1] %v3773_v55 }
 0xa6b   :  { %v3859_v45 = vpop.f32.mrf.mxu0  ;;  %v3879_v12 = vpop.f32.mrf.mxu1 }
 0xa6c   :  { %v3902_v46 = vadd.f32 %v3859_v45, %v178_v43  ;;  %v3903_v11 = vadd.f32 %v3879_v12, %v243_v7 }
 0xa6e   :  { %v4352_v22 = vmul.f32 -1.442695, %v3902_v46  ;;  %v4353_v54 = vmul.f32 -1.442695, %v3903_v11 }
 0xa70   :  { %4585 = vpow2.f32 %v4352_v22  ;;  %v9238_v22 = vld [vmem:[#allocation62_spill] sm:$0xff] }
 0xa71   :  { %4587 = vpow2.f32 %v4353_v54  ;;  %v181_v54 = vadd.f32 %v9238_v22, %v9230_v44 }
 0xa72   :  { %v3938_v42 = vpop.f32.mrf.mxu3  ;;  %v3899_v19 = vpop.f32.mrf.mxu2 }
 0xa73   :  { %v3941_v9 = vadd.f32 %v3938_v42, %v373_v18  ;;  %v3904_v52 = vadd.f32 %v3899_v19, %v308_v56  ;;  %v246_v18 = vadd.f32 %v9239_v35, %v9232_v28 }
 0xa75   :  { %v4354_v26 = vmul.f32 -1.442695, %v3941_v9 }
 0xa76   :  { %v4586_v37 = vpop.eup %4585 }
 0xa77   :  { %v4588_v47 = vpop.eup %4587  ;;  %v3945_v0 = vadd.f32 1.0, %v4586_v37  ;;  %4589 = vpow2.f32 %v4354_v26 }
 0xa78   :  { %v3964_v41 = vadd.f32 1.0, %v4588_v47 }
 0xa79   :  { %4591 = vrcp.f32 %v3945_v0  ;;  %v3957_v48 = vand.u32 2147483648, %v3945_v0  ;;  %v3955_v23 = vand.u32 2147483647, %v3945_v0  ;;  %vm3951_vm10 = vweird.f32 %v3945_v0 }
 0xa7a   :  { %4593 = vrcp.f32 %v3964_v41  ;;  %v3976_v14 = vand.u32 2147483648, %v3964_v41  ;;  %v3974_v39 = vand.u32 2147483647, %v3964_v41  ;;  %vm3970_vm11 = vweird.f32 %v3964_v41 }
 0xa7b   :  { %v3958_v58 = vor.u32 1.1754944e-38, %v3957_v48  ;;  %vm3956_vm14 = vcmp.eq.f32.partialorder %v3955_v23, 8.507059e+37 }
 0xa7c   :  { %v3977_v62 = vor.u32 1.1754944e-38, %v3976_v14  ;;  %vm3975_vm15 = vcmp.eq.f32.partialorder %v3974_v39, 8.507059e+37 }
 0xa7d   :  { %v4590_v13 = vpop.eup %4589 }
 0xa7e   :  { %v3984_v60 = vadd.f32 1.0, %v4590_v13 }
 0xa7f   :  { %v4592_v2 = vpop.eup %4591 }
 0xa80   :  { %v4594_v59 = vpop.eup %4593  ;;  %v3947_v32 = vmul.f32 %v4592_v2, %v3945_v0  ;;  %4595 = vrcp.f32 %v3984_v60  ;;  %vm3952_vm8 = vweird.f32 %v4592_v2  ;;  %v3996_v21 = vand.u32 2147483648, %v3984_v60 }
 0xa81   :  { %v3966_v17 = vmul.f32 %v4594_v59, %v3964_v41  ;;  %4597 = vtanh.f32 %v3904_v52  ;;  %vm3971_vm9 = vweird.f32 %v4594_v59  ;;  %vm3953_vm12 = vmor %vm3951_vm10, %vm3952_vm8  ;;  %vm3990_vm1 = vweird.f32 %v3984_v60  ;;  %v9240_v41 = vld [vmem:[#allocation67_spill] sm:$0xff] }
 0xa82   :  { %v3948_v24 = vsub.f32 1.0, %v3947_v32  ;;  %vm3972_vm13 = vmor %vm3970_vm11, %vm3971_vm9  ;;  %v3994_v15 = vand.u32 2147483647, %v3984_v60  ;;  %v3997_v36 = vor.u32 1.1754944e-38, %v3996_v21  ;;  %v376_v19 = vadd.f32 %v9240_v41, %v9234_v40  ;;  %v9241_v32 = vld [vmem:[#allocation69_spill] sm:$0xff] }
 0xa83   :  { %v3967_v16 = vsub.f32 1.0, %v3966_v17  ;;  %v311_v17 = vadd.f32 %v9241_v32, %v9236_v50 }
 0xa84   :  { %v3949_v10 = vmul.f32 %v4592_v2, %v3948_v24  ;;  %vm3995_vm3 = vcmp.eq.f32.partialorder %v3994_v15, 8.507059e+37 }
 0xa85   :  { %v3968_v38 = vmul.f32 %v4594_v59, %v3967_v16 }
 0xa86   :  { %v4596_v6 = vpop.eup %4595  ;;  %v3950_v8 = vadd.f32 %v4592_v2, %v3949_v10 }
 0xa87   :  { %v3969_v25 = vadd.f32 %v4594_v59, %v3968_v38  ;;  %v3986_v49 = vmul.f32 %v4596_v6, %v3984_v60  ;;  %v4598_v61 = vpop.eup %4597  ;;  %vm3991_vm0 = vweird.f32 %v4596_v6 }
 0xa88   :  { %v3954_v5 = vsel %vm3953_vm12, %v4592_v2, %v3950_v8  ;;  %vm3992_vm2 = vmor %vm3990_vm1, %vm3991_vm0 }
 0xa89   :  { %v3959_v34 = vsel %vm3956_vm14, %v3958_v58, %v3954_v5  ;;  %v3973_v20 = vsel %vm3972_vm13, %v4594_v59, %v3969_v25  ;;  %v3987_v3 = vsub.f32 1.0, %v3986_v49 }
 0xa8a   :  { %v3978_v4 = vsel %vm3975_vm15, %v3977_v62, %v3973_v20  ;;  %v4001_v30 = vmul.f32 %v4598_v61, %v3959_v34 }
 0xa8b   :  { %v4000_v29 = vmul.f32 %v3978_v4, %v8614_v27  ;;  %v3988_v1 = vmul.f32 %v4596_v6, %v3987_v3 }
 0xa8d   :  { %v8692_v55 = vadd.f32 %v4001_v30, %v4000_v29  ;;  %v3989_v57 = vadd.f32 %v4596_v6, %v3988_v1 }
 0xa8f   :  { %4599 = vtanh.f32 %v8692_v55  ;;  %v3993_v31 = vsel %vm3992_vm2, %v4596_v6, %v3989_v57 }
 0xa90   :  { %v3998_v53 = vsel %vm3995_vm3, %v3997_v36, %v3993_v31 }
 0xa95   :  { %v4600_v33 = vpop.eup %4599 }
 0xa96   :  { %v4004_v43 = vmul.f32 %v4600_v33, %v3998_v53 }
 0xa98   :  { %v4006_v51 = vrot.slane %v4004_v43, 1  ;;  %v4007_v7 = vrot.slane %v4004_v43, 2  ;;  %v4008_v27 = vrot.slane %v4004_v43, 3  ;;  %4020 = vst [vmem:[%s8762_s4 + $0xe] sm:$0x1] %v4004_v43  ;;  %4097 = vmatmul.f32.vlgmr.msra.gmra.mxu0 %v4004_v43  ;;  %4117 = vmatmul.f32.vlgmr.msra.gmra.mxu1 %v4004_v43  ;;  %v4009_v45 = vrot.slane %v4004_v43, 4 }
 0xa99   :  { %4137 = vmatmul.f32.vlgmr.msra.gmra.mxu2 %v4004_v43  ;;  %4176 = vmatmul.f32.vlgmr.msra.gmra.mxu3 %v4004_v43  ;;  %v4010_v12 = vrot.slane %v4004_v43, 5  ;;  %v4011_v46 = vrot.slane %v4004_v43, 6  ;;  %v4012_v11 = vrot.slane %v4004_v43, 7 }
 0xa9a   :  { %4021 = vst [vmem:[%s8762_s4 + $0x1e] sm:$0x1] %v4006_v51 }
 0xa9b   :  { %4022 = vst [vmem:[%s8762_s4 + $0x2e] sm:$0x1] %v4007_v7 }
 0xa9c   :  { %4023 = vst [vmem:[%s8762_s4 + $0x3e] sm:$0x1] %v4008_v27 }
 0xa9d   :  { %4024 = vst [vmem:[%s8762_s4 + $0x4e] sm:$0x1] %v4009_v45 }
 0xa9e   :  { %4025 = vst [vmem:[%s8762_s4 + $0x5e] sm:$0x1] %v4010_v12 }
 0xa9f   :  { %4026 = vst [vmem:[%s8762_s4 + $0x6e] sm:$0x1] %v4011_v46 }
 0xaa0   :  { %4027 = vst [vmem:[%s8762_s4 + $0x7e] sm:$0x1] %v4012_v11 }
 0xb15   :  { %v4098_v42 = vpop.f32.mrf.mxu0  ;;  %v4118_v9 = vpop.f32.mrf.mxu1 }
 0xb16   :  { %v4141_v26 = vadd.f32 %v4098_v42, %v181_v54  ;;  %v4142_v37 = vadd.f32 %v4118_v9, %v246_v18 }
 0xb18   :  { %v4355_v47 = vmul.f32 -1.442695, %v4141_v26  ;;  %v4356_v0 = vmul.f32 -1.442695, %v4142_v37 }
 0xb1a   :  { %4601 = vpow2.f32 %v4355_v47 }
 0xb1b   :  { %4603 = vpow2.f32 %v4356_v0 }
 0xb1c   :  { %v4177_v13 = vpop.f32.mrf.mxu3  ;;  %v4138_v28 = vpop.f32.mrf.mxu2 }
 0xb1d   :  { %v4180_v63 = vadd.f32 %v4177_v13, %v376_v19  ;;  %v4143_v48 = vadd.f32 %v4138_v28, %v311_v17 }
 0xb1f   :  { %v4357_v56 = vmul.f32 -1.442695, %v4180_v63 }
 0xb20   :  { %v4602_v60 = vpop.eup %4601 }
 0xb21   :  { %v4604_v2 = vpop.eup %4603  ;;  %v4184_v44 = vadd.f32 1.0, %v4602_v60  ;;  %4605 = vpow2.f32 %v4357_v56 }
 0xb22   :  { %v4203_v52 = vadd.f32 1.0, %v4604_v2 }
 0xb23   :  { %4607 = vrcp.f32 %v4184_v44  ;;  %v4196_v39 = vand.u32 2147483648, %v4184_v44  ;;  %v4194_v58 = vand.u32 2147483647, %v4184_v44  ;;  %vm4190_vm6 = vweird.f32 %v4184_v44 }
 0xb24   :  { %4609 = vrcp.f32 %v4203_v52  ;;  %v4215_v6 = vand.u32 2147483648, %v4203_v52  ;;  %v4213_v49 = vand.u32 2147483647, %v4203_v52  ;;  %vm4209_vm7 = vweird.f32 %v4203_v52 }
 0xb25   :  { %v4197_v5 = vor.u32 1.1754944e-38, %v4196_v39  ;;  %vm4195_vm10 = vcmp.eq.f32.partialorder %v4194_v58, 8.507059e+37 }
 0xb26   :  { %v4216_v20 = vor.u32 1.1754944e-38, %v4215_v6  ;;  %vm4214_vm11 = vcmp.eq.f32.partialorder %v4213_v49, 8.507059e+37 }
 0xb27   :  { %v4606_v59 = vpop.eup %4605 }
 0xb28   :  { %v4223_v24 = vadd.f32 1.0, %v4606_v59 }
 0xb29   :  { %v4608_v16 = vpop.eup %4607 }
 0xb2a   :  { %v4610_v40 = vpop.eup %4609  ;;  %v4186_v14 = vmul.f32 %v4608_v16, %v4184_v44  ;;  %4611 = vrcp.f32 %v4223_v24  ;;  %vm4191_vm4 = vweird.f32 %v4608_v16  ;;  %v4235_v53 = vand.u32 2147483648, %v4223_v24 }
 0xb2b   :  { %v4205_v10 = vmul.f32 %v4610_v40, %v4203_v52  ;;  %4613 = vtanh.f32 %v4143_v48  ;;  %vm4210_vm5 = vweird.f32 %v4610_v40  ;;  %vm4192_vm8 = vmor %vm4190_vm6, %vm4191_vm4  ;;  %vm4229_vm13 = vweird.f32 %v4223_v24 }
 0xb2c   :  { %v4187_v23 = vsub.f32 1.0, %v4186_v14  ;;  %vm4211_vm9 = vmor %vm4209_vm7, %vm4210_vm5  ;;  %v4233_v43 = vand.u32 2147483647, %v4223_v24  ;;  %v4236_v7 = vor.u32 1.1754944e-38, %v4235_v53 }
 0xb2d   :  { %v4206_v38 = vsub.f32 1.0, %v4205_v10 }
 0xb2e   :  { %v4188_v8 = vmul.f32 %v4608_v16, %v4187_v23  ;;  %vm4234_vm15 = vcmp.eq.f32.partialorder %v4233_v43, 8.507059e+37 }
 0xb2f   :  { %v4207_v25 = vmul.f32 %v4610_v40, %v4206_v38 }
 0xb30   :  { %v4612_v62 = vpop.eup %4611  ;;  %v4189_v50 = vadd.f32 %v4608_v16, %v4188_v8 }
 0xb31   :  { %v4208_v61 = vadd.f32 %v4610_v40, %v4207_v25  ;;  %v4225_v34 = vmul.f32 %v4612_v62, %v4223_v24  ;;  %v4614_v4 = vpop.eup %4613  ;;  %vm4230_vm12 = vweird.f32 %v4612_v62 }
 0xb32   :  { %v4193_v3 = vsel %vm4192_vm8, %v4608_v16, %v4189_v50  ;;  %vm4231_vm14 = vmor %vm4229_vm13, %vm4230_vm12 }
 0xb33   :  { %v4198_v30 = vsel %vm4195_vm10, %v4197_v5, %v4193_v3  ;;  %v4212_v29 = vsel %vm4211_vm9, %v4610_v40, %v4208_v61  ;;  %v4226_v1 = vsub.f32 1.0, %v4225_v34 }
 0xb34   :  { %v4217_v57 = vsel %vm4214_vm11, %v4216_v20, %v4212_v29  ;;  %v4240_v21 = vmul.f32 %v4614_v4, %v4198_v30 }
 0xb35   :  { %v4239_v15 = vmul.f32 %v4217_v57, %v8692_v55  ;;  %v4227_v31 = vmul.f32 %v4612_v62, %v4226_v1 }
 0xb37   :  { %v4241_v36 = vadd.f32 %v4240_v21, %v4239_v15  ;;  %v4228_v33 = vadd.f32 %v4612_v62, %v4227_v31 }
 0xb39   :  { %4615 = vtanh.f32 %v4241_v36  ;;  %4273 = vst [vmem:[#allocation7] sm:$0xff] %v4241_v36  ;;  %v4232_v51 = vsel %vm4231_vm14, %v4612_v62, %v4228_v33 }
 0xb3a   :  { %4297 = dma.vmem_to_hbm [thread:$0]  %s4293_s29, 128, %s4295_s8, [#allocation8]   ;;  %v4237_v27 = vsel %vm4234_vm15, %v4236_v7, %v4232_v51 }
 0xb3f   :  { %v4616_v55 = vpop.eup %4615 }
 0xb40   :  { %v4243_v45 = vmul.f32 %v4616_v55, %v4237_v27 }
 0xb42   :  { %v4245_v12 = vrot.slane %v4243_v45, 1  ;;  %v4246_v46 = vrot.slane %v4243_v45, 2  ;;  %v4247_v11 = vrot.slane %v4243_v45, 3  ;;  %4259 = vst [vmem:[%s8762_s4 + $0xf] sm:$0x1] %v4243_v45  ;;  %v4248_v22 = vrot.slane %v4243_v45, 4 }
 0xb43   :  { %4272 = vst [vmem:[#allocation5] sm:$0xff] %v4243_v45  ;;  %v4249_v54 = vrot.slane %v4243_v45, 5  ;;  %v4250_v35 = vrot.slane %v4243_v45, 6  ;;  %v4251_v18 = vrot.slane %v4243_v45, 7 }
 0xb44   :  { %4260 = vst [vmem:[%s8762_s4 + $0x1f] sm:$0x1] %v4245_v12  ;;  %4286 = dma.vmem_to_hbm [thread:$0]  %s4282_s6, 128, %s4284_s11, [#allocation6]  }
 0xb45   :  { %4261 = vst [vmem:[%s8762_s4 + $0x2f] sm:$0x1] %v4246_v46 }
 0xb46   :  { %4262 = vst [vmem:[%s8762_s4 + $0x3f] sm:$0x1] %v4247_v11 }
 0xb47   :  { %4263 = vst [vmem:[%s8762_s4 + $0x4f] sm:$0x1] %v4248_v22 }
 0xb48   :  { %4264 = vst [vmem:[%s8762_s4 + $0x5f] sm:$0x1] %v4249_v54 }
 0xb49   :  { %4265 = vst [vmem:[%s8762_s4 + $0x6f] sm:$0x1] %v4250_v35 }
 0xb4a   :  { %4266 = vst [vmem:[%s8762_s4 + $0x7f] sm:$0x1] %v4251_v18 }
 0xb4b   :  { %4665 = dma.done.wait [#allocation6], 128  }
 0xb4c   :  { %4666 = vsyncadd [#allocation6], 4294967168 }
 0xb4d   :  { %4667 = dma.done.wait [#allocation8], 128  }
 0xb4e   :  { %4668 = vsyncadd [#allocation8], 4294967168 }
 0xb4f   :  { %4308 = vsyncpa [#allocation6], 1 }
 0xb50   :  { %4309 = vsyncpa [#allocation8], 1 }

</bundles_post_ra>
